<compile_context>
chip_gen: v5e
topology: v5e:2x2
jax: 0.10.0
libtpu: 0.0.40
codegen_flags: <defaults>
</compile_context>

<pallas_src>
import math
from functools import partial

import jax
import jax.numpy as jnp
from jax import lax
from jax.experimental import pallas as pl
from jax.experimental.pallas import tpu as pltpu


def _flatten_rows(t, th, w):
    """(th, w) -> (1, th*w) row-major, inside the kernel.

    When w is lane-aligned the reshape is a cheap relayout; otherwise build it
    with a lane-dimension concatenate of the (1, w) rows (a handful of tiny
    vector ops, same pattern as rotary-embedding half concats).
    """
    if w % 128 == 0:
        return t.reshape(1, th * w)
    return jnp.concatenate([t[h:h + 1, :] for h in range(th)], axis=1)


def _pos_embed_kernel(mask_ref, lower_ref, upper_ref, coef_ref, phase_ref,
                      out_ref, *, num_pos_feats, normalize, scale, h_tile,
                      loop_unroll):
    F = num_pos_feats
    Bt, H, W = mask_ref.shape
    th = h_tile
    thw = th * W

    lower_rows = lower_ref[...]                    # (th, H) bf16 lower-tri rows
    upper = upper_ref[...]                         # (W, W)  bf16 upper-tri

    # Hoisted lane broadcasts of the per-feature constants, already in the
    # output (feature-major) layout.  phase = pi/2 on odd features turns the
    # single jnp.sin into the reference's sin/cos interleave.
    coef_b = jnp.broadcast_to(coef_ref[...], (F, thw))      # 1 / dim_t
    phase_b = jnp.broadcast_to(phase_ref[...], (F, thw))    # {0, pi/2}

    if th == H:
        h0 = 0
    else:
        h0 = pl.multiple_of(pl.program_id(1) * th, th)

    def item(b, carry):
        m = mask_ref[b]                                           # (H, W) bf16
        m_rows = m if th == H else mask_ref[b, pl.ds(h0, th), :]  # (th, W)

        # Prefix sums on the MXU (bf16 operands, f32 accumulation; exact for
        # 0/1 padding masks).
        y_t = jnp.dot(lower_rows, m, preferred_element_type=jnp.float32)  # (th, W)
        x_t = jnp.dot(m_rows, upper, preferred_element_type=jnp.float32)  # (th, W)

        if normalize:
            eps = 1e-6
            # Reference normalizes by the last cumsum row/col (== column/row
            # totals): one small divide each, scale folded into the multiply.
            col_tot = jnp.sum(m.astype(jnp.float32), axis=0, keepdims=True)  # (1, W)
            y_t = y_t * (jnp.float32(scale) / (col_tot + eps))
            x_t = x_t * (jnp.float32(scale) / (x_t[:, W - 1:W] + eps))

        # Directly in output layout: feature k of each half is
        # sin(val / dim_t[k] + phase[k]).  No select, no transpose.
        y_flat = _flatten_rows(y_t, th, W)                        # (1, th*W)
        x_flat = _flatten_rows(x_t, th, W)
        out_ref[b, :F, :] = jnp.sin(y_flat * coef_b + phase_b).astype(out_ref.dtype)
        out_ref[b, F:, :] = jnp.sin(x_flat * coef_b + phase_b).astype(out_ref.dtype)
        return carry

    if Bt == 1:
        item(0, None)
    else:
        # fori_loop bounds live ranges across batch items (a fully unrolled
        # Python loop would keep many (F, th*W) temporaries live); the small
        # unroll keeps LLO scheduling visibility.
        lax.fori_loop(0, Bt, item, None, unroll=loop_unroll)


def position_embedding_sine(x, mask, *, num_pos_feats=64, temperature=10000,
                            normalize=False, scale=None,
                            out_dtype=jnp.float32):
    """Matches PositionEmbeddingSine.forward(x, mask) -> (B, 2*F, H, W)."""
    del x  # only used for device/dtype placement in the PyTorch module
    if scale is not None and normalize is False:
        raise ValueError('normalize should be True if scale is passed')
    if scale is None:
        scale = 2 * math.pi

    B, H, W = mask.shape
    F = num_pos_feats
    F2 = 2 * F
    HW = H * W

    # Binary padding mask -> bf16 is exact; bf16 MXU matmuls take ~1/3 the
    # passes of f32 and halve the resident triangular matrices.
    mask_bf16 = mask.astype(jnp.bfloat16)
    lower_h = (jnp.arange(H)[:, None] >= jnp.arange(H)[None, :]).astype(jnp.bfloat16)
    upper_w = (jnp.arange(W)[:, None] <= jnp.arange(W)[None, :]).astype(jnp.bfloat16)

    k = jnp.arange(F, dtype=jnp.float32)
    inv_dim_t = jnp.float32(temperature) ** (-2.0 * jnp.floor(k / 2.0) / F)
    coef = inv_dim_t.reshape(F, 1)                                   # 1 / dim_t
    phase = ((jnp.arange(F) % 2).astype(jnp.float32)
             * (math.pi / 2.0)).reshape(F, 1)                        # cos via phase

    out_isize = jnp.dtype(out_dtype).itemsize
    item_out_bytes = F2 * HW * out_isize

    # Batch tile: amortize ~0.35us/grid-step, keep >= 2 batch steps when B >= 2
    # (second TensorCore / megacore), and stay well inside v7x's 64 MiB VMEM
    # including per-item temporaries.
    bt = max(1, min(B, (6 * 1024 * 1024) // max(item_out_bytes, 1)))
    if B >= 2:
        bt = min(bt, B // 2)
    while B % bt:
        bt -= 1
    nb = B // bt

    # H split: gives the second TensorCore work when there is only one batch
    # grid step (e.g. B == 1 on v7x), at the cost of recomputing the tiny
    # cumsum per tile.  Needs a lane-dense flat output tile (th*W % 128 == 0)
    # and sublane-aligned mask rows (th % 8 == 0).
    nh = 1
    if nb < 2 and H % 2 == 0:
        th_c = H // 2
        if th_c % 8 == 0 and (th_c * W) % 128 == 0:
            nh = 2
    th = H // nh
    # TODO(synk): for very large H*W also split over H here to bound the
    # (2F, th*W) expansion working set (keeps output DMAs double-buffered).

    loop_unroll = 2 if bt > 2 else 1

    # VMEM accounting: double-buffered out/mask blocks + resident constants
    # + hoisted (F, th*W) coef/phase broadcasts + per-item f32 temporaries.
    out_blk = bt * F2 * th * W * out_isize
    mask_blk = bt * H * W * 2
    const_b = (th * H + W * W) * 2 + 2 * F * 4
    temp_b = 6 * F * th * W * 4
    vmem_est = 2 * (out_blk + mask_blk) + const_b + temp_b
    vmem_limit = int(min(48 * 1024 * 1024,
                         max(32 * 1024 * 1024, int(1.5 * vmem_est))))

    kernel = partial(_pos_embed_kernel, num_pos_feats=F, normalize=normalize,
                     scale=float(scale), h_tile=th, loop_unroll=loop_unroll)

    pos_flat = pl.pallas_call(
        kernel,
        out_shape=jax.ShapeDtypeStruct((B, F2, HW), out_dtype),
        grid_spec=pltpu.PrefetchScalarGridSpec(
            num_scalar_prefetch=0,
            grid=(nb, nh),
            in_specs=[
                pl.BlockSpec((bt, H, W), lambda i, j: (i, 0, 0)),
                pl.BlockSpec((th, H), lambda i, j: (j, 0)),
                pl.BlockSpec((W, W), lambda i, j: (0, 0)),
                pl.BlockSpec((F, 1), lambda i, j: (0, 0)),
                pl.BlockSpec((F, 1), lambda i, j: (0, 0)),
            ],
            out_specs=pl.BlockSpec((bt, F2, th * W), lambda i, j: (i, 0, j)),
        ),
        compiler_params=pltpu.CompilerParams(
            dimension_semantics=("parallel", "parallel"),
            vmem_limit_bytes=vmem_limit),
    )(mask_bf16, lower_h, upper_w, coef, phase)

    # NCHW via a contiguous (free) reshape — no extra HBM transpose pass.
    return pos_flat.reshape(B, F2, H, W)


def _reference(mask, num_pos_feats, temperature, normalize, scale):
    mask = mask.astype(jnp.float32)
    y_embed = jnp.cumsum(mask, axis=1)
    x_embed = jnp.cumsum(mask, axis=2)
    if normalize:
        eps = 1e-6
        y_embed = y_embed / (y_embed[:, -1:, :] + eps) * scale
        x_embed = x_embed / (x_embed[:, :, -1:] + eps) * scale
    dim_t = jnp.arange(num_pos_feats, dtype=jnp.float32)
    dim_t = temperature ** (2 * jnp.floor(dim_t / 2) / num_pos_feats)
    pos_x = x_embed[..., None] / dim_t
    pos_y = y_embed[..., None] / dim_t

    def inter(p):
        return jnp.stack(
            [jnp.sin(p[..., 0::2]), jnp.cos(p[..., 1::2])], axis=-1
        ).reshape(p.shape)

    pos = jnp.concatenate([inter(pos_y), inter(pos_x)], axis=-1)
    return jnp.transpose(pos, (0, 3, 1, 2))


if __name__ == "__main__":
    key = jax.random.PRNGKey(0)
    kx, km, km1 = jax.random.split(key, 3)

    B, H, W = 2, 16, 16
    F = 64
    x = jax.random.normal(kx, (B, 4, H, W), dtype=jnp.float32)  # device only

    # Case 1: default config (normalize=False), random 0/1 padding mask.
    mask01 = (jax.random.uniform(km, (B, H, W)) > 0.3).astype(jnp.float32)
    out1 = jax.block_until_ready(
        position_embedding_sine(x, mask01, num_pos_feats=F))
    ref1 = _reference(mask01, F, 10000, False, 2 * math.pi)
    assert out1.shape == (B, 2 * F, H, W)
    assert jnp.allclose(out1, ref1, atol=1e-4, rtol=1e-5), \
        float(jnp.max(jnp.abs(out1 - ref1)))

    # Case 2: normalize=True (as used in the CAN head), all-ones mask.
    mask1 = jnp.ones((B, H, W), dtype=jnp.float32)
    out2 = jax.block_until_ready(
        position_embedding_sine(x, mask1, num_pos_feats=F, normalize=True))
    ref2 = _reference(mask1, F, 10000, True, 2 * math.pi)
    assert out2.shape == (B, 2 * F, H, W)
    assert jnp.allclose(out2, ref2, atol=1e-4, rtol=1e-5), \
        float(jnp.max(jnp.abs(out2 - ref2)))

    # Case 3: B == 1 exercises the H-split grid axis (both TCs on v7x).
    mask3 = (jax.random.uniform(km1, (1, H, W)) > 0.5).astype(jnp.float32)
    out3 = jax.block_until_ready(
        position_embedding_sine(x[:1], mask3, num_pos_feats=F, normalize=True))
    ref3 = _reference(mask3, F, 10000, True, 2 * math.pi)
    assert out3.shape == (1, 2 * F, H, W)
    assert jnp.allclose(out3, ref3, atol=1e-4, rtol=1e-5), \
        float(jnp.max(jnp.abs(out3 - ref3)))

    print("KERNEL_OK")
</pallas_src>

<mosaic_0001>
module attributes {stable_mosaic.version = 11 : i64} {
  func.func @_pos_embed_kernel(%arg0: i32, %arg1: i32, %arg2: memref<1x16x16xbf16, #tpu.memory_space<vmem>>, %arg3: memref<16x16xbf16, #tpu.memory_space<vmem>>, %arg4: memref<16x16xbf16, #tpu.memory_space<vmem>>, %arg5: memref<64x1xf32, #tpu.memory_space<vmem>>, %arg6: memref<64x1xf32, #tpu.memory_space<vmem>>, %arg7: memref<1x128x256xf32, #tpu.memory_space<vmem>>) attributes {dimension_semantics = [#tpu.dimension_semantics<parallel>, #tpu.dimension_semantics<parallel>], iteration_bounds = array<i64: 2, 1>, scalar_prefetch = 0 : i64, scratch_operands = 0 : i64, tpu.core_type = #tpu.core_type<tc>, window_params = [{transform_indices = @transform_0, window_bounds = array<i64: 1, 16, 16>}, {transform_indices = @transform_1, window_bounds = array<i64: 16, 16>}, {pipeline_mode = #tpu.pipeline_mode<synchronous>, transform_indices = @transform_2, window_bounds = array<i64: 16, 16>}, {pipeline_mode = #tpu.pipeline_mode<synchronous>, transform_indices = @transform_3, window_bounds = array<i64: 64, 1>}, {pipeline_mode = #tpu.pipeline_mode<synchronous>, transform_indices = @transform_4, window_bounds = array<i64: 64, 1>}, {transform_indices = @transform_5, window_bounds = array<i64: 1, 128, 256>}]} {
    %c0 = arith.constant 0 : index
    %c0_0 = arith.constant 0 : index
    %0 = vector.load %arg3[%c0, %c0_0] : memref<16x16xbf16, #tpu.memory_space<vmem>>, vector<16x16xbf16>
    %c0_1 = arith.constant 0 : index
    %c0_2 = arith.constant 0 : index
    %1 = vector.load %arg4[%c0_1, %c0_2] : memref<16x16xbf16, #tpu.memory_space<vmem>>, vector<16x16xbf16>
    %c0_3 = arith.constant 0 : index
    %c0_4 = arith.constant 0 : index
    %2 = vector.load %arg5[%c0_3, %c0_4] : memref<64x1xf32, #tpu.memory_space<vmem>>, vector<64x1xf32>
    %3 = vector.shape_cast %2 : vector<64x1xf32> to vector<64x1xf32>
    %4 = vector.broadcast %3 : vector<64x1xf32> to vector<64x256xf32>
    %c0_5 = arith.constant 0 : index
    %c0_6 = arith.constant 0 : index
    %5 = vector.load %arg6[%c0_5, %c0_6] : memref<64x1xf32, #tpu.memory_space<vmem>>, vector<64x1xf32>
    %6 = vector.shape_cast %5 : vector<64x1xf32> to vector<64x1xf32>
    %7 = vector.broadcast %6 : vector<64x1xf32> to vector<64x256xf32>
    %c0_7 = arith.constant 0 : index
    %c0_8 = arith.constant 0 : index
    %c0_9 = arith.constant 0 : index
    %8 = vector.load %arg2[%c0_7, %c0_8, %c0_9] : memref<1x16x16xbf16, #tpu.memory_space<vmem>>, vector<1x16x16xbf16>
    %9 = vector.shape_cast %8 : vector<1x16x16xbf16> to vector<16x16xbf16>
    %cst = arith.constant dense<0.000000e+00> : vector<16x16xf32>
    %10 = tpu.matmul %0, %9, %cst {dimension_numbers = #tpu.dot_dimension_numbers<[1], [0], [0], [1], [0, 0, 1, 1], [], []>} : vector<16x16xbf16>, vector<16x16xbf16>, vector<16x16xf32> -> vector<16x16xf32>
    %cst_10 = arith.constant dense<0.000000e+00> : vector<16x16xf32>
    %11 = tpu.matmul %9, %1, %cst_10 {dimension_numbers = #tpu.dot_dimension_numbers<[1], [0], [0], [1], [0, 0, 1, 1], [], []>} : vector<16x16xbf16>, vector<16x16xbf16>, vector<16x16xf32> -> vector<16x16xf32>
    %12 = vector.extract_strided_slice %10 {offsets = [0, 0], sizes = [1, 16], strides = [1, 1]} : vector<16x16xf32> to vector<1x16xf32>
    %13 = vector.extract_strided_slice %10 {offsets = [1, 0], sizes = [1, 16], strides = [1, 1]} : vector<16x16xf32> to vector<1x16xf32>
    %14 = vector.extract_strided_slice %10 {offsets = [2, 0], sizes = [1, 16], strides = [1, 1]} : vector<16x16xf32> to vector<1x16xf32>
    %15 = vector.extract_strided_slice %10 {offsets = [3, 0], sizes = [1, 16], strides = [1, 1]} : vector<16x16xf32> to vector<1x16xf32>
    %16 = vector.extract_strided_slice %10 {offsets = [4, 0], sizes = [1, 16], strides = [1, 1]} : vector<16x16xf32> to vector<1x16xf32>
    %17 = vector.extract_strided_slice %10 {offsets = [5, 0], sizes = [1, 16], strides = [1, 1]} : vector<16x16xf32> to vector<1x16xf32>
    %18 = vector.extract_strided_slice %10 {offsets = [6, 0], sizes = [1, 16], strides = [1, 1]} : vector<16x16xf32> to vector<1x16xf32>
    %19 = vector.extract_strided_slice %10 {offsets = [7, 0], sizes = [1, 16], strides = [1, 1]} : vector<16x16xf32> to vector<1x16xf32>
    %20 = vector.extract_strided_slice %10 {offsets = [8, 0], sizes = [1, 16], strides = [1, 1]} : vector<16x16xf32> to vector<1x16xf32>
    %21 = vector.extract_strided_slice %10 {offsets = [9, 0], sizes = [1, 16], strides = [1, 1]} : vector<16x16xf32> to vector<1x16xf32>
    %22 = vector.extract_strided_slice %10 {offsets = [10, 0], sizes = [1, 16], strides = [1, 1]} : vector<16x16xf32> to vector<1x16xf32>
    %23 = vector.extract_strided_slice %10 {offsets = [11, 0], sizes = [1, 16], strides = [1, 1]} : vector<16x16xf32> to vector<1x16xf32>
    %24 = vector.extract_strided_slice %10 {offsets = [12, 0], sizes = [1, 16], strides = [1, 1]} : vector<16x16xf32> to vector<1x16xf32>
    %25 = vector.extract_strided_slice %10 {offsets = [13, 0], sizes = [1, 16], strides = [1, 1]} : vector<16x16xf32> to vector<1x16xf32>
    %26 = vector.extract_strided_slice %10 {offsets = [14, 0], sizes = [1, 16], strides = [1, 1]} : vector<16x16xf32> to vector<1x16xf32>
    %27 = vector.extract_strided_slice %10 {offsets = [15, 0], sizes = [1, 16], strides = [1, 1]} : vector<16x16xf32> to vector<1x16xf32>
    %28 = tpu.concatenate %12, %13, %14, %15, %16, %17, %18, %19, %20, %21, %22, %23, %24, %25, %26, %27 in 1 : vector<1x16xf32>, vector<1x16xf32>, vector<1x16xf32>, vector<1x16xf32>, vector<1x16xf32>, vector<1x16xf32>, vector<1x16xf32>, vector<1x16xf32>, vector<1x16xf32>, vector<1x16xf32>, vector<1x16xf32>, vector<1x16xf32>, vector<1x16xf32>, vector<1x16xf32>, vector<1x16xf32>, vector<1x16xf32> -> vector<1x256xf32>
    %29 = vector.extract_strided_slice %11 {offsets = [0, 0], sizes = [1, 16], strides = [1, 1]} : vector<16x16xf32> to vector<1x16xf32>
    %30 = vector.extract_strided_slice %11 {offsets = [1, 0], sizes = [1, 16], strides = [1, 1]} : vector<16x16xf32> to vector<1x16xf32>
    %31 = vector.extract_strided_slice %11 {offsets = [2, 0], sizes = [1, 16], strides = [1, 1]} : vector<16x16xf32> to vector<1x16xf32>
    %32 = vector.extract_strided_slice %11 {offsets = [3, 0], sizes = [1, 16], strides = [1, 1]} : vector<16x16xf32> to vector<1x16xf32>
    %33 = vector.extract_strided_slice %11 {offsets = [4, 0], sizes = [1, 16], strides = [1, 1]} : vector<16x16xf32> to vector<1x16xf32>
    %34 = vector.extract_strided_slice %11 {offsets = [5, 0], sizes = [1, 16], strides = [1, 1]} : vector<16x16xf32> to vector<1x16xf32>
    %35 = vector.extract_strided_slice %11 {offsets = [6, 0], sizes = [1, 16], strides = [1, 1]} : vector<16x16xf32> to vector<1x16xf32>
    %36 = vector.extract_strided_slice %11 {offsets = [7, 0], sizes = [1, 16], strides = [1, 1]} : vector<16x16xf32> to vector<1x16xf32>
    %37 = vector.extract_strided_slice %11 {offsets = [8, 0], sizes = [1, 16], strides = [1, 1]} : vector<16x16xf32> to vector<1x16xf32>
    %38 = vector.extract_strided_slice %11 {offsets = [9, 0], sizes = [1, 16], strides = [1, 1]} : vector<16x16xf32> to vector<1x16xf32>
    %39 = vector.extract_strided_slice %11 {offsets = [10, 0], sizes = [1, 16], strides = [1, 1]} : vector<16x16xf32> to vector<1x16xf32>
    %40 = vector.extract_strided_slice %11 {offsets = [11, 0], sizes = [1, 16], strides = [1, 1]} : vector<16x16xf32> to vector<1x16xf32>
    %41 = vector.extract_strided_slice %11 {offsets = [12, 0], sizes = [1, 16], strides = [1, 1]} : vector<16x16xf32> to vector<1x16xf32>
    %42 = vector.extract_strided_slice %11 {offsets = [13, 0], sizes = [1, 16], strides = [1, 1]} : vector<16x16xf32> to vector<1x16xf32>
    %43 = vector.extract_strided_slice %11 {offsets = [14, 0], sizes = [1, 16], strides = [1, 1]} : vector<16x16xf32> to vector<1x16xf32>
    %44 = vector.extract_strided_slice %11 {offsets = [15, 0], sizes = [1, 16], strides = [1, 1]} : vector<16x16xf32> to vector<1x16xf32>
    %45 = tpu.concatenate %29, %30, %31, %32, %33, %34, %35, %36, %37, %38, %39, %40, %41, %42, %43, %44 in 1 : vector<1x16xf32>, vector<1x16xf32>, vector<1x16xf32>, vector<1x16xf32>, vector<1x16xf32>, vector<1x16xf32>, vector<1x16xf32>, vector<1x16xf32>, vector<1x16xf32>, vector<1x16xf32>, vector<1x16xf32>, vector<1x16xf32>, vector<1x16xf32>, vector<1x16xf32>, vector<1x16xf32>, vector<1x16xf32> -> vector<1x256xf32>
    %46 = vector.broadcast %28 : vector<1x256xf32> to vector<64x256xf32>
    %47 = arith.mulf %46, %4 : vector<64x256xf32>
    %48 = arith.addf %47, %7 : vector<64x256xf32>
    %49 = math.sin %48 : vector<64x256xf32>
    %c0_11 = arith.constant 0 : index
    %c0_12 = arith.constant 0 : index
    %c0_13 = arith.constant 0 : index
    %50 = vector.load %arg7[%c0_11, %c0_12, %c0_13] : memref<1x128x256xf32, #tpu.memory_space<vmem>>, vector<1x64x256xf32>
    %51 = vector.shape_cast %50 : vector<1x64x256xf32> to vector<64x256xf32>
    %52 = vector.shape_cast %49 : vector<64x256xf32> to vector<1x64x256xf32>
    tpu.vector_store %arg7[%c0_11, %c0_12, %c0_13], %52 {strides = array<i32>} : memref<1x128x256xf32, #tpu.memory_space<vmem>>, vector<1x64x256xf32>,
    %53 = vector.broadcast %45 : vector<1x256xf32> to vector<64x256xf32>
    %54 = arith.mulf %53, %4 : vector<64x256xf32>
    %55 = arith.addf %54, %7 : vector<64x256xf32>
    %56 = math.sin %55 : vector<64x256xf32>
    %c0_14 = arith.constant 0 : index
    %c64 = arith.constant 64 : index
    %c0_15 = arith.constant 0 : index
    %57 = vector.load %arg7[%c0_14, %c64, %c0_15] : memref<1x128x256xf32, #tpu.memory_space<vmem>>, vector<1x64x256xf32>
    %58 = vector.shape_cast %57 : vector<1x64x256xf32> to vector<64x256xf32>
    %59 = vector.shape_cast %56 : vector<64x256xf32> to vector<1x64x256xf32>
    tpu.vector_store %arg7[%c0_14, %c64, %c0_15], %59 {strides = array<i32>} : memref<1x128x256xf32, #tpu.memory_space<vmem>>, vector<1x64x256xf32>,
    return
  }
  func.func @transform_0(%arg0: i32, %arg1: i32) -> (i32, i32, i32) {
    %c0_i32 = arith.constant 0 : i32
    %c0_i32_0 = arith.constant 0 : i32
    %c0_i32_1 = arith.constant 0 : i32
    return %arg0, %c0_i32, %c0_i32_0 : i32, i32, i32
  }
  func.func @transform_1(%arg0: i32, %arg1: i32) -> (i32, i32) {
    %c0_i32 = arith.constant 0 : i32
    %c0_i32_0 = arith.constant 0 : i32
    return %arg1, %c0_i32 : i32, i32
  }
  func.func @transform_2(%arg0: i32, %arg1: i32) -> (i32, i32) {
    %c0_i32 = arith.constant 0 : i32
    %c0_i32_0 = arith.constant 0 : i32
    %c0_i32_1 = arith.constant 0 : i32
    return %c0_i32, %c0_i32_0 : i32, i32
  }
  func.func @transform_3(%arg0: i32, %arg1: i32) -> (i32, i32) {
    %c0_i32 = arith.constant 0 : i32
    %c0_i32_0 = arith.constant 0 : i32
    %c0_i32_1 = arith.constant 0 : i32
    return %c0_i32, %c0_i32_0 : i32, i32
  }
  func.func @transform_4(%arg0: i32, %arg1: i32) -> (i32, i32) {
    %c0_i32 = arith.constant 0 : i32
    %c0_i32_0 = arith.constant 0 : i32
    %c0_i32_1 = arith.constant 0 : i32
    return %c0_i32, %c0_i32_0 : i32, i32
  }
  func.func @transform_5(%arg0: i32, %arg1: i32) -> (i32, i32, i32) {
    %c0_i32 = arith.constant 0 : i32
    %c0_i32_0 = arith.constant 0 : i32
    return %arg0, %c0_i32, %arg1 : i32, i32, i32
  }
}

</mosaic_0001>

<bundles_post_ra>
// kernel: tpu_custom_call.1
= control target key start
LH: loop header
LB: loop body
LE: loop exit
PB: predicated region body
PF: predicated region fallthrough
CT: control target
= control target key end

     0   :  { %10 = vsyncpa [#allocation3], 0  ;;  %s10030_s0 = inlined_call_operand.vmem [shape: bf16[2,16,16], index: 0, kind: input, shape index: {}]   ;;  %s10031_s1 = inlined_call_operand.vmem [shape: bf16[16,16], index: 1, kind: input, shape index: {}]   ;;  %s10032_s2 = inlined_call_operand.vmem [shape: bf16[16,16], index: 2, kind: input, shape index: {}]   ;;  %s10033_s3 = inlined_call_operand.vmem [shape: f32[64,1], index: 3, kind: input, shape index: {}]   ;;  %s10034_s4 = inlined_call_operand.vmem [shape: f32[64,1], index: 4, kind: input, shape index: {}]   ;;  %s10035_s5 = inlined_call_operand.hbm [shape: f32[2,128,256], index: 5, kind: output, shape index: {}]  }
   0x1   :  { %12 = vsyncpa [#allocation3 + $0x1], 0  ;;  %s6058_s18 = smov 0   ;;  %s6060_s19 = smov 0  }
   0x2   :  { %s6062_s20 = smov 0   ;;  %s6064_s21 = smov 0  }
   0x3   :  { %s6066_s22 = smov 0   ;;  %s6068_s23 = smov 0  }
   0x4 LB: > { %s5731_s24 = sadd.s32 4294967295, %s6011_s23   ;;  %s5732_s25 = sadd.s32 4294967294, %s6011_s23   ;;  %s6011_s23 = sphi %s6068_s23, %s18_s23   ;;  %s6007_s22 = sphi %s6066_s22, %s10167_s22   ;;  %s6003_s21 = sphi %s6064_s21, %s10166_s21   ;;  %s5999_s20 = sphi %s6062_s20, %s10165_s20   ;;  %s5995_s19 = sphi %s6060_s19, %s10164_s19   ;;  %s5991_s18 = sphi %s6058_s18, %s10163_s18  }
   0x5   : > { %s30_s26 = sadd.s32 1, %s6007_s22  ;;  %s154_s27 = sadd.s32 1, %s5999_s20 }
   0x6   : > { %p32_p0 = scmp.ge.s32.totalorder %s30_s26, 2  ;;  %p164_p1 = scmp.ne.s32.totalorder %s5999_s20, %s5995_s19 }
   0x7   : > { %p165_p2 = scmp.eq.s32.totalorder %s5731_s24, 1  ;;  %p170_p3 = scmp.ne.s32.totalorder %s5995_s19, %s5991_s18 }
   0x8   : > { %s10169_s26 = smov (%p32_p0, %s30_s26), 0  ;;  %p171_p5 = scmp.eq.s32.totalorder %s5732_s25, 1 }
   0x9   : > { %p6098_p4 = por %p165_p2, %p164_p1  ;;  %s149_s29 = ssub.s32 %s6007_s22, %s10169_s26 }
   0xa   : > { %p5736_p6 = scmp.ge.s32.totalorder %s6011_s23, 1  ;;  %p152_p7 = scmp.eq.s32.totalorder %s149_s29, 0 }
   0xb   : > { %p6105_p8 = por %p171_p5, %p170_p3  ;;  %p215_p9 = scmp.lt.s32.totalorder %s6011_s23, 3 }
   0xc   : > { %s6111_s6 = scalar_select %p152_p7, %s5999_s20, %s154_s27  }
   0xd   : > { %p216_p10 = pnand %p5736_p6, %p215_p9 }
   0xf   : > { %219 = sbr.rel (%p216_p10) target bundleno = 1547 (0x60b), region = 40 }
  0x14   : > { %v5857_v0 = vld [vmem:[%s10032_s2] sm:$0xff]  ;;  %p248_p11 = scmp.lt.s32.totalorder %s6003_s21, 1  ;;  %v267_v1 = vld [vmem:[%s10033_s3 + $0x10] sm:$0xff]  ;;  %v10060_v2 = vmov 0   ;;  %vm374_vm0 = vcmask 130048   ;;  %v268_v7 = vld [vmem:[%s10033_s3 + $0x18] sm:$0xff] }
  0x15   : > { %5931 = vset.pattern.permute.xlu1 %v10060_v2  ;;  %5930 = vset.pattern.permute.xlu0 %v10060_v2  ;;  %v265_v3 = vld [vmem:[%s10033_s3] sm:$0xff]  ;;  %v266_v8 = vld [vmem:[%s10033_s3 + $0x8] sm:$0xff]  ;;  %v271_v10 = vld [vmem:[%s10033_s3 + $0x30] sm:$0xff]  ;;  %s6014_s12 = smov 48   ;;  %s6016_s14 = smov 16   ;;  %vm474_vm1 = vcmask 261120  }
  0x16   : > { %408 = vmatpush.bf16.msra.mxu1 %v5857_v0  ;;  %s249_s13 = scalar_select %p248_p11, %s6003_s21, 1  ;;  %285 = vperm.xlu1 %5931, %v267_v1   ;;  %v269_v4 = vld [vmem:[%s10033_s3 + $0x20] sm:$0xff]  ;;  %v270_v9 = vld [vmem:[%s10033_s3 + $0x28] sm:$0xff]  ;;  %v272_v12 = vld [vmem:[%s10033_s3 + $0x38] sm:$0xff]  ;;  %vm476_vm2 = vcmask 392192   ;;  %vm478_vm3 = vcmask 523264  }
  0x17   : > { %275 = vperm.xlu0 %5930, %v265_v3   ;;  %5932 = vset.pattern.permute.xlu2 %v10060_v2  ;;  %v5856_v6 = vld [vmem:[%s10031_s1] sm:$0xff]  ;;  %v314_v13 = vld [vmem:[%s10034_s4 + $0x8] sm:$0xff]  ;;  %v316_v14 = vld [vmem:[%s10034_s4 + $0x18] sm:$0xff]  ;;  %s6017_s15 = smov 96   ;;  %s6019_s17 = smov 64   ;;  %vm10055_vm4 = vcmask 654336  }
  0x18   : > { %s5855_s16 = sshll.u32 %s249_s13, 3  ;;  %295 = vperm.xlu2 %5932, %v269_v4   ;;  %v313_v11 = vld [vmem:[%s10034_s4] sm:$0xff]  ;;  %v315_v15 = vld [vmem:[%s10034_s4 + $0x10] sm:$0xff]  ;;  %s6015_s13 = smov 32   ;;  %v320_v50 = vld [vmem:[%s10034_s4 + $0x38] sm:$0xff]  ;;  %vm10070_vm5 = vcmask 785408  }
  0x19   : > { %s252_s25 = scalar_lea.vmem %s10030_s0, %s5855_s16  ;;  %v317_v16 = vld [vmem:[%s10034_s4 + $0x20] sm:$0xff]  ;;  %s6018_s16 = smov 80   ;;  %v318_v52 = vld [vmem:[%s10034_s4 + $0x28] sm:$0xff]  ;;  %v319_v56 = vld [vmem:[%s10034_s4 + $0x30] sm:$0xff]  ;;  %vm10058_vm6 = vcmask 916480  }
  0x1a   : > { %v5858_v5 = vld [vmem:[%s252_s25] sm:$0xff]  ;;  %s6020_s24 = smov 112   ;;  %s245_s10 = sand.u32 1, %s5995_s19  }
  0x1b   : > { %5753 = vmatmul.msk.bf16.vlgmr.msra.gmra.mxu1 %vm374_vm0, %v5858_v5  ;;  %385 = vmatpush.bf16.msra.mxu0 %v5858_v5  ;;  %s5737_s11 = sshll.u32 %s245_s10, 8  ;;  %s5953_s9 = scalar_lea.hbm %s10035_s5, 512 }
  0x1e   : > { %290 = vperm.xlu1 %5931, %v268_v7   ;;  %5748 = vmatmul.msk.bf16.vlgmr.msra.gmra.mxu0 %vm374_vm0, %v5856_v6 }
  0x1f   : > { %280 = vperm.xlu0 %5930, %v266_v8  }
  0x20   : > { %300 = vperm.xlu2 %5932, %v270_v9  }
  0x26   : > { %305 = vperm.xlu1 %5931, %v271_v10  }
  0x27   : > { %323 = vperm.xlu0 %5930, %v313_v11  }
  0x28   : > { %310 = vperm.xlu2 %5932, %v272_v12  }
  0x2e   : > { %328 = vperm.xlu1 %5931, %v314_v13  }
  0x2f   : > { %338 = vperm.xlu0 %5930, %v316_v14  }
  0x30   : > { %333 = vperm.xlu2 %5932, %v315_v15  }
  0x36   : > { %343 = vperm.xlu1 %5931, %v317_v16  }
  0x72   : > { %v6226_v47 = vpop.permute.xlu2 %295 }
  0x7a   : > { %v6242_v53 = vpop.permute.xlu2 %300 }
  0x82   : > { %v6251_v57 = vpop.permute.xlu2 %310 }
  0x83   : > { %10074 = vst [vmem:[#allocation6_spill] sm:$0xff] %v6251_v57 }
  0x88   : > { %v6232_v49 = vpop.permute.xlu1 %285 }
  0x89   : > { %v6246_v55 = vpop.permute.xlu0 %275 }
  0x8a   : > { %v6257_v60 = vpop.permute.xlu2 %333 }
  0x8b   : > { %10076 = vst [vmem:[#allocation8_spill] sm:$0xff] %v6257_v60 }
  0x90   : > { %v6244_v54 = vpop.permute.xlu1 %290 }
  0x91   : > { %v6255_v59 = vpop.permute.xlu0 %280 }
  0x98   : > { %v6168_v17 = vpop.f32.mrf.mxu1  ;;  %v6253_v58 = vpop.permute.xlu1 %305 }
  0x99   : > { %v502_v18 = vrot.slane %v6168_v17, 3  ;;  %v498_v19 = vrot.slane %v6168_v17, 2  ;;  %v494_v20 = vrot.slane %v6168_v17, 1  ;;  %v514_v21 = vrot.slane %v6168_v17, 6  ;;  %10075 = vst [vmem:[#allocation7_spill] sm:$0xff] %v6253_v58  ;;  %v6261_v62 = vpop.permute.xlu0 %323 }
  0x9a   : > { %v510_v22 = vrot.slane %v6168_v17, 5  ;;  %v506_v23 = vrot.slane %v6168_v17, 4  ;;  %v518_v27 = vrot.slane %v6168_v17, 7 }
  0x9b   : > { %503 = vrot.lane.b32.xlu1 %v502_v18, %s6014_s12  ;;  %499 = vrot.lane.b32.xlu0 %v498_v19, %s6015_s13  ;;  %v6182_v24 = vpop.f32.mrf.mxu0 }
  0x9c   : > { %495 = vrot.lane.b32.xlu2 %v494_v20, %s6016_s14  ;;  %v420_v25 = vrot.slane %v6182_v24, 2  ;;  %v416_v26 = vrot.slane %v6182_v24, 1  ;;  %v432_v28 = vrot.slane %v6182_v24, 5  ;;  %v428_v29 = vrot.slane %v6182_v24, 4 }
  0x9d   : > { %v424_v30 = vrot.slane %v6182_v24, 3  ;;  %v440_v33 = vrot.slane %v6182_v24, 7  ;;  %v436_v34 = vrot.slane %v6182_v24, 6 }
  0xa0   : > { %v6196_v31 = vpop.f32.mrf.mxu1  ;;  %v6259_v61 = vpop.permute.xlu1 %328 }
  0xa1   : > { %v527_v32 = vrot.slane %v6196_v31, 2  ;;  %v539_v35 = vrot.slane %v6196_v31, 5  ;;  %v523_v36 = vrot.slane %v6196_v31, 1  ;;  %v531_v37 = vrot.slane %v6196_v31, 3  ;;  %v6265_v1 = vpop.permute.xlu0 %338 }
  0xa2   : > { %v535_v39 = vrot.slane %v6196_v31, 4  ;;  %v543_v41 = vrot.slane %v6196_v31, 6  ;;  %v547_v42 = vrot.slane %v6196_v31, 7 }
  0xa3   : > { %515 = vrot.lane.b32.xlu1 %v514_v21, %s6017_s15  ;;  %511 = vrot.lane.b32.xlu0 %v510_v22, %s6018_s16  ;;  %v6210_v38 = vpop.f32.mrf.mxu0 }
  0xa4   : > { %507 = vrot.lane.b32.xlu2 %v506_v23, %s6019_s17  ;;  %10073 = vst [vmem:[#allocation5_spill] sm:$0xff] %v6210_v38  ;;  %v445_v40 = vrot.slane %v6210_v38, 1  ;;  %v457_v43 = vrot.slane %v6210_v38, 4  ;;  %v449_v44 = vrot.slane %v6210_v38, 2  ;;  %v453_v45 = vrot.slane %v6210_v38, 3 }
  0xa5   : > { %v469_v46 = vrot.slane %v6210_v38, 7  ;;  %v461_v48 = vrot.slane %v6210_v38, 5  ;;  %v465_v51 = vrot.slane %v6210_v38, 6 }
  0xa8   : > { %v6263_v0 = vpop.permute.xlu1 %343 }
  0xab   : > { %421 = vrot.lane.b32.xlu1 %v420_v25, %s6015_s13  ;;  %417 = vrot.lane.b32.xlu0 %v416_v26, %s6016_s14 }
  0xac   : > { %519 = vrot.lane.b32.xlu2 %v518_v27, %s6020_s24 }
  0xb3   : > { %433 = vrot.lane.b32.xlu1 %v432_v28, %s6018_s16  ;;  %429 = vrot.lane.b32.xlu0 %v428_v29, %s6019_s17 }
  0xb4   : > { %425 = vrot.lane.b32.xlu2 %v424_v30, %s6014_s12 }
  0xbb   : > { %528 = vrot.lane.b32.xlu1 %v527_v32, %s6015_s13  ;;  %441 = vrot.lane.b32.xlu0 %v440_v33, %s6020_s24 }
  0xbc   : > { %437 = vrot.lane.b32.xlu2 %v436_v34, %s6017_s15 }
  0xc3   : > { %540 = vrot.lane.b32.xlu1 %v539_v35, %s6018_s16  ;;  %524 = vrot.lane.b32.xlu0 %v523_v36, %s6016_s14 }
  0xc4   : > { %532 = vrot.lane.b32.xlu2 %v531_v37, %s6014_s12 }
  0xcb   : > { %536 = vrot.lane.b32.xlu0 %v535_v39, %s6019_s17  ;;  %446 = vrot.lane.b32.xlu1 %v445_v40, %s6016_s14 }
  0xcc   : > { %544 = vrot.lane.b32.xlu2 %v543_v41, %s6017_s15 }
  0xd3   : > { %548 = vrot.lane.b32.xlu0 %v547_v42, %s6020_s24  ;;  %458 = vrot.lane.b32.xlu1 %v457_v43, %s6019_s17 }
  0xd4   : > { %450 = vrot.lane.b32.xlu2 %v449_v44, %s6015_s13  ;;  %s5859_s13 = sshll.u32 %s6003_s21, 8  ;;  %s5626_s21 = scalar_lea.sflag [#allocation3], %s245_s10 }
  0xd5   : > { %s5639_s17 = scalar_lea.hbm %s10035_s5, %s5859_s13 }
  0xd6   : > { %s5642_s25 = sshll.u32 %s5639_s17, 4  ;;  %s5643_s25 = int_to_ptr.hbm [resolvable:$true] %s5642_s25 }
  0xd7   : > { %s5947_s27 = sshra.s32 %s5643_s25, 4  ;;  %s5948_s27 = int_to_ptr.hbm [resolvable:$true] %s5947_s27 }
  0xd8   : > { %s5949_s29 = scalar_lea.hbm %s5948_s27, 256  ;;  %p5954_p1 = scmp.lt.s32.totalorder %s5948_s27, %s10035_s5 }
  0xd9   : > { %p5950_p12 = scmp.ne.s32.totalorder %s5948_s27, %s5949_s29  ;;  %p5955_p2 = scmp.lt.s32.totalorder %s5953_s9, %s5949_s29 }
  0xdb   : > { %454 = vrot.lane.b32.xlu0 %v453_v45, %s6014_s12  ;;  %470 = vrot.lane.b32.xlu1 %v469_v46, %s6020_s24  ;;  %s6642_s12 = scalar_lea.vmem [#allocation2], %s5737_s11  ;;  %p5951_p13 = pnand %p5950_p12, %p6098_p4 }
  0xdc   : > { %462 = vrot.lane.b32.xlu2 %v461_v48, %s6018_s16  ;;  %s5640_s24 = sshll.u32 %s6642_s12, 4  ;;  %p5956_p3 = por %p5955_p2, %p5954_p1  ;;  %s5641_s24 = int_to_ptr.vmem [resolvable:$true] %s5640_s24 }
  0xdd   : > { %p5952_p0 = pneg %p5951_p13 }
  0xdf   : > { %p5957_p5 = pnand %p5956_p3, %p5952_p0 }
  0xe3   : > { %466 = vrot.lane.b32.xlu0 %v465_v51, %s6017_s15  ;;  %358 = vperm.xlu1 %5931, %v320_v50  }
  0xe4   : > { %348 = vperm.xlu2 %5932, %v318_v52  }
  0xeb   : > { %353 = vperm.xlu0 %5930, %v319_v56   ;;  %v10040_v56 = vmov 683565275  }
  0xf6   : > { %v496_v63 = vpop.permute.xlu2 %495 }
  0xf7   : > { %v551_v6 = vsel %vm374_vm0, %v6168_v17, %v496_v63 }
  0xfe   : > { %v508_v3 = vpop.permute.xlu2 %507 }
 0x106   : > { %v520_v13 = vpop.permute.xlu2 %519 }
 0x10d   : > { %v504_v4 = vpop.permute.xlu1 %503  ;;  %v500_v5 = vpop.permute.xlu0 %499 }
 0x10e   : > { %v552_v7 = vsel %vm474_vm1, %v551_v6, %v500_v5  ;;  %v10042_v6 = vmov 2131351028  }
 0x10f   : > { %v553_v8 = vsel %vm476_vm2, %v552_v7, %v504_v4 }
 0x110   : > { %v554_v11 = vsel %vm478_vm3, %v553_v8, %v508_v3  ;;  %v10037_v3 = vmov 2475754826  }
 0x115   : > { %v516_v9 = vpop.permute.xlu1 %515  ;;  %v512_v10 = vpop.permute.xlu0 %511 }
 0x116   : > { %v555_v12 = vsel %vm10055_vm4, %v554_v11, %v512_v10 }
 0x117   : > { %v556_v14 = vsel %vm10070_vm5, %v555_v12, %v516_v9  ;;  %v10049_v9 = vmov 2102212464   ;;  %v10047_v12 = vmov 920167782  }
 0x118   : > { %v557_v15 = vsel %vm10058_vm6, %v556_v14, %v520_v13 }
 0x119   : > { %v6275_v16 = vperm.slane %v557_v15, 0  ;;  %v10044_v15 = vmov 1326507024  }
 0x11b   : > { %10077 = vst [vmem:[#allocation9_spill] sm:$0xff] %v6275_v16  ;;  %v3097_v17 = vmul.f32 %v6275_v16, %v6246_v55  ;;  %v3099_v18 = vmul.f32 %v6275_v16, %v6255_v59  ;;  %v3101_v21 = vmul.f32 %v6275_v16, %v6232_v49  ;;  %v6305_v44 = vmul.f32 %v6275_v16, %v6244_v54 }
 0x11d   : > { %v6282_v19 = vadd.f32 %v3097_v17, %v6261_v62  ;;  %v6285_v20 = vadd.f32 %v3099_v18, %v6259_v61  ;;  %v6298_v30 = vadd.f32 %v3101_v21, %v6257_v60 }
 0x11f   : > { %v10039_v22 = vand.u32 2147483647, %v6282_v19  ;;  %v3132_v23 = vand.u32 2139095040, %v6282_v19  ;;  %v10036_v25 = vand.u32 2147483647, %v6285_v20  ;;  %v3442_v28 = vand.u32 2139095040, %v6285_v20 }
 0x120   : > { %v3752_v40 = vand.u32 2139095040, %v6298_v30  ;;  %v10084_v38 = vand.u32 2147483647, %v6285_v20 }
 0x121   : > { %v3133_v26 = vshrl.u32 %v3132_v23, 23  ;;  %v3136_v27 = vand.u32 8388607, %v10039_v22  ;;  %v3446_v29 = vand.u32 8388607, %v10036_v25  ;;  %v3443_v34 = vshrl.u32 %v3442_v28, 23 }
 0x122   : > { %v6315_v51 = vshrl.u32 %v3752_v40, 23 }
 0x123   : > { %v5802_v32 = vadd.s32 4294967169, %v3133_v26  ;;  %v3137_v33 = vor.u32 8388608, %v3136_v27  ;;  %v5808_v36 = vadd.s32 4294967169, %v3443_v34  ;;  %v3447_v37 = vor.u32 8388608, %v3446_v29 }
 0x125   : > { %v3139_v35 = vadd.s32 1, %v5802_v32  ;;  %v6300_v39 = vshll.u32 %v3137_v33, 8  ;;  %v3449_v42 = vadd.s32 1, %v5808_v36  ;;  %v6307_v45 = vshll.u32 %v3447_v37, 8 }
 0x127   : > { %vm3140_vm7 = vcmp.gt.s32.totalorder %v3139_v35, 0  ;;  %v6310_v48 = vand.u32 65535, %v6300_v39  ;;  %v6313_v50 = vshrl.u32 %v6300_v39, 16  ;;  %vm3450_vm8 = vcmp.gt.s32.totalorder %v3449_v42, 0 }
 0x128   : > { %v3141_v41 = vsel %vm3140_vm7, %v3139_v35, 0  ;;  %v3451_v26 = vsel %vm3450_vm8, %v3449_v42, 0  ;;  %v6339_v34 = vand.u32 65535, %v6307_v45 }
 0x129   : > { %v3143_v43 = vand.u32 31, %v3141_v41  ;;  %v6317_v52 = vshrl.u32 %v3141_v41, 5  ;;  %v6331_v29 = vand.u32 31, %v3451_v26 }
 0x12b   : > { %v3144_v46 = vsub.s32 32, %v3143_v43  ;;  %v3146_v63 = vshll.u32 %v10040_v56, %v3143_v43  ;;  %v3149_v4 = vshll.u32 %v10037_v3, %v3143_v43  ;;  %v3152_v8 = vshll.u32 %v10042_v6, %v3143_v43 }
 0x12c   : > { %v3155_v11 = vshll.u32 %v10049_v9, %v3143_v43  ;;  %v3158_v14 = vshll.u32 %v10047_v12, %v3143_v43  ;;  %vm3161_vm9 = vcmp.lt.s32.totalorder %v6317_v52, 1  ;;  %vm3164_vm10 = vcmp.lt.s32.totalorder %v6317_v52, 4 }
 0x12d   : > { %v3147_v5 = vshrl.u32 %v10037_v3, %v3144_v46  ;;  %v3150_v7 = vshrl.u32 %v10042_v6, %v3144_v46  ;;  %v3153_v10 = vshrl.u32 %v10049_v9, %v3144_v46  ;;  %v3156_v13 = vshrl.u32 %v10047_v12, %v3144_v46 }
 0x12e   : > { %v3159_v17 = vshrl.u32 %v10044_v15, %v3144_v46  ;;  %vm3163_vm11 = vcmp.lt.s32.totalorder %v6317_v52, 3  ;;  %v6343_v37 = vsub.s32 32, %v6331_v29  ;;  %vm3162_vm12 = vcmp.lt.s32.totalorder %v6317_v52, 2 }
 0x12f   : > { %v3148_v18 = vor.u32 %v3147_v5, %v3146_v63  ;;  %v3151_v21 = vor.u32 %v3150_v7, %v3149_v4  ;;  %v3154_v23 = vor.u32 %v3153_v10, %v3152_v8  ;;  %v3157_v27 = vor.u32 %v3156_v13, %v3155_v11 }
 0x130   : > { %v3160_v28 = vor.u32 %v3159_v17, %v3158_v14  ;;  %v3145_v43 = vshrl.u32 %v10040_v56, %v3144_v46  ;;  %v6355_v5 = vshrl.u32 %v3451_v26, 5  ;;  %v3456_v46 = vshll.u32 %v10040_v56, %v6331_v29 }
 0x131   : > { %v3169_v32 = vsel %vm3161_vm9, %v3148_v18, %v3151_v21  ;;  %v3173_v33 = vsel %vm3161_vm9, %v3151_v21, %v3154_v23  ;;  %v3170_v35 = vsel %vm3164_vm10, %v3157_v27, 920167782  ;;  %v3166_v40 = vsel %vm3164_vm10, %v3154_v23, 2102212464 }
 0x132   : > { %v3174_v36 = vsel %vm3164_vm10, %v3160_v28, 1326507024  ;;  %v3171_v41 = vsel %vm3163_vm11, %v3154_v23, %v3170_v35  ;;  %v3165_v13 = vsel %vm3161_vm9, %v3145_v43, %v3148_v18  ;;  %v3167_v14 = vsel %vm3163_vm11, %v3151_v21, %v3166_v40 }
 0x133   : > { %v3175_v42 = vsel %vm3163_vm11, %v3157_v27, %v3174_v36  ;;  %v3172_v63 = vsel %vm3162_vm12, %v3169_v32, %v3171_v41  ;;  %v3457_v17 = vshrl.u32 %v10037_v3, %v6343_v37  ;;  %v3459_v27 = vshll.u32 %v10037_v3, %v6331_v29 }
 0x134   : > { %v3176_v4 = vsel %vm3162_vm12, %v3173_v33, %v3175_v42  ;;  %v3202_v10 = vand.u32 65535, %v3172_v63  ;;  %v3203_v11 = vshrl.u32 %v3172_v63, 16  ;;  %v3460_v28 = vshrl.u32 %v10042_v6, %v6343_v37 }
 0x135   : > { %v3180_v7 = vand.u32 65535, %v3176_v4  ;;  %v3181_v8 = vshrl.u32 %v3176_v4, 16  ;;  %v3462_v33 = vshll.u32 %v10042_v6, %v6331_v29  ;;  %vm3471_vm8 = vcmp.lt.s32.totalorder %v6355_v5, 1 }
 0x136   : > { %v3205_v21 = vmul.u32 %v3203_v11, %v6310_v48  ;;  %v3206_v32 = vmul.u32 %v3202_v10, %v6313_v50  ;;  %v3204_v40 = vmul.u32 %v3202_v10, %v6310_v48  ;;  %v3207_v41 = vmul.u32 %v3203_v11, %v6313_v50 }
 0x137   : > { %v3183_v23 = vmul.u32 %v3181_v8, %v6310_v48  ;;  %v3184_v26 = vmul.u32 %v3180_v7, %v6313_v50  ;;  %v3182_v18 = vmul.u32 %v3180_v7, %v6310_v48  ;;  %v3185_v35 = vmul.u32 %v3181_v8, %v6313_v50 }
 0x138   : > { %v3208_v4 = vshll.u32 %v3205_v21, 16  ;;  %v3209_v25 = vshrl.u32 %v3205_v21, 16  ;;  %v3210_v3 = vshll.u32 %v3206_v32, 16  ;;  %v3463_v8 = vshrl.u32 %v10049_v9, %v6343_v37 }
 0x139   : > { %v3186_v36 = vshll.u32 %v3183_v23, 16  ;;  %v3187_v42 = vshrl.u32 %v3183_v23, 16  ;;  %v3188_v43 = vshll.u32 %v3184_v26, 16  ;;  %v3189_v63 = vshrl.u32 %v3184_v26, 16 }
 0x13a   : > { %vm3212_vm14 = vc.u32 %v3204_v40, %v3208_v4  ;;  %v3214_v56 = vadd.s32 %v3208_v4, %v3204_v40  ;;  %v3458_v50 = vor.u32 %v3457_v17, %v3456_v46  ;;  %v6384_v23 = vor.u32 %v3460_v28, %v3459_v27 }
 0x13b   : > { %vm3190_vm13 = vc.u32 %v3182_v18, %v3186_v36  ;;  %v3192_v7 = vadd.s32 %v3186_v36, %v3182_v18  ;;  %v3213_v48 = vsel %vm3212_vm14, 1, %v10060_v2  ;;  %v3465_v21 = vshll.u32 %v10049_v9, %v6331_v29 }
 0x13c   : > { %v3191_v22 = vsel %vm3190_vm13, 1, %v10060_v2  ;;  %v3215_v11 = vadd.s32 %v3213_v48, %v3207_v41  ;;  %vm3216_vm7 = vc.u32 %v3214_v56, %v3210_v3  ;;  %v3466_v36 = vshrl.u32 %v10047_v12, %v6343_v37 }
 0x13d   : > { %v3193_v6 = vadd.s32 %v3191_v22, %v3185_v35  ;;  %vm3194_vm15 = vc.u32 %v3192_v7, %v3188_v43  ;;  %v3217_v18 = vsel %vm3216_vm7, 1, %v10060_v2  ;;  %v3464_v35 = vor.u32 %v3463_v8, %v3462_v33 }
 0x13e   : > { %v3195_v10 = vsel %vm3194_vm15, 1, %v10060_v2  ;;  %v3219_v22 = vadd.s32 %v3217_v18, %v3215_v11  ;;  %v3468_v46 = vshll.u32 %v10047_v12, %v6331_v29  ;;  %v3469_v17 = vshrl.u32 %v10044_v15, %v6343_v37 }
 0x13f   : > { %v3197_v26 = vadd.s32 %v3195_v10, %v3193_v6  ;;  %v3211_v27 = vshrl.u32 %v3206_v32, 16  ;;  %v6395_v28 = vadd.s32 %v3214_v56, %v3210_v3  ;;  %v3467_v6 = vor.u32 %v3466_v36, %v3465_v21 }
 0x140   : > { %v3220_v41 = vadd.s32 %v3219_v22, %v3209_v25  ;;  %v3470_v43 = vor.u32 %v3469_v17, %v3468_v46  ;;  %vm3474_vm9 = vcmp.lt.s32.totalorder %v6355_v5, 4  ;;  %vm3473_vm10 = vcmp.lt.s32.totalorder %v6355_v5, 3 }
 0x141   : > { %v3198_v40 = vadd.s32 %v3197_v26, %v3187_v42  ;;  %v3479_v29 = vsel %vm3471_vm8, %v3458_v50, %v6384_v23  ;;  %v3480_v32 = vsel %vm3474_vm9, %v3467_v6, 920167782  ;;  %v3168_v56 = vsel %vm3162_vm12, %v3165_v13, %v3167_v14 }
 0x142   : > { %v3221_v25 = vadd.s32 %v3220_v41, %v3211_v27  ;;  %vm3472_vm11 = vcmp.lt.s32.totalorder %v6355_v5, 2  ;;  %v3481_v3 = vsel %vm3473_vm10, %v3464_v35, %v3480_v32  ;;  %v3483_v42 = vsel %vm3471_vm8, %v6384_v23, %v3464_v35 }
 0x143   : > { %v6399_v4 = vadd.s32 %v3198_v40, %v3189_v63  ;;  %v3482_v33 = vsel %vm3472_vm11, %v3479_v29, %v3481_v3  ;;  %v5814_v63 = vadd.s32 4294967169, %v6315_v51  ;;  %v3484_v13 = vsel %vm3474_vm9, %v3470_v43, 1326507024 }
 0x144   : > { %v3225_v52 = vadd.s32 1, %v3221_v25  ;;  %v3512_v14 = vand.u32 65535, %v3482_v33  ;;  %v3513_v7 = vshrl.u32 %v3482_v33, 16  ;;  %v6424_v8 = vmul.f32 %v6275_v16, %v6226_v47 }
 0x145   : > { %vm3224_vm13 = vc.u32 %v6399_v4, %v6395_v28  ;;  %v3222_v48 = vmul.u32 %v6300_v39, %v3168_v56  ;;  %v3485_v10 = vsel %vm3473_vm10, %v3467_v6, %v3484_v13  ;;  %v10046_v11 = vand.u32 2147483647, %v6298_v30 }
 0x146   : > { %v3226_v26 = vsel %vm3224_vm13, %v3225_v52, %v3221_v25  ;;  %v3486_v51 = vsel %vm3472_vm11, %v3483_v42, %v3485_v10  ;;  %v3489_v18 = vshrl.u32 %v6307_v45, 16  ;;  %v3515_v21 = vmul.u32 %v3513_v7, %v6339_v34 }
 0x147   : > { %v3227_v36 = vadd.s32 %v3226_v26, %v3222_v48  ;;  %v3490_v22 = vand.u32 65535, %v3486_v51  ;;  %v3491_v46 = vshrl.u32 %v3486_v51, 16  ;;  %v3759_v17 = vadd.s32 1, %v5814_v63 }
 0x148   : > { %v10078_v40 = vmov 683565275   ;;  %v3514_v27 = vmul.u32 %v3512_v14, %v6339_v34  ;;  %v3516_v6 = vmul.u32 %v3512_v14, %v3489_v18  ;;  %v3518_v41 = vshll.u32 %v3515_v21, 16 }
 0x149   : > { %v3455_v39 = vshrl.u32 %v10078_v40, %v6343_v37  ;;  %v3228_v43 = vadd.s32 536870912, %v3227_v36  ;;  %v3493_v29 = vmul.u32 %v3491_v46, %v6339_v34  ;;  %v3494_v32 = vmul.u32 %v3490_v22, %v3489_v18 }
 0x14a   : > { %v6440_v56 = vand.u32 8388607, %v10046_v11  ;;  %v3476_v3 = vsel %vm3474_vm9, %v3464_v35, 2102212464  ;;  %v3517_v33 = vmul.u32 %v3513_v7, %v3489_v18  ;;  %vm3522_vm12 = vc.u32 %v3514_v27, %v3518_v41 }
 0x14b   : > { %v3475_v25 = vsel %vm3471_vm8, %v3455_v39, %v3458_v50  ;;  %v3229_v37 = vshrl.u32 %v3228_v43, 30  ;;  %v3492_v42 = vmul.u32 %v3490_v22, %v6339_v34  ;;  %v3496_v63 = vshll.u32 %v3493_v29, 16 }
 0x14c   : > { %vm3760_vm14 = vcmp.gt.s32.totalorder %v3759_v17, 0  ;;  %v3495_v52 = vmul.u32 %v3491_v46, %v3489_v18  ;;  %v3520_v13 = vshll.u32 %v3516_v6, 16  ;;  %v3523_v14 = vsel %vm3522_vm12, 1, %v10060_v2 }
 0x14d   : > { %v3524_v48 = vadd.s32 %v3518_v41, %v3514_v27  ;;  %v3230_v10 = vshll.u32 %v3229_v37, 30  ;;  %v3498_v26 = vshll.u32 %v3494_v32, 16  ;;  %vm3500_vm15 = vc.u32 %v3492_v42, %v3496_v63 }
 0x14e   : > { %v3502_v51 = vadd.s32 %v3496_v63, %v3492_v42  ;;  %v3477_v50 = vsel %vm3473_vm10, %v6384_v23, %v3476_v3  ;;  %v3501_v35 = vsel %vm3500_vm15, 1, %v10060_v2  ;;  %v3525_v7 = vadd.s32 %v3523_v14, %v3517_v33 }
 0x14f   : > { %vm3526_vm7 = vc.u32 %v3524_v48, %v3520_v13  ;;  %v3231_v34 = vsub.s32 %v3227_v36, %v3230_v10  ;;  %v3503_v22 = vadd.s32 %v3501_v35, %v3495_v52  ;;  %v3761_v18 = vsel %vm3760_vm14, %v3759_v17, 0 }
 0x150   : > { %vm3504_vm8 = vc.u32 %v3502_v51, %v3498_v26  ;;  %vm3131_vm9 = vcmp.lt.s32.totalorder %v6282_v19, 0  ;;  %v3527_v39 = vsel %vm3526_vm7, 1, %v10060_v2  ;;  %v3757_v27 = vor.u32 8388608, %v6440_v56 }
 0x151   : > { %v3505_v46 = vsel %vm3504_vm8, 1, %v10060_v2  ;;  %vm3232_vm13 = vcmp.lt.s32.totalorder %v3231_v34, 0  ;;  %v3233_v41 = vsub.s32 0, %v3231_v34  ;;  %v3497_v23 = vshrl.u32 %v3493_v29, 16 }
 0x152   : > { %v3507_v43 = vadd.s32 %v3505_v46, %v3503_v22  ;;  %v3478_v3 = vsel %vm3472_vm11, %v3475_v25, %v3477_v50  ;;  %v3519_v36 = vshrl.u32 %v3515_v21, 16  ;;  %v3529_v33 = vadd.s32 %v3527_v39, %v3525_v7 }
 0x153   : > { %v3763_v42 = vand.u32 31, %v3761_v18  ;;  %v3234_v63 = vsel %vm3232_vm13, %v3233_v41, %v3231_v34  ;;  %v3253_v17 = vsub.s32 4, %v3229_v37  ;;  %v3499_v52 = vshrl.u32 %v3494_v32, 16 }
 0x154   : > { %v3508_v14 = vadd.s32 %v3507_v43, %v3497_v23  ;;  %v10079_v10 = vand.u32 2147483647, %v6282_v19  ;;  %v3235_v56 = vclz %v3234_v63  ;;  %v3521_v51 = vshrl.u32 %v3516_v6, 16 }
 0x155   : > { %v3530_v29 = vadd.s32 %v3529_v33, %v3519_v36  ;;  %v6465_v35 = vsub.s32 32, %v3763_v42  ;;  %v3223_v5 = vadd.s32 %v6395_v28, %v6399_v4  ;;  %v6471_v25 = vadd.s32 %v3524_v48, %v3520_v13 }
 0x156   : > { %vm6461_vm10 = vcmp.le.f32.partialorder %v10079_v10, 0.7853982  ;;  %v6469_v21 = vadd.s32 %v3508_v14, %v3499_v52  ;;  %v3532_v32 = vmul.u32 %v6307_v45, %v3478_v3  ;;  %v5803_v50 = vadd.s32 4294967294, %v3235_v56 }
 0x157   : > { %v3531_v7 = vadd.s32 %v3530_v29, %v3521_v51  ;;  %v3766_v22 = vshll.u32 %v10078_v40, %v3763_v42  ;;  %v10082_v46 = vmov 2475754826   ;;  %v3254_v6 = vsel %vm3131_vm9, %v3253_v17, %v3229_v37 }
 0x158   : > { %v3767_v39 = vshrl.u32 %v10082_v46, %v6465_v35  ;;  %vm3534_vm11 = vc.u32 %v6469_v21, %v6471_v25  ;;  %v3769_v28 = vshll.u32 %v10082_v46, %v3763_v42  ;;  %v10083_v4 = vmov 2131351028  }
 0x159   : > { %v3770_v13 = vshrl.u32 %v10083_v4, %v6465_v35  ;;  %vm5804_vm12 = vcmp.lt.s32.totalorder %v5803_v50, 0  ;;  %v3535_v45 = vadd.s32 1, %v3531_v7  ;;  %v6484_v48 = vshrl.u32 %v3761_v18, 5 }
 0x15a   : > { %v6486_v41 = vor.u32 %v3767_v39, %v3766_v22  ;;  %v3238_v23 = vsel %vm5804_vm12, 0, %v5803_v50  ;;  %v3772_v3 = vshll.u32 %v10083_v4, %v3763_v42  ;;  %v3773_v37 = vshrl.u32 %v10049_v9, %v6465_v35 }
 0x15b   : > { %v6488_v43 = vor.u32 %v3770_v13, %v3769_v28  ;;  %v3239_v36 = vsub.s32 32, %v3238_v23  ;;  %v3243_v33 = vsub.s32 4294967266, %v3238_v23  ;;  %v3536_v63 = vsel %vm3534_vm11, %v3535_v45, %v3531_v7 }
 0x15c   : > { %v3775_v17 = vshll.u32 %v10049_v9, %v3763_v42  ;;  %v3240_v52 = vshll.u32 %v3231_v34, %v3238_v23  ;;  %v3537_v14 = vadd.s32 %v3536_v63, %v3532_v32  ;;  %v3774_v10 = vor.u32 %v3773_v37, %v3772_v3 }
 0x15d   : > { %v3776_v18 = vshrl.u32 %v10047_v12, %v6465_v35  ;;  %v3241_v56 = vshrl.u32 %v3223_v5, %v3239_v36  ;;  %v3244_v51 = vadd.s32 127, %v3243_v33  ;;  %v3778_v29 = vshll.u32 %v10047_v12, %v3763_v42  ;;  %v418_v5 = vpop.permute.xlu0 %417 }
 0x15e   : > { %v3779_v50 = vshrl.u32 %v10044_v15, %v6465_v35  ;;  %v3256_v22 = vsel %vm6461_vm10, 0, %v3254_v6  ;;  %v3538_v39 = vadd.s32 536870912, %v3537_v14  ;;  %v6501_v28 = vshll.u32 %v3757_v27, 8 }
 0x15f   : > { %v3777_v7 = vor.u32 %v3776_v18, %v3775_v17  ;;  %v3242_v34 = vor.u32 %v3241_v56, %v3240_v52  ;;  %v3245_v32 = vshll.u32 %v3244_v51, 23  ;;  %vm3784_vm14 = vcmp.lt.s32.totalorder %v6484_v48, 4  ;;  %v422_v56 = vpop.permute.xlu1 %421 }
 0x160   : > { %v3780_v13 = vor.u32 %v3779_v50, %v3778_v29  ;;  %v6504_v45 = vshrl.u32 %v3538_v39, 30  ;;  %vm3781_vm15 = vcmp.lt.s32.totalorder %v6484_v48, 1  ;;  %vm3783_vm7 = vcmp.lt.s32.totalorder %v6484_v48, 3 }
 0x161   : > { %v3790_v42 = vsel %vm3784_vm14, %v3777_v7, 920167782  ;;  %v3246_v6 = vor.u32 4788187, %v3245_v32  ;;  %v3789_v27 = vsel %vm3781_vm15, %v6486_v41, %v6488_v43  ;;  %v3793_v3 = vsel %vm3781_vm15, %v6488_v43, %v3774_v10 }
 0x162   : > { %v3791_v23 = vsel %vm3783_vm7, %v3774_v10, %v3790_v42  ;;  %v6521_v37 = vadd.f32 %v6305_v44, %v6265_v1  ;;  %v3273_v36 = vadd.s32 3, %v3256_v22  ;;  %v3540_v33 = vshll.u32 %v6504_v45, 30 }
 0x163   : > { %v3794_v63 = vsel %vm3784_vm14, %v3780_v13, 1326507024  ;;  %v3247_v17 = vand.u32 2147483647, %v3246_v6  ;;  %v3249_v52 = vcvt.s32.f32 %v3242_v34  ;;  %vm3782_vm8 = vcmp.lt.s32.totalorder %v6484_v48, 2 }
 0x164   : > { %v3795_v18 = vsel %vm3783_vm7, %v3777_v7, %v3794_v63  ;;  %v473_v51 = vsel %vm374_vm0, %v6182_v24, %v418_v5  ;;  %v6531_v29 = vsub.s32 %v3537_v14, %v3540_v33  ;;  %v6535_v44 = vsel %vm3782_vm8, %v3789_v27, %v3791_v23 }
 0x165   : > { %v3796_v50 = vsel %vm3782_vm8, %v3793_v3, %v3795_v18  ;;  %v3250_v22 = vmul.f32 %v3249_v52, %v3247_v17  ;;  %v3798_v39 = vand.u32 65535, %v6501_v28  ;;  %v6542_v7 = vadd.f32 %v6424_v8, %v6263_v0 }
 0x166   : > { %v3800_v34 = vand.u32 65535, %v3796_v50  ;;  %v3801_v32 = vshrl.u32 %v3796_v50, 16  ;;  %vm3542_vm13 = vcmp.lt.s32.totalorder %v6531_v29, 0  ;;  %v3543_v24 = vsub.s32 0, %v6531_v29 }
 0x167   : > { %v3799_v14 = vshrl.u32 %v6501_v28, 16  ;;  %v6548_v13 = vsel %vm474_vm1, %v473_v51, %v422_v56  ;;  %v3251_v42 = vxor.u32 2147483648, %v3250_v22  ;;  %v6550_v5 = vand.u32 3, %v3273_v36 }
 0x168   : > { %v3803_v6 = vmul.u32 %v3801_v32, %v3798_v39  ;;  %v3544_v27 = vsel %vm3542_vm13, %v3543_v24, %v6531_v29  ;;  %v3765_v23 = vshrl.u32 %v10078_v40, %v6465_v35  ;;  %v3823_v3 = vshrl.u32 %v6535_v44, 16 }
 0x169   : > { %v6555_v8 = vmul.u32 %v3800_v34, %v3799_v14  ;;  %v3252_v33 = vsel %vm3131_vm9, %v3251_v42, %v3250_v22  ;;  %v3533_v63 = vadd.s32 %v6471_v25, %v6469_v21  ;;  %v3545_v17 = vclz %v3544_v27 }
 0x16a   : > { %v3806_v52 = vshll.u32 %v3803_v6, 16  ;;  %v3255_v36 = vsel %vm6461_vm10, %v6282_v19, %v3252_v33  ;;  %v6568_v35 = vsel %vm3781_vm15, %v3765_v23, %v6486_v41  ;;  %v3786_v18 = vsel %vm3784_vm14, %v3774_v10, 2102212464 }
 0x16b   : > { %v3802_v56 = vmul.u32 %v3800_v34, %v3798_v39  ;;  %v3257_v51 = vmul.f32 %v3255_v36, %v3255_v36  ;;  %v5809_v50 = vadd.s32 4294967294, %v3545_v17  ;;  %v3805_v22 = vmul.u32 %v3801_v32, %v3799_v14 }
 0x16c   : > { %v3822_v21 = vand.u32 65535, %v6535_v44  ;;  %v3808_v25 = vshll.u32 %v6555_v8, 16  ;;  %v3825_v26 = vmul.u32 %v3823_v3, %v3798_v39  ;;  %vm3441_vm10 = vcmp.lt.s32.totalorder %v6285_v20, 0 }
 0x16d   : > { %vm3810_vm9 = vc.u32 %v3802_v56, %v3806_v52  ;;  %v3812_v24 = vadd.s32 %v3806_v52, %v3802_v56  ;;  %v3258_v42 = vmul.f32 -0.001358992, %v3257_v51  ;;  %v3265_v27 = vmul.f32 -0.00019511016, %v3257_v51 }
 0x16e   : > { %vm5810_vm11 = vcmp.lt.s32.totalorder %v5809_v50, 0  ;;  %v3811_v41 = vsel %vm3810_vm9, 1, %v10060_v2  ;;  %v3563_v10 = vsub.s32 4, %v6504_v45  ;;  %v3826_v17 = vmul.u32 %v3822_v21, %v3799_v14 }
 0x16f   : > { %v3548_v23 = vsel %vm5810_vm11, 0, %v5809_v50  ;;  %v3813_v34 = vadd.s32 %v3811_v41, %v3805_v22  ;;  %vm3814_vm12 = vc.u32 %v3812_v24, %v3808_v25  ;;  %v3259_v32 = vadd.f32 0.041655596, %v3258_v42 }
 0x170   : > { %v3266_v33 = vadd.f32 0.008332121, %v3265_v27  ;;  %v3549_v44 = vsub.s32 32, %v3548_v23  ;;  %v3553_v15 = vsub.s32 4294967266, %v3548_v23  ;;  %v3815_v52 = vsel %vm3814_vm12, 1, %v10060_v2 }
 0x171   : > { %v3824_v56 = vmul.u32 %v3822_v21, %v3798_v39  ;;  %v3828_v11 = vshll.u32 %v3825_v26, 16  ;;  %v3260_v12 = vmul.f32 %v3259_v32, %v3257_v51  ;;  %v3817_v57 = vadd.s32 %v3815_v52, %v3813_v34 }
 0x172   : > { %v3267_v9 = vmul.f32 %v3266_v33, %v3257_v51  ;;  %v3551_v58 = vshrl.u32 %v3533_v63, %v3549_v44  ;;  %vm6580_vm14 = vcmp.le.f32.partialorder %v10084_v38, 0.7853982  ;;  %v3550_v22 = vshll.u32 %v6531_v29, %v3548_v23 }
 0x173   : > { %v3554_v25 = vadd.s32 127, %v3553_v15  ;;  %v3807_v24 = vshrl.u32 %v3803_v6, 16  ;;  %vm3832_vm15 = vc.u32 %v3824_v56, %v3828_v11  ;;  %v3261_v42 = vadd.f32 -0.4999988, %v3260_v12 }
 0x174   : > { %v3268_v27 = vadd.f32 -0.16666654, %v3267_v9  ;;  %v3827_v41 = vmul.u32 %v3823_v3, %v3799_v14  ;;  %v3830_v39 = vshll.u32 %v3826_v17, 16  ;;  %v3552_v21 = vor.u32 %v3551_v58, %v3550_v22 }
 0x175   : > { %v3555_v32 = vshll.u32 %v3554_v25, 23  ;;  %v3833_v63 = vsel %vm3832_vm15, 1, %v10060_v2  ;;  %v3834_v34 = vadd.s32 %v3828_v11, %v3824_v56  ;;  %v3262_v33 = vmul.f32 %v3261_v42, %v3257_v51 }
 0x176   : > { %v3269_v44 = vmul.f32 %v3268_v27, %v3257_v51  ;;  %v3787_v38 = vsel %vm3783_vm7, %v6488_v43, %v3786_v18  ;;  %v3818_v52 = vadd.s32 %v3817_v57, %v3807_v24  ;;  %v3564_v12 = vsel %vm3441_vm10, %v3563_v10, %v6504_v45 }
 0x177   : > { %v3556_v29 = vor.u32 4788187, %v3555_v32  ;;  %v3835_v9 = vadd.s32 %v3833_v63, %v3827_v41  ;;  %vm3836_vm13 = vc.u32 %v3834_v34, %v3830_v39  ;;  %v3809_v58 = vshrl.u32 %v6555_v8, 16 }
 0x178   : > { %v3270_v15 = vadd.f32 1.0, %v3269_v44  ;;  %v3829_v14 = vshrl.u32 %v3825_v26, 16  ;;  %v3837_v11 = vsel %vm3836_vm13, 1, %v10060_v2  ;;  %v3263_v6 = vadd.f32 1.0, %v3262_v33  ;;  %v426_v44 = vpop.permute.xlu2 %425 }
 0x179   : > { %v3557_v3 = vand.u32 2147483647, %v3556_v29  ;;  %v3559_v51 = vcvt.s32.f32 %v3552_v21  ;;  %v3839_v23 = vadd.s32 %v3837_v11, %v3835_v9  ;;  %vm3276_vm7 = vcmp.eq.s32.totalorder %v6550_v5, 0 }
 0x17a   : > { %v3271_v56 = vmul.f32 %v3270_v15, %v3255_v36  ;;  %v6595_v57 = vadd.s32 %v3818_v52, %v3809_v58  ;;  %v4059_v43 = vand.u32 2147483647, %v6521_v37  ;;  %v3831_v18 = vshrl.u32 %v3826_v17, 16 }
 0x17b   : > { %v3560_v45 = vmul.f32 %v3559_v51, %v3557_v3  ;;  %v3840_v10 = vadd.s32 %v3839_v23, %v3829_v14  ;;  %v4062_v22 = vand.u32 2139095040, %v6521_v37  ;;  %v3566_v26 = vsel %vm6580_vm14, 0, %v3564_v12 }
 0x17c   : > { %v3277_v8 = vxor.u32 2147483648, %v3271_v56  ;;  %v3788_v25 = vsel %vm3782_vm8, %v6568_v35, %v3787_v38  ;;  %v3838_v36 = vadd.s32 %v3834_v34, %v3830_v39  ;;  %v3280_v24 = vxor.u32 2147483648, %v3263_v6  ;;  %v430_v38 = vpop.permute.xlu0 %429 }
 0x17d   : > { %v3561_v42 = vxor.u32 2147483648, %v3560_v45  ;;  %v3841_v27 = vadd.s32 %v3840_v10, %v3831_v18  ;;  %v4063_v41 = vshrl.u32 %v4062_v22, 23  ;;  %vm3275_vm9 = vcmp.lt.s32.totalorder %v6550_v5, 2 }
 0x17e   : > { %v3278_v17 = vsel %vm3276_vm7, %v3263_v6, %v3277_v8  ;;  %vm3844_vm11 = vc.u32 %v6595_v57, %v3838_v36  ;;  %v4066_v21 = vand.u32 8388607, %v4059_v43  ;;  %v4372_v39 = vand.u32 2139095040, %v6542_v7 }
 0x17f   : > { %v3562_v32 = vsel %vm3441_vm10, %v3561_v42, %v3560_v45  ;;  %v3845_v48 = vadd.s32 1, %v3841_v27  ;;  %v5820_v35 = vadd.s32 4294967169, %v4063_v41  ;;  %vm3279_vm8 = vcmp.eq.s32.totalorder %v6550_v5, 2 }
 0x180   : > { %v6617_v63 = vsel %vm6580_vm14, %v6285_v20, %v3562_v32  ;;  %v3583_v34 = vadd.s32 3, %v3566_v26  ;;  %v3842_v33 = vmul.u32 %v6501_v28, %v3788_v25  ;;  %v3281_v52 = vsel %vm3279_vm8, %v3280_v24, %v3271_v56  ;;  %v434_v56 = vpop.permute.xlu1 %433 }
 0x181   : > { %v3567_v29 = vmul.f32 %v6617_v63, %v6617_v63  ;;  %v3846_v12 = vsel %vm3844_vm11, %v3845_v48, %v3841_v27  ;;  %v4069_v9 = vadd.s32 1, %v5820_v35  ;;  %v477_v15 = vsel %vm476_vm2, %v6548_v13, %v426_v44 }
 0x182   : > { %v3282_v58 = vsel %vm3275_vm9, %v3278_v17, %v3281_v52  ;;  %v3847_v50 = vadd.s32 %v3846_v12, %v3842_v33  ;;  %v4067_v14 = vor.u32 8388608, %v4066_v21  ;;  %v4373_v28 = vshrl.u32 %v4372_v39, 23 }
 0x183   : > { %v3568_v11 = vmul.f32 -0.001358992, %v3567_v29  ;;  %v3575_v6 = vmul.f32 -0.00019511016, %v3567_v29  ;;  %vm4070_vm10 = vcmp.gt.s32.totalorder %v4069_v9, 0  ;;  %v479_v3 = vsel %vm478_vm3, %v477_v15, %v430_v38 }
 0x184   : > { %vm3272_vm12 = vweird.f32 %v6282_v19  ;;  %v3848_v51 = vadd.s32 536870912, %v3847_v50  ;;  %v4071_v23 = vsel %vm4070_vm10, %v4069_v9, 0  ;;  %v6628_v18 = vand.u32 3, %v3583_v34 }
 0x185   : > { %v3569_v45 = vadd.f32 0.041655596, %v3568_v11  ;;  %v3576_v13 = vadd.f32 0.008332121, %v3575_v6  ;;  %v4073_v5 = vand.u32 31, %v4071_v23  ;;  %v3283_v10 = vsel %vm3272_vm12, nan, %v3282_v58 }
 0x186   : > { %v3849_v22 = vshrl.u32 %v3848_v51, 30  ;;  %v6630_v8 = vshll.u32 %v4067_v14, 8  ;;  %v10054_v26 = vand.u32 2147483647, %v6542_v7  ;;  %v5826_v42 = vadd.s32 4294967169, %v4373_v28  ;;  %5609 = vst [vmem:[%s6642_s12 + $0x80] sm:$0xff] %v3283_v10 }
 0x187   : > { %v3570_v25 = vmul.f32 %v3569_v45, %v3567_v29  ;;  %v3577_v24 = vmul.f32 %v3576_v13, %v3567_v29  ;;  %v6637_v19 = vsel %vm10055_vm4, %v479_v3, %v434_v56  ;;  %vm3751_vm14 = vcmp.lt.s32.totalorder %v6298_v30, 0 }
 0x188   : > { %v3850_v27 = vshll.u32 %v3849_v22, 30  ;;  %vm3589_vm15 = vcmp.eq.s32.totalorder %v6628_v18, 2  ;;  %v3843_v21 = vadd.s32 %v3838_v36, %v6595_v57  ;;  %v4074_v32 = vsub.s32 32, %v4073_v5 }
 0x189   : > { %v3571_v41 = vadd.f32 -0.4999988, %v3570_v25  ;;  %v3578_v17 = vadd.f32 -0.16666654, %v3577_v24  ;;  %vm3586_vm13 = vcmp.eq.s32.totalorder %v6628_v18, 0  ;;  %v6648_v35 = vshrl.u32 %v4071_v23, 5 }
 0x18a   : > { %v6646_v48 = vsub.s32 %v3847_v50, %v3850_v27  ;;  %v6651_v39 = vand.u32 65535, %v6630_v8  ;;  %v6655_v34 = vand.u32 8388607, %v10054_v26  ;;  %vm3585_vm7 = vcmp.lt.s32.totalorder %v6628_v18, 2 }
 0x18b   : > { %v3572_v33 = vmul.f32 %v3571_v41, %v3567_v29  ;;  %v3579_v57 = vmul.f32 %v3578_v17, %v3567_v29  ;;  %v4076_v36 = vshll.u32 %v10078_v40, %v4073_v5  ;;  %v6659_v44 = vadd.s32 1, %v5826_v42 }
 0x18c   : > { %vm3582_vm9 = vweird.f32 %v6285_v20  ;;  %vm3852_vm11 = vcmp.lt.s32.totalorder %v6646_v48, 0  ;;  %v3853_v38 = vsub.s32 0, %v6646_v48  ;;  %v3873_v52 = vsub.s32 4, %v3849_v22 }
 0x18d   : > { %v4079_v12 = vshll.u32 %v10082_v46, %v4073_v5  ;;  %v3573_v9 = vadd.f32 1.0, %v3572_v33  ;;  %v3580_v15 = vadd.f32 1.0, %v3579_v57  ;;  %v4077_v58 = vshrl.u32 %v10082_v46, %v4074_v32 }
 0x18e   : > { %v4080_v29 = vshrl.u32 %v10083_v4, %v4074_v32  ;;  %v3854_v50 = vsel %vm3852_vm11, %v3853_v38, %v6646_v48  ;;  %v4082_v14 = vshll.u32 %v10083_v4, %v4073_v5  ;;  %v10087_v11 = vmov 2102212464  }
 0x18f   : > { %v4083_v6 = vshrl.u32 %v10087_v11, %v4074_v32  ;;  %v10088_v28 = vmov 920167782   ;;  %v3581_v51 = vmul.f32 %v3580_v15, %v6617_v63  ;;  %v3590_v23 = vxor.u32 2147483648, %v3573_v9 }
 0x190   : > { %v4086_v3 = vshrl.u32 %v10088_v28, %v4074_v32  ;;  %v10089_v56 = vand.u32 2147483647, %v6298_v30  ;;  %v3855_v13 = vclz %v3854_v50  ;;  %v10092_v10 = vmov 1326507024  }
 0x191   : > { %v4089_v25 = vshrl.u32 %v10092_v10, %v4074_v32  ;;  %v3874_v24 = vsel %vm3751_vm14, %v3873_v52, %v3849_v22  ;;  %v4075_v42 = vshrl.u32 %v10078_v40, %v4074_v32  ;;  %v4085_v27 = vshll.u32 %v10087_v11, %v4073_v5 }
 0x192   : > { %vm6674_vm8 = vcmp.le.f32.partialorder %v10089_v56, 0.7853982  ;;  %v4088_v41 = vshll.u32 %v10088_v28, %v4073_v5  ;;  %v3587_v63 = vxor.u32 2147483648, %v3581_v51  ;;  %v5815_v17 = vadd.s32 4294967294, %v3855_v13 }
 0x193   : > { %v4078_v33 = vor.u32 %v4077_v58, %v4076_v36  ;;  %v4081_v57 = vor.u32 %v4080_v29, %v4079_v12  ;;  %v3591_v38 = vsel %vm3589_vm15, %v3590_v23, %v3581_v51  ;;  %v4084_v15 = vor.u32 %v4083_v6, %v4082_v14 }
 0x194   : > { %v4087_v50 = vor.u32 %v4086_v3, %v4085_v27  ;;  %v4090_v56 = vor.u32 %v4089_v25, %v4088_v41  ;;  %v3588_v26 = vsel %vm3586_vm13, %v3573_v9, %v3587_v63  ;;  %vm5816_vm10 = vcmp.lt.s32.totalorder %v5815_v17, 0 }
 0x195   : > { %vm4091_vm12 = vcmp.lt.s32.totalorder %v6648_v35, 1  ;;  %vm4092_vm11 = vcmp.lt.s32.totalorder %v6648_v35, 2  ;;  %v3592_v5 = vsel %vm3585_vm7, %v3588_v26, %v3591_v38  ;;  %v3858_v22 = vsel %vm5816_vm10, 0, %v5815_v17 }
 0x196   : > { %vm4093_vm4 = vcmp.lt.s32.totalorder %v6648_v35, 3  ;;  %vm4094_vm15 = vcmp.lt.s32.totalorder %v6648_v35, 4  ;;  %v3593_v32 = vsel %vm3582_vm9, nan, %v3592_v5  ;;  %v3859_v36 = vsub.s32 32, %v3858_v22 }
 0x197   : > { %v3863_v52 = vsub.s32 4294967266, %v3858_v22  ;;  %v4099_v12 = vsel %vm4091_vm12, %v4078_v33, %v4081_v57  ;;  %v3860_v9 = vshll.u32 %v6646_v48, %v3858_v22  ;;  %v4100_v58 = vsel %vm4094_vm15, %v4087_v50, 920167782  ;;  %5611 = vst [vmem:[%s6642_s12 + $0x90] sm:$0xff] %v3593_v32 }
 0x198   : > { %v4103_v18 = vsel %vm4091_vm12, %v4081_v57, %v4084_v15  ;;  %v4104_v26 = vsel %vm4094_vm15, %v4090_v56, 1326507024  ;;  %v3861_v29 = vshrl.u32 %v3843_v21, %v3859_v36  ;;  %v4101_v6 = vsel %vm4093_vm4, %v4084_v15, %v4100_v58 }
 0x199   : > { %v3864_v14 = vadd.s32 127, %v3863_v52  ;;  %v4105_v20 = vsel %vm4093_vm4, %v4087_v50, %v4104_v26  ;;  %v3876_v3 = vsel %vm6674_vm8, 0, %v3874_v24  ;;  %v4096_v51 = vsel %vm4094_vm15, %v4084_v15, 2102212464 }
 0x19a   : > { %v4102_v48 = vsel %vm4092_vm11, %v4099_v12, %v4101_v6  ;;  %v4106_v23 = vsel %vm4092_vm11, %v4103_v18, %v4105_v20  ;;  %v3862_v13 = vor.u32 %v3861_v29, %v3860_v9  ;;  %v4109_v41 = vshrl.u32 %v6630_v8, 16 }
 0x19b   : > { %v3865_v25 = vshll.u32 %v3864_v14, 23  ;;  %v4110_v21 = vand.u32 65535, %v4106_v23  ;;  %v4111_v27 = vshrl.u32 %v4106_v23, 16  ;;  %v4132_v63 = vand.u32 65535, %v4102_v48 }
 0x19c   : > { %v4133_v17 = vshrl.u32 %v4102_v48, 16  ;;  %v4377_v38 = vor.u32 8388608, %v6655_v34  ;;  %v6714_v56 = vadd.s32 3, %v3876_v3  ;;  %v4095_v24 = vsel %vm4091_vm12, %v4075_v42, %v4078_v33 }
 0x19d   : > { %v3866_v50 = vor.u32 4788187, %v3865_v25  ;;  %v4113_v15 = vmul.u32 %v4111_v27, %v6651_v39  ;;  %v4097_v5 = vsel %vm4093_vm4, %v4081_v57, %v4096_v51  ;;  %v4114_v22 = vmul.u32 %v4110_v21, %v4109_v41 }
 0x19e   : > { %v4135_v32 = vmul.u32 %v4133_v17, %v6651_v39  ;;  %vm4380_vm13 = vcmp.gt.s32.totalorder %v6659_v44, 0  ;;  %v3869_v52 = vcvt.s32.f32 %v3862_v13  ;;  %v4112_v12 = vmul.u32 %v4110_v21, %v6651_v39 }
 0x19f   : > { %v3867_v36 = vand.u32 2147483647, %v3866_v50  ;;  %v4116_v9 = vshll.u32 %v4113_v15, 16  ;;  %v4115_v58 = vmul.u32 %v4111_v27, %v4109_v41  ;;  %v4134_v18 = vmul.u32 %v4132_v63, %v6651_v39 }
 0x1a0   : > { %v4136_v26 = vmul.u32 %v4132_v63, %v4109_v41  ;;  %v4138_v42 = vshll.u32 %v4135_v32, 16  ;;  %v4118_v29 = vshll.u32 %v4114_v22, 16  ;;  %v4137_v6 = vmul.u32 %v4133_v17, %v4109_v41 }
 0x1a1   : > { %v3870_v33 = vmul.f32 %v3869_v52, %v3867_v36  ;;  %vm4120_vm7 = vc.u32 %v4112_v12, %v4116_v9  ;;  %v4122_v14 = vadd.s32 %v4116_v9, %v4112_v12  ;;  %v4381_v20 = vsel %vm4380_vm13, %v6659_v44, 0 }
 0x1a2   : > { %v4121_v57 = vsel %vm4120_vm7, 1, %v10060_v2  ;;  %vm4142_vm4 = vc.u32 %v4134_v18, %v4138_v42  ;;  %v4140_v23 = vshll.u32 %v4136_v26, 16  ;;  %v4144_v13 = vadd.s32 %v4138_v42, %v4134_v18 }
 0x1a3   : > { %v3871_v3 = vxor.u32 2147483648, %v3870_v33  ;;  %v4123_v51 = vadd.s32 %v4121_v57, %v4115_v58  ;;  %vm4124_vm9 = vc.u32 %v4122_v14, %v4118_v29  ;;  %v4143_v48 = vsel %vm4142_vm4, 1, %v10060_v2 }
 0x1a4   : > { %v4125_v39 = vsel %vm4124_vm9, 1, %v10060_v2  ;;  %v4145_v25 = vadd.s32 %v4143_v48, %v4137_v6  ;;  %v4117_v27 = vshrl.u32 %v4113_v15, 16  ;;  %v4383_v63 = vand.u32 31, %v4381_v20 }
 0x1a5   : > { %v3872_v21 = vsel %vm3751_vm14, %v3871_v3, %v3870_v33  ;;  %v4127_v41 = vadd.s32 %v4125_v39, %v4123_v51  ;;  %v4098_v17 = vsel %vm4092_vm11, %v4095_v24, %v4097_v5  ;;  %v4119_v50 = vshrl.u32 %v4114_v22, 16 }
 0x1a6   : > { %v3875_v44 = vsel %vm6674_vm8, %v6298_v30, %v3872_v21  ;;  %vm4146_vm10 = vc.u32 %v4144_v13, %v4140_v23  ;;  %v6739_v9 = vsub.s32 32, %v4383_v63  ;;  %v4139_v58 = vshrl.u32 %v4135_v32, 16 }
 0x1a7   : > { %v3877_v36 = vmul.f32 %v3875_v44, %v3875_v44  ;;  %v4128_v52 = vadd.s32 %v4127_v41, %v4117_v27  ;;  %v4147_v12 = vsel %vm4146_vm10, 1, %v10060_v2  ;;  %v4141_v18 = vshrl.u32 %v4136_v26, 16 }
 0x1a8   : > { %v4149_v15 = vadd.s32 %v4147_v12, %v4145_v25  ;;  %v6741_v42 = vshrl.u32 %v4381_v20, 5  ;;  %v6745_v14 = vadd.s32 %v4144_v13, %v4140_v23  ;;  %v4386_v24 = vshll.u32 %v10078_v40, %v4383_v63 }
 0x1a9   : > { %v3878_v33 = vmul.f32 -0.001358992, %v3877_v36  ;;  %v3885_v29 = vmul.f32 -0.00019511016, %v3877_v36  ;;  %v6743_v45 = vadd.s32 %v4128_v52, %v4119_v50  ;;  %v4387_v5 = vshrl.u32 %v10082_v46, %v6739_v9 }
 0x1aa   : > { %v4150_v35 = vadd.s32 %v4149_v15, %v4139_v58  ;;  %v4390_v22 = vshrl.u32 %v10083_v4, %v6739_v9  ;;  %v4389_v57 = vshll.u32 %v10082_v46, %v4383_v63  ;;  %v4392_v6 = vshll.u32 %v10083_v4, %v4383_v63 }
 0x1ab   : > { %v3879_v32 = vadd.f32 0.041655596, %v3878_v33  ;;  %v3886_v26 = vadd.f32 0.008332121, %v3885_v29  ;;  %vm4154_vm14 = vc.u32 %v6743_v45, %v6745_v14  ;;  %v6756_v3 = vor.u32 %v4387_v5, %v4386_v24 }
 0x1ac   : > { %v4151_v20 = vadd.s32 %v4150_v35, %v4141_v18  ;;  %v4393_v51 = vshrl.u32 %v10087_v11, %v6739_v9  ;;  %v4395_v23 = vshll.u32 %v10087_v11, %v4383_v63  ;;  %v4396_v13 = vshrl.u32 %v10088_v28, %v6739_v9 }
 0x1ad   : > { %v3880_v48 = vmul.f32 %v3879_v32, %v3877_v36  ;;  %v3887_v39 = vmul.f32 %v3886_v26, %v3877_v36  ;;  %v6763_v21 = vor.u32 %v4390_v22, %v4389_v57  ;;  %v4398_v27 = vshll.u32 %v10088_v28, %v4383_v63 }
 0x1ae   : > { %v4155_v25 = vadd.s32 1, %v4151_v20  ;;  %v4399_v41 = vshrl.u32 %v10092_v10, %v6739_v9  ;;  %v4152_v12 = vmul.u32 %v6630_v8, %v4098_v17  ;;  %v4397_v58 = vor.u32 %v4396_v13, %v4395_v23 }
 0x1af   : > { %v3881_v50 = vadd.f32 -0.4999988, %v3880_v48  ;;  %v3888_v52 = vadd.f32 -0.16666654, %v3887_v39  ;;  %v4394_v15 = vor.u32 %v4393_v51, %v4392_v6  ;;  %vm4401_vm8 = vcmp.lt.s32.totalorder %v6741_v42, 1 }
 0x1b0   : > { %v4156_v18 = vsel %vm4154_vm14, %v4155_v25, %v4151_v20  ;;  %v4400_v33 = vor.u32 %v4399_v41, %v4398_v27  ;;  %vm4404_vm12 = vcmp.lt.s32.totalorder %v6741_v42, 4  ;;  %v3894_v63 = vand.u32 3, %v6714_v56 }
 0x1b1   : > { %v3882_v29 = vmul.f32 %v3881_v50, %v3877_v36  ;;  %v3889_v35 = vmul.f32 %v3888_v52, %v3877_v36  ;;  %v4157_v24 = vadd.s32 %v4156_v18, %v4152_v12  ;;  %v4409_v5 = vsel %vm4401_vm8, %v6756_v3, %v6763_v21 }
 0x1b2   : > { %v4410_v8 = vsel %vm4404_vm12, %v4397_v58, 920167782  ;;  %v6780_v17 = vshll.u32 %v4377_v38, 8  ;;  %vm4403_vm11 = vcmp.lt.s32.totalorder %v6741_v42, 3  ;;  %vm4402_vm15 = vcmp.lt.s32.totalorder %v6741_v42, 2 }
 0x1b3   : > { %v3883_v22 = vadd.f32 1.0, %v3882_v29  ;;  %v3890_v32 = vadd.f32 1.0, %v3889_v35  ;;  %v4158_v36 = vadd.s32 536870912, %v4157_v24  ;;  %v4411_v56 = vsel %vm4403_vm11, %v4394_v15, %v4410_v8  ;;  %v438_v35 = vpop.permute.xlu2 %437 }
 0x1b4   : > { %v4413_v26 = vsel %vm4401_vm8, %v6763_v21, %v4394_v15  ;;  %v4414_v57 = vsel %vm4404_vm12, %v4400_v33, 1326507024  ;;  %v4412_v20 = vsel %vm4402_vm15, %v4409_v5, %v4411_v56  ;;  %vm3892_vm13 = vweird.f32 %v6298_v30 }
 0x1b5   : > { %v3891_v34 = vmul.f32 %v3890_v32, %v3875_v44  ;;  %v3900_v38 = vxor.u32 2147483648, %v3883_v22  ;;  %v6791_v6 = vshrl.u32 %v4158_v36, 30  ;;  %vm3895_vm7 = vcmp.lt.s32.totalorder %v3894_v63, 2 }
 0x1b6   : > { %v4415_v51 = vsel %vm4403_vm11, %v4397_v58, %v4414_v57  ;;  %v4443_v48 = vshrl.u32 %v4412_v20, 16  ;;  %vm3899_vm4 = vcmp.eq.s32.totalorder %v3894_v63, 2  ;;  %v4418_v13 = vand.u32 65535, %v6780_v17 }
 0x1b7   : > { %v3897_v39 = vxor.u32 2147483648, %v3891_v34  ;;  %v4160_v23 = vshll.u32 %v6791_v6, 30  ;;  %vm3896_vm9 = vcmp.eq.s32.totalorder %v3894_v63, 0  ;;  %v3901_v44 = vsel %vm3899_vm4, %v3900_v38, %v3891_v34 }
 0x1b8   : > { %v4416_v25 = vsel %vm4402_vm15, %v4413_v26, %v4415_v51  ;;  %v4442_v27 = vand.u32 65535, %v4412_v20  ;;  %v6802_v12 = vmul.u32 %v4443_v48, %v4418_v13  ;;  %v4385_v18 = vshrl.u32 %v10078_v40, %v6739_v9 }
 0x1b9   : > { %v3898_v41 = vsel %vm3896_vm9, %v3883_v22, %v3897_v39  ;;  %v4161_v50 = vsub.s32 %v4157_v24, %v4160_v23  ;;  %v4420_v52 = vand.u32 65535, %v4416_v25  ;;  %v4419_v33 = vshrl.u32 %v6780_v17, 16 }
 0x1ba   : > { %v3902_v58 = vsel %vm3895_vm7, %v3898_v41, %v3901_v44  ;;  %v4421_v29 = vshrl.u32 %v4416_v25, 16  ;;  %v4406_v24 = vsel %vm4404_vm12, %v4394_v15, 2102212464  ;;  %v483_v8 = vsel %vm10070_vm5, %v6637_v19, %v438_v35 }
 0x1bb   : > { %v3903_v63 = vsel %vm3892_vm13, nan, %v3902_v58  ;;  %vm4162_vm10 = vcmp.lt.s32.totalorder %v4161_v50, 0  ;;  %v4163_v5 = vsub.s32 0, %v4161_v50  ;;  %v4153_v22 = vadd.s32 %v6745_v14, %v6743_v45 }
 0x1bc   : > { %v4423_v32 = vmul.u32 %v4421_v29, %v4418_v13  ;;  %v4424_v9 = vmul.u32 %v4420_v52, %v4419_v33  ;;  %5613 = vst [vmem:[%s6642_s12 + $0xa0] sm:$0xff] %v3903_v63  ;;  %v4405_v30 = vsel %vm4401_vm8, %v4385_v18, %v6756_v3  ;;  %v4446_v56 = vmul.u32 %v4442_v27, %v4419_v33 }
 0x1bd   : > { %v4164_v36 = vsel %vm4162_vm10, %v4163_v5, %v4161_v50  ;;  %v4448_v26 = vshll.u32 %v6802_v12, 16  ;;  %v4407_v15 = vsel %vm4403_vm11, %v6763_v21, %v4406_v24  ;;  %v4422_v19 = vmul.u32 %v4420_v52, %v4418_v13  ;;  %v442_v52 = vpop.permute.xlu0 %441 }
 0x1be   : > { %v4165_v57 = vclz %v4164_v36  ;;  %v4426_v34 = vshll.u32 %v4423_v32, 16  ;;  %v4425_v38 = vmul.u32 %v4421_v29, %v4419_v33  ;;  %v4444_v45 = vmul.u32 %v4442_v27, %v4418_v13 }
 0x1bf   : > { %v4447_v14 = vmul.u32 %v4443_v48, %v4419_v33  ;;  %v4449_v20 = vshrl.u32 %v6802_v12, 16  ;;  %v4428_v39 = vshll.u32 %v4424_v9, 16  ;;  %v4450_v44 = vshll.u32 %v4446_v56, 16 }
 0x1c0   : > { %v5821_v51 = vadd.s32 4294967294, %v4165_v57  ;;  %vm4430_vm14 = vc.u32 %v4422_v19, %v4426_v34  ;;  %v4432_v23 = vadd.s32 %v4426_v34, %v4422_v19  ;;  %vm4452_vm8 = vc.u32 %v4444_v45, %v4448_v26 }
 0x1c1   : > { %v4431_v3 = vsel %vm4430_vm14, 1, %v10060_v2  ;;  %v4454_v25 = vadd.s32 %v4448_v26, %v4444_v45  ;;  %v4453_v21 = vsel %vm4452_vm8, 1, %v10060_v2  ;;  %v4427_v18 = vshrl.u32 %v4423_v32, 16 }
 0x1c2   : > { %vm5822_vm12 = vcmp.lt.s32.totalorder %v5821_v51, 0  ;;  %v4433_v41 = vadd.s32 %v4431_v3, %v4425_v38  ;;  %vm4434_vm13 = vc.u32 %v4432_v23, %v4428_v39  ;;  %v4455_v13 = vadd.s32 %v4453_v21, %v4447_v14 }
 0x1c3   : > { %v4168_v58 = vsel %vm5822_vm12, 0, %v5821_v51  ;;  %v4435_v48 = vsel %vm4434_vm13, 1, %v10060_v2  ;;  %vm4456_vm11 = vc.u32 %v4454_v25, %v4450_v44  ;;  %v4429_v35 = vshrl.u32 %v4424_v9, 16 }
 0x1c4   : > { %v4169_v27 = vsub.s32 32, %v4168_v58  ;;  %v4173_v12 = vsub.s32 4294967266, %v4168_v58  ;;  %v4437_v33 = vadd.s32 %v4435_v48, %v4433_v41  ;;  %v4170_v29 = vshll.u32 %v4161_v50, %v4168_v58 }
 0x1c5   : > { %v4457_v63 = vsel %vm4456_vm11, 1, %v10060_v2  ;;  %v485_v5 = vsel %vm10058_vm6, %v483_v8, %v442_v52  ;;  %v4408_v19 = vsel %vm4402_vm15, %v4405_v30, %v4407_v15  ;;  %v4451_v34 = vshrl.u32 %v4446_v56, 16 }
 0x1c6   : > { %v4171_v24 = vshrl.u32 %v4153_v22, %v4169_v27  ;;  %v4174_v36 = vadd.s32 127, %v4173_v12  ;;  %v4438_v26 = vadd.s32 %v4437_v33, %v4427_v18  ;;  %v4459_v57 = vadd.s32 %v4457_v63, %v4455_v13 }
 0x1c7   : > { %v6831_v38 = vperm.slane %v485_v5, 0  ;;  %v4183_v50 = vsub.s32 4, %v6791_v6  ;;  %v4458_v9 = vadd.s32 %v4454_v25, %v4450_v44  ;;  %vm4061_vm15 = vcmp.lt.s32.totalorder %v6521_v37, 0 }
 0x1c8   : > { %v4172_v45 = vor.u32 %v4171_v24, %v4170_v29  ;;  %v4175_v14 = vshll.u32 %v4174_v36, 23  ;;  %v4439_v32 = vadd.s32 %v4438_v26, %v4429_v35  ;;  %v4460_v51 = vadd.s32 %v4459_v57, %v4449_v20 }
 0x1c9   : > { %10093 = vst [vmem:[#allocation10_spill] sm:$0xff] %v6831_v38  ;;  %v567_v8 = vmul.f32 %v6831_v38, %v6246_v55  ;;  %v569_v22 = vmul.f32 %v6831_v38, %v6255_v59  ;;  %v4462_v15 = vmul.u32 %v6780_v17, %v4408_v19  ;;  %v4184_v3 = vsel %vm4061_vm15, %v4183_v50, %v6791_v6 }
 0x1ca   : > { %v4176_v39 = vor.u32 4788187, %v4175_v14  ;;  %v4461_v23 = vadd.s32 %v4460_v51, %v4451_v34  ;;  %vm4464_vm7 = vc.u32 %v4439_v32, %v4458_v9  ;;  %v4179_v56 = vcvt.s32.f32 %v4172_v45 }
 0x1cb   : > { %v6840_v42 = vadd.f32 %v567_v8, %v6261_v62  ;;  %v6847_v44 = vadd.f32 %v569_v22, %v6259_v61  ;;  %vm4060_vm4 = vcmp.le.f32.partialorder %v4059_v43, 0.7853982  ;;  %vm4371_vm10 = vcmp.lt.s32.totalorder %v6542_v7, 0 }
 0x1cc   : > { %v4177_v30 = vand.u32 2147483647, %v4176_v39  ;;  %v4465_v20 = vadd.s32 1, %v4461_v23  ;;  %v4186_v27 = vsel %vm4060_vm4, 0, %v4184_v3  ;;  %vm4202_vm11 = vweird.f32 %v6521_v37 }
 0x1cd   : > { %v599_v25 = vand.u32 2147483647, %v6840_v42  ;;  %v602_v41 = vand.u32 2139095040, %v6840_v42  ;;  %v912_v33 = vand.u32 2139095040, %v6847_v44  ;;  %v4203_v63 = vadd.s32 3, %v4186_v27 }
 0x1ce   : > { %v4180_v21 = vmul.f32 %v4179_v56, %v4177_v30  ;;  %v4466_v52 = vsel %vm4464_vm7, %v4465_v20, %v4461_v23  ;;  %v909_v36 = vand.u32 2147483647, %v6847_v44  ;;  %v4463_v30 = vadd.s32 %v4458_v9, %v4439_v32 }
 0x1cf   : > { %v4467_v58 = vadd.s32 %v4466_v52, %v4462_v15  ;;  %v603_v48 = vshrl.u32 %v602_v41, 23  ;;  %v606_v17 = vand.u32 8388607, %v599_v25  ;;  %v913_v19 = vshrl.u32 %v912_v33, 23 }
 0x1d0   : > { %v4181_v13 = vxor.u32 2147483648, %v4180_v21  ;;  %v6866_v50 = vand.u32 3, %v4203_v63  ;;  %v6873_v56 = vand.u32 8388607, %v909_v36 }
 0x1d1   : > { %v4468_v6 = vadd.s32 536870912, %v4467_v58  ;;  %v5754_v12 = vadd.s32 4294967169, %v603_v48  ;;  %v607_v18 = vor.u32 8388608, %v606_v17  ;;  %v5760_v3 = vadd.s32 4294967169, %v913_v19 }
 0x1d2   : > { %v4182_v29 = vsel %vm4061_vm15, %v4181_v13, %v4180_v21  ;;  %vm4209_vm8 = vcmp.eq.s32.totalorder %v6866_v50, 2  ;;  %vm4206_vm12 = vcmp.eq.s32.totalorder %v6866_v50, 0  ;;  %vm4205_vm13 = vcmp.lt.s32.totalorder %v6866_v50, 2 }
 0x1d3   : > { %v6859_v35 = vsel %vm4060_vm4, %v6521_v37, %v4182_v29  ;;  %v4469_v43 = vshrl.u32 %v4468_v6, 30  ;;  %v609_v5 = vadd.s32 1, %v5754_v12  ;;  %v6864_v57 = vshll.u32 %v607_v18, 8 }
 0x1d4   : > { %v4187_v24 = vmul.f32 %v6859_v35, %v6859_v35  ;;  %v6894_v63 = vadd.s32 1, %v5760_v3 }
 0x1d5   : > { %v4470_v26 = vshll.u32 %v4469_v43, 30  ;;  %vm610_vm9 = vcmp.gt.s32.totalorder %v609_v5, 0  ;;  %v4493_v14 = vsub.s32 4, %v4469_v43  ;;  %v649_v50 = vshrl.u32 %v6864_v57, 16 }
 0x1d6   : > { %v4188_v34 = vmul.f32 -0.001358992, %v4187_v24  ;;  %v4195_v45 = vmul.f32 -0.00019511016, %v4187_v24  ;;  %v611_v51 = vsel %vm610_vm9, %v609_v5, 0 }
 0x1d7   : > { %v6869_v8 = vsub.s32 %v4467_v58, %v4470_v26  ;;  %v613_v22 = vand.u32 31, %v611_v51  ;;  %v6879_v52 = vsel %vm4371_vm10, %v4493_v14, %v4469_v43  ;;  %v6882_v58 = vand.u32 65535, %v6864_v57 }
 0x1d8   : > { %v4189_v39 = vadd.f32 0.041655596, %v4188_v34  ;;  %v4196_v23 = vadd.f32 0.008332121, %v4195_v45  ;;  %v6891_v18 = vshrl.u32 %v611_v51, 5 }
 0x1d9   : > { %vm4472_vm14 = vcmp.lt.s32.totalorder %v6869_v8, 0  ;;  %v4473_v15 = vsub.s32 0, %v6869_v8  ;;  %v614_v20 = vsub.s32 32, %v613_v22  ;;  %v616_v9 = vshll.u32 %v10078_v40, %v613_v22 }
 0x1da   : > { %v4190_v41 = vmul.f32 %v4189_v39, %v4187_v24  ;;  %v4197_v21 = vmul.f32 %v4196_v23, %v4187_v24  ;;  %v619_v17 = vshll.u32 %v10082_v46, %v613_v22  ;;  %v10094_v34 = vand.u32 2147483647, %v6542_v7 }
 0x1db   : > { %v4474_v32 = vsel %vm4472_vm14, %v4473_v15, %v6869_v8  ;;  %v617_v48 = vshrl.u32 %v10082_v46, %v614_v20  ;;  %v620_v12 = vshrl.u32 %v10083_v4, %v614_v20  ;;  %v615_v33 = vshrl.u32 %v10078_v40, %v614_v20 }
 0x1dc   : > { %v4191_v13 = vadd.f32 -0.4999988, %v4190_v41  ;;  %v4198_v27 = vadd.f32 -0.16666654, %v4197_v21  ;;  %v4475_v6 = vclz %v4474_v32  ;;  %vm6900_vm15 = vcmp.le.f32.partialorder %v10094_v34, 0.7853982 }
 0x1dd   : > { %v618_v29 = vor.u32 %v617_v48, %v616_v9  ;;  %v621_v19 = vor.u32 %v620_v12, %v619_v17  ;;  %v622_v14 = vshll.u32 %v10083_v4, %v613_v22  ;;  %v623_v51 = vshrl.u32 %v10087_v11, %v614_v20 }
 0x1de   : > { %v4192_v43 = vmul.f32 %v4191_v13, %v4187_v24  ;;  %v4199_v5 = vmul.f32 %v4198_v27, %v4187_v24  ;;  %v5827_v26 = vadd.s32 4294967294, %v4475_v6  ;;  %v625_v39 = vshll.u32 %v10087_v11, %v613_v22 }
 0x1df   : > { %v626_v24 = vshrl.u32 %v10088_v28, %v614_v20  ;;  %v628_v3 = vshll.u32 %v10088_v28, %v613_v22  ;;  %v624_v21 = vor.u32 %v623_v51, %v622_v14  ;;  %v629_v9 = vshrl.u32 %v10092_v10, %v614_v20 }
 0x1e0   : > { %v4193_v23 = vadd.f32 1.0, %v4192_v43  ;;  %v4200_v15 = vadd.f32 1.0, %v4199_v5  ;;  %vm5828_vm7 = vcmp.lt.s32.totalorder %v5827_v26, 0  ;;  %vm631_vm4 = vcmp.lt.s32.totalorder %v6891_v18, 1 }
 0x1e1   : > { %v4478_v41 = vsel %vm5828_vm7, 0, %v5827_v26  ;;  %v627_v32 = vor.u32 %v626_v24, %v625_v39  ;;  %v630_v12 = vor.u32 %v629_v9, %v628_v3  ;;  %vm632_vm9 = vcmp.lt.s32.totalorder %v6891_v18, 2 }
 0x1e2   : > { %v4201_v48 = vmul.f32 %v4200_v15, %v6859_v35  ;;  %v4210_v17 = vxor.u32 2147483648, %v4193_v23  ;;  %v4479_v13 = vsub.s32 32, %v4478_v41  ;;  %v4480_v27 = vshll.u32 %v6869_v8, %v4478_v41 }
 0x1e3   : > { %v4483_v6 = vsub.s32 4294967266, %v4478_v41  ;;  %vm633_vm14 = vcmp.lt.s32.totalorder %v6891_v18, 3  ;;  %vm634_vm7 = vcmp.lt.s32.totalorder %v6891_v18, 4  ;;  %v635_v35 = vsel %vm631_vm4, %v615_v33, %v618_v29 }
 0x1e4   : > { %v4207_v43 = vxor.u32 2147483648, %v4201_v48  ;;  %v4211_v22 = vsel %vm4209_vm8, %v4210_v17, %v4201_v48  ;;  %v4481_v5 = vshrl.u32 %v4463_v30, %v4479_v13  ;;  %v639_v8 = vsel %vm631_vm4, %v618_v29, %v621_v19 }
 0x1e5   : > { %v4484_v20 = vadd.s32 127, %v4483_v6  ;;  %v636_v14 = vsel %vm634_vm7, %v624_v21, 2102212464  ;;  %v640_v30 = vsel %vm634_vm7, %v627_v32, 920167782  ;;  %v643_v41 = vsel %vm631_vm4, %v621_v19, %v624_v21 }
 0x1e6   : > { %v4208_v26 = vsel %vm4206_vm12, %v4193_v23, %v4207_v43  ;;  %v4482_v34 = vor.u32 %v4481_v5, %v4480_v27  ;;  %v637_v33 = vsel %vm633_vm14, %v621_v19, %v636_v14  ;;  %v641_v29 = vsel %vm633_vm14, %v624_v21, %v640_v30 }
 0x1e7   : > { %v4212_v51 = vsel %vm4205_vm13, %v4208_v26, %v4211_v22  ;;  %v4485_v39 = vshll.u32 %v4484_v20, 23  ;;  %v4496_v23 = vsel %vm6900_vm15, 0, %v6879_v52  ;;  %v642_v15 = vsel %vm632_vm9, %v639_v8, %v641_v29 }
 0x1e8   : > { %v4213_v24 = vsel %vm4202_vm11, nan, %v4212_v51  ;;  %v644_v9 = vsel %vm634_vm7, %v630_v12, 1326507024  ;;  %v672_v48 = vand.u32 65535, %v642_v15  ;;  %v4489_v37 = vcvt.s32.f32 %v4482_v34 }
 0x1e9   : > { %v4486_v3 = vor.u32 4788187, %v4485_v39  ;;  %5615 = vst [vmem:[%s6642_s12 + $0xb0] sm:$0xff] %v4213_v24  ;;  %v6949_v17 = vsel %vm632_vm9, %v635_v35, %v637_v33  ;;  %v645_v52 = vsel %vm633_vm14, %v627_v32, %v644_v9  ;;  %v673_v13 = vshrl.u32 %v642_v15, 16 }
 0x1ea   : > { %v646_v6 = vsel %vm632_vm9, %v643_v41, %v645_v52  ;;  %v676_v43 = vmul.u32 %v672_v48, %v649_v50  ;;  %vm920_vm8 = vcmp.gt.s32.totalorder %v6894_v63, 0  ;;  %v917_v22 = vor.u32 8388608, %v6873_v56 }
 0x1eb   : > { %v4487_v27 = vand.u32 2147483647, %v4486_v3  ;;  %v650_v19 = vand.u32 65535, %v646_v6  ;;  %v651_v21 = vshrl.u32 %v646_v6, 16  ;;  %v675_v12 = vmul.u32 %v673_v13, %v6882_v58 }
 0x1ec   : > { %v6958_v20 = vadd.s32 3, %v4496_v23  ;;  %v674_v35 = vmul.u32 %v672_v48, %v6882_v58  ;;  %v692_v32 = vmul.u32 %v6864_v57, %v6949_v17  ;;  %v677_v26 = vmul.u32 %v673_v13, %v649_v50 }
 0x1ed   : > { %v4490_v5 = vmul.f32 %v4489_v37, %v4487_v27  ;;  %v653_v18 = vmul.u32 %v651_v21, %v6882_v58  ;;  %v654_v8 = vmul.u32 %v650_v19, %v649_v50  ;;  %v921_v34 = vsel %vm920_vm8, %v6894_v63, 0 }
 0x1ee   : > { %v678_v30 = vshll.u32 %v675_v12, 16  ;;  %v680_v51 = vshll.u32 %v676_v43, 16  ;;  %v681_v39 = vshrl.u32 %v676_v43, 16  ;;  %v652_v33 = vmul.u32 %v650_v19, %v6882_v58 }
 0x1ef   : > { %v4491_v14 = vxor.u32 2147483648, %v4490_v5  ;;  %v655_v29 = vmul.u32 %v651_v21, %v649_v50  ;;  %v656_v24 = vshll.u32 %v653_v18, 16  ;;  %v658_v23 = vshll.u32 %v654_v8, 16 }
 0x1f0   : > { %vm682_vm12 = vc.u32 %v674_v35, %v678_v30  ;;  %v684_v3 = vadd.s32 %v678_v30, %v674_v35  ;;  %v923_v41 = vand.u32 31, %v921_v34  ;;  %v679_v13 = vshrl.u32 %v675_v12, 16 }
 0x1f1   : > { %v4492_v15 = vsel %vm4371_vm10, %v4491_v14, %v4490_v5  ;;  %vm660_vm13 = vc.u32 %v652_v33, %v656_v24  ;;  %v662_v63 = vadd.s32 %v656_v24, %v652_v33  ;;  %v683_v48 = vsel %vm682_vm12, 1, %v10060_v2 }
 0x1f2   : > { %v4495_v9 = vsel %vm6900_vm15, %v6542_v7, %v4492_v15  ;;  %v661_v58 = vsel %vm660_vm13, 1, %v10060_v2  ;;  %v685_v50 = vadd.s32 %v683_v48, %v677_v26  ;;  %vm686_vm11 = vc.u32 %v684_v3, %v680_v51 }
 0x1f3   : > { %v4497_v37 = vmul.f32 %v4495_v9, %v4495_v9  ;;  %v663_v52 = vadd.s32 %v661_v58, %v655_v29  ;;  %vm664_vm4 = vc.u32 %v662_v63, %v658_v23  ;;  %v687_v27 = vsel %vm686_vm11, 1, %v10060_v2 }
 0x1f4   : > { %v665_v19 = vsel %vm664_vm4, 1, %v10060_v2  ;;  %v689_v45 = vadd.s32 %v687_v27, %v685_v50  ;;  %v657_v21 = vshrl.u32 %v653_v18, 16  ;;  %v6975_v35 = vshrl.u32 %v921_v34, 5 }
 0x1f5   : > { %v4498_v6 = vmul.f32 -0.001358992, %v4497_v37  ;;  %v4505_v43 = vmul.f32 -0.00019511016, %v4497_v37  ;;  %v667_v5 = vadd.s32 %v665_v19, %v663_v52  ;;  %v6977_v14 = vsub.s32 32, %v923_v41 }
 0x1f6   : > { %v659_v26 = vshrl.u32 %v654_v8, 16  ;;  %v690_v24 = vadd.s32 %v689_v45, %v679_v13  ;;  %v6979_v23 = vadd.s32 %v684_v3, %v680_v51  ;;  %v926_v34 = vshll.u32 %v10078_v40, %v923_v41 }
 0x1f7   : > { %v4499_v30 = vadd.f32 0.041655596, %v4498_v6  ;;  %v4506_v33 = vadd.f32 0.008332121, %v4505_v43  ;;  %v668_v29 = vadd.s32 %v667_v5, %v657_v21  ;;  %v927_v12 = vshrl.u32 %v10082_v46, %v6977_v14 }
 0x1f8   : > { %v930_v15 = vshrl.u32 %v10083_v4, %v6977_v14  ;;  %v691_v48 = vadd.s32 %v690_v24, %v681_v39  ;;  %v929_v50 = vshll.u32 %v10082_v46, %v923_v41  ;;  %v932_v8 = vshll.u32 %v10083_v4, %v923_v41 }
 0x1f9   : > { %v4500_v63 = vmul.f32 %v4499_v30, %v4497_v37  ;;  %v4507_v18 = vmul.f32 %v4506_v33, %v4497_v37  ;;  %v6986_v58 = vadd.s32 %v668_v29, %v659_v26  ;;  %v933_v51 = vshrl.u32 %v10087_v11, %v6977_v14 }
 0x1fa   : > { %v695_v13 = vadd.s32 1, %v691_v48  ;;  %v6992_v27 = vor.u32 %v927_v12, %v926_v34  ;;  %v6996_v39 = vor.u32 %v930_v15, %v929_v50  ;;  %v935_v6 = vshll.u32 %v10087_v11, %v923_v41 }
 0x1fb   : > { %v4501_v3 = vadd.f32 -0.4999988, %v4500_v63  ;;  %v4508_v52 = vadd.f32 -0.16666654, %v4507_v18  ;;  %vm694_vm10 = vc.u32 %v6986_v58, %v6979_v23  ;;  %v936_v43 = vshrl.u32 %v10088_v28, %v6977_v14 }
 0x1fc   : > { %v696_v21 = vsel %vm694_vm10, %v695_v13, %v691_v48  ;;  %v939_v5 = vshrl.u32 %v10092_v10, %v6977_v14  ;;  %vm4512_vm15 = vweird.f32 %v6542_v7  ;;  %v934_v33 = vor.u32 %v933_v51, %v932_v8 }
 0x1fd   : > { %v4502_v19 = vmul.f32 %v4501_v3, %v4497_v37  ;;  %v4509_v45 = vmul.f32 %v4508_v52, %v4497_v37  ;;  %v697_v30 = vadd.s32 %v696_v21, %v692_v32  ;;  %v937_v26 = vor.u32 %v936_v43, %v935_v6 }
 0x1fe   : > { %v938_v24 = vshll.u32 %v10088_v28, %v923_v41  ;;  %v4514_v15 = vand.u32 3, %v6958_v20  ;;  %vm941_vm9 = vcmp.lt.s32.totalorder %v6975_v35, 1  ;;  %vm944_vm14 = vcmp.lt.s32.totalorder %v6975_v35, 4 }
 0x1ff   : > { %v4503_v29 = vadd.f32 1.0, %v4502_v19  ;;  %v4510_v12 = vadd.f32 1.0, %v4509_v45  ;;  %v698_v37 = vadd.s32 536870912, %v697_v30  ;;  %v949_v57 = vsel %vm941_vm9, %v6992_v27, %v6996_v39 }
 0x200   : > { %v940_v63 = vor.u32 %v939_v5, %v938_v24  ;;  %vm943_vm7 = vcmp.lt.s32.totalorder %v6975_v35, 3  ;;  %v950_v41 = vsel %vm944_vm14, %v937_v26, 920167782  ;;  %v571_v20 = vmul.f32 %v6831_v38, %v6232_v49 }
 0x201   : > { %v4511_v17 = vmul.f32 %v4510_v12, %v4495_v9  ;;  %v4520_v32 = vxor.u32 2147483648, %v4503_v29  ;;  %v7020_v18 = vshrl.u32 %v698_v37, 30  ;;  %vm942_vm8 = vcmp.lt.s32.totalorder %v6975_v35, 2 }
 0x202   : > { %v951_v48 = vsel %vm943_vm7, %v934_v33, %v950_v41  ;;  %vm4516_vm12 = vcmp.eq.s32.totalorder %v4514_v15, 0  ;;  %v953_v50 = vsel %vm941_vm9, %v6996_v39, %v934_v33  ;;  %vm4519_vm13 = vcmp.eq.s32.totalorder %v4514_v15, 2 }
 0x203   : > { %v4517_v34 = vxor.u32 2147483648, %v4511_v17  ;;  %v952_v9 = vsel %vm942_vm8, %v949_v57, %v951_v48  ;;  %v700_v8 = vshll.u32 %v7020_v18, 30  ;;  %v954_v51 = vsel %vm944_vm14, %v940_v63, 1326507024 }
 0x204   : > { %v7035_v3 = vshll.u32 %v917_v22, 8  ;;  %vm4515_vm11 = vcmp.lt.s32.totalorder %v4514_v15, 2  ;;  %v4521_v13 = vsel %vm4519_vm13, %v4520_v32, %v4511_v17  ;;  %v955_v6 = vsel %vm943_vm7, %v937_v26, %v954_v51 }
 0x205   : > { %v4518_v52 = vsel %vm4516_vm12, %v4503_v29, %v4517_v34  ;;  %v701_v19 = vsub.s32 %v697_v30, %v700_v8  ;;  %v956_v45 = vsel %vm942_vm8, %v953_v50, %v955_v6  ;;  %v983_v21 = vshrl.u32 %v952_v9, 16 }
 0x206   : > { %v4522_v43 = vsel %vm4515_vm11, %v4518_v52, %v4521_v13  ;;  %v573_v56 = vmul.f32 %v6831_v38, %v6244_v54  ;;  %v958_v22 = vand.u32 65535, %v7035_v3  ;;  %v982_v24 = vand.u32 65535, %v952_v9 }
 0x207   : > { %v4523_v5 = vsel %vm4512_vm15, nan, %v4522_v43  ;;  %vm702_vm4 = vcmp.lt.s32.totalorder %v701_v19, 0  ;;  %v703_v29 = vsub.s32 0, %v701_v19  ;;  %v959_v12 = vshrl.u32 %v7035_v3, 16 }
 0x208   : > { %v960_v26 = vand.u32 65535, %v956_v45  ;;  %5617 = vst [vmem:[%s6642_s12 + $0xc0] sm:$0xff] %v4523_v5  ;;  %v946_v30 = vsel %vm944_vm14, %v934_v33, 2102212464  ;;  %v961_v15 = vshrl.u32 %v956_v45, 16  ;;  %v925_v7 = vshrl.u32 %v10078_v40, %v6977_v14 }
 0x209   : > { %v704_v37 = vsel %vm702_vm4, %v703_v29, %v701_v19  ;;  %v985_v57 = vmul.u32 %v983_v21, %v958_v22  ;;  %v7053_v17 = vadd.f32 %v571_v20, %v6257_v60  ;;  %v986_v48 = vmul.u32 %v982_v24, %v959_v12 }
 0x20a   : > { %v964_v63 = vmul.u32 %v960_v26, %v959_v12  ;;  %v705_v32 = vclz %v704_v37  ;;  %v963_v41 = vmul.u32 %v961_v15, %v958_v22  ;;  %v7056_v34 = vadd.f32 %v573_v56, %v6265_v1 }
 0x20b   : > { %v693_v9 = vadd.s32 %v6979_v23, %v6986_v58  ;;  %v945_v33 = vsel %vm941_vm9, %v925_v7, %v6992_v27  ;;  %v947_v14 = vsel %vm943_vm7, %v6996_v39, %v946_v30  ;;  %vm601_vm10 = vcmp.lt.s32.totalorder %v6840_v42, 0 }
 0x20c   : > { %v5755_v20 = vadd.s32 4294967294, %v705_v32  ;;  %v723_v50 = vsub.s32 4, %v7020_v18  ;;  %v962_v8 = vmul.u32 %v960_v26, %v958_v22  ;;  %v966_v51 = vshll.u32 %v963_v41, 16 }
 0x20d   : > { %v965_v52 = vmul.u32 %v961_v15, %v959_v12  ;;  %v968_v13 = vshll.u32 %v964_v63, 16  ;;  %v984_v6 = vmul.u32 %v982_v24, %v958_v22  ;;  %v988_v43 = vshll.u32 %v985_v57, 16 }
 0x20e   : > { %vm5756_vm15 = vcmp.lt.s32.totalorder %v5755_v20, 0  ;;  %vm970_vm14 = vc.u32 %v962_v8, %v966_v51  ;;  %v972_v23 = vadd.s32 %v966_v51, %v962_v8  ;;  %v990_v58 = vshll.u32 %v986_v48, 16 }
 0x20f   : > { %v708_v27 = vsel %vm5756_vm15, 0, %v5755_v20  ;;  %v971_v45 = vsel %vm970_vm14, 1, %v10060_v2  ;;  %vm992_vm9 = vc.u32 %v984_v6, %v988_v43  ;;  %v994_v39 = vadd.s32 %v988_v43, %v984_v6 }
 0x210   : > { %v709_v5 = vsub.s32 32, %v708_v27  ;;  %v713_v56 = vsub.s32 4294967266, %v708_v27  ;;  %v973_v29 = vadd.s32 %v971_v45, %v965_v52  ;;  %v987_v30 = vmul.u32 %v983_v21, %v959_v12 }
 0x211   : > { %v710_v37 = vshll.u32 %v701_v19, %v708_v27  ;;  %vm974_vm7 = vc.u32 %v972_v23, %v968_v13  ;;  %v993_v26 = vsel %vm992_vm9, 1, %v10060_v2  ;;  %vm996_vm12 = vc.u32 %v994_v39, %v990_v58 }
 0x212   : > { %v711_v22 = vshrl.u32 %v693_v9, %v709_v5  ;;  %v714_v24 = vadd.s32 127, %v713_v56  ;;  %v975_v15 = vsel %vm974_vm7, 1, %v10060_v2  ;;  %v995_v7 = vadd.s32 %v993_v26, %v987_v30 }
 0x213   : > { %v967_v32 = vshrl.u32 %v963_v41, 16  ;;  %v977_v20 = vadd.s32 %v975_v15, %v973_v29  ;;  %v997_v8 = vsel %vm996_vm12, 1, %v10060_v2  ;;  %v10057_v51 = vand.u32 2147483647, %v7053_v17 }
 0x214   : > { %v712_v6 = vor.u32 %v711_v22, %v710_v37  ;;  %v715_v43 = vshll.u32 %v714_v24, 23  ;;  %v989_v52 = vshrl.u32 %v985_v57, 16  ;;  %v999_v21 = vadd.s32 %v997_v8, %v995_v7 }
 0x215   : > { %v724_v19 = vsel %vm601_vm10, %v723_v50, %v7020_v18  ;;  %v969_v12 = vshrl.u32 %v964_v63, 16  ;;  %v978_v9 = vadd.s32 %v977_v20, %v967_v32  ;;  %v1222_v13 = vand.u32 2139095040, %v7053_v17 }
 0x216   : > { %v716_v23 = vor.u32 4788187, %v715_v43  ;;  %v991_v27 = vshrl.u32 %v986_v48, 16  ;;  %v1000_v41 = vadd.s32 %v999_v21, %v989_v52  ;;  %v1226_v45 = vand.u32 8388607, %v10057_v51 }
 0x217   : > { %vm7081_vm13 = vcmp.le.f32.partialorder %v599_v25, 0.7853982  ;;  %v979_v57 = vadd.s32 %v978_v9, %v969_v12  ;;  %v998_v56 = vadd.s32 %v994_v39, %v990_v58  ;;  %v1223_v29 = vshrl.u32 %v1222_v13, 23 }
 0x218   : > { %v717_v18 = vand.u32 2147483647, %v716_v23  ;;  %v719_v63 = vcvt.s32.f32 %v712_v6  ;;  %v948_v50 = vsel %vm942_vm8, %v945_v33, %v947_v14  ;;  %v1001_v30 = vadd.s32 %v1000_v41, %v991_v27 }
 0x219   : > { %v726_v48 = vsel %vm7081_vm13, 0, %v724_v19  ;;  %vm1004_vm11 = vc.u32 %v979_v57, %v998_v56  ;;  %v5766_v37 = vadd.s32 4294967169, %v1223_v29  ;;  %v1227_v25 = vor.u32 8388608, %v1226_v45 }
 0x21a   : > { %v720_v26 = vmul.f32 %v719_v63, %v717_v18  ;;  %v1005_v22 = vadd.s32 1, %v1001_v30  ;;  %v1532_v24 = vand.u32 2139095040, %v7056_v34  ;;  %v1002_v15 = vmul.u32 %v7035_v3, %v948_v50 }
 0x21b   : > { %v1229_v58 = vadd.s32 1, %v5766_v37  ;;  %v10056_v39 = vand.u32 2147483647, %v7056_v34  ;;  %v743_v35 = vadd.s32 3, %v726_v48  ;;  %v7094_v8 = vshll.u32 %v1227_v25, 8 }
 0x21c   : > { %v721_v7 = vxor.u32 2147483648, %v720_v26  ;;  %v1006_v32 = vsel %vm1004_vm11, %v1005_v22, %v1001_v30  ;;  %v1533_v6 = vshrl.u32 %v1532_v24, 23  ;;  %v7107_v19 = vmul.f32 %v6831_v38, %v6226_v47 }
 0x21d   : > { %v1007_v33 = vadd.s32 %v1006_v32, %v1002_v15  ;;  %vm1230_vm8 = vcmp.gt.s32.totalorder %v1229_v58, 0  ;;  %v7103_v21 = vand.u32 8388607, %v10056_v39  ;;  %v7111_v9 = vand.u32 3, %v743_v35 }
 0x21e   : > { %v722_v14 = vsel %vm601_vm10, %v721_v7, %v720_v26  ;;  %v1231_v20 = vsel %vm1230_vm8, %v1229_v58, 0  ;;  %vm911_vm4 = vcmp.lt.s32.totalorder %v6847_v44, 0  ;;  %v7114_v45 = vadd.s32 %v998_v56, %v979_v57 }
 0x21f   : > { %v7099_v43 = vsel %vm7081_vm13, %v6840_v42, %v722_v14  ;;  %v1008_v3 = vadd.s32 536870912, %v1007_v33  ;;  %v1233_v52 = vand.u32 31, %v1231_v20  ;;  %v7117_v5 = vand.u32 65535, %v7094_v8 }
 0x220   : > { %v727_v12 = vmul.f32 %v7099_v43, %v7099_v43  ;;  %v7120_v18 = vshrl.u32 %v7094_v8, 16  ;;  %v5772_v63 = vadd.s32 4294967169, %v1533_v6  ;;  %vm7125_vm10 = vcmp.le.f32.partialorder %v909_v36, 0.7853982 }
 0x221   : > { %v1009_v13 = vshrl.u32 %v1008_v3, 30  ;;  %v1234_v23 = vsub.s32 32, %v1233_v52  ;;  %v7129_v56 = vshrl.u32 %v1231_v20, 5  ;;  %v1236_v22 = vshll.u32 %v10078_v40, %v1233_v52 }
 0x222   : > { %v728_v27 = vmul.f32 -0.001358992, %v727_v12  ;;  %v735_v41 = vmul.f32 -0.00019511016, %v727_v12  ;;  %v1239_v24 = vshll.u32 %v10082_v46, %v1233_v52  ;;  %v1242_v36 = vshll.u32 %v10083_v4, %v1233_v52 }
 0x223   : > { %v1010_v29 = vshll.u32 %v1009_v13, 30  ;;  %v1033_v57 = vsub.s32 4, %v1009_v13  ;;  %v1237_v25 = vshrl.u32 %v10082_v46, %v1234_v23  ;;  %v1240_v7 = vshrl.u32 %v10083_v4, %v1234_v23 }
 0x224   : > { %v729_v30 = vadd.f32 0.041655596, %v728_v27  ;;  %v736_v48 = vadd.f32 0.008332121, %v735_v41  ;;  %vm749_vm15 = vcmp.eq.s32.totalorder %v7111_v9, 2  ;;  %v1243_v35 = vshrl.u32 %v10087_v11, %v1234_v23 }
 0x225   : > { %v7131_v26 = vsub.s32 %v1007_v33, %v1010_v29  ;;  %v1246_v33 = vshrl.u32 %v10088_v28, %v1234_v23  ;;  %v1034_v6 = vsel %vm911_vm4, %v1033_v57, %v1009_v13  ;;  %v1245_v3 = vshll.u32 %v10087_v11, %v1233_v52 }
 0x226   : > { %v730_v15 = vmul.f32 %v729_v30, %v727_v12  ;;  %v737_v58 = vmul.f32 %v736_v48, %v727_v12  ;;  %vm746_vm9 = vcmp.eq.s32.totalorder %v7111_v9, 0  ;;  %v1238_v41 = vor.u32 %v1237_v25, %v1236_v22 }
 0x227   : > { %vm1012_vm14 = vcmp.lt.s32.totalorder %v7131_v26, 0  ;;  %v1013_v32 = vsub.s32 0, %v7131_v26  ;;  %v1248_v29 = vshll.u32 %v10088_v28, %v1233_v52  ;;  %v1249_v30 = vshrl.u32 %v10092_v10, %v1234_v23 }
 0x228   : > { %v731_v14 = vadd.f32 -0.4999988, %v730_v15  ;;  %v738_v20 = vadd.f32 -0.16666654, %v737_v58  ;;  %vm745_vm7 = vcmp.lt.s32.totalorder %v7111_v9, 2  ;;  %v7151_v58 = vor.u32 %v1240_v7, %v1239_v24 }
 0x229   : > { %v1014_v27 = vsel %vm1012_vm14, %v1013_v32, %v7131_v26  ;;  %vm742_vm12 = vweird.f32 %v6840_v42  ;;  %v1244_v13 = vor.u32 %v1243_v35, %v1242_v36  ;;  %v1247_v57 = vor.u32 %v1246_v33, %v1245_v3 }
 0x22a   : > { %v732_v48 = vmul.f32 %v731_v14, %v727_v12  ;;  %v739_v39 = vmul.f32 %v738_v20, %v727_v12  ;;  %v1015_v15 = vclz %v1014_v27  ;;  %v1250_v51 = vor.u32 %v1249_v30, %v1248_v29 }
 0x22b   : > { %v7154_v50 = vadd.s32 1, %v5772_v63  ;;  %v1235_v52 = vshrl.u32 %v10078_v40, %v1234_v23  ;;  %v1036_v12 = vsel %vm7125_vm10, 0, %v1034_v6  ;;  %vm1251_vm13 = vcmp.lt.s32.totalorder %v7129_v56, 1 }
 0x22c   : > { %v733_v32 = vadd.f32 1.0, %v732_v48  ;;  %v740_v22 = vadd.f32 1.0, %v739_v39  ;;  %v5761_v25 = vadd.s32 4294967294, %v1015_v15  ;;  %vm1252_vm11 = vcmp.lt.s32.totalorder %v7129_v56, 2 }
 0x22d   : > { %vm1254_vm8 = vcmp.lt.s32.totalorder %v7129_v56, 4  ;;  %v1259_v39 = vsel %vm1251_vm13, %v1238_v41, %v7151_v58  ;;  %v1263_v36 = vsel %vm1251_vm13, %v7151_v58, %v1244_v13  ;;  %vm1253_vm6 = vcmp.lt.s32.totalorder %v7129_v56, 3 }
 0x22e   : > { %v741_v24 = vmul.f32 %v740_v22, %v7099_v43  ;;  %v750_v7 = vxor.u32 2147483648, %v733_v32  ;;  %vm5762_vm14 = vcmp.lt.s32.totalorder %v5761_v25, 0  ;;  %v1260_v23 = vsel %vm1254_vm8, %v1247_v57, 920167782 }
 0x22f   : > { %v1018_v63 = vsel %vm5762_vm14, 0, %v5761_v25  ;;  %v1264_v35 = vsel %vm1254_vm8, %v1250_v51, 1326507024  ;;  %v1261_v3 = vsel %vm1253_vm6, %v1244_v13, %v1260_v23  ;;  %v7196_v23 = vadd.s32 3, %v1036_v12 }
 0x230   : > { %v747_v33 = vxor.u32 2147483648, %v741_v24  ;;  %v751_v43 = vsel %vm749_vm15, %v750_v7, %v741_v24  ;;  %v1019_v14 = vsub.s32 32, %v1018_v63  ;;  %v1020_v20 = vshll.u32 %v7131_v26, %v1018_v63 }
 0x231   : > { %v1023_v6 = vsub.s32 4294967266, %v1018_v63  ;;  %v1265_v27 = vsel %vm1253_vm6, %v1247_v57, %v1264_v35  ;;  %v1262_v30 = vsel %vm1252_vm11, %v1259_v39, %v1261_v3  ;;  %vm1540_vm15 = vcmp.gt.s32.totalorder %v7154_v50, 0 }
 0x232   : > { %v748_v29 = vsel %vm746_vm9, %v733_v32, %v747_v33  ;;  %v1021_v51 = vshrl.u32 %v7114_v45, %v1019_v14  ;;  %v1266_v48 = vsel %vm1252_vm11, %v1263_v36, %v1265_v27  ;;  %v1292_v32 = vand.u32 65535, %v1262_v30 }
 0x233   : > { %v752_v26 = vsel %vm745_vm7, %v748_v29, %v751_v43  ;;  %v1024_v15 = vadd.s32 127, %v1023_v6  ;;  %v1270_v22 = vand.u32 65535, %v1266_v48  ;;  %v1271_v25 = vshrl.u32 %v1266_v48, 16 }
 0x234   : > { %v753_v57 = vsel %vm742_vm12, nan, %v752_v26  ;;  %v1022_v24 = vor.u32 %v1021_v51, %v1020_v20  ;;  %v1293_v7 = vshrl.u32 %v1262_v30, 16  ;;  %v1255_v9 = vsel %vm1251_vm13, %v1235_v52, %v1238_v41 }
 0x235   : > { %v1025_v63 = vshll.u32 %v1024_v15, 23  ;;  %v1273_v45 = vmul.u32 %v1271_v25, %v7117_v5  ;;  %v1274_v39 = vmul.u32 %v1270_v22, %v7120_v18  ;;  %3079 = vst [vmem:[%s6642_s12] sm:$0xff] %v753_v57  ;;  %v1256_v42 = vsel %vm1254_vm8, %v1244_v13, 2102212464 }
 0x236   : > { %v1295_v36 = vmul.u32 %v1293_v7, %v7117_v5  ;;  %v1029_v33 = vcvt.s32.f32 %v1022_v24  ;;  %v1272_v43 = vmul.u32 %v1270_v22, %v7117_v5  ;;  %v1275_v20 = vmul.u32 %v1271_v25, %v7120_v18 }
 0x237   : > { %v1026_v35 = vor.u32 4788187, %v1025_v63  ;;  %v1276_v14 = vshll.u32 %v1273_v45, 16  ;;  %v1294_v6 = vmul.u32 %v1292_v32, %v7117_v5  ;;  %v1296_v12 = vmul.u32 %v1292_v32, %v7120_v18 }
 0x238   : > { %v1298_v3 = vshll.u32 %v1295_v36, 16  ;;  %v1278_v29 = vshll.u32 %v1274_v39, 16  ;;  %v1257_v13 = vsel %vm1253_vm6, %v7151_v58, %v1256_v42  ;;  %v1297_v51 = vmul.u32 %v1293_v7, %v7120_v18 }
 0x239   : > { %v1027_v27 = vand.u32 2147483647, %v1026_v35  ;;  %vm1280_vm9 = vc.u32 %v1272_v43, %v1276_v14  ;;  %v1282_v41 = vadd.s32 %v1276_v14, %v1272_v43  ;;  %v1300_v15 = vshll.u32 %v1296_v12, 16  ;;  %v7222_v14 = vpop.permute.xlu2 %532 }
 0x23a   : > { %v1281_v52 = vsel %vm1280_vm9, 1, %v10060_v2  ;;  %vm1302_vm7 = vc.u32 %v1294_v6, %v1298_v3  ;;  %v1304_v22 = vadd.s32 %v1298_v3, %v1294_v6  ;;  %v1277_v24 = vshrl.u32 %v1273_v45, 16 }
 0x23b   : > { %v1030_v30 = vmul.f32 %v1029_v33, %v1027_v27  ;;  %v1283_v48 = vadd.s32 %v1281_v52, %v1275_v20  ;;  %vm1284_vm12 = vc.u32 %v1282_v41, %v1278_v29  ;;  %v1303_v5 = vsel %vm1302_vm7, 1, %v10060_v2 }
 0x23c   : > { %v1285_v26 = vsel %vm1284_vm12, 1, %v10060_v2  ;;  %v1305_v25 = vadd.s32 %v1303_v5, %v1297_v51  ;;  %v1541_v58 = vsel %vm1540_vm15, %v7154_v50, 0  ;;  %v1258_v18 = vsel %vm1252_vm11, %v1255_v9, %v1257_v13 }
 0x23d   : > { %v1031_v57 = vxor.u32 2147483648, %v1030_v30  ;;  %v1287_v32 = vadd.s32 %v1285_v26, %v1283_v48  ;;  %v1279_v7 = vshrl.u32 %v1274_v39, 16  ;;  %vm1306_vm6 = vc.u32 %v1304_v22, %v1300_v15 }
 0x23e   : > { %v1543_v63 = vand.u32 31, %v1541_v58  ;;  %v1299_v33 = vshrl.u32 %v1295_v36, 16  ;;  %v1307_v43 = vsel %vm1306_vm6, 1, %v10060_v2  ;;  %v1301_v50 = vshrl.u32 %v1296_v12, 16 }
 0x23f   : > { %v1032_v42 = vsel %vm911_vm4, %v1031_v57, %v1030_v30  ;;  %v1288_v35 = vadd.s32 %v1287_v32, %v1277_v24  ;;  %v1309_v20 = vadd.s32 %v1307_v43, %v1305_v25  ;;  %v7231_v6 = vadd.s32 %v1304_v22, %v1300_v15 }
 0x240   : > { %v1035_v45 = vsel %vm7125_vm10, %v6847_v44, %v1032_v42  ;;  %v7227_v56 = vsub.s32 32, %v1543_v63  ;;  %v7233_v3 = vshrl.u32 %v1541_v58, 5  ;;  %v1546_v27 = vshll.u32 %v10078_v40, %v1543_v63 }
 0x241   : > { %v1037_v39 = vmul.f32 %v1035_v45, %v1035_v45  ;;  %v7229_v9 = vadd.s32 %v1288_v35, %v1279_v7  ;;  %v1310_v36 = vadd.s32 %v1309_v20, %v1299_v33  ;;  %v1549_v13 = vshll.u32 %v10082_v46, %v1543_v63 }
 0x242   : > { %v1547_v29 = vshrl.u32 %v10082_v46, %v7227_v56  ;;  %v1550_v37 = vshrl.u32 %v10083_v4, %v7227_v56  ;;  %v1552_v52 = vshll.u32 %v10083_v4, %v1543_v63  ;;  %v1553_v48 = vshrl.u32 %v10087_v11, %v7227_v56 }
 0x243   : > { %v1038_v12 = vmul.f32 -0.001358992, %v1037_v39  ;;  %v1045_v41 = vmul.f32 -0.00019511016, %v1037_v39  ;;  %v1311_v51 = vadd.s32 %v1310_v36, %v1301_v50  ;;  %vm1314_vm4 = vc.u32 %v7229_v9, %v7231_v6 }
 0x244   : > { %v7244_v30 = vor.u32 %v1547_v29, %v1546_v27  ;;  %v1555_v15 = vshll.u32 %v10087_v11, %v1543_v63  ;;  %v1556_v22 = vshrl.u32 %v10088_v28, %v7227_v56  ;;  %v7251_v57 = vor.u32 %v1550_v37, %v1549_v13  ;;  %v7259_v29 = vpop.permute.xlu2 %544 }
 0x245   : > { %v1039_v5 = vadd.f32 0.041655596, %v1038_v12  ;;  %v1046_v26 = vadd.f32 0.008332121, %v1045_v41  ;;  %v1315_v25 = vadd.s32 1, %v1311_v51  ;;  %v1558_v24 = vshll.u32 %v10088_v28, %v1543_v63 }
 0x246   : > { %v1559_v32 = vshrl.u32 %v10092_v10, %v7227_v56  ;;  %v1312_v42 = vmul.u32 %v7094_v8, %v1258_v18  ;;  %v1557_v35 = vor.u32 %v1556_v22, %v1555_v15  ;;  %v1554_v43 = vor.u32 %v1553_v48, %v1552_v52 }
 0x247   : > { %v1040_v58 = vmul.f32 %v1039_v5, %v1037_v39  ;;  %v1047_v7 = vmul.f32 %v1046_v26, %v1037_v39  ;;  %v1316_v33 = vsel %vm1314_vm4, %v1315_v25, %v1311_v51  ;;  %vm1561_vm10 = vcmp.lt.s32.totalorder %v7233_v3, 1 }
 0x248   : > { %v1560_v50 = vor.u32 %v1559_v32, %v1558_v24  ;;  %v1317_v27 = vadd.s32 %v1316_v33, %v1312_v42  ;;  %vm1564_vm13 = vcmp.lt.s32.totalorder %v7233_v3, 4  ;;  %v1054_v63 = vand.u32 3, %v7196_v23 }
 0x249   : > { %v1041_v20 = vadd.f32 -0.4999988, %v1040_v58  ;;  %v1048_v36 = vadd.f32 -0.16666654, %v1047_v7  ;;  %v1569_v8 = vsel %vm1561_vm10, %v7244_v30, %v7251_v57  ;;  %v1570_v18 = vsel %vm1564_vm13, %v1557_v35, 920167782 }
 0x24a   : > { %v10101_v37 = vor.u32 8388608, %v7103_v21  ;;  %v1318_v52 = vadd.s32 536870912, %v1317_v27  ;;  %vm1563_vm11 = vcmp.lt.s32.totalorder %v7233_v3, 3  ;;  %vm1562_vm8 = vcmp.lt.s32.totalorder %v7233_v3, 2 }
 0x24b   : > { %v1042_v41 = vmul.f32 %v1041_v20, %v1037_v39  ;;  %v1049_v13 = vmul.f32 %v1048_v36, %v1037_v39  ;;  %v1571_v23 = vsel %vm1563_vm11, %v1554_v43, %v1570_v18  ;;  %v1573_v51 = vsel %vm1561_vm10, %v7251_v57, %v1554_v43 }
 0x24c   : > { %v7270_v12 = vshll.u32 %v10101_v37, 8  ;;  %v1574_v48 = vsel %vm1564_vm13, %v1560_v50, 1326507024  ;;  %v7281_v26 = vshrl.u32 %v1318_v52, 30  ;;  %v1572_v39 = vsel %vm1562_vm8, %v1569_v8, %v1571_v23  ;;  %v7304_v23 = vpop.permute.xlu2 %450 }
 0x24d   : > { %v1043_v21 = vadd.f32 1.0, %v1042_v41  ;;  %v1050_v5 = vadd.f32 1.0, %v1049_v13  ;;  %v7287_v15 = vadd.f32 %v7107_v19, %v6263_v0  ;;  %vm1052_vm14 = vweird.f32 %v6847_v44 }
 0x24e   : > { %v1575_v22 = vsel %vm1563_vm11, %v1557_v35, %v1574_v48  ;;  %vm1055_vm15 = vcmp.lt.s32.totalorder %v1054_v63, 2  ;;  %v1320_v32 = vshll.u32 %v7281_v26, 30  ;;  %vm1056_vm9 = vcmp.eq.s32.totalorder %v1054_v63, 0 }
 0x24f   : > { %v1051_v25 = vmul.f32 %v1050_v5, %v1035_v45  ;;  %v1060_v24 = vxor.u32 2147483648, %v1043_v21  ;;  %vm1059_vm7 = vcmp.eq.s32.totalorder %v1054_v63, 2  ;;  %v1576_v58 = vsel %vm1562_vm8, %v1573_v51, %v1575_v22 }
 0x250   : > { %v1603_v7 = vshrl.u32 %v1572_v39, 16  ;;  %v7295_v33 = vsub.s32 %v1317_v27, %v1320_v32  ;;  %v1578_v19 = vand.u32 65535, %v7270_v12  ;;  %v1602_v50 = vand.u32 65535, %v1572_v39 }
 0x251   : > { %v1057_v42 = vxor.u32 2147483648, %v1051_v25  ;;  %v1545_v35 = vshrl.u32 %v10078_v40, %v7227_v56  ;;  %v1579_v45 = vshrl.u32 %v7270_v12, 16  ;;  %v1580_v20 = vand.u32 65535, %v1576_v58 }
 0x252   : > { %v1581_v36 = vshrl.u32 %v1576_v58, 16  ;;  %v1061_v18 = vsel %vm1059_vm7, %v1060_v24, %v1051_v25  ;;  %vm1322_vm12 = vcmp.lt.s32.totalorder %v7295_v33, 0  ;;  %v1323_v37 = vsub.s32 0, %v7295_v33 }
 0x253   : > { %v1058_v8 = vsel %vm1056_vm9, %v1043_v21, %v1057_v42  ;;  %v1584_v13 = vmul.u32 %v1580_v20, %v1579_v45  ;;  %v1605_v52 = vmul.u32 %v1603_v7, %v1578_v19  ;;  %v1313_v51 = vadd.s32 %v7231_v6, %v7229_v9 }
 0x254   : > { %v1062_v27 = vsel %vm1055_vm15, %v1058_v8, %v1061_v18  ;;  %v1583_v41 = vmul.u32 %v1581_v36, %v1578_v19  ;;  %v1324_v48 = vsel %vm1322_vm12, %v1323_v37, %v7295_v33  ;;  %v1606_v21 = vmul.u32 %v1602_v50, %v1579_v45 }
 0x255   : > { %v1063_v56 = vsel %vm1052_vm14, nan, %v1062_v27  ;;  %v1325_v5 = vclz %v1324_v48  ;;  %v1566_v39 = vsel %vm1564_vm13, %v1554_v43, 2102212464  ;;  %v1582_v63 = vmul.u32 %v1580_v20, %v1578_v19 }
 0x256   : > { %v1586_v22 = vshll.u32 %v1583_v41, 16  ;;  %3081 = vst [vmem:[%s6642_s12 + $0x10] sm:$0xff] %v1063_v56  ;;  %v1565_v25 = vsel %vm1561_vm10, %v1545_v35, %v7244_v30  ;;  %v1585_v24 = vmul.u32 %v1581_v36, %v1579_v45  ;;  %v1588_v44 = vshll.u32 %v1584_v13, 16 }
 0x257   : > { %v1604_v32 = vmul.u32 %v1602_v50, %v1578_v19  ;;  %v5767_v58 = vadd.s32 4294967294, %v1325_v5  ;;  %v1608_v6 = vshll.u32 %v1605_v52, 16  ;;  %v1567_v42 = vsel %vm1563_vm11, %v7251_v57, %v1566_v39 }
 0x258   : > { %vm1590_vm6 = vc.u32 %v1582_v63, %v1586_v22  ;;  %v1592_v9 = vadd.s32 %v1586_v22, %v1582_v63  ;;  %v1607_v20 = vmul.u32 %v1603_v7, %v1579_v45  ;;  %v1610_v8 = vshll.u32 %v1606_v21, 16  ;;  %v7325_v22 = vpop.permute.xlu2 %462 }
 0x259   : > { %v1591_v43 = vsel %vm1590_vm6, 1, %v10060_v2  ;;  %vm5768_vm4 = vcmp.lt.s32.totalorder %v5767_v58, 0  ;;  %vm1612_vm14 = vc.u32 %v1604_v32, %v1608_v6  ;;  %v1614_v50 = vadd.s32 %v1608_v6, %v1604_v32 }
 0x25a   : > { %v1593_v18 = vadd.s32 %v1591_v43, %v1585_v24  ;;  %vm1594_vm13 = vc.u32 %v1592_v9, %v1588_v44  ;;  %v1328_v30 = vsel %vm5768_vm4, 0, %v5767_v58  ;;  %v1613_v19 = vsel %vm1612_vm14, 1, %v10060_v2 }
 0x25b   : > { %v1595_v35 = vsel %vm1594_vm13, 1, %v10060_v2  ;;  %v1329_v36 = vsub.s32 32, %v1328_v30  ;;  %v1333_v37 = vsub.s32 4294967266, %v1328_v30  ;;  %v1587_v27 = vshrl.u32 %v1583_v41, 16 }
 0x25c   : > { %v1597_v56 = vadd.s32 %v1595_v35, %v1593_v18  ;;  %v1330_v57 = vshll.u32 %v7295_v33, %v1328_v30  ;;  %v1589_v48 = vshrl.u32 %v1584_v13, 16  ;;  %v1615_v5 = vadd.s32 %v1613_v19, %v1607_v20 }
 0x25d   : > { %vm1616_vm10 = vc.u32 %v1614_v50, %v1610_v8  ;;  %v1331_v7 = vshrl.u32 %v1313_v51, %v1329_v36  ;;  %v1334_v45 = vadd.s32 127, %v1333_v37  ;;  %v1343_v24 = vsub.s32 4, %v7281_v26 }
 0x25e   : > { %v1598_v39 = vadd.s32 %v1597_v56, %v1587_v27  ;;  %v1617_v63 = vsel %vm1616_vm10, 1, %v10060_v2  ;;  %v1609_v44 = vshrl.u32 %v1605_v52, 16  ;;  %v10059_v58 = vand.u32 2147483647, %v7287_v15 }
 0x25f   : > { %v1619_v32 = vadd.s32 %v1617_v63, %v1615_v5  ;;  %v1332_v41 = vor.u32 %v1331_v7, %v1330_v57  ;;  %v1335_v9 = vshll.u32 %v1334_v45, 23  ;;  %v1842_v33 = vand.u32 2139095040, %v7287_v15 }
 0x260   : > { %v1599_v6 = vadd.s32 %v1598_v39, %v1589_v48  ;;  %v1611_v13 = vshrl.u32 %v1606_v21, 16  ;;  %vm1221_vm11 = vcmp.lt.s32.totalorder %v7053_v17, 0  ;;  %v1618_v20 = vadd.s32 %v1614_v50, %v1610_v8  ;;  %v7347_v7 = vpop.permute.xlu2 %348 }
 0x261   : > { %v1620_v43 = vadd.s32 %v1619_v32, %v1609_v44  ;;  %v1336_v51 = vor.u32 4788187, %v1335_v9  ;;  %v1568_v18 = vsel %vm1562_vm8, %v1565_v25, %v1567_v42  ;;  %v1843_v35 = vshrl.u32 %v1842_v33, 23 }
 0x262   : > { %v1846_v52 = vand.u32 8388607, %v10059_v58  ;;  %v1339_v36 = vcvt.s32.f32 %v1332_v41  ;;  %v1344_v37 = vsel %vm1221_vm11, %v1343_v24, %v7281_v26  ;;  %vm1624_vm15 = vc.u32 %v1599_v6, %v1618_v20 }
 0x263   : > { %v1621_v30 = vadd.s32 %v1620_v43, %v1611_v13  ;;  %v1337_v19 = vand.u32 2147483647, %v1336_v51  ;;  %v5778_v27 = vadd.s32 4294967169, %v1843_v35  ;;  %v10102_v56 = vand.u32 2147483647, %v7053_v17 }
 0x264   : > { %v1622_v25 = vmul.u32 %v7270_v12, %v1568_v18  ;;  %v1847_v57 = vor.u32 8388608, %v1846_v52  ;;  %v577_v45 = vmul.f32 %v6831_v38, %v6242_v53  ;;  %vm1531_vm7 = vcmp.lt.s32.totalorder %v7056_v34, 0 }
 0x265   : > { %v1625_v21 = vadd.s32 1, %v1621_v30  ;;  %vm7340_vm9 = vcmp.le.f32.partialorder %v10102_v56, 0.7853982  ;;  %v1340_v3 = vmul.f32 %v1339_v36, %v1337_v19  ;;  %v1849_v48 = vadd.s32 1, %v5778_v27 }
 0x266   : > { %v1346_v42 = vsel %vm7340_vm9, 0, %v1344_v37  ;;  %v7356_v41 = vshll.u32 %v1847_v57, 8  ;;  %v7359_v9 = vadd.f32 %v577_v45, %v7347_v7  ;;  %v1623_v52 = vadd.s32 %v1618_v20, %v1599_v6 }
 0x267   : > { %v1626_v50 = vsel %vm1624_vm15, %v1625_v21, %v1621_v30  ;;  %v1341_v5 = vxor.u32 2147483648, %v1340_v3  ;;  %vm1850_vm8 = vcmp.gt.s32.totalorder %v1849_v48, 0  ;;  %v1363_v63 = vadd.s32 3, %v1346_v42 }
 0x268   : > { %v1627_v26 = vadd.s32 %v1626_v50, %v1622_v25  ;;  %v1851_v12 = vsel %vm1850_vm8, %v1849_v48, 0  ;;  %v7365_v19 = vand.u32 65535, %v7356_v41  ;;  %v7368_v36 = vshrl.u32 %v7356_v41, 16 }
 0x269   : > { %v1342_v39 = vsel %vm1221_vm11, %v1341_v5, %v1340_v3  ;;  %v1853_v32 = vand.u32 31, %v1851_v12  ;;  %v7362_v30 = vand.u32 3, %v1363_v63  ;;  %v7373_v8 = vshrl.u32 %v1851_v12, 5 }
 0x26a   : > { %v1628_v24 = vadd.s32 536870912, %v1627_v26  ;;  %v1345_v44 = vsel %vm7340_vm9, %v7053_v17, %v1342_v39  ;;  %vm1362_vm14 = vweird.f32 %v7053_v17  ;;  %v10105_v6 = vand.u32 2147483647, %v7056_v34 }
 0x26b   : > { %v1347_v33 = vmul.f32 %v1345_v44, %v1345_v44  ;;  %v1854_v43 = vsub.s32 32, %v1853_v32  ;;  %v1856_v25 = vshll.u32 %v10078_v40, %v1853_v32  ;;  %v1859_v48 = vshll.u32 %v10082_v46, %v1853_v32 }
 0x26c   : > { %v1629_v13 = vshrl.u32 %v1628_v24, 30  ;;  %vm1366_vm6 = vcmp.eq.s32.totalorder %v7362_v30, 0  ;;  %vm1369_vm4 = vcmp.eq.s32.totalorder %v7362_v30, 2  ;;  %vm1365_vm13 = vcmp.lt.s32.totalorder %v7362_v30, 2 }
 0x26d   : > { %v1348_v51 = vmul.f32 -0.001358992, %v1347_v33  ;;  %v1355_v18 = vmul.f32 -0.00019511016, %v1347_v33  ;;  %v1857_v42 = vshrl.u32 %v10082_v46, %v1854_v43  ;;  %v1860_v5 = vshrl.u32 %v10083_v4, %v1854_v43 }
 0x26e   : > { %v1630_v35 = vshll.u32 %v1629_v13, 30  ;;  %v1653_v3 = vsub.s32 4, %v1629_v13  ;;  %v1863_v45 = vshrl.u32 %v10087_v11, %v1854_v43  ;;  %v1866_v12 = vshrl.u32 %v10088_v28, %v1854_v43 }
 0x26f   : > { %v1349_v21 = vadd.f32 0.041655596, %v1348_v51  ;;  %v1356_v27 = vadd.f32 0.008332121, %v1355_v18  ;;  %v1861_v37 = vor.u32 %v1860_v5, %v1859_v48  ;;  %v1868_v2 = vshll.u32 %v10088_v28, %v1853_v32 }
 0x270   : > { %v7371_v56 = vsub.s32 %v1627_v26, %v1630_v35  ;;  %v1862_v26 = vshll.u32 %v10083_v4, %v1853_v32  ;;  %v7390_v18 = vsel %vm1531_vm7, %v1653_v3, %v1629_v13  ;;  %v1855_v35 = vshrl.u32 %v10078_v40, %v1854_v43 }
 0x271   : > { %v1350_v20 = vmul.f32 %v1349_v21, %v1347_v33  ;;  %v1357_v50 = vmul.f32 %v1356_v27, %v1347_v33  ;;  %v1869_v21 = vshrl.u32 %v10092_v10, %v1854_v43  ;;  %vm7400_vm10 = vcmp.le.f32.partialorder %v10105_v6, 0.7853982 }
 0x272   : > { %vm1632_vm12 = vcmp.lt.s32.totalorder %v7371_v56, 0  ;;  %v1633_v57 = vsub.s32 0, %v7371_v56  ;;  %vm1871_vm11 = vcmp.lt.s32.totalorder %v7373_v8, 1  ;;  %vm1872_vm9 = vcmp.lt.s32.totalorder %v7373_v8, 2 }
 0x273   : > { %v1351_v39 = vadd.f32 -0.4999988, %v1350_v20  ;;  %v1358_v63 = vadd.f32 -0.16666654, %v1357_v50  ;;  %v1858_v50 = vor.u32 %v1857_v42, %v1856_v25  ;;  %v1870_v25 = vor.u32 %v1869_v21, %v1868_v2 }
 0x274   : > { %v1634_v24 = vsel %vm1632_vm12, %v1633_v57, %v7371_v56  ;;  %v1865_v57 = vshll.u32 %v10087_v11, %v1853_v32  ;;  %vm1873_vm8 = vcmp.lt.s32.totalorder %v7373_v8, 3  ;;  %vm1874_vm12 = vcmp.lt.s32.totalorder %v7373_v8, 4 }
 0x275   : > { %v1635_v51 = vclz %v1634_v24  ;;  %v1352_v27 = vmul.f32 %v1351_v39, %v1347_v33  ;;  %v1359_v20 = vmul.f32 %v1358_v63, %v1347_v33  ;;  %v1864_v24 = vor.u32 %v1863_v45, %v1862_v26 }
 0x276   : > { %v1867_v33 = vor.u32 %v1866_v12, %v1865_v57  ;;  %v1879_v45 = vsel %vm1871_vm11, %v1858_v50, %v1861_v37 }
 0x277   : > { %v5773_v58 = vadd.s32 4294967294, %v1635_v51  ;;  %v1353_v13 = vadd.f32 1.0, %v1352_v27  ;;  %v1360_v3 = vadd.f32 1.0, %v1359_v20  ;;  %v1876_v6 = vsel %vm1874_vm12, %v1864_v24, 2102212464 }
 0x278   : > { %v1880_v12 = vsel %vm1874_vm12, %v1867_v33, 920167782  ;;  %v1883_v2 = vsel %vm1871_vm11, %v1861_v37, %v1864_v24  ;;  %v1877_v17 = vsel %vm1873_vm8, %v1861_v37, %v1876_v6 }
 0x279   : > { %vm5774_vm15 = vcmp.lt.s32.totalorder %v5773_v58, 0  ;;  %v1361_v42 = vmul.f32 %v1360_v3, %v1345_v44  ;;  %v1370_v48 = vxor.u32 2147483648, %v1353_v13  ;;  %v1884_v44 = vsel %vm1874_vm12, %v1870_v25, 1326507024  ;;  %v525_v3 = vpop.permute.xlu0 %524 }
 0x27a   : > { %v1638_v32 = vsel %vm5774_vm15, 0, %v5773_v58  ;;  %v1881_v58 = vsel %vm1873_vm8, %v1864_v24, %v1880_v12  ;;  %v1885_v57 = vsel %vm1873_vm8, %v1867_v33, %v1884_v44  ;;  %v1656_v33 = vsel %vm7400_vm10, 0, %v7390_v18 }
 0x27b   : > { %v1639_v5 = vsub.s32 32, %v1638_v32  ;;  %v1643_v26 = vsub.s32 4294967266, %v1638_v32  ;;  %v1367_v39 = vxor.u32 2147483648, %v1361_v42  ;;  %v1640_v63 = vshll.u32 %v7371_v56, %v1638_v32 }
 0x27c   : > { %v1371_v20 = vsel %vm1369_vm4, %v1370_v48, %v1361_v42  ;;  %v1882_v56 = vsel %vm1872_vm9, %v1879_v45, %v1881_v58  ;;  %v1886_v25 = vsel %vm1872_vm9, %v1883_v2, %v1885_v57  ;;  %v7435_v30 = vsel %vm374_vm0, %v6196_v31, %v525_v3 }
 0x27d   : > { %v1641_v51 = vshrl.u32 %v1623_v52, %v1639_v5  ;;  %v1644_v21 = vadd.s32 127, %v1643_v26  ;;  %v1368_v27 = vsel %vm1366_vm6, %v1353_v13, %v1367_v39  ;;  %v1890_v5 = vand.u32 65535, %v1886_v25 }
 0x27e   : > { %v1372_v52 = vsel %vm1365_vm13, %v1368_v27, %v1371_v20  ;;  %v1891_v42 = vshrl.u32 %v1886_v25, 16  ;;  %v1912_v48 = vand.u32 65535, %v1882_v56  ;;  %v1913_v45 = vshrl.u32 %v1882_v56, 16 }
 0x27f   : > { %v1642_v32 = vor.u32 %v1641_v51, %v1640_v63  ;;  %v1645_v24 = vshll.u32 %v1644_v21, 23  ;;  %v1373_v13 = vsel %vm1362_vm14, nan, %v1372_v52  ;;  %v1875_v39 = vsel %vm1871_vm11, %v1855_v35, %v1858_v50 }
 0x280   : > { %3083 = vst [vmem:[%s6642_s12 + $0x20] sm:$0xff] %v1373_v13  ;;  %v1893_v63 = vmul.u32 %v1891_v42, %v7365_v19  ;;  %v1894_v12 = vmul.u32 %v1890_v5, %v7368_v36  ;;  %v1915_v18 = vmul.u32 %v1913_v45, %v7365_v19  ;;  %v1916_v21 = vmul.u32 %v1912_v48, %v7368_v36 }
 0x281   : > { %v1646_v26 = vor.u32 4788187, %v1645_v24  ;;  %v1649_v51 = vcvt.s32.f32 %v1642_v32  ;;  %v1892_v58 = vmul.u32 %v1890_v5, %v7365_v19  ;;  %v1895_v31 = vmul.u32 %v1891_v42, %v7368_v36 }
 0x282   : > { %v1896_v44 = vshll.u32 %v1893_v63, 16  ;;  %v10108_v35 = vand.u32 2139095040, %v7359_v9  ;;  %v1898_v37 = vshll.u32 %v1894_v12, 16  ;;  %v1914_v6 = vmul.u32 %v1912_v48, %v7365_v19 }
 0x283   : > { %v1647_v2 = vand.u32 2147483647, %v1646_v26  ;;  %v1918_v20 = vshll.u32 %v1915_v18, 16  ;;  %v1917_v57 = vmul.u32 %v1913_v45, %v7368_v36  ;;  %v1920_v3 = vshll.u32 %v1916_v21, 16 }
 0x284   : > { %v2153_v50 = vshrl.u32 %v10108_v35, 23  ;;  %vm1900_vm6 = vc.u32 %v1892_v58, %v1896_v44  ;;  %v1902_v56 = vadd.s32 %v1896_v44, %v1892_v58  ;;  %v10109_v32 = vmov 0  }
 0x285   : > { %v1650_v27 = vmul.f32 %v1649_v51, %v1647_v2  ;;  %v1901_v24 = vsel %vm1900_vm6, 1, %v10109_v32  ;;  %vm1922_vm4 = vc.u32 %v1914_v6, %v1918_v20  ;;  %v1924_v25 = vadd.s32 %v1918_v20, %v1914_v6 }
 0x286   : > { %v1903_v13 = vadd.s32 %v1901_v24, %v1895_v31  ;;  %vm1904_vm13 = vc.u32 %v1902_v56, %v1898_v37  ;;  %v1923_v5 = vsel %vm1922_vm4, 1, %v10109_v32  ;;  %v5784_v42 = vadd.s32 4294967169, %v2153_v50 }
 0x287   : > { %v1651_v52 = vxor.u32 2147483648, %v1650_v27  ;;  %v1905_v19 = vsel %vm1904_vm13, 1, %v10109_v32  ;;  %v1925_v48 = vadd.s32 %v1923_v5, %v1917_v57  ;;  %vm1926_vm14 = vc.u32 %v1924_v25, %v1920_v3 }
 0x288   : > { %v1897_v45 = vshrl.u32 %v1893_v63, 16  ;;  %v1907_v2 = vadd.s32 %v1905_v19, %v1903_v13  ;;  %v1927_v51 = vsel %vm1926_vm14, 1, %v10109_v32  ;;  %v1919_v31 = vshrl.u32 %v1915_v18, 16 }
 0x289   : > { %v1652_v26 = vsel %vm1531_vm7, %v1651_v52, %v1650_v27  ;;  %v1929_v44 = vadd.s32 %v1927_v51, %v1925_v48  ;;  %v2159_v35 = vadd.s32 1, %v5784_v42  ;;  %v1673_v50 = vadd.s32 3, %v1656_v33 }
 0x28a   : > { %v1655_v36 = vsel %vm7400_vm10, %v7056_v34, %v1652_v26  ;;  %v1878_v27 = vsel %vm1872_vm9, %v1875_v39, %v1877_v17  ;;  %v1899_v37 = vshrl.u32 %v1894_v12, 16  ;;  %v1908_v6 = vadd.s32 %v1907_v2, %v1897_v45  ;;  %v529_v17 = vpop.permute.xlu1 %528 }
 0x28b   : > { %v1657_v58 = vmul.f32 %v1655_v36, %v1655_v36  ;;  %v1921_v57 = vshrl.u32 %v1916_v21, 16  ;;  %v1930_v52 = vadd.s32 %v1929_v44, %v1919_v31  ;;  %v7464_v63 = vadd.s32 %v1924_v25, %v1920_v3 }
 0x28c   : > { %v7462_v43 = vadd.s32 %v1908_v6, %v1899_v37  ;;  %v10110_v24 = vand.u32 2147483647, %v7359_v9  ;;  %vm2160_vm7 = vcmp.gt.s32.totalorder %v2159_v35, 0  ;;  %v1674_v42 = vand.u32 3, %v1673_v50 }
 0x28d   : > { %v1658_v20 = vmul.f32 -0.001358992, %v1657_v58  ;;  %v1665_v56 = vmul.f32 -0.00019511016, %v1657_v58  ;;  %v1931_v5 = vadd.s32 %v1930_v52, %v1921_v57  ;;  %v2161_v8 = vsel %vm2160_vm7, %v2159_v35, 0 }
 0x28e   : > { %v7468_v13 = vand.u32 8388607, %v10110_v24  ;;  %vm1934_vm10 = vc.u32 %v7462_v43, %v7464_v63  ;;  %v2163_v39 = vand.u32 31, %v2161_v8  ;;  %v1932_v3 = vmul.u32 %v7356_v41, %v1878_v27 }
 0x28f   : > { %v1659_v18 = vadd.f32 0.041655596, %v1658_v20  ;;  %v1666_v33 = vadd.f32 0.008332121, %v1665_v56  ;;  %v1935_v26 = vadd.s32 1, %v1931_v5  ;;  %v559_v25 = vsel %vm474_vm1, %v7435_v30, %v529_v17 }
 0x290   : > { %v3107_v19 = vmul.f32 %v6275_v16, %v6242_v53  ;;  %v7477_v48 = vsub.s32 32, %v2163_v39  ;;  %v2157_v31 = vor.u32 8388608, %v7468_v13  ;;  %v2166_v35 = vshll.u32 %v10078_v40, %v2163_v39 }
 0x291   : > { %v1660_v12 = vmul.f32 %v1659_v18, %v1657_v58  ;;  %v1667_v21 = vmul.f32 %v1666_v33, %v1657_v58  ;;  %v1936_v51 = vsel %vm1934_vm10, %v1935_v26, %v1931_v5  ;;  %vm1675_vm11 = vcmp.lt.s32.totalorder %v1674_v42, 2 }
 0x292   : > { %v1937_v44 = vadd.s32 %v1936_v51, %v1932_v3  ;;  %v2167_v50 = vshrl.u32 %v10082_v46, %v7477_v48  ;;  %v2170_v41 = vshrl.u32 %v10083_v4, %v7477_v48  ;;  %v2173_v37 = vshrl.u32 %v10087_v11, %v7477_v48 }
 0x293   : > { %v1661_v45 = vadd.f32 -0.4999988, %v1660_v12  ;;  %v1668_v2 = vadd.f32 -0.16666654, %v1667_v21  ;;  %v2176_v6 = vshrl.u32 %v10088_v28, %v7477_v48  ;;  %vm1672_vm15 = vweird.f32 %v7056_v34 }
 0x294   : > { %v1938_v20 = vadd.s32 536870912, %v1937_v44  ;;  %v7490_v56 = vshrl.u32 %v2161_v8, 5  ;;  %v2169_v57 = vshll.u32 %v10082_v46, %v2163_v39  ;;  %v2175_v52 = vshll.u32 %v10087_v11, %v2163_v39 }
 0x295   : > { %v1662_v30 = vmul.f32 %v1661_v45, %v1657_v58  ;;  %v1669_v27 = vmul.f32 %v1668_v2, %v1657_v58  ;;  %v7494_v18 = vor.u32 %v2167_v50, %v2166_v35  ;;  %v2172_v58 = vshll.u32 %v10083_v4, %v2163_v39 }
 0x296   : > { %v7497_v33 = vshrl.u32 %v1938_v20, 30  ;;  %v7499_v5 = vor.u32 %v2170_v41, %v2169_v57  ;;  %v2177_v17 = vor.u32 %v2176_v6, %v2175_v52  ;;  %v2179_v12 = vshrl.u32 %v10092_v10, %v7477_v48 }
 0x297   : > { %v1663_v24 = vadd.f32 1.0, %v1662_v30  ;;  %v1670_v13 = vadd.f32 1.0, %v1669_v27  ;;  %v2174_v26 = vor.u32 %v2173_v37, %v2172_v58  ;;  %v2178_v3 = vshll.u32 %v10088_v28, %v2163_v39 }
 0x298   : > { %vm1676_vm9 = vcmp.eq.s32.totalorder %v1674_v42, 0  ;;  %vm1679_vm8 = vcmp.eq.s32.totalorder %v1674_v42, 2  ;;  %v1940_v45 = vshll.u32 %v7497_v33, 30  ;;  %v7506_v2 = vadd.f32 %v3107_v19, %v7347_v7 }
 0x299   : > { %v1671_v8 = vmul.f32 %v1670_v13, %v1655_v36  ;;  %v1680_v21 = vxor.u32 2147483648, %v1663_v24  ;;  %v2180_v35 = vor.u32 %v2179_v12, %v2178_v3  ;;  %vm2181_vm12 = vcmp.lt.s32.totalorder %v7490_v56, 1 }
 0x29a   : > { %vm2184_vm6 = vcmp.lt.s32.totalorder %v7490_v56, 4  ;;  %v1941_v50 = vsub.s32 %v1937_v44, %v1940_v45  ;;  %vm2183_vm4 = vcmp.lt.s32.totalorder %v7490_v56, 3  ;;  %v2189_v36 = vsel %vm2181_vm12, %v7494_v18, %v7499_v5 }
 0x29b   : > { %v1677_v51 = vxor.u32 2147483648, %v1671_v8  ;;  %v2190_v39 = vsel %vm2184_vm6, %v2177_v17, 920167782  ;;  %v1681_v41 = vsel %vm1679_vm8, %v1680_v21, %v1671_v8  ;;  %v7519_v27 = vshll.u32 %v2157_v31, 8 }
 0x29c   : > { %v2191_v30 = vsel %vm2183_vm4, %v2174_v26, %v2190_v39  ;;  %vm1942_vm13 = vcmp.lt.s32.totalorder %v1941_v50, 0  ;;  %v1943_v37 = vsub.s32 0, %v1941_v50  ;;  %vm2182_vm14 = vcmp.lt.s32.totalorder %v7490_v56, 2 }
 0x29d   : > { %v1678_v19 = vsel %vm1676_vm9, %v1663_v24, %v1677_v51  ;;  %v2192_v20 = vsel %vm2182_vm14, %v2189_v36, %v2191_v30  ;;  %v2193_v57 = vsel %vm2181_vm12, %v7499_v5, %v2174_v26  ;;  %v2194_v31 = vsel %vm2184_vm6, %v2180_v35, 1326507024 }
 0x29e   : > { %v1682_v44 = vsel %vm1675_vm11, %v1678_v19, %v1681_v41  ;;  %v1944_v52 = vsel %vm1942_vm13, %v1943_v37, %v1941_v50  ;;  %v2195_v42 = vsel %vm2183_vm4, %v2177_v17, %v2194_v31  ;;  %v560_v34 = vsel %vm476_vm2, %v559_v25, %v7222_v14 }
 0x29f   : > { %v1683_v6 = vsel %vm1672_vm15, nan, %v1682_v44  ;;  %v1945_v24 = vclz %v1944_v52  ;;  %v2196_v13 = vsel %vm2182_vm14, %v2193_v57, %v2195_v42  ;;  %v2199_v58 = vshrl.u32 %v7519_v27, 16 }
 0x2a0   : > { %3085 = vst [vmem:[%s6642_s12 + $0x30] sm:$0xff] %v1683_v6  ;;  %v2200_v12 = vand.u32 65535, %v2196_v13  ;;  %v2222_v8 = vand.u32 65535, %v2192_v20  ;;  %vm1841_vm7 = vcmp.lt.s32.totalorder %v7287_v15, 0  ;;  %v2198_v45 = vand.u32 65535, %v7519_v27 }
 0x2a1   : > { %v5779_v3 = vadd.s32 4294967294, %v1945_v24  ;;  %v2201_v51 = vshrl.u32 %v2196_v13, 16  ;;  %v2223_v17 = vshrl.u32 %v2192_v20, 16  ;;  %v1933_v35 = vadd.s32 %v7464_v63, %v7462_v43 }
 0x2a2   : > { %v1963_v14 = vsub.s32 4, %v7497_v33  ;;  %v2165_v25 = vshrl.u32 %v10078_v40, %v7477_v48  ;;  %v2204_v36 = vmul.u32 %v2200_v12, %v2199_v58  ;;  %v2186_v39 = vsel %vm2184_vm6, %v2174_v26, 2102212464 }
 0x2a3   : > { %vm5780_vm10 = vcmp.lt.s32.totalorder %v5779_v3, 0  ;;  %v2203_v19 = vmul.u32 %v2201_v51, %v2198_v45  ;;  %v2225_v41 = vmul.u32 %v2223_v17, %v2198_v45  ;;  %v2202_v44 = vmul.u32 %v2200_v12, %v2198_v45 }
 0x2a4   : > { %v1948_v30 = vsel %vm5780_vm10, 0, %v5779_v3  ;;  %v2224_v37 = vmul.u32 %v2222_v8, %v2198_v45  ;;  %v2226_v6 = vmul.u32 %v2222_v8, %v2199_v58  ;;  %v2205_v31 = vmul.u32 %v2201_v51, %v2199_v58 }
 0x2a5   : > { %v1949_v20 = vsub.s32 32, %v1948_v30  ;;  %v1953_v57 = vsub.s32 4294967266, %v1948_v30  ;;  %v2206_v43 = vshll.u32 %v2203_v19, 16  ;;  %v1950_v63 = vshll.u32 %v1941_v50, %v1948_v30 }
 0x2a6   : > { %v2208_v52 = vshll.u32 %v2204_v36, 16  ;;  %v2227_v42 = vmul.u32 %v2223_v17, %v2199_v58  ;;  %v2228_v24 = vshll.u32 %v2225_v41, 16  ;;  %v10111_v48 = vand.u32 2147483647, %v7287_v15 }
 0x2a7   : > { %v1951_v26 = vshrl.u32 %v1933_v35, %v1949_v20  ;;  %v1954_v21 = vadd.s32 127, %v1953_v57  ;;  %vm2210_vm15 = vc.u32 %v2202_v44, %v2206_v43  ;;  %v2212_v12 = vadd.s32 %v2206_v43, %v2202_v44  ;;  %v537_v44 = vpop.permute.xlu0 %536 }
 0x2a8   : > { %vm7552_vm11 = vcmp.le.f32.partialorder %v10111_v48, 0.7853982  ;;  %v2211_v8 = vsel %vm2210_vm15, 1, %v10109_v32  ;;  %v2230_v3 = vshll.u32 %v2226_v6, 16  ;;  %vm2232_vm9 = vc.u32 %v2224_v37, %v2228_v24 }
 0x2a9   : > { %v2234_v45 = vadd.s32 %v2228_v24, %v2224_v37  ;;  %v1952_v51 = vor.u32 %v1951_v26, %v1950_v63  ;;  %v1955_v50 = vshll.u32 %v1954_v21, 23  ;;  %v2213_v30 = vadd.s32 %v2211_v8, %v2205_v31 }
 0x2aa   : > { %vm2214_vm8 = vc.u32 %v2212_v12, %v2208_v52  ;;  %v1964_v58 = vsel %vm1841_vm7, %v1963_v14, %v7497_v33  ;;  %v2233_v35 = vsel %vm2232_vm9, 1, %v10109_v32  ;;  %v2207_v57 = vshrl.u32 %v2203_v19, 16 }
 0x2ab   : > { %v2215_v17 = vsel %vm2214_vm8, 1, %v10109_v32  ;;  %vm2236_vm6 = vc.u32 %v2234_v45, %v2230_v3  ;;  %v1956_v20 = vor.u32 4788187, %v1955_v50  ;;  %v2235_v48 = vadd.s32 %v2233_v35, %v2227_v42 }
 0x2ac   : > { %v2217_v43 = vadd.s32 %v2215_v17, %v2213_v30  ;;  %v2209_v16 = vshrl.u32 %v2204_v36, 16  ;;  %v2229_v37 = vshrl.u32 %v2225_v41, 16  ;;  %v2237_v21 = vsel %vm2236_vm6, 1, %v10109_v32 }
 0x2ad   : > { %v4682_v31 = vand.u32 2139095040, %v7506_v2  ;;  %v1957_v63 = vand.u32 2147483647, %v1956_v20  ;;  %v1959_v52 = vcvt.s32.f32 %v1952_v51  ;;  %v2239_v33 = vadd.s32 %v2237_v21, %v2235_v48  ;;  %v541_v20 = vpop.permute.xlu1 %540 }
 0x2ae   : > { %v2218_v24 = vadd.s32 %v2217_v43, %v2207_v57  ;;  %v561_v14 = vsel %vm478_vm3, %v560_v34, %v537_v44  ;;  %v2185_v26 = vsel %vm2181_vm12, %v2165_v25, %v7494_v18  ;;  %v2187_v19 = vsel %vm2183_vm4, %v7499_v5, %v2186_v39 }
 0x2af   : > { %v4683_v36 = vshrl.u32 %v4682_v31, 23  ;;  %v1960_v41 = vmul.f32 %v1959_v52, %v1957_v63  ;;  %v2231_v12 = vshrl.u32 %v2226_v6, 16  ;;  %v2240_v8 = vadd.s32 %v2239_v33, %v2229_v37  ;;  %v549_v48 = vpop.permute.xlu0 %548 }
 0x2b0   : > { %v2219_v42 = vadd.s32 %v2218_v24, %v2209_v16  ;;  %v1966_v51 = vsel %vm7552_vm11, 0, %v1964_v58  ;;  %v2238_v50 = vadd.s32 %v2234_v45, %v2230_v3  ;;  %v10114_v34 = vand.u32 2147483647, %v7506_v2 }
 0x2b1   : > { %v5832_v30 = vadd.s32 4294967169, %v4683_v36  ;;  %v1961_v35 = vxor.u32 2147483648, %v1960_v41  ;;  %v2188_v18 = vsel %vm2182_vm14, %v2185_v26, %v2187_v19  ;;  %v2241_v25 = vadd.s32 %v2240_v8, %v2231_v12 }
 0x2b2   : > { %v4686_v17 = vand.u32 8388607, %v10114_v34  ;;  %vm2244_vm12 = vc.u32 %v2219_v42, %v2238_v50  ;;  %v1983_v39 = vadd.s32 3, %v1966_v51  ;;  %vm10115_vm4 = vcmask 654336  }
 0x2b3   : > { %v4689_v5 = vadd.s32 1, %v5832_v30  ;;  %v1962_v16 = vsel %vm1841_vm7, %v1961_v35, %v1960_v41  ;;  %v562_v6 = vsel %vm10115_vm4, %v561_v14, %v541_v20  ;;  %v2245_v58 = vadd.s32 1, %v2241_v25 }
 0x2b4   : > { %v1965_v3 = vsel %vm7552_vm11, %v7287_v15, %v1962_v16  ;;  %v2242_v45 = vmul.u32 %v7519_v27, %v2188_v18  ;;  %v4687_v44 = vor.u32 8388608, %v4686_v17  ;;  %v563_v52 = vsel %vm10070_vm5, %v562_v6, %v7259_v29 }
 0x2b5   : > { %vm4690_vm13 = vcmp.gt.s32.totalorder %v4689_v5, 0  ;;  %v1967_v56 = vmul.f32 %v1965_v3, %v1965_v3  ;;  %v2246_v57 = vsel %vm2244_vm12, %v2245_v58, %v2241_v25  ;;  %v7586_v24 = vand.u32 3, %v1983_v39 }
 0x2b6   : > { %v4691_v43 = vsel %vm4690_vm13, %v4689_v5, 0  ;;  %v2247_v37 = vadd.s32 %v2246_v57, %v2242_v45  ;;  %v7588_v13 = vshll.u32 %v4687_v44, 8  ;;  %vm10116_vm14 = vcmask 916480  }
 0x2b7   : > { %v4693_v21 = vand.u32 31, %v4691_v43  ;;  %v1968_v31 = vmul.f32 -0.001358992, %v1967_v56  ;;  %v1975_v63 = vmul.f32 -0.00019511016, %v1967_v56  ;;  %v564_v27 = vsel %vm10116_vm14, %v563_v52, %v549_v48 }
 0x2b8   : > { %v2248_v33 = vadd.s32 536870912, %v2247_v37  ;;  %v7595_v8 = vadd.s32 %v2238_v50, %v2219_v42  ;;  %v7597_v51 = vperm.slane %v564_v27, 0  ;;  %vm1989_vm7 = vcmp.eq.s32.totalorder %v7586_v24, 2 }
 0x2b9   : > { %v1969_v14 = vadd.f32 0.041655596, %v1968_v31  ;;  %v1976_v26 = vadd.f32 0.008332121, %v1975_v63  ;;  %v7591_v19 = vsub.s32 32, %v4693_v21  ;;  %v7601_v30 = vshrl.u32 %v4691_v43, 5 }
 0x2ba   : > { %v7593_v36 = vshrl.u32 %v2248_v33, 30  ;;  %v4696_v34 = vshll.u32 %v10078_v40, %v4693_v21  ;;  %v7605_v17 = vand.u32 65535, %v7588_v13  ;;  %vm1986_vm10 = vcmp.eq.s32.totalorder %v7586_v24, 0 }
 0x2bb   : > { %v1970_v41 = vmul.f32 %v1969_v14, %v1967_v56  ;;  %v1977_v12 = vmul.f32 %v1976_v26, %v1967_v56  ;;  %v4697_v25 = vshrl.u32 %v10082_v46, %v7591_v19  ;;  %v4700_v42 = vshrl.u32 %v10083_v4, %v7591_v19 }
 0x2bc   : > { %v2250_v29 = vshll.u32 %v7593_v36, 30  ;;  %v4703_v20 = vshrl.u32 %v10087_v11, %v7591_v19  ;;  %v4706_v5 = vshrl.u32 %v10088_v28, %v7591_v19  ;;  %v4709_v16 = vshrl.u32 %v10092_v10, %v7591_v19 }
 0x2bd   : > { %v1971_v35 = vadd.f32 -0.4999988, %v1970_v41  ;;  %v1978_v18 = vadd.f32 -0.16666654, %v1977_v12  ;;  %vm1985_vm11 = vcmp.lt.s32.totalorder %v7586_v24, 2  ;;  %v4699_v58 = vshll.u32 %v10082_v46, %v4693_v21 }
 0x2be   : > { %v7612_v50 = vsub.s32 %v2247_v37, %v2250_v29  ;;  %v4702_v45 = vshll.u32 %v10083_v4, %v4693_v21  ;;  %vm1982_vm15 = vweird.f32 %v7287_v15  ;;  %v4705_v57 = vshll.u32 %v10087_v11, %v4693_v21 }
 0x2bf   : > { %v1972_v39 = vmul.f32 %v1971_v35, %v1967_v56  ;;  %v1979_v6 = vmul.f32 %v1978_v18, %v1967_v56  ;;  %v4708_v43 = vshll.u32 %v10088_v28, %v4693_v21  ;;  %vm2151_vm8 = vcmp.lt.s32.totalorder %v7359_v9, 0 }
 0x2c0   : > { %vm2252_vm9 = vcmp.lt.s32.totalorder %v7612_v50, 0  ;;  %v2253_v44 = vsub.s32 0, %v7612_v50  ;;  %v7629_v56 = vor.u32 %v4697_v25, %v4696_v34  ;;  %v7631_v31 = vor.u32 %v4700_v42, %v4699_v58 }
 0x2c1   : > { %v1973_v48 = vadd.f32 1.0, %v1972_v39  ;;  %v1980_v37 = vadd.f32 1.0, %v1979_v6  ;;  %v7634_v52 = vor.u32 %v4703_v20, %v4702_v45  ;;  %v4707_v33 = vor.u32 %v4706_v5, %v4705_v57 }
 0x2c2   : > { %v2254_v63 = vsel %vm2252_vm9, %v2253_v44, %v7612_v50  ;;  %v4710_v27 = vor.u32 %v4709_v16, %v4708_v43  ;;  %v3098_v21 = vmul.f32 %v7597_v51, %v6246_v55  ;;  %v2273_v12 = vsub.s32 4, %v7593_v36 }
 0x2c3   : > { %v1981_v14 = vmul.f32 %v1980_v37, %v1965_v3  ;;  %v1990_v26 = vxor.u32 2147483648, %v1973_v48  ;;  %v2255_v41 = vclz %v2254_v63  ;;  %vm4711_vm6 = vcmp.lt.s32.totalorder %v7601_v30, 1 }
 0x2c4   : > { %vm4712_vm12 = vcmp.lt.s32.totalorder %v7601_v30, 2  ;;  %vm4713_vm4 = vcmp.lt.s32.totalorder %v7601_v30, 3  ;;  %vm4714_vm13 = vcmp.lt.s32.totalorder %v7601_v30, 4  ;;  %v4719_v3 = vsel %vm4711_vm6, %v7629_v56, %v7631_v31 }
 0x2c5   : > { %v1987_v29 = vxor.u32 2147483648, %v1981_v14  ;;  %v1991_v34 = vsel %vm1989_vm7, %v1990_v26, %v1981_v14  ;;  %v5785_v35 = vadd.s32 4294967294, %v2255_v41  ;;  %v4720_v18 = vsel %vm4714_vm13, %v4707_v33, 920167782 }
 0x2c6   : > { %v4723_v25 = vsel %vm4711_vm6, %v7631_v31, %v7634_v52  ;;  %v4724_v42 = vsel %vm4714_vm13, %v4710_v27, 1326507024  ;;  %v4721_v5 = vsel %vm4713_vm4, %v7634_v52, %v4720_v18  ;;  %v2274_v24 = vsel %vm2151_vm8, %v2273_v12, %v7593_v36 }
 0x2c7   : > { %v1988_v20 = vsel %vm1986_vm10, %v1973_v48, %v1987_v29  ;;  %vm5786_vm14 = vcmp.lt.s32.totalorder %v5785_v35, 0  ;;  %v4725_v16 = vsel %vm4713_vm4, %v4707_v33, %v4724_v42  ;;  %v4722_v58 = vsel %vm4712_vm12, %v4719_v3, %v4721_v5 }
 0x2c8   : > { %v1992_v39 = vsel %vm1985_vm11, %v1988_v20, %v1991_v34  ;;  %v2258_v6 = vsel %vm5786_vm14, 0, %v5785_v35  ;;  %v4726_v45 = vsel %vm4712_vm12, %v4723_v25, %v4725_v16  ;;  %v4729_v48 = vshrl.u32 %v7588_v13, 16 }
 0x2c9   : > { %v1993_v44 = vsel %vm1982_vm15, nan, %v1992_v39  ;;  %v2259_v57 = vsub.s32 32, %v2258_v6  ;;  %v2263_v43 = vsub.s32 4294967266, %v2258_v6  ;;  %v4730_v37 = vand.u32 65535, %v4726_v45 }
 0x2ca   : > { %3087 = vst [vmem:[%s6642_s12 + $0x40] sm:$0xff] %v1993_v44  ;;  %v4731_v63 = vshrl.u32 %v4726_v45, 16  ;;  %v4753_v33 = vshrl.u32 %v4722_v58, 16  ;;  %v2260_v27 = vshll.u32 %v7612_v50, %v2258_v6  ;;  %v4752_v41 = vand.u32 65535, %v4722_v58 }
 0x2cb   : > { %v2261_v14 = vshrl.u32 %v7595_v8, %v2259_v57  ;;  %v2264_v26 = vadd.s32 127, %v2263_v43  ;;  %v10117_v15 = vand.u32 2147483647, %v7359_v9  ;;  %v4734_v35 = vmul.u32 %v4730_v37, %v4729_v48 }
 0x2cc   : > { %v4733_v34 = vmul.u32 %v4731_v63, %v7605_v17  ;;  %v7687_v36 = vadd.f32 %v3098_v21, %v6261_v62  ;;  %v4695_v50 = vshrl.u32 %v10078_v40, %v7591_v19  ;;  %v4755_v8 = vmul.u32 %v4753_v33, %v7605_v17 }
 0x2cd   : > { %vm7681_vm7 = vcmp.le.f32.partialorder %v10117_v15, 0.7853982  ;;  %v2262_v12 = vor.u32 %v2261_v14, %v2260_v27  ;;  %v2265_v3 = vshll.u32 %v2264_v26, 23  ;;  %v4732_v25 = vmul.u32 %v4730_v37, %v7605_v17 }
 0x2ce   : > { %v2276_v18 = vsel %vm7681_vm7, 0, %v2274_v24  ;;  %v4735_v42 = vmul.u32 %v4731_v63, %v4729_v48  ;;  %v4736_v20 = vshll.u32 %v4733_v34, 16  ;;  %v4738_v16 = vshll.u32 %v4734_v35, 16 }
 0x2cf   : > { %v2266_v5 = vor.u32 4788187, %v2265_v3  ;;  %v4754_v39 = vmul.u32 %v4752_v41, %v7605_v17  ;;  %v4756_v21 = vmul.u32 %v4752_v41, %v4729_v48  ;;  %v2269_v6 = vcvt.s32.f32 %v2262_v12 }
 0x2d0   : > { %vm4740_vm10 = vc.u32 %v4732_v25, %v4736_v20  ;;  %v4742_v58 = vadd.s32 %v4736_v20, %v4732_v25  ;;  %v4758_v45 = vshll.u32 %v4755_v8, 16  ;;  %v4757_v57 = vmul.u32 %v4753_v33, %v4729_v48 }
 0x2d1   : > { %v2267_v44 = vand.u32 2147483647, %v2266_v5  ;;  %v4741_v19 = vsel %vm4740_vm10, 1, %v10109_v32  ;;  %v4760_v43 = vshll.u32 %v4756_v21, 16  ;;  %v4716_v63 = vsel %vm4714_vm13, %v7634_v52, 2102212464 }
 0x2d2   : > { %v4743_v27 = vadd.s32 %v4741_v19, %v4735_v42  ;;  %vm4744_vm11 = vc.u32 %v4742_v58, %v4738_v16  ;;  %vm4762_vm15 = vc.u32 %v4754_v39, %v4758_v45  ;;  %v4764_v24 = vadd.s32 %v4758_v45, %v4754_v39 }
 0x2d3   : > { %v2270_v37 = vmul.f32 %v2269_v6, %v2267_v44  ;;  %v4745_v17 = vsel %vm4744_vm11, 1, %v10109_v32  ;;  %v4763_v14 = vsel %vm4762_vm15, 1, %v10109_v32  ;;  %v4737_v26 = vshrl.u32 %v4733_v34, 16 }
 0x2d4   : > { %v4747_v41 = vadd.s32 %v4745_v17, %v4743_v27  ;;  %v4765_v15 = vadd.s32 %v4763_v14, %v4757_v57  ;;  %vm4766_vm9 = vc.u32 %v4764_v24, %v4760_v43  ;;  %v4715_v48 = vsel %vm4711_vm6, %v4695_v50, %v7629_v56 }
 0x2d5   : > { %v2271_v12 = vxor.u32 2147483648, %v2270_v37  ;;  %v4739_v33 = vshrl.u32 %v4734_v35, 16  ;;  %v4767_v3 = vsel %vm4766_vm9, 1, %v10109_v32  ;;  %v4759_v42 = vshrl.u32 %v4755_v8, 16 }
 0x2d6   : > { %v4748_v25 = vadd.s32 %v4747_v41, %v4737_v26  ;;  %v4769_v20 = vadd.s32 %v4767_v3, %v4765_v15  ;;  %v3287_v52 = vand.u32 2139095040, %v7687_v36  ;;  %v4717_v34 = vsel %vm4713_vm4, %v7631_v31, %v4716_v63 }
 0x2d7   : > { %v2272_v5 = vsel %vm2151_vm8, %v2271_v12, %v2270_v37  ;;  %v4761_v16 = vshrl.u32 %v4756_v21, 16  ;;  %v10065_v39 = vand.u32 2147483647, %v7687_v36  ;;  %v4768_v58 = vadd.s32 %v4764_v24, %v4760_v43 }
 0x2d8   : > { %v2275_v56 = vsel %vm7681_vm7, %v7359_v9, %v2272_v5  ;;  %v7716_v35 = vadd.s32 %v4748_v25, %v4739_v33  ;;  %v4770_v50 = vadd.s32 %v4769_v20, %v4759_v42  ;;  %v3288_v8 = vshrl.u32 %v3287_v52, 23 }
 0x2d9   : > { %v2277_v6 = vmul.f32 %v2275_v56, %v2275_v56  ;;  %v2293_v45 = vadd.s32 3, %v2276_v18  ;;  %v4718_v44 = vsel %vm4712_vm12, %v4715_v48, %v4717_v34  ;;  %v3291_v29 = vand.u32 8388607, %v10065_v39 }
 0x2da   : > { %v4771_v19 = vadd.s32 %v4770_v50, %v4761_v16  ;;  %v5805_v57 = vadd.s32 4294967169, %v3288_v8  ;;  %vm4774_vm8 = vc.u32 %v7716_v35, %v4768_v58  ;;  %v4772_v14 = vmul.u32 %v7588_v13, %v4718_v44 }
 0x2db   : > { %v2278_v31 = vmul.f32 -0.001358992, %v2277_v6  ;;  %v2285_v21 = vmul.f32 -0.00019511016, %v2277_v6  ;;  %v2294_v43 = vand.u32 3, %v2293_v45  ;;  %v3100_v30 = vmul.f32 %v7597_v51, %v6255_v59 }
 0x2dc   : > { %v4775_v27 = vadd.s32 1, %v4771_v19  ;;  %v3294_v37 = vadd.s32 1, %v5805_v57  ;;  %v3292_v12 = vor.u32 8388608, %v3291_v29  ;;  %vm2292_vm13 = vweird.f32 %v7359_v9 }
 0x2dd   : > { %v2279_v63 = vadd.f32 0.041655596, %v2278_v31  ;;  %v2286_v17 = vadd.f32 0.008332121, %v2285_v21  ;;  %v7727_v42 = vadd.f32 %v3100_v30, %v6259_v61  ;;  %vm2295_vm12 = vcmp.lt.s32.totalorder %v2294_v43, 2 }
 0x2de   : > { %v4776_v18 = vsel %vm4774_vm8, %v4775_v27, %v4771_v19  ;;  %vm3295_vm6 = vcmp.gt.s32.totalorder %v3294_v37, 0  ;;  %vm2296_vm4 = vcmp.eq.s32.totalorder %v2294_v43, 0  ;;  %v7740_v8 = vshll.u32 %v3292_v12, 8 }
 0x2df   : > { %v2280_v24 = vmul.f32 %v2279_v63, %v2277_v6  ;;  %v2287_v26 = vmul.f32 %v2286_v17, %v2277_v6  ;;  %v4777_v41 = vadd.s32 %v4776_v18, %v4772_v14  ;;  %v3296_v15 = vsel %vm3295_vm6, %v3294_v37, 0 }
 0x2e0   : > { %v3298_v48 = vand.u32 31, %v3296_v15  ;;  %v7734_v34 = vshrl.u32 %v3296_v15, 5  ;;  %vm2299_vm7 = vcmp.eq.s32.totalorder %v2294_v43, 2  ;;  %vm4681_vm10 = vcmp.lt.s32.totalorder %v7506_v2, 0 }
 0x2e1   : > { %v2281_v33 = vadd.f32 -0.4999988, %v2280_v24  ;;  %v2288_v3 = vadd.f32 -0.16666654, %v2287_v26  ;;  %v4778_v25 = vadd.s32 536870912, %v4777_v41  ;;  %v3333_v43 = vand.u32 65535, %v7740_v8 }
 0x2e2   : > { %v7729_v20 = vsub.s32 32, %v3298_v48  ;;  %v3301_v19 = vshll.u32 %v10078_v40, %v3298_v48  ;;  %v3304_v57 = vshll.u32 %v10082_v46, %v3298_v48  ;;  %v3310_v21 = vshll.u32 %v10087_v11, %v3298_v48 }
 0x2e3   : > { %v2282_v13 = vmul.f32 %v2281_v33, %v2277_v6  ;;  %v2289_v52 = vmul.f32 %v2288_v3, %v2277_v6  ;;  %v7731_v5 = vshrl.u32 %v4778_v25, 30  ;;  %v3307_v17 = vshll.u32 %v10083_v4, %v3298_v48 }
 0x2e4   : > { %v3302_v16 = vshrl.u32 %v10082_v46, %v7729_v20  ;;  %v3305_v50 = vshrl.u32 %v10083_v4, %v7729_v20  ;;  %v3308_v31 = vshrl.u32 %v10087_v11, %v7729_v20  ;;  %v3311_v27 = vshrl.u32 %v10088_v28, %v7729_v20 }
 0x2e5   : > { %v2283_v45 = vadd.f32 1.0, %v2282_v13  ;;  %v2290_v44 = vadd.f32 1.0, %v2289_v52  ;;  %v4780_v6 = vshll.u32 %v7731_v5, 30  ;;  %v3314_v24 = vshrl.u32 %v10092_v10, %v7729_v20 }
 0x2e6   : > { %v3303_v14 = vor.u32 %v3302_v16, %v3301_v19  ;;  %v7751_v18 = vor.u32 %v3305_v50, %v3304_v57  ;;  %v3312_v30 = vor.u32 %v3311_v27, %v3310_v21  ;;  %v3313_v12 = vshll.u32 %v10088_v28, %v3298_v48 }
 0x2e7   : > { %v2291_v29 = vmul.f32 %v2290_v44, %v2275_v56  ;;  %v2300_v37 = vxor.u32 2147483648, %v2283_v45  ;;  %v4781_v63 = vsub.s32 %v4777_v41, %v4780_v6  ;;  %v4773_v33 = vadd.s32 %v4768_v58, %v7716_v35 }
 0x2e8   : > { %v3309_v56 = vor.u32 %v3308_v31, %v3307_v17  ;;  %v3597_v41 = vand.u32 2139095040, %v7727_v42  ;;  %v3315_v52 = vor.u32 %v3314_v24, %v3313_v12  ;;  %vm3316_vm11 = vcmp.lt.s32.totalorder %v7734_v34, 1 }
 0x2e9   : > { %v2297_v26 = vxor.u32 2147483648, %v2291_v29  ;;  %vm4782_vm14 = vcmp.lt.s32.totalorder %v4781_v63, 0  ;;  %v4783_v15 = vsub.s32 0, %v4781_v63  ;;  %v2301_v25 = vsel %vm2299_vm7, %v2300_v37, %v2291_v29 }
 0x2ea   : > { %vm3319_vm15 = vcmp.lt.s32.totalorder %v7734_v34, 4  ;;  %v3324_v58 = vsel %vm3316_vm11, %v3303_v14, %v7751_v18  ;;  %vm3318_vm9 = vcmp.lt.s32.totalorder %v7734_v34, 3  ;;  %v3334_v44 = vshrl.u32 %v7740_v8, 16 }
 0x2eb   : > { %v2298_v3 = vsel %vm2296_vm4, %v2283_v45, %v2297_v26  ;;  %v4784_v13 = vsel %vm4782_vm14, %v4783_v15, %v4781_v63  ;;  %v3325_v48 = vsel %vm3319_vm15, %v3312_v30, 920167782  ;;  %v3598_v6 = vshrl.u32 %v3597_v41, 23 }
 0x2ec   : > { %v2302_v16 = vsel %vm2295_vm12, %v2298_v3, %v2301_v25  ;;  %v4785_v50 = vclz %v4784_v13  ;;  %vm3317_vm8 = vcmp.lt.s32.totalorder %v7734_v34, 2  ;;  %v3326_v9 = vsel %vm3318_vm9, %v3309_v56, %v3325_v48 }
 0x2ed   : > { %v2303_v35 = vsel %vm2292_vm13, nan, %v2302_v16  ;;  %v3328_v19 = vsel %vm3316_vm11, %v7751_v18, %v3309_v56  ;;  %v3329_v57 = vsel %vm3319_vm15, %v3315_v52, 1326507024  ;;  %v4803_v31 = vsub.s32 4, %v7731_v5 }
 0x2ee   : > { %3089 = vst [vmem:[%s6642_s12 + $0x50] sm:$0xff] %v2303_v35  ;;  %v5833_v45 = vadd.s32 4294967294, %v4785_v50  ;;  %v3327_v21 = vsel %vm3317_vm8, %v3324_v58, %v3326_v9  ;;  %v3330_v27 = vsel %vm3318_vm9, %v3312_v30, %v3329_v57  ;;  %v5811_v41 = vadd.s32 4294967169, %v3598_v6 }
 0x2ef   : > { %v3331_v37 = vsel %vm3317_vm8, %v3328_v19, %v3330_v27  ;;  %v3357_v17 = vand.u32 65535, %v3327_v21  ;;  %v3358_v24 = vshrl.u32 %v3327_v21, 16  ;;  %v3300_v25 = vshrl.u32 %v10078_v40, %v7729_v20 }
 0x2f0   : > { %vm5834_vm6 = vcmp.lt.s32.totalorder %v5833_v45, 0  ;;  %v3335_v12 = vand.u32 65535, %v3331_v37  ;;  %v3336_v13 = vshrl.u32 %v3331_v37, 16  ;;  %v4804_v58 = vsel %vm4681_vm10, %v4803_v31, %v7731_v5 }
 0x2f1   : > { %v4788_v29 = vsel %vm5834_vm6, 0, %v5833_v45  ;;  %v3360_v52 = vmul.u32 %v3358_v24, %v3333_v43  ;;  %v3361_v30 = vmul.u32 %v3357_v17, %v3334_v44  ;;  %v3320_v48 = vsel %vm3316_vm11, %v3300_v25, %v3303_v14 }
 0x2f2   : > { %v4789_v26 = vsub.s32 32, %v4788_v29  ;;  %v4793_v15 = vsub.s32 4294967266, %v4788_v29  ;;  %v4790_v3 = vshll.u32 %v4781_v63, %v4788_v29  ;;  %v3339_v35 = vmul.u32 %v3335_v12, %v3334_v44 }
 0x2f3   : > { %v3338_v45 = vmul.u32 %v3336_v13, %v3333_v43  ;;  %v3363_v9 = vshll.u32 %v3360_v52, 16  ;;  %v3321_v20 = vsel %vm3319_vm15, %v3309_v56, 2102212464  ;;  %v3359_v19 = vmul.u32 %v3357_v17, %v3333_v43 }
 0x2f4   : > { %v4791_v16 = vshrl.u32 %v4773_v33, %v4789_v26  ;;  %v4794_v50 = vadd.s32 127, %v4793_v15  ;;  %v10120_v33 = vand.u32 2147483647, %v7506_v2  ;;  %v3337_v21 = vmul.u32 %v3335_v12, %v3333_v43 }
 0x2f5   : > { %v3340_v27 = vmul.u32 %v3336_v13, %v3334_v44  ;;  %v3341_v5 = vshll.u32 %v3338_v45, 16  ;;  %v3362_v31 = vmul.u32 %v3358_v24, %v3334_v44  ;;  %v3343_v14 = vshll.u32 %v3339_v35, 16 }
 0x2f6   : > { %v4792_v6 = vor.u32 %v4791_v16, %v4790_v3  ;;  %v4795_v63 = vshll.u32 %v4794_v50, 23  ;;  %vm7800_vm12 = vcmp.le.f32.partialorder %v10120_v33, 0.7853982  ;;  %v3365_v37 = vshll.u32 %v3361_v30, 16 }
 0x2f7   : > { %vm3367_vm4 = vc.u32 %v3359_v19, %v3363_v9  ;;  %vm3345_vm13 = vc.u32 %v3337_v21, %v3341_v5  ;;  %v3347_v26 = vadd.s32 %v3341_v5, %v3337_v21  ;;  %v3369_v56 = vadd.s32 %v3363_v9, %v3359_v19 }
 0x2f8   : > { %v4796_v29 = vor.u32 4788187, %v4795_v63  ;;  %v3368_v15 = vsel %vm3367_vm4, 1, %v10109_v32  ;;  %v4799_v3 = vcvt.s32.f32 %v4792_v6  ;;  %v3346_v25 = vsel %vm3345_vm13, 1, %v10109_v32 }
 0x2f9   : > { %v3370_v16 = vadd.s32 %v3368_v15, %v3362_v31  ;;  %v3322_v43 = vsel %vm3318_vm9, %v7751_v18, %v3321_v20  ;;  %v3348_v12 = vadd.s32 %v3346_v25, %v3340_v27  ;;  %vm3349_vm14 = vc.u32 %v3347_v26, %v3343_v14 }
 0x2fa   : > { %v4797_v17 = vand.u32 2147483647, %v4796_v29  ;;  %vm3371_vm7 = vc.u32 %v3369_v56, %v3365_v37  ;;  %v3350_v24 = vsel %vm3349_vm14, 1, %v10109_v32  ;;  %v3604_v50 = vadd.s32 1, %v5811_v41 }
 0x2fb   : > { %v3372_v13 = vsel %vm3371_vm7, 1, %v10109_v32  ;;  %v3342_v63 = vshrl.u32 %v3338_v45, 16  ;;  %v3352_v9 = vadd.s32 %v3350_v24, %v3348_v12  ;;  %v3364_v19 = vshrl.u32 %v3360_v52, 16 }
 0x2fc   : > { %v4800_v44 = vmul.f32 %v4799_v3, %v4797_v17  ;;  %v3374_v6 = vadd.s32 %v3372_v13, %v3370_v16  ;;  %v3344_v21 = vshrl.u32 %v3339_v35, 16  ;;  %v10064_v5 = vand.u32 2147483647, %v7727_v42 }
 0x2fd   : > { %vm3605_vm11 = vcmp.gt.s32.totalorder %v3604_v50, 0  ;;  %v3353_v31 = vadd.s32 %v3352_v9, %v3342_v63  ;;  %v3366_v18 = vshrl.u32 %v3361_v30, 16  ;;  %v4806_v14 = vsel %vm7800_vm12, 0, %v4804_v58 }
 0x2fe   : > { %v4801_v33 = vxor.u32 2147483648, %v4800_v44  ;;  %v3375_v20 = vadd.s32 %v3374_v6, %v3364_v19  ;;  %v3606_v27 = vsel %vm3605_vm11, %v3604_v50, 0  ;;  %v3323_v41 = vsel %vm3317_vm8, %v3320_v48, %v3322_v43 }
 0x2ff   : > { %v3608_v52 = vand.u32 31, %v3606_v27  ;;  %v7821_v45 = vadd.s32 %v3353_v31, %v3344_v21  ;;  %v7823_v26 = vadd.s32 %v3369_v56, %v3365_v37  ;;  %v3601_v17 = vand.u32 8388607, %v10064_v5 }
 0x300   : > { %v4802_v29 = vsel %vm4681_vm10, %v4801_v33, %v4800_v44  ;;  %v3376_v30 = vadd.s32 %v3375_v20, %v3366_v18  ;;  %v4823_v58 = vadd.s32 3, %v4806_v14  ;;  %v3377_v34 = vmul.u32 %v7740_v8, %v3323_v41 }
 0x301   : > { %v4805_v35 = vsel %vm7800_vm12, %v7506_v2, %v4802_v29  ;;  %v7827_v3 = vsub.s32 32, %v3608_v52  ;;  %vm3379_vm10 = vc.u32 %v7821_v45, %v7823_v26  ;;  %v7832_v16 = vshrl.u32 %v3606_v27, 5 }
 0x302   : > { %v4807_v15 = vmul.f32 %v4805_v35, %v4805_v35  ;;  %v3380_v48 = vadd.s32 1, %v3376_v30  ;;  %v3611_v37 = vshll.u32 %v10078_v40, %v3608_v52  ;;  %v3614_v50 = vshll.u32 %v10082_v46, %v3608_v52 }
 0x303   : > { %v3612_v43 = vshrl.u32 %v10082_v46, %v7827_v3  ;;  %v3615_v12 = vshrl.u32 %v10083_v4, %v7827_v3  ;;  %v3618_v8 = vshrl.u32 %v10087_v11, %v7827_v3  ;;  %v3617_v63 = vshll.u32 %v10083_v4, %v3608_v52 }
 0x304   : > { %v4808_v57 = vmul.f32 -0.001358992, %v4807_v15  ;;  %v4815_v25 = vmul.f32 -0.00019511016, %v4807_v15  ;;  %v3381_v56 = vsel %vm3379_vm10, %v3380_v48, %v3376_v30  ;;  %v3620_v9 = vshll.u32 %v10087_v11, %v3608_v52 }
 0x305   : > { %v3382_v13 = vadd.s32 %v3381_v56, %v3377_v34  ;;  %v3621_v19 = vshrl.u32 %v10088_v28, %v7827_v3  ;;  %v3623_v6 = vshll.u32 %v10088_v28, %v3608_v52  ;;  %v3624_v18 = vshrl.u32 %v10092_v10, %v7827_v3 }
 0x306   : > { %v4809_v44 = vadd.f32 0.041655596, %v4808_v57  ;;  %v4816_v24 = vadd.f32 0.008332121, %v4815_v25  ;;  %v7849_v20 = vor.u32 %v3612_v43, %v3611_v37  ;;  %v7851_v27 = vor.u32 %v3615_v12, %v3614_v50 }
 0x307   : > { %v3383_v31 = vadd.s32 536870912, %v3382_v13  ;;  %v7853_v29 = vor.u32 %v3618_v8, %v3617_v63  ;;  %v3622_v14 = vor.u32 %v3621_v19, %v3620_v9  ;;  %v3625_v48 = vor.u32 %v3624_v18, %v3623_v6 }
 0x308   : > { %v4810_v33 = vmul.f32 %v4809_v44, %v4807_v15  ;;  %v4817_v21 = vmul.f32 %v4816_v24, %v4807_v15  ;;  %v4824_v57 = vand.u32 3, %v4823_v58  ;;  %v3102_v52 = vmul.f32 %v7597_v51, %v6232_v49 }
 0x309   : > { %v7855_v34 = vshrl.u32 %v3383_v31, 30  ;;  %v3602_v25 = vor.u32 8388608, %v3601_v17  ;;  %vm3626_vm15 = vcmp.lt.s32.totalorder %v7832_v16, 1  ;;  %vm3629_vm9 = vcmp.lt.s32.totalorder %v7832_v16, 4 }
 0x30a   : > { %v4811_v41 = vadd.f32 -0.4999988, %v4810_v33  ;;  %v4818_v30 = vadd.f32 -0.16666654, %v4817_v21  ;;  %vm4822_vm8 = vweird.f32 %v7506_v2  ;;  %vm3628_vm6 = vcmp.lt.s32.totalorder %v7832_v16, 3 }
 0x30b   : > { %v3385_v43 = vshll.u32 %v7855_v34, 30  ;;  %v3634_v58 = vsel %vm3626_vm15, %v7849_v20, %v7851_v27  ;;  %v3635_v17 = vsel %vm3629_vm9, %v3622_v14, 920167782  ;;  %v3639_v12 = vsel %vm3629_vm9, %v3625_v48, 1326507024 }
 0x30c   : > { %v4812_v56 = vmul.f32 %v4811_v41, %v4807_v15  ;;  %v4819_v37 = vmul.f32 %v4818_v30, %v4807_v15  ;;  %v3638_v24 = vsel %vm3626_vm15, %v7851_v27, %v7853_v29  ;;  %vm3627_vm12 = vcmp.lt.s32.totalorder %v7832_v16, 2 }
 0x30d   : > { %v3386_v44 = vsub.s32 %v3382_v13, %v3385_v43  ;;  %v3636_v50 = vsel %vm3628_vm6, %v7853_v29, %v3635_v17  ;;  %v3640_v63 = vsel %vm3628_vm6, %v3622_v14, %v3639_v12  ;;  %v7882_v9 = vshll.u32 %v3602_v25, 8 }
 0x30e   : > { %v4813_v15 = vadd.f32 1.0, %v4812_v56  ;;  %v4820_v8 = vadd.f32 1.0, %v4819_v37  ;;  %vm4825_vm13 = vcmp.lt.s32.totalorder %v4824_v57, 2  ;;  %v7885_v33 = vadd.f32 %v3102_v52, %v6257_v60 }
 0x30f   : > { %vm3387_vm4 = vcmp.lt.s32.totalorder %v3386_v44, 0  ;;  %v3388_v13 = vsub.s32 0, %v3386_v44  ;;  %v3637_v21 = vsel %vm3627_vm12, %v3634_v58, %v3636_v50  ;;  %v3641_v31 = vsel %vm3627_vm12, %v3638_v24, %v3640_v63 }
 0x310   : > { %v4821_v19 = vmul.f32 %v4820_v8, %v4805_v35  ;;  %v4830_v6 = vxor.u32 2147483648, %v4813_v15  ;;  %vm4826_vm14 = vcmp.eq.s32.totalorder %v4824_v57, 0  ;;  %v3645_v14 = vand.u32 65535, %v3641_v31 }
 0x311   : > { %v3389_v41 = vsel %vm3387_vm4, %v3388_v13, %v3386_v44  ;;  %vm4829_vm7 = vcmp.eq.s32.totalorder %v4824_v57, 2  ;;  %v3644_v30 = vshrl.u32 %v7882_v9, 16  ;;  %v3646_v48 = vshrl.u32 %v3641_v31, 16 }
 0x312   : > { %v4827_v18 = vxor.u32 2147483648, %v4821_v19  ;;  %v3390_v35 = vclz %v3389_v41  ;;  %v4831_v56 = vsel %vm4829_vm7, %v4830_v6, %v4821_v19  ;;  %v3643_v52 = vand.u32 65535, %v7882_v9 }
 0x313   : > { %v3668_v37 = vshrl.u32 %v3637_v21, 16  ;;  %v3649_v17 = vmul.u32 %v3645_v14, %v3644_v30  ;;  %v3667_v12 = vand.u32 65535, %v3637_v21  ;;  %v3104_v24 = vmul.f32 %v7597_v51, %v6244_v54 }
 0x314   : > { %v4828_v25 = vsel %vm4826_vm14, %v4813_v15, %v4827_v18  ;;  %v5806_v58 = vadd.s32 4294967294, %v3390_v35  ;;  %v3648_v50 = vmul.u32 %v3646_v48, %v3643_v52  ;;  %v3378_v15 = vadd.s32 %v7823_v26, %v7821_v45 }
 0x315   : > { %v4832_v43 = vsel %vm4825_vm13, %v4828_v25, %v4831_v56  ;;  %v3408_v57 = vsub.s32 4, %v7855_v34  ;;  %v3647_v19 = vmul.u32 %v3645_v14, %v3643_v52  ;;  %v3650_v13 = vmul.u32 %v3646_v48, %v3644_v30 }
 0x316   : > { %v4833_v8 = vsel %vm4822_vm8, nan, %v4832_v43  ;;  %vm5807_vm11 = vcmp.lt.s32.totalorder %v5806_v58, 0  ;;  %v3651_v21 = vshll.u32 %v3648_v50, 16  ;;  %v3670_v31 = vmul.u32 %v3668_v37, %v3643_v52 }
 0x317   : > { %5619 = vst [vmem:[%s6642_s12 + $0xd0] sm:$0xff] %v4833_v8  ;;  %v3393_v6 = vsel %vm5807_vm11, 0, %v5806_v58  ;;  %vm3286_vm10 = vcmp.lt.s32.totalorder %v7687_v36, 0  ;;  %v3653_v41 = vshll.u32 %v3649_v17, 16  ;;  %v3669_v35 = vmul.u32 %v3667_v12, %v3643_v52 }
 0x318   : > { %v3394_v2 = vsub.s32 32, %v3393_v6  ;;  %v3398_v18 = vsub.s32 4294967266, %v3393_v6  ;;  %vm3655_vm8 = vc.u32 %v3647_v19, %v3651_v21  ;;  %v3657_v25 = vadd.s32 %v3651_v21, %v3647_v19 }
 0x319   : > { %v3671_v56 = vmul.u32 %v3667_v12, %v3644_v30  ;;  %v3673_v43 = vshll.u32 %v3670_v31, 16  ;;  %v3395_v8 = vshll.u32 %v3386_v44, %v3393_v6  ;;  %v3656_v5 = vsel %vm3655_vm8, 1, %v10109_v32 }
 0x31a   : > { %v3396_v45 = vshrl.u32 %v3378_v15, %v3394_v2  ;;  %v3399_v26 = vadd.s32 127, %v3398_v18  ;;  %v3652_v14 = vshrl.u32 %v3648_v50, 16  ;;  %v3658_v58 = vadd.s32 %v3656_v5, %v3650_v13 }
 0x31b   : > { %vm3659_vm4 = vc.u32 %v3657_v25, %v3653_v41  ;;  %v3672_v48 = vmul.u32 %v3668_v37, %v3644_v30  ;;  %vm3677_vm13 = vc.u32 %v3669_v35, %v3673_v43  ;;  %v3675_v52 = vshll.u32 %v3671_v56, 16 }
 0x31c   : > { %v3397_v63 = vor.u32 %v3396_v45, %v3395_v8  ;;  %v3400_v39 = vshll.u32 %v3399_v26, 23  ;;  %v3660_v38 = vsel %vm3659_vm4, 1, %v10109_v32  ;;  %v3678_v19 = vsel %vm3677_vm13, 1, %v10109_v32 }
 0x31d   : > { %v3662_v60 = vadd.s32 %v3660_v38, %v3658_v58  ;;  %v3679_v12 = vadd.s32 %v3673_v43, %v3669_v35  ;;  %v3610_v44 = vshrl.u32 %v10078_v40, %v7827_v3  ;;  %v3680_v15 = vadd.s32 %v3678_v19, %v3672_v48 }
 0x31e   : > { %v3401_v21 = vor.u32 4788187, %v3400_v39  ;;  %v3907_v50 = vand.u32 2139095040, %v7885_v33  ;;  %v3631_v5 = vsel %vm3629_vm9, %v7853_v29, 2102212464  ;;  %v3654_v30 = vshrl.u32 %v3649_v17, 16 }
 0x31f   : > { %v3663_v37 = vadd.s32 %v3662_v60, %v3652_v14  ;;  %vm3681_vm14 = vc.u32 %v3679_v12, %v3675_v52  ;;  %v3404_v38 = vcvt.s32.f32 %v3397_v63  ;;  %v3409_v39 = vsel %vm3286_vm10, %v3408_v57, %v7855_v34 }
 0x320   : > { %v3402_v6 = vand.u32 2147483647, %v3401_v21  ;;  %v3682_v13 = vsel %vm3681_vm14, 1, %v10109_v32  ;;  %v3908_v2 = vshrl.u32 %v3907_v50, 23  ;;  %v3630_v3 = vsel %vm3626_vm15, %v3610_v44, %v7849_v20 }
 0x321   : > { %v3674_v18 = vshrl.u32 %v3670_v31, 16  ;;  %v3684_v41 = vadd.s32 %v3682_v13, %v3680_v15  ;;  %v3632_v60 = vsel %vm3628_vm6, %v7851_v27, %v3631_v5  ;;  %v3664_v29 = vadd.s32 %v3663_v37, %v3654_v30 }
 0x322   : > { %v3405_v35 = vmul.f32 %v3404_v38, %v3402_v6  ;;  %v5817_v17 = vadd.s32 4294967169, %v3908_v2  ;;  %v7924_v63 = vadd.f32 %v3104_v24, %v6265_v1  ;;  %v10123_v25 = vand.u32 2147483647, %v7687_v36 }
 0x323   : > { %v3676_v34 = vshrl.u32 %v3671_v56, 16  ;;  %v3685_v57 = vadd.s32 %v3684_v41, %v3674_v18  ;;  %v3683_v20 = vadd.s32 %v3679_v12, %v3675_v52  ;;  %v3633_v45 = vsel %vm3627_vm12, %v3630_v3, %v3632_v60 }
 0x324   : > { %vm3285_vm9 = vcmp.le.f32.partialorder %v10123_v25, 0.7853982  ;;  %v3406_v43 = vxor.u32 2147483648, %v3405_v35  ;;  %v3914_v31 = vadd.s32 1, %v5817_v17  ;;  %v10124_v27 = vand.u32 2147483647, %v7885_v33 }
 0x325   : > { %v3411_v8 = vsel %vm3285_vm9, 0, %v3409_v39  ;;  %v3686_v26 = vadd.s32 %v3685_v57, %v3676_v34  ;;  %vm3689_vm15 = vc.u32 %v3664_v29, %v3683_v20  ;;  %v3687_v16 = vmul.u32 %v7882_v9, %v3633_v45 }
 0x326   : > { %v3911_v14 = vand.u32 8388607, %v10124_v27  ;;  %v3407_v24 = vsel %vm3286_vm10, %v3406_v43, %v3405_v35  ;;  %vm3915_vm6 = vcmp.gt.s32.totalorder %v3914_v31, 0  ;;  %v3428_v56 = vadd.s32 3, %v3411_v8 }
 0x327   : > { %v7935_v58 = vsel %vm3285_vm9, %v7687_v36, %v3407_v24  ;;  %v3690_v48 = vadd.s32 1, %v3686_v26  ;;  %v3916_v19 = vsel %vm3915_vm6, %v3914_v31, 0  ;;  %v4217_v21 = vand.u32 2139095040, %v7924_v63 }
 0x328   : > { %v3412_v52 = vmul.f32 %v7935_v58, %v7935_v58  ;;  %v3918_v12 = vand.u32 31, %v3916_v19  ;;  %v3912_v15 = vor.u32 8388608, %v3911_v14  ;;  %v7943_v6 = vand.u32 3, %v3428_v56 }
 0x329   : > { %v3691_v44 = vsel %vm3689_vm15, %v3690_v48, %v3686_v26  ;;  %v7945_v38 = vadd.s32 %v3683_v20, %v3664_v29  ;;  %v4214_v13 = vand.u32 2147483647, %v7924_v63  ;;  %v4218_v9 = vshrl.u32 %v4217_v21, 23 }
 0x32a   : > { %v3413_v50 = vmul.f32 -0.001358992, %v3412_v52  ;;  %v3420_v5 = vmul.f32 -0.00019511016, %v3412_v52  ;;  %v3692_v30 = vadd.s32 %v3691_v44, %v3687_v16  ;;  %v7941_v37 = vsub.s32 32, %v3918_v12 }
 0x32b   : > { %v7954_v60 = vshll.u32 %v3912_v15, 8  ;;  %v7956_v34 = vshrl.u32 %v3916_v19, 5  ;;  %v3921_v57 = vshll.u32 %v10078_v40, %v3918_v12  ;;  %v3924_v43 = vshll.u32 %v10082_v46, %v3918_v12 }
 0x32c   : > { %v3414_v2 = vadd.f32 0.041655596, %v3413_v50  ;;  %v3421_v39 = vadd.f32 0.008332121, %v3420_v5  ;;  %v3693_v3 = vadd.s32 536870912, %v3692_v30  ;;  %v3922_v18 = vshrl.u32 %v10082_v46, %v7941_v37 }
 0x32d   : > { %v3925_v41 = vshrl.u32 %v10083_v4, %v7941_v37  ;;  %v3931_v35 = vshrl.u32 %v10088_v28, %v7941_v37  ;;  %v3928_v8 = vshrl.u32 %v10087_v11, %v7941_v37  ;;  %v3930_v20 = vshll.u32 %v10087_v11, %v3918_v12 }
 0x32e   : > { %v3415_v17 = vmul.f32 %v3414_v2, %v3412_v52  ;;  %v3422_v29 = vmul.f32 %v3421_v39, %v3412_v52  ;;  %v3694_v25 = vshrl.u32 %v3693_v3, 30  ;;  %vm3434_vm12 = vcmp.eq.s32.totalorder %v7943_v6, 2 }
 0x32f   : > { %vm3596_vm7 = vcmp.lt.s32.totalorder %v7727_v42, 0  ;;  %v5823_v27 = vadd.s32 4294967169, %v4218_v9  ;;  %vm3431_vm11 = vcmp.eq.s32.totalorder %v7943_v6, 0  ;;  %v3923_v14 = vor.u32 %v3922_v18, %v3921_v57 }
 0x330   : > { %v3416_v31 = vadd.f32 -0.4999988, %v3415_v17  ;;  %v3423_v45 = vadd.f32 -0.16666654, %v3422_v29  ;;  %v3695_v26 = vshll.u32 %v3694_v25, 30  ;;  %v7966_v24 = vor.u32 %v3925_v41, %v3924_v43 }
 0x331   : > { %v3927_v56 = vshll.u32 %v10083_v4, %v3918_v12  ;;  %v3932_v48 = vor.u32 %v3931_v35, %v3930_v20  ;;  %vm3430_vm10 = vcmp.lt.s32.totalorder %v7943_v6, 2  ;;  %v3934_v44 = vshrl.u32 %v10092_v10, %v7941_v37 }
 0x332   : > { %v3417_v19 = vmul.f32 %v3416_v31, %v3412_v52  ;;  %v3424_v16 = vmul.f32 %v3423_v45, %v3412_v52  ;;  %v3696_v21 = vsub.s32 %v3692_v30, %v3695_v26  ;;  %vm3427_vm8 = vweird.f32 %v7687_v36 }
 0x333   : > { %v10125_v15 = vand.u32 2147483647, %v7727_v42  ;;  %v3929_v5 = vor.u32 %v3928_v8, %v3927_v56  ;;  %v3933_v2 = vshll.u32 %v10088_v28, %v3918_v12  ;;  %vm3936_vm13 = vcmp.lt.s32.totalorder %v7956_v34, 1 }
 0x334   : > { %vm3939_vm14 = vcmp.lt.s32.totalorder %v7956_v34, 4  ;;  %v3418_v52 = vadd.f32 1.0, %v3417_v19  ;;  %v3425_v30 = vadd.f32 1.0, %v3424_v16  ;;  %vm3697_vm9 = vcmp.lt.s32.totalorder %v3696_v21, 0 }
 0x335   : > { %vm7975_vm4 = vcmp.le.f32.partialorder %v10125_v15, 0.7853982  ;;  %v3698_v39 = vsub.s32 0, %v3696_v21  ;;  %v3718_v3 = vsub.s32 4, %v3694_v25  ;;  %vm3938_vm15 = vcmp.lt.s32.totalorder %v7956_v34, 3 }
 0x336   : > { %v3944_v9 = vsel %vm3936_vm13, %v3923_v14, %v7966_v24  ;;  %v3945_v18 = vsel %vm3939_vm14, %v3932_v48, 920167782  ;;  %v3426_v12 = vmul.f32 %v3425_v30, %v7935_v58  ;;  %v3435_v41 = vxor.u32 2147483648, %v3418_v52 }
 0x337   : > { %v3699_v35 = vsel %vm3697_vm9, %v3698_v39, %v3696_v21  ;;  %v3935_v17 = vor.u32 %v3934_v44, %v3933_v2  ;;  %vm3937_vm6 = vcmp.lt.s32.totalorder %v7956_v34, 2  ;;  %v3946_v57 = vsel %vm3938_vm15, %v3929_v5, %v3945_v18 }
 0x338   : > { %v3700_v29 = vclz %v3699_v35  ;;  %v3953_v43 = vand.u32 65535, %v7954_v60  ;;  %v3432_v8 = vxor.u32 2147483648, %v3426_v12  ;;  %v3947_v20 = vsel %vm3937_vm6, %v3944_v9, %v3946_v57 }
 0x339   : > { %v3954_v31 = vshrl.u32 %v7954_v60, 16  ;;  %v4224_v45 = vadd.s32 1, %v5823_v27  ;;  %v3436_v58 = vsel %vm3434_vm12, %v3435_v41, %v3426_v12  ;;  %v8000_v56 = vsel %vm3596_vm7, %v3718_v3, %v3694_v25 }
 0x33a   : > { %v5812_v26 = vadd.s32 4294967294, %v3700_v29  ;;  %v3948_v19 = vsel %vm3936_vm13, %v7966_v24, %v3929_v5  ;;  %v3433_v16 = vsel %vm3431_vm11, %v3418_v52, %v3432_v8  ;;  %v3949_v44 = vsel %vm3939_vm14, %v3935_v17, 1326507024 }
 0x33b   : > { %v3977_v27 = vand.u32 65535, %v3947_v20  ;;  %v3978_v15 = vshrl.u32 %v3947_v20, 16  ;;  %v3437_v2 = vsel %vm3430_vm10, %v3433_v16, %v3436_v58  ;;  %v3920_v25 = vshrl.u32 %v10078_v40, %v7941_v37 }
 0x33c   : > { %vm5813_vm12 = vcmp.lt.s32.totalorder %v5812_v26, 0  ;;  %v3950_v30 = vsel %vm3938_vm15, %v3932_v48, %v3949_v44  ;;  %v3438_v39 = vsel %vm3427_vm8, nan, %v3437_v2  ;;  %v3721_v3 = vsel %vm7975_vm4, 0, %v8000_v56 }
 0x33d   : > { %v3703_v52 = vsel %vm5813_vm12, 0, %v5812_v26  ;;  %v3951_v9 = vsel %vm3937_vm6, %v3948_v19, %v3950_v30  ;;  %v3941_v12 = vsel %vm3939_vm14, %v3929_v5, 2102212464  ;;  %5610 = vst [vmem:[%s6642_s12 + $0x88] sm:$0xff] %v3438_v39  ;;  %v3940_v48 = vsel %vm3936_vm13, %v3920_v25, %v3923_v14 }
 0x33e   : > { %v3704_v6 = vsub.s32 32, %v3703_v52  ;;  %v3708_v18 = vsub.s32 4294967266, %v3703_v52  ;;  %v3955_v37 = vand.u32 65535, %v3951_v9  ;;  %v3956_v36 = vshrl.u32 %v3951_v9, 16 }
 0x33f   : > { %v3980_v41 = vmul.u32 %v3978_v15, %v3953_v43  ;;  %v3981_v35 = vmul.u32 %v3977_v27, %v3954_v31  ;;  %v3705_v17 = vshll.u32 %v3696_v21, %v3703_v52  ;;  %v3942_v20 = vsel %vm3938_vm15, %v7966_v24, %v3941_v12 }
 0x340   : > { %v3706_v29 = vshrl.u32 %v7945_v38, %v3704_v6  ;;  %v3709_v57 = vadd.s32 127, %v3708_v18  ;;  %v3959_v8 = vmul.u32 %v3955_v37, %v3954_v31  ;;  %v3958_v58 = vmul.u32 %v3956_v36, %v3953_v43 }
 0x341   : > { %v3979_v26 = vmul.u32 %v3977_v27, %v3953_v43  ;;  %v3983_v5 = vshll.u32 %v3980_v41, 16  ;;  %v3957_v16 = vmul.u32 %v3955_v37, %v3953_v43  ;;  %v3982_v44 = vmul.u32 %v3978_v15, %v3954_v31 }
 0x342   : > { %v3707_v56 = vor.u32 %v3706_v29, %v3705_v17  ;;  %v3710_v19 = vshll.u32 %v3709_v57, 23  ;;  %v3960_v14 = vmul.u32 %v3956_v36, %v3954_v31  ;;  %v3961_v2 = vshll.u32 %v3958_v58, 16 }
 0x343   : > { %v3963_v25 = vshll.u32 %v3959_v8, 16  ;;  %v3985_v30 = vshll.u32 %v3981_v35, 16  ;;  %vm3987_vm11 = vc.u32 %v3979_v26, %v3983_v5  ;;  %v3989_v38 = vadd.s32 %v3983_v5, %v3979_v26 }
 0x344   : > { %v3711_v21 = vor.u32 4788187, %v3710_v19  ;;  %v3714_v39 = vcvt.s32.f32 %v3707_v56  ;;  %vm3965_vm10 = vc.u32 %v3957_v16, %v3961_v2  ;;  %v3967_v52 = vadd.s32 %v3961_v2, %v3957_v16 }
 0x345   : > { %v3988_v9 = vsel %vm3987_vm11, 1, %v10109_v32  ;;  %vm4225_vm8 = vcmp.gt.s32.totalorder %v4224_v45, 0  ;;  %v3966_v27 = vsel %vm3965_vm10, 1, %v10109_v32  ;;  %vm3991_vm13 = vc.u32 %v3989_v38, %v3985_v30 }
 0x346   : > { %v3712_v24 = vand.u32 2147483647, %v3711_v21  ;;  %v3990_v6 = vadd.s32 %v3988_v9, %v3982_v44  ;;  %v3968_v43 = vadd.s32 %v3966_v27, %v3960_v14  ;;  %vm3969_vm14 = vc.u32 %v3967_v52, %v3963_v25 }
 0x347   : > { %v3984_v31 = vshrl.u32 %v3980_v41, 16  ;;  %v3992_v15 = vsel %vm3991_vm13, 1, %v10109_v32  ;;  %v3970_v12 = vsel %vm3969_vm14, 1, %v10109_v32  ;;  %v4226_v36 = vsel %vm4225_vm8, %v4224_v45, 0 }
 0x348   : > { %v3715_v18 = vmul.f32 %v3714_v39, %v3712_v24  ;;  %v3994_v37 = vadd.s32 %v3992_v15, %v3990_v6  ;;  %v3943_v17 = vsel %vm3937_vm6, %v3940_v48, %v3942_v20  ;;  %v3962_v29 = vshrl.u32 %v3958_v58, 16 }
 0x349   : > { %v3972_v57 = vadd.s32 %v3970_v12, %v3968_v43  ;;  %v4228_v26 = vand.u32 31, %v4226_v36  ;;  %v8039_v5 = vmul.f32 %v7597_v51, %v6226_v47  ;;  %v3986_v19 = vshrl.u32 %v3981_v35, 16 }
 0x34a   : > { %v3716_v56 = vxor.u32 2147483648, %v3715_v18  ;;  %v3995_v41 = vadd.s32 %v3994_v37, %v3984_v31  ;;  %v3964_v16 = vshrl.u32 %v3959_v8, 16  ;;  %v4221_v14 = vand.u32 8388607, %v4214_v13 }
 0x34b   : > { %v3973_v44 = vadd.s32 %v3972_v57, %v3962_v29  ;;  %v8043_v2 = vsub.s32 32, %v4228_v26  ;;  %v3738_v45 = vadd.s32 3, %v3721_v3  ;;  %v3997_v20 = vmul.u32 %v7954_v60, %v3943_v17 }
 0x34c   : > { %v3717_v34 = vsel %vm3596_vm7, %v3716_v56, %v3715_v18  ;;  %v3996_v48 = vadd.s32 %v3995_v41, %v3986_v19  ;;  %v8053_v8 = vadd.s32 %v3989_v38, %v3985_v30  ;;  %v8055_v25 = vshrl.u32 %v4226_v36, 5 }
 0x34d   : > { %v3720_v58 = vsel %vm7975_vm4, %v7727_v42, %v3717_v34  ;;  %v8051_v35 = vadd.s32 %v3973_v44, %v3964_v16  ;;  %v4232_v52 = vshrl.u32 %v10082_v46, %v8043_v2  ;;  %v4240_v3 = vshll.u32 %v10087_v11, %v4228_v26 }
 0x34e   : > { %v3722_v21 = vmul.f32 %v3720_v58, %v3720_v58  ;;  %v4000_v39 = vadd.s32 1, %v3996_v48  ;;  %v4235_v60 = vshrl.u32 %v10083_v4, %v8043_v2  ;;  %v4238_v50 = vshrl.u32 %v10087_v11, %v8043_v2 }
 0x34f   : > { %vm3999_vm7 = vc.u32 %v8051_v35, %v8053_v8  ;;  %v4241_v30 = vshrl.u32 %v10088_v28, %v8043_v2  ;;  %v4231_v27 = vshll.u32 %v10078_v40, %v4228_v26  ;;  %v4234_v43 = vshll.u32 %v10082_v46, %v4228_v26 }
 0x350   : > { %v3723_v38 = vmul.f32 -0.001358992, %v3722_v21  ;;  %v3730_v9 = vmul.f32 -0.00019511016, %v3722_v21  ;;  %v4001_v24 = vsel %vm3999_vm7, %v4000_v39, %v3996_v48  ;;  %v4237_v31 = vshll.u32 %v10083_v4, %v4228_v26 }
 0x351   : > { %v4002_v6 = vadd.s32 %v4001_v24, %v3997_v20  ;;  %v4242_v15 = vor.u32 %v4241_v30, %v4240_v3  ;;  %v4243_v37 = vshll.u32 %v10088_v28, %v4228_v26  ;;  %v4244_v36 = vshrl.u32 %v10092_v10, %v8043_v2 }
 0x352   : > { %v3724_v18 = vadd.f32 0.041655596, %v3723_v38  ;;  %v3731_v12 = vadd.f32 0.008332121, %v3730_v9  ;;  %v8074_v29 = vor.u32 %v4232_v52, %v4231_v27  ;;  %v8076_v57 = vor.u32 %v4235_v60, %v4234_v43 }
 0x353   : > { %v4003_v17 = vadd.s32 536870912, %v4002_v6  ;;  %v8078_v56 = vor.u32 %v4238_v50, %v4237_v31  ;;  %v4245_v16 = vor.u32 %v4244_v36, %v4243_v37  ;;  %vm4249_vm4 = vcmp.lt.s32.totalorder %v8055_v25, 4 }
 0x354   : > { %v3725_v19 = vmul.f32 %v3724_v18, %v3722_v21  ;;  %v3732_v41 = vmul.f32 %v3731_v12, %v3722_v21  ;;  %v3108_v44 = vmul.f32 %v7597_v51, %v6242_v53  ;;  %v4222_v26 = vor.u32 8388608, %v4221_v14 }
 0x355   : > { %v8083_v34 = vshrl.u32 %v4003_v17, 30  ;;  %v4255_v48 = vsel %vm4249_vm4, %v4242_v15, 920167782  ;;  %vm4246_vm9 = vcmp.lt.s32.totalorder %v8055_v25, 1  ;;  %vm4248_vm15 = vcmp.lt.s32.totalorder %v8055_v25, 3 }
 0x356   : > { %v3726_v20 = vadd.f32 -0.4999988, %v3725_v19  ;;  %v3733_v39 = vadd.f32 -0.16666654, %v3732_v41  ;;  %v3739_v52 = vand.u32 3, %v3738_v45  ;;  %v4254_v60 = vsel %vm4246_vm9, %v8074_v29, %v8076_v57 }
 0x357   : > { %v4005_v3 = vshll.u32 %v8083_v34, 30  ;;  %v4256_v14 = vsel %vm4248_vm15, %v8078_v56, %v4255_v48  ;;  %v4258_v38 = vsel %vm4246_vm9, %v8076_v57, %v8078_v56  ;;  %v4259_v45 = vsel %vm4249_vm4, %v4245_v16, 1326507024 }
 0x358   : > { %v3727_v50 = vmul.f32 %v3726_v20, %v3722_v21  ;;  %v3734_v30 = vmul.f32 %v3733_v39, %v3722_v21  ;;  %vm4247_vm6 = vcmp.lt.s32.totalorder %v8055_v25, 2  ;;  %v4260_v24 = vsel %vm4248_vm15, %v4242_v15, %v4259_v45 }
 0x359   : > { %v4006_v9 = vsub.s32 %v4002_v6, %v4005_v3  ;;  %v8106_v27 = vshll.u32 %v4222_v26, 8  ;;  %v8110_v43 = vadd.f32 %v8039_v5, %v6263_v0  ;;  %v4261_v18 = vsel %vm4247_vm6, %v4258_v38, %v4260_v24 }
 0x35a   : > { %v3728_v21 = vadd.f32 1.0, %v3727_v50  ;;  %v3735_v31 = vadd.f32 1.0, %v3734_v30  ;;  %v8115_v12 = vadd.f32 %v3108_v44, %v7347_v7  ;;  %v4257_v37 = vsel %vm4247_vm6, %v4254_v60, %v4256_v14 }
 0x35b   : > { %vm4007_vm12 = vcmp.lt.s32.totalorder %v4006_v9, 0  ;;  %v4008_v6 = vsub.s32 0, %v4006_v9  ;;  %v4265_v17 = vand.u32 65535, %v4261_v18  ;;  %v4266_v19 = vshrl.u32 %v4261_v18, 16 }
 0x35c   : > { %v3736_v15 = vmul.f32 %v3735_v31, %v3720_v58  ;;  %v3745_v36 = vxor.u32 2147483648, %v3728_v21  ;;  %vm3737_vm11 = vweird.f32 %v7727_v42  ;;  %vm3740_vm10 = vcmp.lt.s32.totalorder %v3739_v52, 2 }
 0x35d   : > { %v4009_v5 = vsel %vm4007_vm12, %v4008_v6, %v4006_v9  ;;  %v4263_v41 = vand.u32 65535, %v8106_v27  ;;  %vm3741_vm8 = vcmp.eq.s32.totalorder %v3739_v52, 0  ;;  %v4264_v44 = vshrl.u32 %v8106_v27, 16 }
 0x35e   : > { %v3742_v16 = vxor.u32 2147483648, %v3736_v15  ;;  %v4010_v26 = vclz %v4009_v5  ;;  %vm3744_vm13 = vcmp.eq.s32.totalorder %v3739_v52, 2  ;;  %v4287_v20 = vand.u32 65535, %v4257_v37 }
 0x35f   : > { %v4268_v48 = vmul.u32 %v4266_v19, %v4263_v41  ;;  %v4288_v39 = vshrl.u32 %v4257_v37, 16  ;;  %v3746_v58 = vsel %vm3744_vm13, %v3745_v36, %v3736_v15  ;;  %v4269_v14 = vmul.u32 %v4265_v17, %v4264_v44 }
 0x360   : > { %v3743_v3 = vsel %vm3741_vm8, %v3728_v21, %v3742_v16  ;;  %v5818_v60 = vadd.s32 4294967294, %v4010_v26  ;;  %v3998_v30 = vadd.s32 %v8053_v8, %v8051_v35  ;;  %v4267_v38 = vmul.u32 %v4265_v17, %v4263_v41 }
 0x361   : > { %v3747_v50 = vsel %vm3740_vm10, %v3743_v3, %v3746_v58  ;;  %v4271_v45 = vshll.u32 %v4268_v48, 16  ;;  %v4270_v31 = vmul.u32 %v4266_v19, %v4264_v44  ;;  %v4273_v52 = vshll.u32 %v4269_v14, 16 }
 0x362   : > { %v3748_v24 = vsel %vm3737_vm11, nan, %v3747_v50  ;;  %vm5819_vm14 = vcmp.lt.s32.totalorder %v5818_v60, 0  ;;  %v4290_v21 = vmul.u32 %v4288_v39, %v4263_v41  ;;  %v4289_v5 = vmul.u32 %v4287_v20, %v4263_v41 }
 0x363   : > { %v4013_v18 = vsel %vm5819_vm14, 0, %v5818_v60  ;;  %vm4275_vm7 = vc.u32 %v4267_v38, %v4271_v45  ;;  %v4277_v6 = vadd.s32 %v4271_v45, %v4267_v38  ;;  %5612 = vst [vmem:[%s6642_s12 + $0x98] sm:$0xff] %v3748_v24  ;;  %v4291_v8 = vmul.u32 %v4287_v20, %v4264_v44 }
 0x364   : > { %v4014_v37 = vsub.s32 32, %v4013_v18  ;;  %v4018_v15 = vsub.s32 4294967266, %v4013_v18  ;;  %v4276_v36 = vsel %vm4275_vm7, 1, %v10109_v32  ;;  %v4015_v16 = vshll.u32 %v4006_v9, %v4013_v18 }
 0x365   : > { %v4278_v35 = vadd.s32 %v4276_v36, %v4270_v31  ;;  %vm4279_vm12 = vc.u32 %v4277_v6, %v4273_v52  ;;  %v4293_v19 = vshll.u32 %v4290_v21, 16  ;;  %v4272_v3 = vshrl.u32 %v4268_v48, 16 }
 0x366   : > { %v4016_v17 = vshrl.u32 %v3998_v30, %v4014_v37  ;;  %v4019_v42 = vadd.s32 127, %v4018_v15  ;;  %v4280_v26 = vsel %vm4279_vm12, 1, %v10109_v32  ;;  %v4292_v60 = vmul.u32 %v4288_v39, %v4264_v44 }
 0x367   : > { %v4282_v58 = vadd.s32 %v4280_v26, %v4278_v35  ;;  %v4295_v50 = vshll.u32 %v4291_v8, 16  ;;  %vm4297_vm11 = vc.u32 %v4289_v5, %v4293_v19  ;;  %v4299_v24 = vadd.s32 %v4293_v19, %v4289_v5 }
 0x368   : > { %v4017_v38 = vor.u32 %v4016_v17, %v4015_v16  ;;  %v4020_v45 = vshll.u32 %v4019_v42, 23  ;;  %v4230_v41 = vshrl.u32 %v10078_v40, %v8043_v2  ;;  %v4298_v31 = vsel %vm4297_vm11, 1, %v10109_v32 }
 0x369   : > { %v4283_v9 = vadd.s32 %v4282_v58, %v4272_v3  ;;  %v4524_v20 = vand.u32 2147483647, %v8110_v43  ;;  %v4251_v48 = vsel %vm4249_vm4, %v8078_v56, 2102212464  ;;  %v4300_v52 = vadd.s32 %v4298_v31, %v4292_v60 }
 0x36a   : > { %v4021_v30 = vor.u32 4788187, %v4020_v45  ;;  %vm4301_vm10 = vc.u32 %v4299_v24, %v4295_v50  ;;  %v4028_v44 = vsub.s32 4, %v8083_v34  ;;  %v4274_v39 = vshrl.u32 %v4269_v14, 16 }
 0x36b   : > { %v4294_v18 = vshrl.u32 %v4290_v21, 16  ;;  %v4302_v6 = vsel %vm4301_vm10, 1, %v10109_v32  ;;  %v4024_v2 = vcvt.s32.f32 %v4017_v38  ;;  %v4527_v36 = vand.u32 2139095040, %v8110_v43 }
 0x36c   : > { %v4022_v37 = vand.u32 2147483647, %v4021_v30  ;;  %v4304_v15 = vadd.s32 %v4302_v6, %v4300_v52  ;;  %vm3906_vm8 = vcmp.lt.s32.totalorder %v7885_v33, 0  ;;  %v4250_v5 = vsel %vm4246_vm9, %v4230_v41, %v8074_v29 }
 0x36d   : > { %v4252_v56 = vsel %vm4248_vm15, %v8076_v57, %v4251_v48  ;;  %v4284_v16 = vadd.s32 %v4283_v9, %v4274_v39  ;;  %v4296_v21 = vshrl.u32 %v4291_v8, 16  ;;  %v4528_v17 = vshrl.u32 %v4527_v36, 23 }
 0x36e   : > { %v4025_v14 = vmul.f32 %v4024_v2, %v4022_v37  ;;  %v4305_v35 = vadd.s32 %v4304_v15, %v4294_v18  ;;  %v4029_v42 = vsel %vm3906_vm8, %v4028_v44, %v8083_v34  ;;  %v4303_v26 = vadd.s32 %v4299_v24, %v4295_v50 }
 0x36f   : > { %v4531_v19 = vand.u32 8388607, %v4524_v20  ;;  %v4837_v3 = vand.u32 2139095040, %v8115_v12  ;;  %v4253_v58 = vsel %vm4247_vm6, %v4250_v5, %v4252_v56  ;;  %v5829_v60 = vadd.s32 4294967169, %v4528_v17 }
 0x370   : > { %v4026_v29 = vxor.u32 2147483648, %v4025_v14  ;;  %v4306_v57 = vadd.s32 %v4305_v35, %v4296_v21  ;;  %v10128_v8 = vand.u32 2147483647, %v7885_v33  ;;  %vm4309_vm9 = vc.u32 %v4284_v16, %v4303_v26 }
 0x371   : > { %v4534_v45 = vadd.s32 1, %v5829_v60  ;;  %v4307_v41 = vmul.u32 %v8106_v27, %v4253_v58  ;;  %v4532_v9 = vor.u32 8388608, %v4531_v19  ;;  %v4838_v31 = vshrl.u32 %v4837_v3, 23 }
 0x372   : > { %vm3905_vm4 = vcmp.le.f32.partialorder %v10128_v8, 0.7853982  ;;  %v4027_v38 = vsel %vm3906_vm8, %v4026_v29, %v4025_v14  ;;  %v4310_v50 = vadd.s32 1, %v4306_v57  ;;  %v10069_v39 = vand.u32 2147483647, %v8115_v12 }
 0x373   : > { %v4031_v34 = vsel %vm3905_vm4, 0, %v4029_v42  ;;  %v4030_v24 = vsel %vm3905_vm4, %v7885_v33, %v4027_v38  ;;  %vm4535_vm15 = vcmp.gt.s32.totalorder %v4534_v45, 0  ;;  %v8161_v15 = vshll.u32 %v4532_v9, 8 }
 0x374   : > { %v4032_v25 = vmul.f32 %v4030_v24, %v4030_v24  ;;  %v4311_v30 = vsel %vm4309_vm9, %v4310_v50, %v4306_v57  ;;  %v4048_v48 = vadd.s32 3, %v4031_v34  ;;  %v4536_v44 = vsel %vm4535_vm15, %v4534_v45, 0 }
 0x375   : > { %v4312_v52 = vadd.s32 %v4311_v30, %v4307_v41  ;;  %v4538_v37 = vand.u32 31, %v4536_v44  ;;  %v5835_v36 = vadd.s32 4294967169, %v4838_v31  ;;  %vm4216_vm6 = vcmp.lt.s32.totalorder %v7924_v63, 0 }
 0x376   : > { %v4033_v18 = vmul.f32 -0.001358992, %v4032_v25  ;;  %v4040_v6 = vmul.f32 -0.00019511016, %v4032_v25  ;;  %v8163_v14 = vand.u32 3, %v4048_v48  ;;  %v8166_v42 = vadd.s32 %v4303_v26, %v4284_v16 }
 0x377   : > { %v4313_v2 = vadd.s32 536870912, %v4312_v52  ;;  %v4539_v27 = vsub.s32 32, %v4538_v37  ;;  %v8170_v19 = vand.u32 8388607, %v10069_v39  ;;  %v8173_v29 = vand.u32 65535, %v8161_v15 }
 0x378   : > { %v4034_v5 = vadd.f32 0.041655596, %v4033_v18  ;;  %v4041_v56 = vadd.f32 0.008332121, %v4040_v6  ;;  %v8176_v58 = vshrl.u32 %v8161_v15, 16  ;;  %v8178_v57 = vadd.s32 1, %v5835_v36 }
 0x379   : > { %v4314_v21 = vshrl.u32 %v4313_v2, 30  ;;  %v8180_v38 = vshrl.u32 %v4536_v44, 5  ;;  %v4542_v16 = vshrl.u32 %v10082_v46, %v4539_v27  ;;  %vm4051_vm13 = vcmp.eq.s32.totalorder %v8163_v14, 0 }
 0x37a   : > { %v4035_v35 = vmul.f32 %v4034_v5, %v4032_v25  ;;  %v4042_v17 = vmul.f32 %v4041_v56, %v4032_v25  ;;  %vm4054_vm14 = vcmp.eq.s32.totalorder %v8163_v14, 2  ;;  %v4541_v34 = vshll.u32 %v10078_v40, %v4538_v37 }
 0x37b   : > { %v4315_v3 = vshll.u32 %v4314_v21, 30  ;;  %v4545_v50 = vshrl.u32 %v10083_v4, %v4539_v27  ;;  %v4551_v45 = vshrl.u32 %v10088_v28, %v4539_v27  ;;  %vm4050_vm7 = vcmp.lt.s32.totalorder %v8163_v14, 2 }
 0x37c   : > { %v4036_v60 = vadd.f32 -0.4999988, %v4035_v35  ;;  %v4043_v8 = vadd.f32 -0.16666654, %v4042_v17  ;;  %v4544_v31 = vshll.u32 %v10082_v46, %v4538_v37  ;;  %v4548_v30 = vshrl.u32 %v10087_v11, %v4539_v27 }
 0x37d   : > { %v8185_v26 = vsub.s32 %v4312_v52, %v4315_v3  ;;  %vm4047_vm12 = vweird.f32 %v7885_v33  ;;  %v4338_v52 = vsub.s32 4, %v4314_v21  ;;  %v4550_v44 = vshll.u32 %v10087_v11, %v4538_v37 }
 0x37e   : > { %v4037_v41 = vmul.f32 %v4036_v60, %v4032_v25  ;;  %v4044_v9 = vmul.f32 %v4043_v8, %v4032_v25  ;;  %vm8199_vm10 = vcmp.le.f32.partialorder %v4214_v13, 0.7853982  ;;  %v4543_v2 = vor.u32 %v4542_v16, %v4541_v34 }
 0x37f   : > { %vm4317_vm11 = vcmp.lt.s32.totalorder %v8185_v26, 0  ;;  %v4318_v48 = vsub.s32 0, %v8185_v26  ;;  %v4547_v36 = vshll.u32 %v10083_v4, %v4538_v37  ;;  %v4546_v56 = vor.u32 %v4545_v50, %v4544_v31 }
 0x380   : > { %v4038_v18 = vadd.f32 1.0, %v4037_v41  ;;  %v4045_v6 = vadd.f32 1.0, %v4044_v9  ;;  %v4552_v35 = vor.u32 %v4551_v45, %v4550_v44  ;;  %v4554_v17 = vshrl.u32 %v10092_v10, %v4539_v27 }
 0x381   : > { %v4319_v5 = vsel %vm4317_vm11, %v4318_v48, %v8185_v26  ;;  %v4549_v41 = vor.u32 %v4548_v30, %v4547_v36  ;;  %v4339_v9 = vsel %vm4216_vm6, %v4338_v52, %v4314_v21  ;;  %v4540_v13 = vshrl.u32 %v10078_v40, %v4539_v27 }
 0x382   : > { %v4046_v3 = vmul.f32 %v4045_v6, %v4030_v24  ;;  %v4055_v60 = vxor.u32 2147483648, %v4038_v18  ;;  %v4320_v8 = vclz %v4319_v5  ;;  %v4553_v39 = vshll.u32 %v10088_v28, %v4538_v37 }
 0x383   : > { %vm4556_vm8 = vcmp.lt.s32.totalorder %v8180_v38, 1  ;;  %vm4845_vm4 = vcmp.gt.s32.totalorder %v8178_v57, 0  ;;  %vm4557_vm9 = vcmp.lt.s32.totalorder %v8180_v38, 2  ;;  %vm4559_vm15 = vcmp.lt.s32.totalorder %v8180_v38, 4 }
 0x384   : > { %v4052_v16 = vxor.u32 2147483648, %v4046_v3  ;;  %v5824_v34 = vadd.s32 4294967294, %v4320_v8  ;;  %v4555_v24 = vor.u32 %v4554_v17, %v4553_v39  ;;  %vm4558_vm11 = vcmp.lt.s32.totalorder %v8180_v38, 3 }
 0x385   : > { %v4564_v21 = vsel %vm4556_vm8, %v4543_v2, %v4546_v56  ;;  %v4565_v27 = vsel %vm4559_vm15, %v4552_v35, 920167782  ;;  %v4056_v50 = vsel %vm4054_vm14, %v4055_v60, %v4046_v3  ;;  %v4561_v30 = vsel %vm4559_vm15, %v4549_v41, 2102212464 }
 0x386   : > { %v4053_v37 = vsel %vm4051_vm13, %v4038_v18, %v4052_v16  ;;  %vm5825_vm5 = vcmp.lt.s32.totalorder %v5824_v34, 0  ;;  %v4566_v45 = vsel %vm4558_vm11, %v4549_v41, %v4565_v27  ;;  %v4568_v6 = vsel %vm4556_vm8, %v4546_v56, %v4549_v41 }
 0x387   : > { %v4057_v39 = vsel %vm4050_vm7, %v4053_v37, %v4056_v50  ;;  %v4323_v31 = vsel %vm5825_vm5, 0, %v5824_v34  ;;  %v4567_v48 = vsel %vm4557_vm9, %v4564_v21, %v4566_v45  ;;  %v4341_v36 = vsel %vm8199_vm10, 0, %v4339_v9 }
 0x388   : > { %v4058_v52 = vsel %vm4047_vm12, nan, %v4057_v39  ;;  %v4324_v44 = vsub.s32 32, %v4323_v31  ;;  %v4328_v18 = vsub.s32 4294967266, %v4323_v31  ;;  %v4569_v14 = vsel %vm4559_vm15, %v4555_v24, 1326507024 }
 0x389   : > { %v4597_v5 = vand.u32 65535, %v4567_v48  ;;  %v4598_v17 = vshrl.u32 %v4567_v48, 16  ;;  %5614 = vst [vmem:[%s6642_s12 + $0xa8] sm:$0xff] %v4058_v52  ;;  %v4325_v3 = vshll.u32 %v8185_v26, %v4323_v31  ;;  %v4570_v8 = vsel %vm4558_vm11, %v4552_v35, %v4569_v14 }
 0x38a   : > { %v4326_v60 = vshrl.u32 %v8166_v42, %v4324_v44  ;;  %v4329_v33 = vadd.s32 127, %v4328_v18  ;;  %v4560_v41 = vsel %vm4556_vm8, %v4540_v13, %v4543_v2  ;;  %v4562_v9 = vsel %vm4558_vm11, %v4546_v56, %v4561_v30 }
 0x38b   : > { %v4571_v16 = vsel %vm4557_vm9, %v4568_v6, %v4570_v8  ;;  %v4600_v34 = vmul.u32 %v4598_v17, %v8173_v29  ;;  %v8251_v42 = vadd.s32 3, %v4341_v36  ;;  %v4599_v37 = vmul.u32 %v4597_v5, %v8173_v29 }
 0x38c   : > { %v4327_v24 = vor.u32 %v4326_v60, %v4325_v3  ;;  %v4330_v21 = vshll.u32 %v4329_v33, 23  ;;  %v4575_v26 = vand.u32 65535, %v4571_v16  ;;  %v4576_v27 = vshrl.u32 %v4571_v16, 16 }
 0x38d   : > { %v4601_v35 = vmul.u32 %v4597_v5, %v8176_v58  ;;  %v4603_v50 = vshll.u32 %v4600_v34, 16  ;;  %v8257_v56 = vsel %vm4557_vm9, %v4560_v41, %v4562_v9  ;;  %v4846_v45 = vsel %vm4845_vm4, %v8178_v57, 0 }
 0x38e   : > { %v4331_v2 = vor.u32 4788187, %v4330_v21  ;;  %v4578_v13 = vmul.u32 %v4576_v27, %v8173_v29  ;;  %v4334_v39 = vcvt.s32.f32 %v4327_v24  ;;  %v4579_v31 = vmul.u32 %v4575_v26, %v8176_v58 }
 0x38f   : > { %v4602_v30 = vmul.u32 %v4598_v17, %v8176_v58  ;;  %vm4607_vm5 = vc.u32 %v4599_v37, %v4603_v50  ;;  %v4577_v52 = vmul.u32 %v4575_v26, %v8173_v29  ;;  %v4580_v18 = vmul.u32 %v4576_v27, %v8176_v58 }
 0x390   : > { %v4332_v48 = vand.u32 2147483647, %v4331_v2  ;;  %v4581_v44 = vshll.u32 %v4578_v13, 16  ;;  %v4608_v38 = vsel %vm4607_vm5, 1, %v10109_v32  ;;  %v4605_v6 = vshll.u32 %v4601_v35, 16 }
 0x391   : > { %v4609_v36 = vadd.s32 %v4603_v50, %v4599_v37  ;;  %v4610_v14 = vadd.s32 %v4608_v38, %v4602_v30  ;;  %v4583_v3 = vshll.u32 %v4579_v31, 16  ;;  %v4617_v17 = vmul.u32 %v8161_v15, %v8257_v56 }
 0x392   : > { %v4335_v5 = vmul.f32 %v4334_v39, %v4332_v48  ;;  %vm4585_vm13 = vc.u32 %v4577_v52, %v4581_v44  ;;  %v4587_v57 = vadd.s32 %v4581_v44, %v4577_v52  ;;  %v4848_v33 = vand.u32 31, %v4846_v45 }
 0x393   : > { %v4586_v60 = vsel %vm4585_vm13, 1, %v10109_v32  ;;  %vm4611_vm14 = vc.u32 %v4609_v36, %v4605_v6  ;;  %v4604_v9 = vshrl.u32 %v4600_v34, 16  ;;  %v4582_v26 = vshrl.u32 %v4578_v13, 16 }
 0x394   : > { %v4336_v29 = vxor.u32 2147483648, %v4335_v5  ;;  %v4588_v8 = vadd.s32 %v4586_v60, %v4580_v18  ;;  %vm4589_vm7 = vc.u32 %v4587_v57, %v4583_v3  ;;  %v4612_v41 = vsel %vm4611_vm14, 1, %v10109_v32 }
 0x395   : > { %v4590_v58 = vsel %vm4589_vm7, 1, %v10109_v32  ;;  %v4614_v16 = vadd.s32 %v4612_v41, %v4610_v14  ;;  %v8273_v24 = vsub.s32 32, %v4848_v33  ;;  %v4606_v37 = vshrl.u32 %v4601_v35, 16 }
 0x396   : > { %v4337_v21 = vsel %vm4216_vm6, %v4336_v29, %v4335_v5  ;;  %v4592_v27 = vadd.s32 %v4590_v58, %v4588_v8  ;;  %v4584_v50 = vshrl.u32 %v4579_v31, 16  ;;  %v8280_v56 = vshrl.u32 %v4846_v45, 5 }
 0x397   : > { %v4340_v15 = vsel %vm8199_vm10, %v7924_v63, %v4337_v21  ;;  %v4615_v2 = vadd.s32 %v4614_v16, %v4604_v9  ;;  %v8282_v34 = vadd.s32 %v4609_v36, %v4605_v6  ;;  %v4855_v48 = vshrl.u32 %v10083_v4, %v8273_v24 }
 0x398   : > { %v4342_v39 = vmul.f32 %v4340_v15, %v4340_v15  ;;  %v4593_v30 = vadd.s32 %v4592_v27, %v4582_v26  ;;  %v4851_v13 = vshll.u32 %v10078_v40, %v4848_v33  ;;  %v4854_v35 = vshll.u32 %v10082_v46, %v4848_v33 }
 0x399   : > { %v4616_v52 = vadd.s32 %v4615_v2, %v4606_v37  ;;  %v4861_v25 = vshrl.u32 %v10088_v28, %v8273_v24  ;;  %v4858_v45 = vshrl.u32 %v10087_v11, %v8273_v24  ;;  %v4852_v6 = vshrl.u32 %v10082_v46, %v8273_v24 }
 0x39a   : > { %v4343_v44 = vmul.f32 -0.001358992, %v4342_v39  ;;  %v4350_v31 = vmul.f32 -0.00019511016, %v4342_v39  ;;  %v8290_v38 = vadd.s32 %v4593_v30, %v4584_v50  ;;  %v4857_v36 = vshll.u32 %v10083_v4, %v4848_v33 }
 0x39b   : > { %v4620_v18 = vadd.s32 1, %v4616_v52  ;;  %v4860_v14 = vshll.u32 %v10087_v11, %v4848_v33  ;;  %v8300_v57 = vor.u32 %v4855_v48, %v4854_v35  ;;  %v4863_v8 = vshll.u32 %v10088_v28, %v4848_v33 }
 0x39c   : > { %v4344_v5 = vadd.f32 0.041655596, %v4343_v44  ;;  %v4351_v3 = vadd.f32 0.008332121, %v4350_v31  ;;  %vm4619_vm6 = vc.u32 %v8290_v38, %v8282_v34  ;;  %v4864_v41 = vshrl.u32 %v10092_v10, %v8273_v24 }
 0x39d   : > { %v4621_v60 = vsel %vm4619_vm6, %v4620_v18, %v4616_v52  ;;  %v4862_v29 = vor.u32 %v4861_v25, %v4860_v14  ;;  %v8305_v21 = vor.u32 %v4858_v45, %v4857_v36  ;;  %v4359_v26 = vand.u32 3, %v8251_v42  ;;  %v447_v42 = vpop.permute.xlu1 %446  ;;  %v10131_v36 = vld [vmem:[#allocation5_spill] sm:$0xff] }
 0x39e   : > { %v4345_v58 = vmul.f32 %v4344_v5, %v4342_v39  ;;  %v4352_v9 = vmul.f32 %v4351_v3, %v4342_v39  ;;  %v4622_v16 = vadd.s32 %v4621_v60, %v4617_v17  ;;  %v4842_v27 = vor.u32 8388608, %v8170_v19 }
 0x39f   : > { %v4853_v37 = vor.u32 %v4852_v6, %v4851_v13  ;;  %v4865_v50 = vor.u32 %v4864_v41, %v4863_v8  ;;  %vm4869_vm12 = vcmp.lt.s32.totalorder %v8280_v56, 4  ;;  %vm4866_vm10 = vcmp.lt.s32.totalorder %v8280_v56, 1 }
 0x3a0   : > { %v4346_v2 = vadd.f32 -0.4999988, %v4345_v58  ;;  %v4353_v30 = vadd.f32 -0.16666654, %v4352_v9  ;;  %v4623_v48 = vadd.s32 536870912, %v4622_v16  ;;  %vm4868_vm8 = vcmp.lt.s32.totalorder %v8280_v56, 3 }
 0x3a1   : > { %v4875_v17 = vsel %vm4869_vm12, %v4862_v29, 920167782  ;;  %v4879_v33 = vsel %vm4869_vm12, %v4865_v50, 1326507024  ;;  %v4878_v35 = vsel %vm4866_vm10, %v8300_v57, %v8305_v21  ;;  %vm4867_vm4 = vcmp.lt.s32.totalorder %v8280_v56, 2 }
 0x3a2   : > { %v4347_v52 = vmul.f32 %v4346_v2, %v4342_v39  ;;  %v4354_v19 = vmul.f32 %v4353_v30, %v4342_v39  ;;  %v8316_v13 = vshrl.u32 %v4623_v48, 30  ;;  %v4874_v25 = vsel %vm4866_vm10, %v4853_v37, %v8300_v57 }
 0x3a3   : > { %v4880_v44 = vsel %vm4868_vm8, %v4862_v29, %v4879_v33  ;;  %v8328_v31 = vshll.u32 %v4842_v27, 8  ;;  %v4876_v6 = vsel %vm4868_vm8, %v8305_v21, %v4875_v17  ;;  %v486_v14 = vsel %vm374_vm0, %v10131_v36, %v447_v42 }
 0x3a4   : > { %v4348_v45 = vadd.f32 1.0, %v4347_v52  ;;  %v4355_v39 = vadd.f32 1.0, %v4354_v19  ;;  %v4625_v18 = vshll.u32 %v8316_v13, 30  ;;  %vm4357_vm9 = vweird.f32 %v7924_v63 }
 0x3a5   : > { %vm4360_vm15 = vcmp.lt.s32.totalorder %v4359_v26, 2  ;;  %v4881_v5 = vsel %vm4867_vm4, %v4878_v35, %v4880_v44  ;;  %vm4364_vm11 = vcmp.eq.s32.totalorder %v4359_v26, 2  ;;  %v4877_v8 = vsel %vm4867_vm4, %v4874_v25, %v4876_v6  ;;  %v455_v44 = vpop.permute.xlu0 %454 }
 0x3a6   : > { %v4356_v3 = vmul.f32 %v4355_v39, %v4340_v15  ;;  %v4365_v60 = vxor.u32 2147483648, %v4348_v45  ;;  %v4626_v29 = vsub.s32 %v4622_v16, %v4625_v18  ;;  %v4883_v41 = vand.u32 65535, %v8328_v31 }
 0x3a7   : > { %v4885_v58 = vand.u32 65535, %v4881_v5  ;;  %v4886_v9 = vshrl.u32 %v4881_v5, 16  ;;  %v4884_v2 = vshrl.u32 %v8328_v31, 16  ;;  %vm4361_vm0 = vcmp.eq.s32.totalorder %v4359_v26, 0 }
 0x3a8   : > { %v4362_v27 = vxor.u32 2147483648, %v4356_v3  ;;  %vm4627_vm5 = vcmp.lt.s32.totalorder %v4626_v29, 0  ;;  %v4628_v50 = vsub.s32 0, %v4626_v29  ;;  %v4366_v30 = vsel %vm4364_vm11, %v4365_v60, %v4356_v3 }
 0x3a9   : > { %v4850_v15 = vshrl.u32 %v10078_v40, %v8273_v24  ;;  %v4888_v48 = vmul.u32 %v4886_v9, %v4883_v41  ;;  %v4889_v33 = vmul.u32 %v4885_v58, %v4884_v2  ;;  %v4908_v42 = vshrl.u32 %v4877_v8, 16 }
 0x3aa   : > { %v4363_v17 = vsel %vm4361_vm0, %v4348_v45, %v4362_v27  ;;  %v4629_v16 = vsel %vm4627_vm5, %v4628_v50, %v4626_v29  ;;  %v4907_v25 = vand.u32 65535, %v4877_v8  ;;  %v4887_v18 = vmul.u32 %v4885_v58, %v4883_v41  ;;  %v459_v8 = vpop.permute.xlu1 %458 }
 0x3ab   : > { %v4367_v52 = vsel %vm4360_vm15, %v4363_v17, %v4366_v30  ;;  %v4630_v19 = vclz %v4629_v16  ;;  %v4891_v35 = vshll.u32 %v4888_v48, 16  ;;  %v487_v6 = vsel %vm474_vm1, %v486_v14, %v7304_v23 }
 0x3ac   : > { %v4368_v39 = vsel %vm4357_vm9, nan, %v4367_v52  ;;  %v4618_v24 = vadd.s32 %v8282_v34, %v8290_v38  ;;  %v4870_v36 = vsel %vm4866_vm10, %v4850_v15, %v4853_v37  ;;  %v4890_v26 = vmul.u32 %v4886_v9, %v4884_v2 }
 0x3ad   : > { %v5830_v45 = vadd.s32 4294967294, %v4630_v19  ;;  %5616 = vst [vmem:[%s6642_s12 + $0xb8] sm:$0xff] %v4368_v39  ;;  %v4893_v5 = vshll.u32 %v4889_v33, 16  ;;  %vm4895_vm13 = vc.u32 %v4887_v18, %v4891_v35  ;;  %v4897_v3 = vadd.s32 %v4891_v35, %v4887_v18 }
 0x3ae   : > { %v4910_v60 = vmul.u32 %v4908_v42, %v4883_v41  ;;  %v4892_v63 = vshrl.u32 %v4888_v48, 16  ;;  %v4896_v58 = vsel %vm4895_vm13, 1, %v10109_v32  ;;  %v4911_v27 = vmul.u32 %v4907_v25, %v4884_v2 }
 0x3af   : > { %vm5831_vm14 = vcmp.lt.s32.totalorder %v5830_v45, 0  ;;  %v4898_v14 = vadd.s32 %v4896_v58, %v4890_v26  ;;  %vm4899_vm1 = vc.u32 %v4897_v3, %v4893_v5  ;;  %v4909_v9 = vmul.u32 %v4907_v25, %v4883_v41 }
 0x3b0   : > { %v4633_v23 = vsel %vm5831_vm14, 0, %v5830_v45  ;;  %v4913_v34 = vshll.u32 %v4910_v60, 16  ;;  %v4900_v37 = vsel %vm4899_vm1, 1, %v10109_v32  ;;  %v4912_v17 = vmul.u32 %v4908_v42, %v4884_v2 }
 0x3b1   : > { %v4634_v38 = vsub.s32 32, %v4633_v23  ;;  %v4638_v50 = vsub.s32 4294967266, %v4633_v23  ;;  %v4635_v30 = vshll.u32 %v4626_v29, %v4633_v23  ;;  %v4902_v15 = vadd.s32 %v4900_v37, %v4898_v14  ;;  %v467_v29 = vpop.permute.xlu0 %466 }
 0x3b2   : > { %v4915_v16 = vshll.u32 %v4911_v27, 16  ;;  %vm4917_vm7 = vc.u32 %v4909_v9, %v4913_v34  ;;  %v4919_v48 = vadd.s32 %v4913_v34, %v4909_v9  ;;  %v4871_v35 = vsel %vm4869_vm12, %v8305_v21, 2102212464  ;;  %v471_v14 = vpop.permute.xlu1 %470 }
 0x3b3   : > { %v4636_v52 = vshrl.u32 %v4618_v24, %v4634_v38  ;;  %v4639_v19 = vadd.s32 127, %v4638_v50  ;;  %v4903_v39 = vadd.s32 %v4902_v15, %v4892_v63  ;;  %v4918_v18 = vsel %vm4917_vm7, 1, %v10109_v32 }
 0x3b4   : > { %v488_v45 = vsel %vm476_vm2, %v487_v6, %v455_v44  ;;  %v4920_v41 = vadd.s32 %v4918_v18, %v4912_v17  ;;  %vm4921_vm6 = vc.u32 %v4919_v48, %v4915_v16  ;;  %v4648_v2 = vsub.s32 4, %v8316_v13 }
 0x3b5   : > { %v4637_v26 = vor.u32 %v4636_v52, %v4635_v30  ;;  %v4640_v5 = vshll.u32 %v4639_v19, 23  ;;  %v4894_v42 = vshrl.u32 %v4889_v33, 16  ;;  %v4922_v25 = vsel %vm4921_vm6, 1, %v10109_v32 }
 0x3b6   : > { %v489_v24 = vsel %vm478_vm3, %v488_v45, %v459_v8  ;;  %v4914_v58 = vshrl.u32 %v4910_v60, 16  ;;  %v4924_v21 = vadd.s32 %v4922_v25, %v4920_v41  ;;  %vm10132_vm12 = vcmask 654336  }
 0x3b7   : > { %v4641_v3 = vor.u32 4788187, %v4640_v5  ;;  %v490_v63 = vsel %vm10132_vm12, %v489_v24, %v7325_v22  ;;  %v4872_v44 = vsel %vm4868_vm8, %v8300_v57, %v4871_v35  ;;  %v8370_v6 = vadd.s32 %v4903_v39, %v4894_v42 }
 0x3b8   : > { %v4916_v23 = vshrl.u32 %v4911_v27, 16  ;;  %vm10133_vm2 = vcmask 785408   ;;  %v4644_v38 = vcvt.s32.f32 %v4637_v26  ;;  %v4925_v50 = vadd.s32 %v4924_v21, %v4914_v58 }
 0x3b9   : > { %v491_v33 = vsel %vm10133_vm2, %v490_v63, %v467_v29  ;;  %v4642_v34 = vand.u32 2147483647, %v4641_v3  ;;  %vm10134_vm3 = vcmask 916480   ;;  %vm4526_vm10 = vcmp.lt.s32.totalorder %v8110_v43, 0 }
 0x3ba   : > { %v492_v8 = vsel %vm10134_vm3, %v491_v33, %v471_v14  ;;  %v8375_v60 = vadd.s32 %v4919_v48, %v4915_v16  ;;  %v4649_v57 = vsel %vm4526_vm10, %v4648_v2, %v8316_v13  ;;  %v4873_v27 = vsel %vm4867_vm4, %v4870_v36, %v4872_v44 }
 0x3bb   : > { %v8377_v22 = vperm.slane %v492_v8, 0  ;;  %v4645_v37 = vmul.f32 %v4644_v38, %v4642_v34  ;;  %v4926_v9 = vadd.s32 %v4925_v50, %v4916_v23  ;;  %vm4525_vm9 = vcmp.le.f32.partialorder %v4524_v20, 0.7853982 }
 0x3bc   : > { %vm4929_vm8 = vc.u32 %v8370_v6, %v8375_v60  ;;  %v4651_v52 = vsel %vm4525_vm9, 0, %v4649_v57  ;;  %v4927_v13 = vmul.u32 %v8328_v31, %v4873_v27  ;;  %v10135_v3 = vand.u32 2147483647, %v8115_v12 }
 0x3bd   : > { %v568_v30 = vmul.f32 %v8377_v22, %v6246_v55  ;;  %v570_v15 = vmul.f32 %v8377_v22, %v6255_v59  ;;  %v4646_v17 = vxor.u32 2147483648, %v4645_v37  ;;  %v4930_v16 = vadd.s32 1, %v4926_v9 }
 0x3be   : > { %v4668_v39 = vadd.s32 3, %v4651_v52  ;;  %vm8412_vm4 = vcmp.le.f32.partialorder %v10135_v3, 0.7853982  ;;  %vm4836_vm15 = vcmp.lt.s32.totalorder %v8115_v12, 0  ;;  %vm4667_vm1 = vweird.f32 %v8110_v43 }
 0x3bf   : > { %v8394_v56 = vadd.f32 %v568_v30, %v6261_v62  ;;  %v4647_v36 = vsel %vm4526_vm10, %v4646_v17, %v4645_v37  ;;  %v4931_v19 = vsel %vm4929_vm8, %v4930_v16, %v4926_v9  ;;  %v8399_v55 = vadd.f32 %v570_v15, %v6259_v61 }
 0x3c0   : > { %v4650_v59 = vsel %vm4525_vm9, %v8110_v43, %v4647_v36  ;;  %v4932_v48 = vadd.s32 %v4931_v19, %v4927_v13  ;;  %v8408_v25 = vand.u32 3, %v4668_v39  ;;  %v4928_v13 = vadd.s32 %v8375_v60, %v8370_v6 }
 0x3c1   : > { %v754_v20 = vand.u32 2147483647, %v8394_v56  ;;  %v4652_v35 = vmul.f32 %v4650_v59, %v4650_v59  ;;  %v757_v18 = vand.u32 2139095040, %v8394_v56  ;;  %v1067_v5 = vand.u32 2139095040, %v8399_v55 }
 0x3c2   : > { %v4933_v31 = vadd.s32 536870912, %v4932_v48  ;;  %v1064_v29 = vand.u32 2147483647, %v8399_v55  ;;  %vm4674_vm11 = vcmp.eq.s32.totalorder %v8408_v25, 2  ;;  %vm4671_vm0 = vcmp.eq.s32.totalorder %v8408_v25, 0 }
 0x3c3   : > { %v4653_v45 = vmul.f32 -0.001358992, %v4652_v35  ;;  %v4660_v62 = vmul.f32 -0.00019511016, %v4652_v35  ;;  %v758_v26 = vshrl.u32 %v757_v18, 23  ;;  %v1068_v44 = vshrl.u32 %v1067_v5, 23 }
 0x3c4   : > { %v4934_v41 = vshrl.u32 %v4933_v31, 30  ;;  %v761_v61 = vand.u32 8388607, %v754_v20  ;;  %v8423_v8 = vand.u32 8388607, %v1064_v29  ;;  %vm4670_vm14 = vcmp.lt.s32.totalorder %v8408_v25, 2 }
 0x3c5   : > { %v4654_v2 = vadd.f32 0.041655596, %v4653_v45  ;;  %v4661_v42 = vadd.f32 0.008332121, %v4660_v62  ;;  %v5757_v24 = vadd.s32 4294967169, %v758_v26  ;;  %v5763_v30 = vadd.s32 4294967169, %v1068_v44 }
 0x3c6   : > { %v4935_v21 = vshll.u32 %v4934_v41, 30  ;;  %v4958_v63 = vsub.s32 4, %v4934_v41  ;;  %v762_v50 = vor.u32 8388608, %v761_v61 }
 0x3c7   : > { %v4655_v23 = vmul.f32 %v4654_v2, %v4652_v35  ;;  %v4662_v14 = vmul.f32 %v4661_v42, %v4652_v35  ;;  %v764_v33 = vadd.s32 1, %v5757_v24  ;;  %v8442_v5 = vadd.s32 1, %v5763_v30 }
 0x3c8   : > { %v8417_v34 = vsub.s32 %v4932_v48, %v4935_v21  ;;  %v4959_v38 = vsel %vm4836_vm15, %v4958_v63, %v4934_v41  ;;  %v8436_v19 = vshll.u32 %v762_v50, 8  ;;  %v1072_v48 = vor.u32 8388608, %v8423_v8 }
 0x3c9   : > { %v4656_v37 = vadd.f32 -0.4999988, %v4655_v23  ;;  %v4663_v57 = vadd.f32 -0.16666654, %v4662_v14  ;;  %vm765_vm5 = vcmp.gt.s32.totalorder %v764_v33, 0  ;;  %v4961_v16 = vsel %vm8412_vm4, 0, %v4959_v38 }
 0x3ca   : > { %vm4937_vm13 = vcmp.lt.s32.totalorder %v8417_v34, 0  ;;  %v4938_v27 = vsub.s32 0, %v8417_v34  ;;  %v766_v9 = vsel %vm765_vm5, %v764_v33, 0  ;;  %v8439_v45 = vadd.s32 3, %v4961_v16 }
 0x3cb   : > { %v4657_v15 = vmul.f32 %v4656_v37, %v4652_v35  ;;  %v4664_v17 = vmul.f32 %v4663_v57, %v4652_v35  ;;  %v768_v52 = vand.u32 31, %v766_v9  ;;  %v767_v62 = vshrl.u32 %v766_v9, 5 }
 0x3cc   : > { %v4939_v36 = vsel %vm4937_vm13, %v4938_v27, %v8417_v34  ;;  %vm1075_vm10 = vcmp.gt.s32.totalorder %v8442_v5, 0 }
 0x3cd   : > { %v4658_v39 = vadd.f32 1.0, %v4657_v15  ;;  %v4665_v18 = vadd.f32 1.0, %v4664_v17  ;;  %v4940_v35 = vclz %v4939_v36  ;;  %v769_v31 = vsub.s32 32, %v768_v52 }
 0x3ce   : > { %v771_v26 = vshll.u32 %v10078_v40, %v768_v52  ;;  %v774_v42 = vshll.u32 %v10082_v46, %v768_v52  ;;  %v777_v3 = vshll.u32 %v10083_v4, %v768_v52  ;;  %v780_v33 = vshll.u32 %v10087_v11, %v768_v52 }
 0x3cf   : > { %v4666_v41 = vmul.f32 %v4665_v18, %v4650_v59  ;;  %v4675_v61 = vxor.u32 2147483648, %v4658_v39  ;;  %v5836_v6 = vadd.s32 4294967294, %v4940_v35  ;;  %v770_v60 = vshrl.u32 %v10078_v40, %v769_v31 }
 0x3d0   : > { %v772_v2 = vshrl.u32 %v10082_v46, %v769_v31  ;;  %v775_v24 = vshrl.u32 %v10083_v4, %v769_v31  ;;  %v778_v44 = vshrl.u32 %v10087_v11, %v769_v31  ;;  %v781_v30 = vshrl.u32 %v10088_v28, %v769_v31 }
 0x3d1   : > { %v4672_v21 = vxor.u32 2147483648, %v4666_v41  ;;  %v4676_v63 = vsel %vm4674_vm11, %v4675_v61, %v4666_v41  ;;  %vm5837_vm7 = vcmp.lt.s32.totalorder %v5836_v6, 0  ;;  %v783_v15 = vshll.u32 %v10088_v28, %v768_v52 }
 0x3d2   : > { %v4943_v59 = vsel %vm5837_vm7, 0, %v5836_v6  ;;  %v773_v23 = vor.u32 %v772_v2, %v771_v26  ;;  %v776_v14 = vor.u32 %v775_v24, %v774_v42  ;;  %v779_v9 = vor.u32 %v778_v44, %v777_v3 }
 0x3d3   : > { %v4673_v38 = vsel %vm4671_vm0, %v4658_v39, %v4672_v21  ;;  %v4944_v50 = vsub.s32 32, %v4943_v59  ;;  %v4945_v37 = vshll.u32 %v8417_v34, %v4943_v59  ;;  %v4948_v57 = vsub.s32 4294967266, %v4943_v59 }
 0x3d4   : > { %v4677_v27 = vsel %vm4670_vm14, %v4673_v38, %v4676_v63  ;;  %v784_v18 = vshrl.u32 %v10092_v10, %v769_v31  ;;  %v782_v39 = vor.u32 %v781_v30, %v780_v33  ;;  %vm786_vm6 = vcmp.lt.s32.totalorder %v767_v62, 1 }
 0x3d5   : > { %v4678_v17 = vsel %vm4667_vm1, nan, %v4677_v27  ;;  %v4946_v16 = vshrl.u32 %v4928_v13, %v4944_v50  ;;  %v4949_v36 = vadd.s32 127, %v4948_v57  ;;  %vm787_vm12 = vcmp.lt.s32.totalorder %v767_v62, 2 }
 0x3d6   : > { %5618 = vst [vmem:[%s6642_s12 + $0xc8] sm:$0xff] %v4678_v17  ;;  %vm788_vm2 = vcmp.lt.s32.totalorder %v767_v62, 3  ;;  %v785_v35 = vor.u32 %v784_v18, %v783_v15  ;;  %vm789_vm3 = vcmp.lt.s32.totalorder %v767_v62, 4  ;;  %v790_v26 = vsel %vm786_vm6, %v770_v60, %v773_v23 }
 0x3d7   : > { %v4947_v34 = vor.u32 %v4946_v16, %v4945_v37  ;;  %v4950_v25 = vshll.u32 %v4949_v36, 23  ;;  %v791_v41 = vsel %vm789_vm3, %v779_v9, 2102212464  ;;  %v794_v52 = vsel %vm786_vm6, %v773_v23, %v776_v14 }
 0x3d8   : > { %v795_v43 = vsel %vm789_vm3, %v782_v39, 920167782  ;;  %v792_v6 = vsel %vm788_vm2, %v776_v14, %v791_v41  ;;  %v798_v24 = vsel %vm786_vm6, %v776_v14, %v779_v9  ;;  %v799_v3 = vsel %vm789_vm3, %v785_v35, 1326507024 }
 0x3d9   : > { %v4951_v61 = vor.u32 4788187, %v4950_v25  ;;  %v4954_v13 = vcvt.s32.f32 %v4947_v34  ;;  %v796_v31 = vsel %vm788_vm2, %v779_v9, %v795_v43  ;;  %v8469_v2 = vsel %vm787_vm12, %v790_v26, %v792_v6 }
 0x3da   : > { %v797_v42 = vsel %vm787_vm12, %v794_v52, %v796_v31  ;;  %v800_v60 = vsel %vm788_vm2, %v782_v39, %v799_v3  ;;  %v803_v23 = vand.u32 65535, %v8436_v19  ;;  %v804_v33 = vshrl.u32 %v8436_v19, 16 }
 0x3db   : > { %v4952_v21 = vand.u32 2147483647, %v4951_v61  ;;  %v827_v63 = vand.u32 65535, %v797_v42  ;;  %v828_v44 = vshrl.u32 %v797_v42, 16  ;;  %v801_v59 = vsel %vm787_vm12, %v798_v24, %v800_v60 }
 0x3dc   : > { %v805_v50 = vand.u32 65535, %v801_v59  ;;  %v806_v37 = vshrl.u32 %v801_v59, 16  ;;  %v8479_v57 = vand.u32 3, %v8439_v45  ;;  %v847_v27 = vmul.u32 %v8436_v19, %v8469_v2 }
 0x3dd   : > { %v4955_v38 = vmul.f32 %v4954_v13, %v4952_v21  ;;  %v830_v14 = vmul.u32 %v828_v44, %v803_v23  ;;  %v8485_v62 = vshll.u32 %v1072_v48, 8  ;;  %v829_v17 = vmul.u32 %v827_v63, %v803_v23 }
 0x3de   : > { %v808_v30 = vmul.u32 %v806_v37, %v803_v23  ;;  %v809_v15 = vmul.u32 %v805_v50, %v804_v33  ;;  %v831_v16 = vmul.u32 %v827_v63, %v804_v33  ;;  %v832_v36 = vmul.u32 %v828_v44, %v804_v33 }
 0x3df   : > { %v4956_v9 = vxor.u32 2147483648, %v4955_v38  ;;  %v833_v18 = vshll.u32 %v830_v14, 16  ;;  %v1076_v39 = vsel %vm1075_vm10, %v8442_v5, 0  ;;  %v807_v34 = vmul.u32 %v805_v50, %v803_v23 }
 0x3e0   : > { %v810_v25 = vmul.u32 %v806_v37, %v804_v33  ;;  %v811_v35 = vshll.u32 %v808_v30, 16  ;;  %v813_v48 = vshll.u32 %v809_v15, 16  ;;  %v834_v26 = vshrl.u32 %v830_v14, 16 }
 0x3e1   : > { %v4957_v45 = vsel %vm4836_vm15, %v4956_v9, %v4955_v38  ;;  %vm837_vm8 = vc.u32 %v829_v17, %v833_v18  ;;  %v835_v61 = vshll.u32 %v831_v16, 16  ;;  %v839_v13 = vadd.s32 %v833_v18, %v829_v17 }
 0x3e2   : > { %v4960_v8 = vsel %vm8412_vm4, %v8115_v12, %v4957_v45  ;;  %vm815_vm9 = vc.u32 %v807_v34, %v811_v35  ;;  %v817_v52 = vadd.s32 %v811_v35, %v807_v34  ;;  %v838_v43 = vsel %vm837_vm8, 1, %v10109_v32 }
 0x3e3   : > { %v4962_v41 = vmul.f32 %v4960_v8, %v4960_v8  ;;  %v816_v5 = vsel %vm815_vm9, 1, %v10109_v32  ;;  %v840_v6 = vadd.s32 %v838_v43, %v832_v36  ;;  %v812_v3 = vshrl.u32 %v808_v30, 16 }
 0x3e4   : > { %v818_v24 = vadd.s32 %v816_v5, %v810_v25  ;;  %vm819_vm15 = vc.u32 %v817_v52, %v813_v48  ;;  %vm841_vm4 = vc.u32 %v839_v13, %v835_v61  ;;  %v1078_v21 = vand.u32 31, %v1076_v39 }
 0x3e5   : > { %v4963_v31 = vmul.f32 -0.001358992, %v4962_v41  ;;  %v4970_v42 = vmul.f32 -0.00019511016, %v4962_v41  ;;  %v820_v58 = vsel %vm819_vm15, 1, %v10109_v32  ;;  %v842_v59 = vsel %vm841_vm4, 1, %v10109_v32 }
 0x3e6   : > { %v822_v44 = vadd.s32 %v820_v58, %v818_v24  ;;  %v814_v23 = vshrl.u32 %v809_v15, 16  ;;  %v836_v33 = vshrl.u32 %v831_v16, 16  ;;  %v844_v38 = vadd.s32 %v842_v59, %v840_v6 }
 0x3e7   : > { %v4964_v60 = vadd.f32 0.041655596, %v4963_v31  ;;  %v4971_v63 = vadd.f32 0.008332121, %v4970_v42  ;;  %v8497_v50 = vsub.s32 32, %v1078_v21  ;;  %v8499_v17 = vshrl.u32 %v1076_v39, 5 }
 0x3e8   : > { %v823_v9 = vadd.s32 %v822_v44, %v812_v3  ;;  %v8501_v30 = vadd.s32 %v839_v13, %v835_v61  ;;  %v845_v36 = vadd.s32 %v844_v38, %v834_v26  ;;  %v1081_v25 = vshll.u32 %v10078_v40, %v1078_v21 }
 0x3e9   : > { %v4965_v37 = vmul.f32 %v4964_v60, %v4962_v41  ;;  %v4972_v14 = vmul.f32 %v4971_v63, %v4962_v41  ;;  %v1082_v18 = vshrl.u32 %v10082_v46, %v8497_v50  ;;  %v1085_v45 = vshrl.u32 %v10083_v4, %v8497_v50 }
 0x3ea   : > { %v8507_v16 = vadd.s32 %v823_v9, %v814_v23  ;;  %v846_v35 = vadd.s32 %v845_v36, %v836_v33  ;;  %v1084_v48 = vshll.u32 %v10082_v46, %v1078_v21  ;;  %v1087_v39 = vshll.u32 %v10083_v4, %v1078_v21 }
 0x3eb   : > { %v4966_v34 = vadd.f32 -0.4999988, %v4965_v37  ;;  %v4973_v15 = vadd.f32 -0.16666654, %v4972_v14  ;;  %v1088_v26 = vshrl.u32 %v10087_v11, %v8497_v50  ;;  %v8516_v5 = vor.u32 %v1082_v18, %v1081_v25 }
 0x3ec   : > { %vm849_vm11 = vc.u32 %v8507_v16, %v8501_v30  ;;  %v850_v61 = vadd.s32 1, %v846_v35  ;;  %v8518_v13 = vor.u32 %v1085_v45, %v1084_v48  ;;  %v1090_v6 = vshll.u32 %v10087_v11, %v1078_v21 }
 0x3ed   : > { %v4967_v52 = vmul.f32 %v4966_v34, %v4962_v41  ;;  %v4974_v43 = vmul.f32 %v4973_v15, %v4962_v41  ;;  %v1091_v31 = vshrl.u32 %v10088_v28, %v8497_v50  ;;  %v1093_v3 = vshll.u32 %v10088_v28, %v1078_v21 }
 0x3ee   : > { %v1094_v41 = vshrl.u32 %v10092_v10, %v8497_v50  ;;  %vm4980_vm5 = vcmp.lt.s32.totalorder %v8479_v57, 2  ;;  %v851_v58 = vsel %vm849_vm11, %v850_v61, %v846_v35  ;;  %v1089_v60 = vor.u32 %v1088_v26, %v1087_v39 }
 0x3ef   : > { %v4968_v42 = vadd.f32 1.0, %v4967_v52  ;;  %v4975_v24 = vadd.f32 1.0, %v4974_v43  ;;  %v1092_v63 = vor.u32 %v1091_v31, %v1090_v6  ;;  %v852_v23 = vadd.s32 %v851_v58, %v847_v27 }
 0x3f0   : > { %v1095_v33 = vor.u32 %v1094_v41, %v1093_v3  ;;  %vm4981_vm0 = vcmp.eq.s32.totalorder %v8479_v57, 0  ;;  %vm4984_vm13 = vcmp.eq.s32.totalorder %v8479_v57, 2  ;;  %vm1096_vm14 = vcmp.lt.s32.totalorder %v8499_v17, 1 }
 0x3f1   : > { %v4976_v44 = vmul.f32 %v4975_v24, %v4960_v8  ;;  %v4985_v59 = vxor.u32 2147483648, %v4968_v42  ;;  %vm1097_vm1 = vcmp.lt.s32.totalorder %v8499_v17, 2  ;;  %v853_v38 = vadd.s32 536870912, %v852_v23  ;;  %v10138_v24 = vld [vmem:[#allocation8_spill] sm:$0xff] }
 0x3f2   : > { %vm1099_vm7 = vcmp.lt.s32.totalorder %v8499_v17, 4  ;;  %v1104_v8 = vsel %vm1096_vm14, %v8516_v5, %v8518_v13  ;;  %vm1098_vm6 = vcmp.lt.s32.totalorder %v8499_v17, 3  ;;  %v1108_v2 = vsel %vm1096_vm14, %v8518_v13, %v1089_v60 }
 0x3f3   : > { %v4982_v21 = vxor.u32 2147483648, %v4976_v44  ;;  %v1105_v19 = vsel %vm1099_vm7, %v1092_v63, 920167782  ;;  %v1109_v27 = vsel %vm1099_vm7, %v1095_v33, 1326507024  ;;  %v4986_v14 = vsel %vm4984_vm13, %v4985_v59, %v4976_v44 }
 0x3f4   : > { %v854_v9 = vshrl.u32 %v853_v38, 30  ;;  %v1106_v36 = vsel %vm1098_vm6, %v1089_v60, %v1105_v19  ;;  %vm4977_vm12 = vweird.f32 %v8115_v12  ;;  %v1110_v34 = vsel %vm1098_vm6, %v1092_v63, %v1109_v27 }
 0x3f5   : > { %v4983_v37 = vsel %vm4981_vm0, %v4968_v42, %v4982_v21  ;;  %v1107_v45 = vsel %vm1097_vm1, %v1104_v8, %v1106_v36  ;;  %v572_v25 = vmul.f32 %v8377_v22, %v6232_v49  ;;  %v1111_v48 = vsel %vm1097_vm1, %v1108_v2, %v1110_v34 }
 0x3f6   : > { %v4987_v18 = vsel %vm4980_vm5, %v4983_v37, %v4986_v14  ;;  %v855_v35 = vshll.u32 %v854_v9, 30  ;;  %v1113_v12 = vand.u32 65535, %v8485_v62  ;;  %v1114_v57 = vshrl.u32 %v8485_v62, 16 }
 0x3f7   : > { %v4988_v15 = vsel %vm4977_vm12, nan, %v4987_v18  ;;  %v1115_v39 = vand.u32 65535, %v1111_v48  ;;  %v1116_v26 = vshrl.u32 %v1111_v48, 16  ;;  %v1138_v43 = vshrl.u32 %v1107_v45, 16 }
 0x3f8   : > { %5620 = vst [vmem:[%s6642_s12 + $0xd8] sm:$0xff] %v4988_v15  ;;  %v856_v52 = vsub.s32 %v852_v23, %v855_v35  ;;  %v1137_v42 = vand.u32 65535, %v1107_v45  ;;  %v8565_v49 = vmul.f32 %v8377_v22, %v6244_v54  ;;  %v8568_v3 = vadd.f32 %v572_v25, %v10138_v24 }
 0x3f9   : > { %v1118_v61 = vmul.u32 %v1116_v26, %v1113_v12  ;;  %v1119_v6 = vmul.u32 %v1115_v39, %v1114_v57  ;;  %v1117_v41 = vmul.u32 %v1115_v39, %v1113_v12  ;;  %vm756_vm3 = vcmp.lt.s32.totalorder %v8394_v56, 0 }
 0x3fa   : > { %vm857_vm2 = vcmp.lt.s32.totalorder %v856_v52, 0  ;;  %v858_v31 = vsub.s32 0, %v856_v52  ;;  %v1120_v44 = vmul.u32 %v1116_v26, %v1114_v57  ;;  %v1140_v59 = vmul.u32 %v1138_v43, %v1113_v12 }
 0x3fb   : > { %v1121_v58 = vshll.u32 %v1118_v61, 16  ;;  %v1123_v33 = vshll.u32 %v1119_v6, 16  ;;  %v848_v38 = vadd.s32 %v8501_v30, %v8507_v16  ;;  %v1080_v54 = vshrl.u32 %v10078_v40, %v8497_v50 }
 0x3fc   : > { %v859_v63 = vsel %vm857_vm2, %v858_v31, %v856_v52  ;;  %v1141_v19 = vmul.u32 %v1137_v42, %v1114_v57  ;;  %v878_v27 = vsub.s32 4, %v854_v9  ;;  %v1101_v14 = vsel %vm1099_vm7, %v1089_v60, 2102212464 }
 0x3fd   : > { %v860_v23 = vclz %v859_v63  ;;  %vm1125_vm10 = vc.u32 %v1117_v41, %v1121_v58  ;;  %v1127_v21 = vadd.s32 %v1121_v58, %v1117_v41  ;;  %v1139_v18 = vmul.u32 %v1137_v42, %v1113_v12 }
 0x3fe   : > { %v1126_v8 = vsel %vm1125_vm10, 1, %v10109_v32  ;;  %v1143_v45 = vshll.u32 %v1140_v59, 16  ;;  %v1122_v34 = vshrl.u32 %v1118_v61, 16  ;;  %v1374_v16 = vand.u32 2147483647, %v8568_v3 }
 0x3ff   : > { %v5758_v2 = vadd.s32 4294967294, %v860_v23  ;;  %v1128_v37 = vadd.s32 %v1126_v8, %v1120_v44  ;;  %vm1129_vm8 = vc.u32 %v1127_v21, %v1123_v33  ;;  %v1145_v15 = vshll.u32 %v1141_v19, 16 }
 0x400   : > { %v1130_v36 = vsel %vm1129_vm8, 1, %v10109_v32  ;;  %vm1147_vm15 = vc.u32 %v1139_v18, %v1143_v45  ;;  %v1149_v25 = vadd.s32 %v1143_v45, %v1139_v18  ;;  %v879_v39 = vsel %vm756_vm3, %v878_v27, %v854_v9 }
 0x401   : > { %vm5759_vm9 = vcmp.lt.s32.totalorder %v5758_v2, 0  ;;  %v1132_v30 = vadd.s32 %v1130_v36, %v1128_v37  ;;  %v1142_v26 = vmul.u32 %v1138_v43, %v1114_v57  ;;  %v1148_v31 = vsel %vm1147_vm15, 1, %v10109_v32 }
 0x402   : > { %v863_v50 = vsel %vm5759_vm9, 0, %v5758_v2  ;;  %vm1151_vm4 = vc.u32 %v1149_v25, %v1145_v15  ;;  %v1377_v12 = vand.u32 2139095040, %v8568_v3  ;;  %v1124_v58 = vshrl.u32 %v1119_v6, 16 }
 0x403   : > { %v864_v35 = vsub.s32 32, %v863_v50  ;;  %v868_v48 = vsub.s32 4294967266, %v863_v50  ;;  %v1133_v60 = vadd.s32 %v1132_v30, %v1122_v34  ;;  %v865_v61 = vshll.u32 %v856_v52, %v863_v50 }
 0x404   : > { %v1150_v41 = vadd.s32 %v1148_v31, %v1142_v26  ;;  %v1152_v63 = vsel %vm1151_vm4, 1, %v10109_v32  ;;  %v1378_v44 = vshrl.u32 %v1377_v12, 23  ;;  %v1381_v23 = vand.u32 8388607, %v1374_v16 }
 0x405   : > { %v866_v42 = vshrl.u32 %v848_v38, %v864_v35  ;;  %v869_v24 = vadd.s32 127, %v868_v48  ;;  %v1144_v57 = vshrl.u32 %v1140_v59, 16  ;;  %v1100_v21 = vsel %vm1096_vm14, %v1080_v54, %v8516_v5 }
 0x406   : > { %v1154_v43 = vadd.s32 %v1152_v63, %v1150_v41  ;;  %v1102_v52 = vsel %vm1098_vm6, %v8518_v13, %v1101_v14  ;;  %v1134_v38 = vadd.s32 %v1133_v60, %v1124_v58  ;;  %v5769_v6 = vadd.s32 4294967169, %v1378_v44 }
 0x407   : > { %v867_v33 = vor.u32 %v866_v42, %v865_v61  ;;  %v870_v9 = vshll.u32 %v869_v24, 23  ;;  %vm8595_vm11 = vcmp.le.f32.partialorder %v754_v20, 0.7853982  ;;  %v1146_v27 = vshrl.u32 %v1141_v19, 16 }
 0x408   : > { %v1155_v59 = vadd.s32 %v1154_v43, %v1144_v57  ;;  %v881_v37 = vsel %vm8595_vm11, 0, %v879_v39  ;;  %v1153_v36 = vadd.s32 %v1149_v25, %v1145_v15  ;;  %v1382_v5 = vor.u32 8388608, %v1381_v23 }
 0x409   : > { %v871_v2 = vor.u32 4788187, %v870_v9  ;;  %v1384_v54 = vadd.s32 1, %v5769_v6  ;;  %v874_v45 = vcvt.s32.f32 %v867_v33  ;;  %v1103_v13 = vsel %vm1097_vm1, %v1100_v21, %v1102_v52 }
 0x40a   : > { %v1156_v14 = vadd.s32 %v1155_v59, %v1146_v27  ;;  %v8605_v20 = vadd.f32 %v8565_v49, %v6265_v1  ;;  %vm1159_vm5 = vc.u32 %v1134_v38, %v1153_v36  ;;  %v898_v34 = vadd.s32 3, %v881_v37 }
 0x40b   : > { %v872_v18 = vand.u32 2147483647, %v871_v2  ;;  %vm1385_vm0 = vcmp.gt.s32.totalorder %v1384_v54, 0  ;;  %v1157_v15 = vmul.u32 %v8485_v62, %v1103_v13  ;;  %v8608_v35 = vshll.u32 %v1382_v5, 8 }
 0x40c   : > { %v1160_v30 = vadd.s32 1, %v1156_v14  ;;  %v1386_v50 = vsel %vm1385_vm0, %v1384_v54, 0  ;;  %v8612_v1 = vand.u32 3, %v898_v34  ;;  %v8614_v49 = vadd.s32 %v1153_v36, %v1134_v38 }
 0x40d   : > { %v875_v19 = vmul.f32 %v874_v45, %v872_v18  ;;  %v1388_v25 = vand.u32 31, %v1386_v50  ;;  %v1684_v31 = vand.u32 2147483647, %v8605_v20  ;;  %v8623_v61 = vand.u32 65535, %v8608_v35 }
 0x40e   : > { %v1161_v39 = vsel %vm1159_vm5, %v1160_v30, %v1156_v14  ;;  %v1687_v42 = vand.u32 2139095040, %v8605_v20  ;;  %v8631_v63 = vshrl.u32 %v8608_v35, 16  ;;  %v8633_v23 = vshrl.u32 %v1386_v50, 5 }
 0x40f   : > { %v876_v48 = vxor.u32 2147483648, %v875_v19  ;;  %v1162_v17 = vadd.s32 %v1161_v39, %v1157_v15  ;;  %v1389_v26 = vsub.s32 32, %v1388_v25  ;;  %v1391_v33 = vshll.u32 %v10078_v40, %v1388_v25 }
 0x410   : > { %v1394_v21 = vshll.u32 %v10082_v46, %v1388_v25  ;;  %v1397_v6 = vshll.u32 %v10083_v4, %v1388_v25  ;;  %v1400_v8 = vshll.u32 %v10087_v11, %v1388_v25  ;;  %vm1066_vm13 = vcmp.lt.s32.totalorder %v8399_v55, 0 }
 0x411   : > { %v877_v60 = vsel %vm756_vm3, %v876_v48, %v875_v19  ;;  %v1163_v12 = vadd.s32 536870912, %v1162_v17  ;;  %v1392_v41 = vshrl.u32 %v10082_v46, %v1389_v26  ;;  %v1395_v58 = vshrl.u32 %v10083_v4, %v1389_v26 }
 0x412   : > { %v8620_v62 = vsel %vm8595_vm11, %v8394_v56, %v877_v60  ;;  %v1401_v9 = vshrl.u32 %v10088_v28, %v1389_v26  ;;  %v1398_v52 = vshrl.u32 %v10087_v11, %v1389_v26  ;;  %v1404_v2 = vshrl.u32 %v10092_v10, %v1389_v26 }
 0x413   : > { %v882_v24 = vmul.f32 %v8620_v62, %v8620_v62  ;;  %v1164_v44 = vshrl.u32 %v1163_v12, 30  ;;  %v1393_v37 = vor.u32 %v1392_v41, %v1391_v33  ;;  %v1396_v36 = vor.u32 %v1395_v58, %v1394_v21 }
 0x414   : > { %v1402_v54 = vor.u32 %v1401_v9, %v1400_v8  ;;  %v1403_v18 = vshll.u32 %v10088_v28, %v1388_v25  ;;  %v1688_v45 = vshrl.u32 %v1687_v42, 23  ;;  %v1399_v19 = vor.u32 %v1398_v52, %v1397_v6 }
 0x415   : > { %v883_v57 = vmul.f32 -0.001358992, %v882_v24  ;;  %v890_v43 = vmul.f32 -0.00019511016, %v882_v24  ;;  %v1165_v38 = vshll.u32 %v1164_v44, 30  ;;  %vm1406_vm14 = vcmp.lt.s32.totalorder %v8633_v23, 1 }
 0x416   : > { %v1188_v30 = vsub.s32 4, %v1164_v44  ;;  %v1405_v50 = vor.u32 %v1404_v2, %v1403_v18  ;;  %vm904_vm7 = vcmp.eq.s32.totalorder %v8612_v1, 2  ;;  %vm1409_vm6 = vcmp.lt.s32.totalorder %v8633_v23, 4 }
 0x417   : > { %v884_v27 = vadd.f32 0.041655596, %v883_v57  ;;  %v891_v59 = vadd.f32 0.008332121, %v890_v43  ;;  %v8643_v5 = vsub.s32 %v1162_v17, %v1165_v38  ;;  %v1414_v25 = vsel %vm1406_vm14, %v1393_v37, %v1396_v36 }
 0x418   : > { %vm901_vm12 = vcmp.eq.s32.totalorder %v8612_v1, 0  ;;  %vm1407_vm2 = vcmp.lt.s32.totalorder %v8633_v23, 2  ;;  %vm1408_vm3 = vcmp.lt.s32.totalorder %v8633_v23, 3  ;;  %v1415_v17 = vsel %vm1409_vm6, %v1402_v54, 920167782 }
 0x419   : > { %v885_v13 = vmul.f32 %v884_v27, %v882_v24  ;;  %v892_v14 = vmul.f32 %v891_v59, %v882_v24  ;;  %vm1167_vm1 = vcmp.lt.s32.totalorder %v8643_v5, 0  ;;  %v1168_v34 = vsub.s32 0, %v8643_v5 }
 0x41a   : > { %vm900_vm10 = vcmp.lt.s32.totalorder %v8612_v1, 2  ;;  %v1416_v41 = vsel %vm1408_vm3, %v1399_v19, %v1415_v17  ;;  %vm897_vm8 = vweird.f32 %v8394_v56  ;;  %v1390_v58 = vshrl.u32 %v10078_v40, %v1389_v26 }
 0x41b   : > { %v886_v15 = vadd.f32 -0.4999988, %v885_v13  ;;  %v893_v48 = vadd.f32 -0.16666654, %v892_v14  ;;  %v1169_v39 = vsel %vm1167_vm1, %v1168_v34, %v8643_v5  ;;  %v1417_v33 = vsel %vm1407_vm2, %v1414_v25, %v1416_v41 }
 0x41c   : > { %v1170_v42 = vclz %v1169_v39  ;;  %v1418_v9 = vsel %vm1406_vm14, %v1396_v36, %v1399_v19  ;;  %v5775_v57 = vadd.s32 4294967169, %v1688_v45  ;;  %v1419_v52 = vsel %vm1409_vm6, %v1405_v50, 1326507024 }
 0x41d   : > { %v887_v60 = vmul.f32 %v886_v15, %v882_v24  ;;  %v894_v12 = vmul.f32 %v893_v48, %v882_v24  ;;  %v8672_v38 = vsel %vm1066_vm13, %v1188_v30, %v1164_v44  ;;  %v1411_v26 = vsel %vm1409_vm6, %v1399_v19, 2102212464 }
 0x41e   : > { %v5764_v24 = vadd.s32 4294967294, %v1170_v42  ;;  %v1420_v6 = vsel %vm1408_vm3, %v1402_v54, %v1419_v52  ;;  %v1448_v8 = vshrl.u32 %v1417_v33, 16  ;;  %v1410_v45 = vsel %vm1406_vm14, %v1390_v58, %v1393_v37 }
 0x41f   : > { %v888_v43 = vadd.f32 1.0, %v887_v60  ;;  %v895_v21 = vadd.f32 1.0, %v894_v12  ;;  %v1421_v59 = vsel %vm1407_vm2, %v1418_v9, %v1420_v6  ;;  %v1412_v19 = vsel %vm1408_vm3, %v1396_v36, %v1411_v26 }
 0x420   : > { %vm5765_vm9 = vcmp.lt.s32.totalorder %v5764_v24, 0  ;;  %v1425_v44 = vand.u32 65535, %v1421_v59  ;;  %v1426_v13 = vshrl.u32 %v1421_v59, 16  ;;  %v1447_v54 = vand.u32 65535, %v1417_v33 }
 0x421   : > { %v896_v2 = vmul.f32 %v895_v21, %v8620_v62  ;;  %v905_v27 = vxor.u32 2147483648, %v888_v43  ;;  %v1173_v18 = vsel %vm5765_vm9, 0, %v5764_v24  ;;  %vm8689_vm15 = vcmp.le.f32.partialorder %v1064_v29, 0.7853982 }
 0x422   : > { %v1174_v34 = vsub.s32 32, %v1173_v18  ;;  %v1178_v50 = vsub.s32 4294967266, %v1173_v18  ;;  %v1428_v37 = vmul.u32 %v1426_v13, %v8623_v61  ;;  %v1429_v15 = vmul.u32 %v1425_v44, %v8631_v63 }
 0x423   : > { %v902_v14 = vxor.u32 2147483648, %v896_v2  ;;  %v906_v62 = vsel %vm904_vm7, %v905_v27, %v896_v2  ;;  %v1175_v36 = vshll.u32 %v8643_v5, %v1173_v18  ;;  %v1450_v39 = vmul.u32 %v1448_v8, %v8623_v61 }
 0x424   : > { %v1176_v25 = vshrl.u32 %v8614_v49, %v1174_v34  ;;  %v1179_v17 = vadd.s32 127, %v1178_v50  ;;  %v1427_v60 = vmul.u32 %v1425_v44, %v8623_v61  ;;  %v1431_v12 = vshll.u32 %v1428_v37, 16 }
 0x425   : > { %v903_v48 = vsel %vm901_vm12, %v888_v43, %v902_v14  ;;  %v1430_v58 = vmul.u32 %v1426_v13, %v8631_v63  ;;  %v1433_v33 = vshll.u32 %v1429_v15, 16  ;;  %v1451_v49 = vmul.u32 %v1447_v54, %v8631_v63 }
 0x426   : > { %v907_v29 = vsel %vm900_vm10, %v903_v48, %v906_v62  ;;  %v1177_v41 = vor.u32 %v1176_v25, %v1175_v36  ;;  %v1180_v9 = vshll.u32 %v1179_v17, 23  ;;  %vm1435_vm4 = vc.u32 %v1427_v60, %v1431_v12 }
 0x427   : > { %v908_v42 = vsel %vm897_vm8, nan, %v907_v29  ;;  %v1437_v5 = vadd.s32 %v1431_v12, %v1427_v60  ;;  %v1432_v43 = vshrl.u32 %v1428_v37, 16  ;;  %v1436_v1 = vsel %vm1435_vm4, 1, %v10109_v32 }
 0x428   : > { %3080 = vst [vmem:[%s6642_s12 + $0x8] sm:$0xff] %v908_v42  ;;  %v1449_v21 = vmul.u32 %v1447_v54, %v8623_v61  ;;  %v1453_v24 = vshll.u32 %v1450_v39, 16  ;;  %v1181_v52 = vor.u32 4788187, %v1180_v9  ;;  %v1184_v26 = vcvt.s32.f32 %v1177_v41 }
 0x429   : > { %v1438_v56 = vadd.s32 %v1436_v1, %v1430_v58  ;;  %vm1439_vm11 = vc.u32 %v1437_v5, %v1433_v33  ;;  %v1452_v2 = vmul.u32 %v1448_v8, %v8631_v63  ;;  %v1455_v27 = vshll.u32 %v1451_v49, 16 }
 0x42a   : > { %v1440_v6 = vsel %vm1439_vm11, 1, %v10109_v32  ;;  %vm1457_vm5 = vc.u32 %v1449_v21, %v1453_v24  ;;  %v1182_v59 = vand.u32 2147483647, %v1181_v52  ;;  %v1459_v13 = vadd.s32 %v1453_v24, %v1449_v21 }
 0x42b   : > { %v1442_v18 = vadd.s32 %v1440_v6, %v1438_v56  ;;  %v1458_v44 = vsel %vm1457_vm5, 1, %v10109_v32  ;;  %v1191_v61 = vsel %vm8689_vm15, 0, %v8672_v38  ;;  %v1691_v34 = vand.u32 8388607, %v1684_v31 }
 0x42c   : > { %v1460_v14 = vadd.s32 %v1458_v44, %v1452_v2  ;;  %v1694_v54 = vadd.s32 1, %v5775_v57  ;;  %v1185_v62 = vmul.f32 %v1184_v26, %v1182_v59  ;;  %v1434_v50 = vshrl.u32 %v1429_v15, 16 }
 0x42d   : > { %v1443_v37 = vadd.s32 %v1442_v18, %v1432_v43  ;;  %vm1461_vm0 = vc.u32 %v1459_v13, %v1455_v27  ;;  %v1413_v63 = vsel %vm1407_vm2, %v1410_v45, %v1412_v19  ;;  %v1454_v8 = vshrl.u32 %v1450_v39, 16 }
 0x42e   : > { %v1462_v48 = vsel %vm1461_vm0, 1, %v10109_v32  ;;  %vm1695_vm14 = vcmp.gt.s32.totalorder %v1694_v54, 0  ;;  %v1186_v36 = vxor.u32 2147483648, %v1185_v62  ;;  %v576_v17 = vmul.f32 %v8377_v22, %v6226_v47 }
 0x42f   : > { %v8721_v25 = vadd.s32 %v1443_v37, %v1434_v50  ;;  %v1464_v38 = vadd.s32 %v1462_v48, %v1460_v14  ;;  %v1696_v29 = vsel %vm1695_vm14, %v1694_v54, 0  ;;  %v1692_v57 = vor.u32 8388608, %v1691_v34 }
 0x430   : > { %v1698_v60 = vand.u32 31, %v1696_v29  ;;  %v1187_v15 = vsel %vm1066_vm13, %v1186_v36, %v1185_v62  ;;  %v1456_v12 = vshrl.u32 %v1451_v49, 16  ;;  %v8727_v23 = vadd.s32 %v1459_v13, %v1455_v27 }
 0x431   : > { %v1465_v45 = vadd.s32 %v1464_v38, %v1454_v8  ;;  %v1190_v19 = vsel %vm8689_vm15, %v8399_v55, %v1187_v15  ;;  %v1208_v39 = vadd.s32 3, %v1191_v61  ;;  %v1467_v42 = vmul.u32 %v8608_v35, %v1413_v63 }
 0x432   : > { %v8733_v41 = vsub.s32 32, %v1698_v60  ;;  %v1192_v58 = vmul.f32 %v1190_v19, %v1190_v19  ;;  %vm1469_vm1 = vc.u32 %v8721_v25, %v8727_v23  ;;  %v8737_v33 = vshrl.u32 %v1696_v29, 5 }
 0x433   : > { %v1466_v47 = vadd.s32 %v1465_v45, %v1456_v12  ;;  %v1704_v9 = vshll.u32 %v10082_v46, %v1698_v60  ;;  %v1707_v30 = vshll.u32 %v10083_v4, %v1698_v60  ;;  %v1701_v24 = vshll.u32 %v10078_v40, %v1698_v60 }
 0x434   : > { %v1705_v5 = vshrl.u32 %v10083_v4, %v8733_v41  ;;  %v1708_v49 = vshrl.u32 %v10087_v11, %v8733_v41  ;;  %v1193_v35 = vmul.f32 -0.001358992, %v1192_v58  ;;  %v1200_v43 = vmul.f32 -0.00019511016, %v1192_v58 }
 0x435   : > { %v1470_v1 = vadd.s32 1, %v1466_v47  ;;  %v1711_v21 = vshrl.u32 %v10088_v28, %v8733_v41  ;;  %v1702_v52 = vshrl.u32 %v10082_v46, %v8733_v41  ;;  %v1710_v56 = vshll.u32 %v10087_v11, %v1698_v60 }
 0x436   : > { %v8750_v26 = vor.u32 %v1705_v5, %v1704_v9  ;;  %v1194_v6 = vadd.f32 0.041655596, %v1193_v35  ;;  %v1201_v2 = vadd.f32 0.008332121, %v1200_v43  ;;  %v8756_v59 = vor.u32 %v1708_v49, %v1707_v30 }
 0x437   : > { %v1471_v27 = vsel %vm1469_vm1, %v1470_v1, %v1466_v47  ;;  %v1712_v44 = vor.u32 %v1711_v21, %v1710_v56  ;;  %v1713_v13 = vshll.u32 %v10088_v28, %v1698_v60  ;;  %v1714_v61 = vshrl.u32 %v10092_v10, %v8733_v41 }
 0x438   : > { %v1472_v18 = vadd.s32 %v1471_v27, %v1467_v42  ;;  %v8763_v14 = vmul.f32 %v8377_v22, %v6242_v53  ;;  %v1195_v34 = vmul.f32 %v1194_v6, %v1192_v58  ;;  %v1202_v54 = vmul.f32 %v1201_v2, %v1192_v58 }
 0x439   : > { %v1209_v62 = vand.u32 3, %v1208_v39  ;;  %v8765_v37 = vor.u32 %v1702_v52, %v1701_v24  ;;  %v1715_v63 = vor.u32 %v1714_v61, %v1713_v13  ;;  %v8767_v8 = vshll.u32 %v1692_v57, 8 }
 0x43a   : > { %v1473_v50 = vadd.s32 536870912, %v1472_v18  ;;  %v1196_v48 = vadd.f32 -0.4999988, %v1195_v34  ;;  %v1203_v36 = vadd.f32 -0.16666654, %v1202_v54  ;;  %vm1716_vm13 = vcmp.lt.s32.totalorder %v8737_v33, 1 }
 0x43b   : > { %vm1719_vm7 = vcmp.lt.s32.totalorder %v8737_v33, 4  ;;  %vm1717_vm6 = vcmp.lt.s32.totalorder %v8737_v33, 2  ;;  %v1728_v29 = vsel %vm1716_vm13, %v8750_v26, %v8756_v59  ;;  %vm1718_vm12 = vcmp.lt.s32.totalorder %v8737_v33, 3 }
 0x43c   : > { %v8771_v38 = vshrl.u32 %v1473_v50, 30  ;;  %v1725_v53 = vsel %vm1719_vm7, %v1712_v44, 920167782  ;;  %v1197_v57 = vmul.f32 %v1196_v48, %v1192_v58  ;;  %v1204_v60 = vmul.f32 %v1203_v36, %v1192_v58 }
 0x43d   : > { %v1729_v15 = vsel %vm1719_vm7, %v1715_v63, 1326507024  ;;  %v1724_v45 = vsel %vm1716_vm13, %v8765_v37, %v8750_v26  ;;  %v1726_v39 = vsel %vm1718_vm12, %v8756_v59, %v1725_v53  ;;  %v8794_v58 = vadd.f32 %v576_v17, %v6263_v0 }
 0x43e   : > { %v1475_v12 = vshll.u32 %v8771_v38, 30  ;;  %v1730_v42 = vsel %vm1718_vm12, %v1712_v44, %v1729_v15  ;;  %v1198_v47 = vadd.f32 1.0, %v1197_v57  ;;  %v1205_v9 = vadd.f32 1.0, %v1204_v60 }
 0x43f   : > { %v1731_v5 = vsel %vm1717_vm6, %v1728_v29, %v1730_v42  ;;  %v1733_v49 = vand.u32 65535, %v8767_v8  ;;  %v1727_v24 = vsel %vm1717_vm6, %v1724_v45, %v1726_v39  ;;  %v1734_v52 = vshrl.u32 %v8767_v8, 16 }
 0x440   : > { %v8798_v30 = vsub.s32 %v1472_v18, %v1475_v12  ;;  %v1735_v35 = vand.u32 65535, %v1731_v5  ;;  %v1736_v43 = vshrl.u32 %v1731_v5, 16  ;;  %v1206_v1 = vmul.f32 %v1205_v9, %v1190_v19 }
 0x441   : > { %v1215_v21 = vxor.u32 2147483648, %v1198_v47  ;;  %vm1207_vm2 = vweird.f32 %v8399_v55  ;;  %vm1210_vm3 = vcmp.lt.s32.totalorder %v1209_v62, 2  ;;  %vm1211_vm8 = vcmp.eq.s32.totalorder %v1209_v62, 0 }
 0x442   : > { %vm1477_vm10 = vcmp.lt.s32.totalorder %v8798_v30, 0  ;;  %v1478_v0 = vsub.s32 0, %v8798_v30  ;;  %v1212_v17 = vxor.u32 2147483648, %v1206_v1  ;;  %v1738_v56 = vmul.u32 %v1736_v43, %v1733_v49 }
 0x443   : > { %v8807_v6 = vmul.u32 %v1735_v35, %v1734_v52  ;;  %vm1214_vm9 = vcmp.eq.s32.totalorder %v1209_v62, 2  ;;  %v1757_v2 = vand.u32 65535, %v1727_v24  ;;  %v1758_v27 = vshrl.u32 %v1727_v24, 16 }
 0x444   : > { %v1479_v19 = vsel %vm1477_vm10, %v1478_v0, %v8798_v30  ;;  %v1213_v18 = vsel %vm1211_vm8, %v1198_v47, %v1212_v17  ;;  %v1216_v44 = vsel %vm1214_vm9, %v1215_v21, %v1206_v1  ;;  %v1741_v61 = vshll.u32 %v1738_v56, 16 }
 0x445   : > { %v1480_v13 = vclz %v1479_v19  ;;  %v1217_v34 = vsel %vm1210_vm3, %v1213_v18, %v1216_v44  ;;  %v1468_v54 = vadd.s32 %v8727_v23, %v8721_v25  ;;  %v1737_v50 = vmul.u32 %v1735_v35, %v1733_v49 }
 0x446   : > { %v1994_v63 = vand.u32 2147483647, %v8794_v58  ;;  %v1218_v48 = vsel %vm1207_vm2, nan, %v1217_v34  ;;  %v1740_v36 = vmul.u32 %v1736_v43, %v1734_v52  ;;  %v1743_v53 = vshll.u32 %v8807_v6, 16 }
 0x447   : > { %v5770_v62 = vadd.s32 4294967294, %v1480_v13  ;;  %vm1376_vm15 = vcmp.lt.s32.totalorder %v8568_v3, 0  ;;  %vm1745_vm4 = vc.u32 %v1737_v50, %v1741_v61  ;;  %v1747_v29 = vadd.s32 %v1741_v61, %v1737_v50  ;;  %3082 = vst [vmem:[%s6642_s12 + $0x18] sm:$0xff] %v1218_v48 }
 0x448   : > { %v1760_v57 = vmul.u32 %v1758_v27, %v1733_v49  ;;  %v1761_v60 = vmul.u32 %v1757_v2, %v1734_v52  ;;  %v1498_v25 = vsub.s32 4, %v8771_v38  ;;  %v1746_v23 = vsel %vm1745_vm4, 1, %v10109_v32 }
 0x449   : > { %vm5771_vm11 = vcmp.lt.s32.totalorder %v5770_v62, 0  ;;  %v1759_v15 = vmul.u32 %v1757_v2, %v1733_v49  ;;  %v1748_v55 = vadd.s32 %v1746_v23, %v1740_v36  ;;  %vm1749_vm5 = vc.u32 %v1747_v29, %v1743_v53 }
 0x44a   : > { %v1483_v12 = vsel %vm5771_vm11, 0, %v5770_v62  ;;  %v1763_v45 = vshll.u32 %v1760_v57, 16  ;;  %vm8822_vm0 = vcmp.le.f32.partialorder %v1374_v16, 0.7853982  ;;  %v1742_v9 = vshrl.u32 %v1738_v56, 16 }
 0x44b   : > { %v1484_v42 = vsub.s32 32, %v1483_v12  ;;  %v1488_v47 = vsub.s32 4294967266, %v1483_v12  ;;  %v1750_v5 = vsel %vm1749_vm5, 1, %v10109_v32  ;;  %v1485_v35 = vshll.u32 %v8798_v30, %v1483_v12 }
 0x44c   : > { %v1752_v43 = vadd.s32 %v1750_v5, %v1748_v55  ;;  %v1762_v1 = vmul.u32 %v1758_v27, %v1734_v52  ;;  %v1765_v49 = vshll.u32 %v1761_v60, 16  ;;  %vm1767_vm14 = vc.u32 %v1759_v15, %v1763_v45 }
 0x44d   : > { %v1486_v21 = vshrl.u32 %v1468_v54, %v1484_v42  ;;  %v1489_v24 = vadd.s32 127, %v1488_v47  ;;  %v1769_v0 = vadd.s32 %v1763_v45, %v1759_v15  ;;  %v1721_v16 = vsel %vm1719_vm7, %v8756_v59, 2102212464 }
 0x44e   : > { %v1753_v17 = vadd.s32 %v1752_v43, %v1742_v9  ;;  %v1768_v19 = vsel %vm1767_vm14, 1, %v10109_v32  ;;  %v1997_v56 = vand.u32 2139095040, %v8794_v58  ;;  %v1700_v30 = vshrl.u32 %v10078_v40, %v8733_v41 }
 0x44f   : > { %v1487_v2 = vor.u32 %v1486_v21, %v1485_v35  ;;  %v1490_v18 = vshll.u32 %v1489_v24, 23  ;;  %v1770_v44 = vadd.s32 %v1768_v19, %v1762_v1  ;;  %vm1771_vm1 = vc.u32 %v1769_v0, %v1765_v49 }
 0x450   : > { %v1744_v52 = vshrl.u32 %v8807_v6, 16  ;;  %v1772_v27 = vsel %vm1771_vm1, 1, %v10109_v32  ;;  %v1998_v13 = vshrl.u32 %v1997_v56, 23  ;;  %v1499_v59 = vsel %vm1376_vm15, %v1498_v25, %v8771_v38 }
 0x451   : > { %v1491_v61 = vor.u32 4788187, %v1490_v18  ;;  %v1764_v34 = vshrl.u32 %v1760_v57, 16  ;;  %v1774_v54 = vadd.s32 %v1772_v27, %v1770_v44  ;;  %v1720_v50 = vsel %vm1716_vm13, %v1700_v30, %v8765_v37 }
 0x452   : > { %v1722_v41 = vsel %vm1718_vm12, %v8750_v26, %v1721_v16  ;;  %v1754_v48 = vadd.s32 %v1753_v17, %v1744_v52  ;;  %v5781_v6 = vadd.s32 4294967169, %v1998_v13  ;;  %v1494_v36 = vcvt.s32.f32 %v1487_v2 }
 0x453   : > { %v1492_v62 = vand.u32 2147483647, %v1491_v61  ;;  %v1766_v53 = vshrl.u32 %v1761_v60, 16  ;;  %v1775_v29 = vadd.s32 %v1774_v54, %v1764_v34  ;;  %v1501_v23 = vsel %vm8822_vm0, 0, %v1499_v59 }
 0x454   : > { %v1773_v38 = vadd.s32 %v1769_v0, %v1765_v49  ;;  %v2001_v57 = vand.u32 8388607, %v1994_v63  ;;  %v2004_v25 = vadd.s32 1, %v5781_v6  ;;  %v8852_v37 = vadd.f32 %v8763_v14, %v7347_v7 }
 0x455   : > { %v1495_v15 = vmul.f32 %v1494_v36, %v1492_v62  ;;  %v1723_v26 = vsel %vm1717_vm6, %v1720_v50, %v1722_v41  ;;  %v1776_v12 = vadd.s32 %v1775_v29, %v1766_v53  ;;  %v1518_v55 = vadd.s32 3, %v1501_v23 }
 0x456   : > { %vm1779_vm13 = vc.u32 %v1754_v48, %v1773_v38  ;;  %vm2005_vm7 = vcmp.gt.s32.totalorder %v2004_v25, 0  ;;  %v1777_v47 = vmul.u32 %v8767_v8, %v1723_v26  ;;  %v2002_v9 = vor.u32 8388608, %v2001_v57 }
 0x457   : > { %v1496_v60 = vxor.u32 2147483648, %v1495_v15  ;;  %v1780_v45 = vadd.s32 1, %v1776_v12  ;;  %v2006_v42 = vsel %vm2005_vm7, %v2004_v25, 0  ;;  %v2307_v14 = vand.u32 2139095040, %v8852_v37 }
 0x458   : > { %v2008_v5 = vand.u32 31, %v2006_v42  ;;  %v8869_v8 = vand.u32 3, %v1518_v55  ;;  %v8871_v21 = vadd.s32 %v1773_v38, %v1754_v48  ;;  %v8875_v16 = vshll.u32 %v2002_v9, 8 }
 0x459   : > { %v1497_v35 = vsel %vm1376_vm15, %v1496_v60, %v1495_v15  ;;  %v1781_v7 = vsel %vm1779_vm13, %v1780_v45, %v1776_v12  ;;  %v2304_v39 = vand.u32 2147483647, %v8852_v37  ;;  %vm1686_vm6 = vcmp.lt.s32.totalorder %v8605_v20, 0 }
 0x45a   : > { %v8863_v33 = vsel %vm8822_vm0, %v8568_v3, %v1497_v35  ;;  %v1782_v43 = vadd.s32 %v1781_v7, %v1777_v47  ;;  %v8865_v1 = vsub.s32 32, %v2008_v5  ;;  %v2308_v2 = vshrl.u32 %v2307_v14, 23 }
 0x45b   : > { %v1502_v49 = vmul.f32 %v8863_v33, %v8863_v33  ;;  %v8881_v44 = vshrl.u32 %v2006_v42, 5  ;;  %v2011_v30 = vshll.u32 %v10078_v40, %v2008_v5  ;;  %v2014_v61 = vshll.u32 %v10082_v46, %v2008_v5 }
 0x45c   : > { %v1783_v24 = vadd.s32 536870912, %v1782_v43  ;;  %v2012_v0 = vshrl.u32 %v10082_v46, %v8865_v1  ;;  %v2015_v56 = vshrl.u32 %v10083_v4, %v8865_v1  ;;  %v2021_v52 = vshrl.u32 %v10088_v28, %v8865_v1 }
 0x45d   : > { %v1503_v17 = vmul.f32 -0.001358992, %v1502_v49  ;;  %v1510_v19 = vmul.f32 -0.00019511016, %v1502_v49  ;;  %v2018_v59 = vshrl.u32 %v10087_v11, %v8865_v1  ;;  %v2017_v50 = vshll.u32 %v10083_v4, %v2008_v5 }
 0x45e   : > { %v1784_v18 = vshrl.u32 %v1783_v24, 30  ;;  %v8889_v54 = vor.u32 %v2012_v0, %v2011_v30  ;;  %v2020_v41 = vshll.u32 %v10087_v11, %v2008_v5  ;;  %vm8895_vm12 = vcmp.le.f32.partialorder %v1684_v31, 0.7853982 }
 0x45f   : > { %v1504_v27 = vadd.f32 0.041655596, %v1503_v17  ;;  %v1511_v13 = vadd.f32 0.008332121, %v1510_v19  ;;  %v8899_v36 = vor.u32 %v2015_v56, %v2014_v61  ;;  %v2023_v53 = vshll.u32 %v10088_v28, %v2008_v5 }
 0x460   : > { %v1785_v34 = vshll.u32 %v1784_v18, 30  ;;  %v1808_v23 = vsub.s32 4, %v1784_v18  ;;  %v2022_v38 = vor.u32 %v2021_v52, %v2020_v41  ;;  %v2024_v57 = vshrl.u32 %v10092_v10, %v8865_v1 }
 0x461   : > { %v1505_v48 = vmul.f32 %v1504_v27, %v1502_v49  ;;  %v1512_v6 = vmul.f32 %v1511_v13, %v1502_v49  ;;  %vm1524_vm2 = vcmp.eq.s32.totalorder %v8869_v8, 2  ;;  %v2019_v26 = vor.u32 %v2018_v59, %v2017_v50 }
 0x462   : > { %v8902_v29 = vsub.s32 %v1782_v43, %v1785_v34  ;;  %vm2026_vm3 = vcmp.lt.s32.totalorder %v8881_v44, 1  ;;  %vm1521_vm10 = vcmp.eq.s32.totalorder %v8869_v8, 0  ;;  %vm2027_vm9 = vcmp.lt.s32.totalorder %v8881_v44, 2 }
 0x463   : > { %v1506_v25 = vadd.f32 -0.4999988, %v1505_v48  ;;  %v1513_v15 = vadd.f32 -0.16666654, %v1512_v6  ;;  %vm2028_vm15 = vcmp.lt.s32.totalorder %v8881_v44, 3  ;;  %vm1520_vm4 = vcmp.lt.s32.totalorder %v8869_v8, 2 }
 0x464   : > { %vm1787_vm8 = vcmp.lt.s32.totalorder %v8902_v29, 0  ;;  %v1788_v31 = vsub.s32 0, %v8902_v29  ;;  %vm2029_vm11 = vcmp.lt.s32.totalorder %v8881_v44, 4  ;;  %v2034_v55 = vsel %vm2026_vm3, %v8889_v54, %v8899_v36 }
 0x465   : > { %v1507_v12 = vmul.f32 %v1506_v25, %v1502_v49  ;;  %v1514_v60 = vmul.f32 %v1513_v15, %v1502_v49  ;;  %vm1517_vm5 = vweird.f32 %v8568_v3  ;;  %v8923_v42 = vsel %vm1686_vm6, %v1808_v23, %v1784_v18 }
 0x466   : > { %v1789_v45 = vsel %vm1787_vm8, %v1788_v31, %v8902_v29  ;;  %v2025_v47 = vor.u32 %v2024_v57, %v2023_v53  ;;  %v2035_v9 = vsel %vm2029_vm11, %v2022_v38, 920167782  ;;  %v2043_v49 = vand.u32 65535, %v8875_v16 }
 0x467   : > { %v1508_v5 = vadd.f32 1.0, %v1507_v12  ;;  %v1515_v35 = vadd.f32 1.0, %v1514_v60  ;;  %v1790_v7 = vclz %v1789_v45  ;;  %v2036_v14 = vsel %vm2028_vm15, %v2019_v26, %v2035_v9 }
 0x468   : > { %v2037_v43 = vsel %vm2027_vm9, %v2034_v55, %v2036_v14  ;;  %v2044_v24 = vshrl.u32 %v8875_v16, 16  ;;  %v5787_v0 = vadd.s32 4294967169, %v2308_v2  ;;  %v2038_v18 = vsel %vm2026_vm3, %v8899_v36, %v2019_v26 }
 0x469   : > { %v1516_v17 = vmul.f32 %v1515_v35, %v8863_v33  ;;  %v1525_v19 = vxor.u32 2147483648, %v1508_v5  ;;  %v5776_v56 = vadd.s32 4294967294, %v1790_v7  ;;  %v1811_v30 = vsel %vm8895_vm12, 0, %v8923_v42 }
 0x46a   : > { %v2010_v52 = vshrl.u32 %v10078_v40, %v8865_v1  ;;  %v2039_v27 = vsel %vm2029_vm11, %v2025_v47, 1326507024  ;;  %v2068_v13 = vshrl.u32 %v2037_v43, 16  ;;  %v2067_v61 = vand.u32 65535, %v2037_v43 }
 0x46b   : > { %v1522_v2 = vxor.u32 2147483648, %v1516_v17  ;;  %vm5777_vm0 = vcmp.lt.s32.totalorder %v5776_v56, 0  ;;  %v2040_v33 = vsel %vm2028_vm15, %v2022_v38, %v2039_v27  ;;  %v1526_v59 = vsel %vm1524_vm2, %v1525_v19, %v1516_v17 }
 0x46c   : > { %v1793_v34 = vsel %vm5777_vm0, 0, %v5776_v56  ;;  %v2031_v50 = vsel %vm2029_vm11, %v2019_v26, 2102212464  ;;  %v2041_v1 = vsel %vm2027_vm9, %v2038_v18, %v2040_v33  ;;  %v2070_v53 = vmul.u32 %v2068_v13, %v2043_v49 }
 0x46d   : > { %v1523_v41 = vsel %vm1521_vm10, %v1508_v5, %v1522_v2  ;;  %v1794_v48 = vsub.s32 32, %v1793_v34  ;;  %v1798_v6 = vsub.s32 4294967266, %v1793_v34  ;;  %v1795_v38 = vshll.u32 %v8902_v29, %v1793_v34 }
 0x46e   : > { %v1527_v23 = vsel %vm1520_vm4, %v1523_v41, %v1526_v59  ;;  %v2045_v57 = vand.u32 65535, %v2041_v1  ;;  %v2046_v25 = vshrl.u32 %v2041_v1, 16  ;;  %v2071_v12 = vmul.u32 %v2067_v61, %v2044_v24 }
 0x46f   : > { %v1528_v15 = vsel %vm1517_vm5, nan, %v1527_v23  ;;  %v1796_v26 = vshrl.u32 %v8871_v21, %v1794_v48  ;;  %v1799_v31 = vadd.s32 127, %v1798_v6  ;;  %v2030_v60 = vsel %vm2026_vm3, %v2010_v52, %v8889_v54 }
 0x470   : > { %v2032_v8 = vsel %vm2028_vm15, %v8899_v36, %v2031_v50  ;;  %v2048_v55 = vmul.u32 %v2046_v25, %v2043_v49  ;;  %v2049_v45 = vmul.u32 %v2045_v57, %v2044_v24  ;;  %3084 = vst [vmem:[%s6642_s12 + $0x28] sm:$0xff] %v1528_v15  ;;  %v2069_v9 = vmul.u32 %v2067_v61, %v2043_v49 }
 0x471   : > { %v1797_v29 = vor.u32 %v1796_v26, %v1795_v38  ;;  %v1800_v47 = vshll.u32 %v1799_v31, 23  ;;  %v2073_v3 = vshll.u32 %v2070_v53, 16  ;;  %v2047_v5 = vmul.u32 %v2045_v57, %v2043_v49 }
 0x472   : > { %v2050_v35 = vmul.u32 %v2046_v25, %v2044_v24  ;;  %v2051_v21 = vshll.u32 %v2048_v55, 16  ;;  %v2072_v7 = vmul.u32 %v2068_v13, %v2044_v24  ;;  %v2053_v17 = vshll.u32 %v2049_v45, 16 }
 0x473   : > { %v1801_v14 = vor.u32 4788187, %v1800_v47  ;;  %v1804_v43 = vcvt.s32.f32 %v1797_v29  ;;  %v2075_v19 = vshll.u32 %v2071_v12, 16  ;;  %vm2077_vm1 = vc.u32 %v2069_v9, %v2073_v3 }
 0x474   : > { %vm2055_vm14 = vc.u32 %v2047_v5, %v2051_v21  ;;  %v2057_v54 = vadd.s32 %v2051_v21, %v2047_v5  ;;  %v2079_v56 = vadd.s32 %v2073_v3, %v2069_v9  ;;  %v2078_v52 = vsel %vm2077_vm1, 1, %v10109_v32 }
 0x475   : > { %v1802_v36 = vand.u32 2147483647, %v1801_v14  ;;  %v2056_v18 = vsel %vm2055_vm14, 1, %v10109_v32  ;;  %v2314_v27 = vadd.s32 1, %v5787_v0  ;;  %v2080_v49 = vadd.s32 %v2078_v52, %v2072_v7 }
 0x476   : > { %v2058_v2 = vadd.s32 %v2056_v18, %v2050_v35  ;;  %vm2059_vm13 = vc.u32 %v2057_v54, %v2053_v17  ;;  %vm2081_vm7 = vc.u32 %v2079_v56, %v2075_v19  ;;  %v2074_v13 = vshrl.u32 %v2070_v53, 16 }
 0x477   : > { %v1805_v33 = vmul.f32 %v1804_v43, %v1802_v36  ;;  %v2060_v24 = vsel %vm2059_vm13, 1, %v10109_v32  ;;  %v2082_v61 = vsel %vm2081_vm7, 1, %v10109_v32  ;;  %v2052_v59 = vshrl.u32 %v2048_v55, 16 }
 0x478   : > { %v2062_v34 = vadd.s32 %v2060_v24, %v2058_v2  ;;  %v2084_v50 = vadd.s32 %v2082_v61, %v2080_v49  ;;  %vm2315_vm2 = vcmp.gt.s32.totalorder %v2314_v27, 0  ;;  %v2033_v41 = vsel %vm2027_vm9, %v2030_v60, %v2032_v8 }
 0x479   : > { %v1806_v1 = vxor.u32 2147483648, %v1805_v33  ;;  %v2054_v48 = vshrl.u32 %v2049_v45, 16  ;;  %v2316_v0 = vsel %vm2315_vm2, %v2314_v27, 0  ;;  %v2076_v23 = vshrl.u32 %v2071_v12, 16 }
 0x47a   : > { %v2063_v6 = vadd.s32 %v2062_v34, %v2052_v59  ;;  %v2085_v38 = vadd.s32 %v2084_v50, %v2074_v13  ;;  %v2318_v57 = vand.u32 31, %v2316_v0  ;;  %v8975_v53 = vadd.s32 %v2079_v56, %v2075_v19 }
 0x47b   : > { %v1807_v25 = vsel %vm1686_vm6, %v1806_v1, %v1805_v33  ;;  %v2311_v15 = vand.u32 8388607, %v2304_v39  ;;  %v1828_v8 = vadd.s32 3, %v1811_v30  ;;  %v2087_v55 = vmul.u32 %v8875_v16, %v2033_v41 }
 0x47c   : > { %v1810_v26 = vsel %vm8895_vm12, %v8605_v20, %v1807_v25  ;;  %v8982_v44 = vadd.s32 %v2063_v6, %v2054_v48  ;;  %v2086_v31 = vadd.s32 %v2085_v38, %v2076_v23  ;;  %v8984_v60 = vsub.s32 32, %v2318_v57 }
 0x47d   : > { %v1812_v12 = vmul.f32 %v1810_v26, %v1810_v26  ;;  %v8991_v45 = vshrl.u32 %v2316_v0, 5  ;;  %v2321_v47 = vshll.u32 %v10078_v40, %v2318_v57  ;;  %v2324_v9 = vshll.u32 %v10082_v46, %v2318_v57 }
 0x47e   : > { %vm2089_vm6 = vc.u32 %v8982_v44, %v8975_v53  ;;  %v2090_v29 = vadd.s32 1, %v2086_v31  ;;  %v2322_v62 = vshrl.u32 %v10082_v46, %v8984_v60  ;;  %v2325_v42 = vshrl.u32 %v10083_v4, %v8984_v60 }
 0x47f   : > { %v1813_v3 = vmul.f32 -0.001358992, %v1812_v12  ;;  %v1820_v5 = vmul.f32 -0.00019511016, %v1812_v12  ;;  %v2328_v16 = vshrl.u32 %v10087_v11, %v8984_v60  ;;  %v2330_v35 = vshll.u32 %v10087_v11, %v2318_v57 }
 0x480   : > { %v2091_v30 = vsel %vm2089_vm6, %v2090_v29, %v2086_v31  ;;  %v2331_v21 = vshrl.u32 %v10088_v28, %v8984_v60  ;;  %v2327_v17 = vshll.u32 %v10083_v4, %v2318_v57  ;;  %v9007_v19 = vor.u32 %v2322_v62, %v2321_v47  ;;  %v10148_v29 = vld [vmem:[#allocation10_spill] sm:$0xff] }
 0x481   : > { %v1814_v7 = vadd.f32 0.041655596, %v1813_v3  ;;  %v1821_v14 = vadd.f32 0.008332121, %v1820_v5  ;;  %v2092_v43 = vadd.s32 %v2091_v30, %v2087_v55  ;;  %v9009_v54 = vor.u32 %v2325_v42, %v2324_v9  ;;  %v10147_v55 = vld [vmem:[#allocation6_spill] sm:$0xff] }
 0x482   : > { %v2332_v56 = vor.u32 %v2331_v21, %v2330_v35  ;;  %v2333_v36 = vshll.u32 %v10088_v28, %v2318_v57  ;;  %v2334_v2 = vshrl.u32 %v10092_v10, %v8984_v60  ;;  %v2312_v49 = vor.u32 8388608, %v2311_v15 }
 0x483   : > { %v1815_v18 = vmul.f32 %v1814_v7, %v1812_v12  ;;  %v1822_v52 = vmul.f32 %v1821_v14, %v1812_v12  ;;  %v2093_v27 = vadd.s32 536870912, %v2092_v43  ;;  %v2329_v33 = vor.u32 %v2328_v16, %v2327_v17 }
 0x484   : > { %vm2339_vm12 = vcmp.lt.s32.totalorder %v8991_v45, 4  ;;  %v2335_v59 = vor.u32 %v2334_v2, %v2333_v36  ;;  %v1829_v34 = vand.u32 3, %v1828_v8  ;;  %vm2336_vm3 = vcmp.lt.s32.totalorder %v8991_v45, 1 }
 0x485   : > { %v1816_v24 = vadd.f32 -0.4999988, %v1815_v18  ;;  %v1823_v13 = vadd.f32 -0.16666654, %v1822_v52  ;;  %v9015_v61 = vshrl.u32 %v2093_v27, 30  ;;  %vm2338_vm10 = vcmp.lt.s32.totalorder %v8991_v45, 3 }
 0x486   : > { %v2345_v50 = vsel %vm2339_vm12, %v2332_v56, 920167782  ;;  %v2344_v0 = vsel %vm2336_vm3, %v9007_v19, %v9009_v54  ;;  %vm1827_vm8 = vweird.f32 %v8605_v20  ;;  %vm2337_vm9 = vcmp.lt.s32.totalorder %v8991_v45, 2 }
 0x487   : > { %v1817_v1 = vmul.f32 %v1816_v24, %v1812_v12  ;;  %v1824_v41 = vmul.f32 %v1823_v13, %v1812_v12  ;;  %v2095_v48 = vshll.u32 %v9015_v61, 30  ;;  %v2346_v6 = vsel %vm2338_vm10, %v2329_v33, %v2345_v50 }
 0x488   : > { %v2349_v23 = vsel %vm2339_vm12, %v2335_v59, 1326507024  ;;  %v9032_v38 = vshll.u32 %v2312_v49, 8  ;;  %v2348_v31 = vsel %vm2336_vm3, %v9009_v54, %v2329_v33  ;;  %vm1830_vm15 = vcmp.lt.s32.totalorder %v1829_v34, 2 }
 0x489   : > { %v1818_v57 = vadd.f32 1.0, %v1817_v1  ;;  %v1825_v25 = vadd.f32 1.0, %v1824_v41  ;;  %v2096_v15 = vsub.s32 %v2092_v43, %v2095_v48  ;;  %v2347_v12 = vsel %vm2337_vm9, %v2344_v0, %v2346_v6 }
 0x48a   : > { %v2350_v8 = vsel %vm2338_vm10, %v2332_v56, %v2349_v23  ;;  %v9043_v47 = vmul.f32 %v10148_v29, %v10147_v55  ;;  %vm1831_vm11 = vcmp.eq.s32.totalorder %v1829_v34, 0  ;;  %vm1834_vm5 = vcmp.eq.s32.totalorder %v1829_v34, 2 }
 0x48b   : > { %v1826_v9 = vmul.f32 %v1825_v25, %v1810_v26  ;;  %v1835_v3 = vxor.u32 2147483648, %v1818_v57  ;;  %vm2097_vm4 = vcmp.lt.s32.totalorder %v2096_v15, 0  ;;  %v2098_v5 = vsub.s32 0, %v2096_v15 }
 0x48c   : > { %v2351_v62 = vsel %vm2337_vm9, %v2348_v31, %v2350_v8  ;;  %v2378_v42 = vshrl.u32 %v2347_v12, 16  ;;  %v2353_v35 = vand.u32 65535, %v9032_v38  ;;  %v2354_v14 = vshrl.u32 %v9032_v38, 16 }
 0x48d   : > { %v1832_v30 = vxor.u32 2147483648, %v1826_v9  ;;  %v2099_v16 = vsel %vm2097_vm4, %v2098_v5, %v2096_v15  ;;  %v2355_v21 = vand.u32 65535, %v2351_v62  ;;  %v2356_v43 = vshrl.u32 %v2351_v62, 16 }
 0x48e   : > { %v2100_v7 = vclz %v2099_v16  ;;  %v2377_v17 = vand.u32 65535, %v2347_v12  ;;  %v1836_v56 = vsel %vm1834_vm5, %v1835_v3, %v1826_v9  ;;  %v2320_v36 = vshrl.u32 %v10078_v40, %v8984_v60 }
 0x48f   : > { %v1833_v26 = vsel %vm1831_vm11, %v1818_v57, %v1832_v30  ;;  %v582_v18 = vmul.f32 %v8377_v22, %v10147_v55  ;;  %v2359_v2 = vmul.u32 %v2355_v21, %v2354_v14  ;;  %v2380_v49 = vmul.u32 %v2378_v42, %v2353_v35 }
 0x490   : > { %v1837_v52 = vsel %vm1830_vm15, %v1833_v26, %v1836_v56  ;;  %v5782_v27 = vadd.s32 4294967294, %v2100_v7  ;;  %v2088_v13 = vadd.s32 %v8975_v53, %v8982_v44  ;;  %v2340_v59 = vsel %vm2336_vm3, %v2320_v36, %v9007_v19 }
 0x491   : > { %v1838_v24 = vsel %vm1827_vm8, nan, %v1837_v52  ;;  %v2358_v50 = vmul.u32 %v2356_v43, %v2353_v35  ;;  %v2341_v60 = vsel %vm2339_vm12, %v2329_v33, 2102212464  ;;  %v2379_v34 = vmul.u32 %v2377_v17, %v2353_v35 }
 0x492   : > { %vm5783_vm0 = vcmp.lt.s32.totalorder %v5782_v27, 0  ;;  %v2381_v1 = vmul.u32 %v2377_v17, %v2354_v14  ;;  %3086 = vst [vmem:[%s6642_s12 + $0x38] sm:$0xff] %v1838_v24  ;;  %v2357_v48 = vmul.u32 %v2355_v21, %v2353_v35  ;;  %v2360_v0 = vmul.u32 %v2356_v43, %v2354_v14  ;;  %v9068_v35 = vpop.permute.xlu1 %358 }
 0x493   : > { %v2103_v41 = vsel %vm5783_vm0, 0, %v5782_v27  ;;  %v2361_v20 = vshll.u32 %v2358_v50, 16  ;;  %v2363_v57 = vshll.u32 %v2359_v2, 16  ;;  %v2383_v53 = vshll.u32 %v2380_v49, 16 }
 0x494   : > { %v2104_v6 = vsub.s32 32, %v2103_v41  ;;  %v2108_v23 = vsub.s32 4294967266, %v2103_v41  ;;  %vm1996_vm14 = vcmp.lt.s32.totalorder %v8794_v58, 0  ;;  %v2105_v44 = vshll.u32 %v2096_v15, %v2103_v41 }
 0x495   : > { %vm2365_vm1 = vc.u32 %v2357_v48, %v2361_v20  ;;  %v2367_v19 = vadd.s32 %v2361_v20, %v2357_v48  ;;  %v2382_v25 = vmul.u32 %v2378_v42, %v2354_v14  ;;  %v2385_v8 = vshll.u32 %v2381_v1, 16 }
 0x496   : > { %v2106_v31 = vshrl.u32 %v2088_v13, %v2104_v6  ;;  %v2109_v12 = vadd.s32 127, %v2108_v23  ;;  %v2366_v33 = vsel %vm2365_vm1, 1, %v10109_v32  ;;  %vm2387_vm7 = vc.u32 %v2379_v34, %v2383_v53 }
 0x497   : > { %v2368_v9 = vadd.s32 %v2366_v33, %v2360_v0  ;;  %vm2369_vm13 = vc.u32 %v2367_v19, %v2363_v57  ;;  %v2389_v3 = vadd.s32 %v2383_v53, %v2379_v34  ;;  %v2388_v16 = vsel %vm2387_vm7, 1, %v10109_v32 }
 0x498   : > { %v2107_v5 = vor.u32 %v2106_v31, %v2105_v44  ;;  %v2110_v62 = vshll.u32 %v2109_v12, 23  ;;  %v2370_v30 = vsel %vm2369_vm13, 1, %v10109_v32  ;;  %v2362_v15 = vshrl.u32 %v2358_v50, 16 }
 0x499   : > { %v2372_v21 = vadd.s32 %v2370_v30, %v2368_v9  ;;  %v2390_v42 = vadd.s32 %v2388_v16, %v2382_v25  ;;  %vm2391_vm2 = vc.u32 %v2389_v3, %v2385_v8  ;;  %v2118_v14 = vsub.s32 4, %v9015_v61 }
 0x49a   : > { %v2111_v7 = vor.u32 4788187, %v2110_v62  ;;  %v2364_v43 = vshrl.u32 %v2359_v2, 16  ;;  %v2392_v17 = vsel %vm2391_vm2, 1, %v10109_v32  ;;  %v2384_v56 = vshrl.u32 %v2380_v49, 16 }
 0x49b   : > { %v2373_v26 = vadd.s32 %v2372_v21, %v2362_v15  ;;  %v2394_v36 = vadd.s32 %v2392_v17, %v2390_v42  ;;  %v9074_v52 = vadd.f32 %v9043_v47, %v9068_v35  ;;  %v2114_v24 = vcvt.s32.f32 %v2107_v5 }
 0x49c   : > { %v2112_v27 = vand.u32 2147483647, %v2111_v7  ;;  %v2342_v13 = vsel %vm2338_vm10, %v9009_v54, %v2341_v60  ;;  %v2386_v50 = vshrl.u32 %v2381_v1, 16  ;;  %v9080_v2 = vadd.f32 %v582_v18, %v9068_v35 }
 0x49d   : > { %v2374_v34 = vadd.s32 %v2373_v26, %v2364_v43  ;;  %v2395_v41 = vadd.s32 %v2394_v36, %v2384_v56  ;;  %v2769_v48 = vand.u32 2147483647, %v9074_v52  ;;  %v2119_v47 = vsel %vm1996_vm14, %v2118_v14, %v9015_v61 }
 0x49e   : > { %v2115_v49 = vmul.f32 %v2114_v24, %v2112_v27  ;;  %v2393_v0 = vadd.s32 %v2389_v3, %v2385_v8  ;;  %v2772_v20 = vand.u32 2139095040, %v9074_v52  ;;  %v2343_v6 = vsel %vm2337_vm9, %v2340_v59, %v2342_v13 }
 0x49f   : > { %v2396_v54 = vadd.s32 %v2395_v41, %v2386_v50  ;;  %vm1995_vm6 = vcmp.le.f32.partialorder %v1994_v63, 0.7853982  ;;  %v2776_v57 = vand.u32 8388607, %v2769_v48  ;;  %v2927_v61 = vand.u32 2139095040, %v9080_v2 }
 0x4a0   : > { %v2116_v60 = vxor.u32 2147483648, %v2115_v49  ;;  %vm2399_vm12 = vc.u32 %v2374_v34, %v2393_v0  ;;  %v2773_v18 = vshrl.u32 %v2772_v20, 23  ;;  %v2121_v1 = vsel %vm1995_vm6, 0, %v2119_v47 }
 0x4a1   : > { %v2400_v23 = vadd.s32 1, %v2396_v54  ;;  %v2397_v45 = vmul.u32 %v9032_v38, %v2343_v6  ;;  %v2138_v25 = vadd.s32 3, %v2121_v1  ;;  %v2777_v33 = vor.u32 8388608, %v2776_v57 }
 0x4a2   : > { %v2117_v53 = vsel %vm1996_vm14, %v2116_v60, %v2115_v49  ;;  %v5796_v59 = vadd.s32 4294967169, %v2773_v18  ;;  %v2928_v8 = vshrl.u32 %v2927_v61, 23  ;;  %v2924_v7 = vand.u32 2147483647, %v9080_v2 }
 0x4a3   : > { %v2120_v44 = vsel %vm1995_vm6, %v8794_v58, %v2117_v53  ;;  %v2401_v19 = vsel %vm2399_vm12, %v2400_v23, %v2396_v54  ;;  %v9098_v15 = vand.u32 3, %v2138_v25  ;;  %v9100_v42 = vshll.u32 %v2777_v33, 8 }
 0x4a4   : > { %v2122_v63 = vmul.f32 %v2120_v44, %v2120_v44  ;;  %v2402_v31 = vadd.s32 %v2401_v19, %v2397_v45  ;;  %v2779_v12 = vadd.s32 1, %v5796_v59  ;;  %v5799_v14 = vadd.s32 4294967169, %v2928_v8 }
 0x4a5   : > { %vm9105_vm10 = vcmp.le.f32.partialorder %v2304_v39, 0.7853982  ;;  %vm2306_vm8 = vcmp.lt.s32.totalorder %v8852_v37, 0  ;;  %vm2144_vm9 = vcmp.eq.s32.totalorder %v9098_v15, 2  ;;  %v2398_v50 = vadd.s32 %v2393_v0, %v2374_v34 }
 0x4a6   : > { %v2123_v9 = vmul.f32 -0.001358992, %v2122_v63  ;;  %v2130_v3 = vmul.f32 -0.00019511016, %v2122_v63  ;;  %v2403_v5 = vadd.s32 536870912, %v2402_v31  ;;  %vm2780_vm3 = vcmp.gt.s32.totalorder %v2779_v12, 0 }
 0x4a7   : > { %v2781_v62 = vsel %vm2780_vm3, %v2779_v12, 0  ;;  %vm2141_vm15 = vcmp.eq.s32.totalorder %v9098_v15, 0  ;;  %v9115_v47 = vand.u32 65535, %v9100_v42  ;;  %v9119_v39 = vand.u32 8388607, %v2924_v7 }
 0x4a8   : > { %v2124_v30 = vadd.f32 0.041655596, %v2123_v9  ;;  %v2131_v16 = vadd.f32 0.008332121, %v2130_v3  ;;  %v2404_v38 = vshrl.u32 %v2403_v5, 30  ;;  %v2783_v21 = vand.u32 31, %v2781_v62 }
 0x4a9   : > { %v9112_v49 = vshrl.u32 %v2781_v62, 5  ;;  %v9121_v20 = vadd.s32 1, %v5799_v14  ;;  %vm2140_vm4 = vcmp.lt.s32.totalorder %v9098_v15, 2  ;;  %vm2137_vm5 = vweird.f32 %v8794_v58 }
 0x4aa   : > { %v2125_v43 = vmul.f32 %v2124_v30, %v2122_v63  ;;  %v2132_v17 = vmul.f32 %v2131_v16, %v2122_v63  ;;  %v2405_v26 = vshll.u32 %v2404_v38, 30  ;;  %v2428_v36 = vsub.s32 4, %v2404_v38 }
 0x4ab   : > { %v2784_v27 = vsub.s32 32, %v2783_v21  ;;  %v2786_v60 = vshll.u32 %v10078_v40, %v2783_v21  ;;  %v2789_v1 = vshll.u32 %v10082_v46, %v2783_v21  ;;  %v2792_v59 = vshll.u32 %v10083_v4, %v2783_v21 }
 0x4ac   : > { %v2126_v24 = vadd.f32 -0.4999988, %v2125_v43  ;;  %v2133_v13 = vadd.f32 -0.16666654, %v2132_v17  ;;  %v2406_v41 = vsub.s32 %v2402_v31, %v2405_v26  ;;  %v2429_v0 = vsel %vm2306_vm8, %v2428_v36, %v2404_v38 }
 0x4ad   : > { %v2787_v18 = vshrl.u32 %v10082_v46, %v2784_v27  ;;  %v2790_v53 = vshrl.u32 %v10083_v4, %v2784_v27  ;;  %v2793_v19 = vshrl.u32 %v10087_v11, %v2784_v27  ;;  %v2795_v12 = vshll.u32 %v10087_v11, %v2783_v21 }
 0x4ae   : > { %v2127_v6 = vmul.f32 %v2126_v24, %v2122_v63  ;;  %v2134_v54 = vmul.f32 %v2133_v13, %v2122_v63  ;;  %vm2407_vm11 = vcmp.lt.s32.totalorder %v2406_v41, 0  ;;  %v2408_v34 = vsub.s32 0, %v2406_v41 }
 0x4af   : > { %v2796_v63 = vshrl.u32 %v10088_v28, %v2784_v27  ;;  %v2799_v33 = vshrl.u32 %v10092_v10, %v2784_v27  ;;  %v2431_v9 = vsel %vm9105_vm10, 0, %v2429_v0  ;;  %v2785_v3 = vshrl.u32 %v10078_v40, %v2784_v27 }
 0x4b0   : > { %v2128_v23 = vadd.f32 1.0, %v2127_v6  ;;  %v2135_v57 = vadd.f32 1.0, %v2134_v54  ;;  %v2409_v61 = vsel %vm2407_vm11, %v2408_v34, %v2406_v41  ;;  %v2798_v5 = vshll.u32 %v10088_v28, %v2783_v21 }
 0x4b1   : > { %v2410_v45 = vclz %v2409_v61  ;;  %v2788_v30 = vor.u32 %v2787_v18, %v2786_v60  ;;  %v2791_v16 = vor.u32 %v2790_v53, %v2789_v1  ;;  %v2797_v38 = vor.u32 %v2796_v63, %v2795_v12 }
 0x4b2   : > { %v2136_v25 = vmul.f32 %v2135_v57, %v2120_v44  ;;  %v2145_v31 = vxor.u32 2147483648, %v2128_v23  ;;  %v2794_v14 = vor.u32 %v2793_v19, %v2792_v59  ;;  %v2800_v43 = vor.u32 %v2799_v33, %v2798_v5 }
 0x4b3   : > { %v5788_v8 = vadd.s32 4294967294, %v2410_v45  ;;  %vm2801_vm14 = vcmp.lt.s32.totalorder %v9112_v49, 1  ;;  %vm2802_vm1 = vcmp.lt.s32.totalorder %v9112_v49, 2  ;;  %vm2804_vm13 = vcmp.lt.s32.totalorder %v9112_v49, 4 }
 0x4b4   : > { %v2142_v62 = vxor.u32 2147483648, %v2136_v25  ;;  %v2146_v44 = vsel %vm2144_vm9, %v2145_v31, %v2136_v25  ;;  %vm2803_vm7 = vcmp.lt.s32.totalorder %v9112_v49, 3  ;;  %v2809_v13 = vsel %vm2801_vm14, %v2788_v30, %v2791_v16 }
 0x4b5   : > { %vm5789_vm0 = vcmp.lt.s32.totalorder %v5788_v8, 0  ;;  %v2810_v6 = vsel %vm2804_vm13, %v2797_v38, 920167782  ;;  %v2806_v60 = vsel %vm2804_vm13, %v2794_v14, 2102212464  ;;  %v2813_v58 = vsel %vm2801_vm14, %v2791_v16, %v2794_v14 }
 0x4b6   : > { %v2143_v17 = vsel %vm2141_vm15, %v2128_v23, %v2142_v62  ;;  %v2413_v26 = vsel %vm5789_vm0, 0, %v5788_v8  ;;  %v2811_v15 = vsel %vm2803_vm7, %v2794_v14, %v2810_v6  ;;  %v2814_v1 = vsel %vm2804_vm13, %v2800_v43, 1326507024 }
 0x4b7   : > { %v2147_v21 = vsel %vm2140_vm4, %v2143_v17, %v2146_v44  ;;  %v2414_v36 = vsub.s32 32, %v2413_v26  ;;  %v2418_v27 = vsub.s32 4294967266, %v2413_v26  ;;  %v2415_v54 = vshll.u32 %v2406_v41, %v2413_v26 }
 0x4b8   : > { %v2148_v24 = vsel %vm2137_vm5, nan, %v2147_v21  ;;  %v2812_v18 = vsel %vm2802_vm1, %v2809_v13, %v2811_v15  ;;  %v2815_v61 = vsel %vm2803_vm7, %v2797_v38, %v2814_v1  ;;  %v2819_v45 = vshrl.u32 %v9100_v42, 16 }
 0x4b9   : > { %v2416_v34 = vshrl.u32 %v2398_v50, %v2414_v36  ;;  %v2419_v0 = vadd.s32 127, %v2418_v27  ;;  %3088 = vst [vmem:[%s6642_s12 + $0x48] sm:$0xff] %v2148_v24  ;;  %v2842_v41 = vand.u32 65535, %v2812_v18  ;;  %v2805_v50 = vsel %vm2801_vm14, %v2785_v3, %v2788_v30 }
 0x4ba   : > { %v2816_v53 = vsel %vm2802_vm1, %v2813_v58, %v2815_v61  ;;  %v2843_v59 = vshrl.u32 %v2812_v18, 16  ;;  %v2807_v63 = vsel %vm2803_vm7, %v2791_v16, %v2806_v60  ;;  %v2448_v12 = vadd.s32 3, %v2431_v9 }
 0x4bb   : > { %v2417_v23 = vor.u32 %v2416_v34, %v2415_v54  ;;  %v2420_v57 = vshll.u32 %v2419_v0, 23  ;;  %v2820_v25 = vand.u32 65535, %v2816_v53  ;;  %v2821_v31 = vshrl.u32 %v2816_v53, 16 }
 0x4bc   : > { %v2845_v33 = vmul.u32 %v2843_v59, %v9115_v47  ;;  %v2846_v8 = vmul.u32 %v2842_v41, %v2819_v45  ;;  %vm2935_vm2 = vcmp.gt.s32.totalorder %v9121_v20, 0  ;;  %v9175_v38 = vsel %vm2802_vm1, %v2805_v50, %v2807_v63 }
 0x4bd   : > { %v2421_v19 = vor.u32 4788187, %v2420_v57  ;;  %v2424_v3 = vcvt.s32.f32 %v2417_v23  ;;  %v2823_v62 = vmul.u32 %v2821_v31, %v9115_v47  ;;  %v2824_v30 = vmul.u32 %v2820_v25, %v2819_v45 }
 0x4be   : > { %v2844_v44 = vmul.u32 %v2842_v41, %v9115_v47  ;;  %v2847_v16 = vmul.u32 %v2843_v59, %v2819_v45  ;;  %v2848_v14 = vshll.u32 %v2845_v33, 16  ;;  %v2822_v9 = vmul.u32 %v2820_v25, %v9115_v47 }
 0x4bf   : > { %v2422_v5 = vand.u32 2147483647, %v2421_v19  ;;  %v2825_v17 = vmul.u32 %v2821_v31, %v2819_v45  ;;  %v2826_v26 = vshll.u32 %v2823_v62, 16  ;;  %v2828_v21 = vshll.u32 %v2824_v30, 16 }
 0x4c0   : > { %v2850_v36 = vshll.u32 %v2846_v8, 16  ;;  %vm2852_vm6 = vc.u32 %v2844_v44, %v2848_v14  ;;  %v2854_v27 = vadd.s32 %v2848_v14, %v2844_v44  ;;  %v2936_v34 = vsel %vm2935_vm2, %v9121_v20, 0 }
 0x4c1   : > { %v2425_v43 = vmul.f32 %v2424_v3, %v2422_v5  ;;  %vm2830_vm12 = vc.u32 %v2822_v9, %v2826_v26  ;;  %v2832_v13 = vadd.s32 %v2826_v26, %v2822_v9  ;;  %v2853_v49 = vsel %vm2852_vm6, 1, %v10109_v32 }
 0x4c2   : > { %v2831_v6 = vsel %vm2830_vm12, 1, %v10109_v32  ;;  %v2855_v54 = vadd.s32 %v2853_v49, %v2847_v16  ;;  %vm2856_vm3 = vc.u32 %v2854_v27, %v2850_v36  ;;  %v2849_v58 = vshrl.u32 %v2845_v33, 16 }
 0x4c3   : > { %v2426_v24 = vxor.u32 2147483648, %v2425_v43  ;;  %v2833_v0 = vadd.s32 %v2831_v6, %v2825_v17  ;;  %vm2834_vm9 = vc.u32 %v2832_v13, %v2828_v21  ;;  %v2857_v15 = vsel %vm2856_vm3, 1, %v10109_v32 }
 0x4c4   : > { %v2835_v18 = vsel %vm2834_vm9, 1, %v10109_v32  ;;  %v2859_v1 = vadd.s32 %v2857_v15, %v2855_v54  ;;  %v2827_v57 = vshrl.u32 %v2823_v62, 16  ;;  %v2938_v41 = vand.u32 31, %v2936_v34 }
 0x4c5   : > { %v2427_v47 = vsel %vm2306_vm8, %v2426_v24, %v2425_v43  ;;  %v2837_v61 = vadd.s32 %v2835_v18, %v2833_v0  ;;  %v2829_v20 = vshrl.u32 %v2824_v30, 16  ;;  %v2851_v50 = vshrl.u32 %v2846_v8, 16 }
 0x4c6   : > { %v2430_v60 = vsel %vm9105_vm10, %v8852_v37, %v2427_v47  ;;  %v2860_v53 = vadd.s32 %v2859_v1, %v2849_v58  ;;  %v2932_v45 = vor.u32 8388608, %v9119_v39  ;;  %v9192_v25 = vsub.s32 32, %v2938_v41 }
 0x4c7   : > { %v2432_v23 = vmul.f32 %v2430_v60, %v2430_v60  ;;  %v2838_v63 = vadd.s32 %v2837_v61, %v2827_v57  ;;  %v9194_v56 = vand.u32 3, %v2448_v12  ;;  %v9196_v31 = vadd.s32 %v2854_v27, %v2850_v36 }
 0x4c8   : > { %v2861_v33 = vadd.s32 %v2860_v53, %v2851_v50  ;;  %v2862_v5 = vmul.u32 %v9100_v42, %v9175_v38  ;;  %v2941_v8 = vshll.u32 %v10078_v40, %v2938_v41  ;;  %v2942_v44 = vshrl.u32 %v10082_v46, %v9192_v25 }
 0x4c9   : > { %v2433_v59 = vmul.f32 -0.001358992, %v2432_v23  ;;  %v2440_v19 = vmul.f32 -0.00019511016, %v2432_v23  ;;  %v9200_v30 = vadd.s32 %v2838_v63, %v2829_v20  ;;  %v2944_v16 = vshll.u32 %v10082_v46, %v2938_v41 }
 0x4ca   : > { %v2865_v39 = vadd.s32 1, %v2861_v33  ;;  %v2945_v12 = vshrl.u32 %v10083_v4, %v9192_v25  ;;  %v2948_v42 = vshrl.u32 %v10087_v11, %v9192_v25  ;;  %v9212_v9 = vshrl.u32 %v2936_v34, 5 }
 0x4cb   : > { %v2434_v3 = vadd.f32 0.041655596, %v2433_v59  ;;  %v2441_v62 = vadd.f32 0.008332121, %v2440_v19  ;;  %vm2864_vm10 = vc.u32 %v9200_v30, %v9196_v31  ;;  %v9214_v17 = vor.u32 %v2942_v44, %v2941_v8 }
 0x4cc   : > { %v2866_v38 = vsel %vm2864_vm10, %v2865_v39, %v2861_v33  ;;  %v2947_v26 = vshll.u32 %v10083_v4, %v2938_v41  ;;  %v9217_v24 = vor.u32 %v2945_v12, %v2944_v16  ;;  %v2950_v13 = vshll.u32 %v10087_v11, %v2938_v41 }
 0x4cd   : > { %v2435_v14 = vmul.f32 %v2434_v3, %v2432_v23  ;;  %v2442_v43 = vmul.f32 %v2441_v62, %v2432_v23  ;;  %v2867_v27 = vadd.s32 %v2866_v38, %v2862_v5  ;;  %v2951_v49 = vshrl.u32 %v10088_v28, %v9192_v25 }
 0x4ce   : > { %v2953_v6 = vshll.u32 %v10088_v28, %v2938_v41  ;;  %v2954_v54 = vshrl.u32 %v10092_v10, %v9192_v25  ;;  %v2949_v15 = vor.u32 %v2948_v42, %v2947_v26  ;;  %vm2956_vm8 = vcmp.lt.s32.totalorder %v9212_v9, 1 }
 0x4cf   : > { %v2436_v21 = vadd.f32 -0.4999988, %v2435_v14  ;;  %v2443_v36 = vadd.f32 -0.16666654, %v2442_v43  ;;  %v2868_v0 = vadd.s32 536870912, %v2867_v27  ;;  %v2952_v18 = vor.u32 %v2951_v49, %v2950_v13  ;;  %v10151_v49 = vld [vmem:[#allocation9_spill] sm:$0xff] }
 0x4d0   : > { %v2955_v58 = vor.u32 %v2954_v54, %v2953_v6  ;;  %v9226_v1 = vshll.u32 %v2932_v45, 8  ;;  %vm2959_vm15 = vcmp.lt.s32.totalorder %v9212_v9, 4  ;;  %vm2958_vm4 = vcmp.lt.s32.totalorder %v9212_v9, 3 }
 0x4d1   : > { %v2437_v34 = vmul.f32 %v2436_v21, %v2432_v23  ;;  %v2444_v47 = vmul.f32 %v2443_v36, %v2432_v23  ;;  %v9228_v20 = vshrl.u32 %v2868_v0, 30  ;;  %v2964_v23 = vsel %vm2956_vm8, %v9214_v17, %v9217_v24 }
 0x4d2   : > { %v2965_v41 = vsel %vm2959_vm15, %v2952_v18, 920167782  ;;  %v2969_v50 = vsel %vm2959_vm15, %v2955_v58, 1326507024  ;;  %v2968_v19 = vsel %vm2956_vm8, %v9217_v24, %v2949_v15  ;;  %vm2447_vm11 = vweird.f32 %v8852_v37 }
 0x4d3   : > { %v2438_v57 = vadd.f32 1.0, %v2437_v34  ;;  %v2445_v61 = vadd.f32 1.0, %v2444_v47  ;;  %v2870_v59 = vshll.u32 %v9228_v20, 30  ;;  %vm2450_vm5 = vcmp.lt.s32.totalorder %v9194_v56, 2 }
 0x4d4   : > { %v2966_v63 = vsel %vm2958_vm4, %v2949_v15, %v2965_v41  ;;  %v2970_v33 = vsel %vm2958_vm4, %v2952_v18, %v2969_v50  ;;  %vm2451_vm0 = vcmp.eq.s32.totalorder %v9194_v56, 0  ;;  %vm2957_vm14 = vcmp.lt.s32.totalorder %v9212_v9, 2 }
 0x4d5   : > { %v2446_v53 = vmul.f32 %v2445_v61, %v2430_v60  ;;  %v2455_v45 = vxor.u32 2147483648, %v2438_v57  ;;  %v2871_v5 = vsub.s32 %v2867_v27, %v2870_v59  ;;  %vm2454_vm1 = vcmp.eq.s32.totalorder %v9194_v56, 2 }
 0x4d6   : > { %v2967_v3 = vsel %vm2957_vm14, %v2964_v23, %v2966_v63  ;;  %v2971_v62 = vsel %vm2957_vm14, %v2968_v19, %v2970_v33  ;;  %v2973_v8 = vand.u32 65535, %v9226_v1  ;;  %v2974_v14 = vshrl.u32 %v9226_v1, 16 }
 0x4d7   : > { %v2452_v60 = vxor.u32 2147483648, %v2446_v53  ;;  %v2456_v44 = vsel %vm2454_vm1, %v2455_v45, %v2446_v53  ;;  %vm2872_vm13 = vcmp.lt.s32.totalorder %v2871_v5, 0  ;;  %v2873_v16 = vsub.s32 0, %v2871_v5 }
 0x4d8   : > { %v2975_v43 = vand.u32 65535, %v2971_v62  ;;  %v2976_v42 = vshrl.u32 %v2971_v62, 16  ;;  %v2998_v26 = vshrl.u32 %v2967_v3, 16  ;;  %v2997_v13 = vand.u32 65535, %v2967_v3 }
 0x4d9   : > { %v2453_v39 = vsel %vm2451_vm0, %v2438_v57, %v2452_v60  ;;  %v2874_v38 = vsel %vm2872_vm13, %v2873_v16, %v2871_v5  ;;  %v3111_v6 = vmul.f32 %v10151_v49, %v10147_v55  ;;  %v3112_v54 = vmul.f32 %v7597_v51, %v10147_v55 }
 0x4da   : > { %v2457_v12 = vsel %vm2450_vm5, %v2453_v39, %v2456_v44  ;;  %v2875_v21 = vclz %v2874_v38  ;;  %v2978_v36 = vmul.u32 %v2976_v42, %v2973_v8  ;;  %v2979_v27 = vmul.u32 %v2975_v43, %v2974_v14 }
 0x4db   : > { %v2458_v56 = vsel %vm2447_vm11, nan, %v2457_v12  ;;  %v2863_v34 = vadd.s32 %v9196_v31, %v9200_v30  ;;  %v2940_v37 = vshrl.u32 %v10078_v40, %v9192_v25  ;;  %v2961_v0 = vsel %vm2959_vm15, %v2949_v15, 2102212464 }
 0x4dc   : > { %3090 = vst [vmem:[%s6642_s12 + $0x58] sm:$0xff] %v2458_v56  ;;  %v5797_v47 = vadd.s32 4294967294, %v2875_v21  ;;  %v2977_v18 = vmul.u32 %v2975_v43, %v2973_v8  ;;  %v2981_v58 = vshll.u32 %v2978_v36, 16  ;;  %v2893_v57 = vsub.s32 4, %v9228_v20 }
 0x4dd   : > { %v2980_v61 = vmul.u32 %v2976_v42, %v2974_v14  ;;  %v2983_v23 = vshll.u32 %v2979_v27, 16  ;;  %v3000_v41 = vmul.u32 %v2998_v26, %v2973_v8  ;;  %v2999_v50 = vmul.u32 %v2997_v13, %v2973_v8 }
 0x4de   : > { %vm5798_vm7 = vcmp.lt.s32.totalorder %v5797_v47, 0  ;;  %vm2985_vm2 = vc.u32 %v2977_v18, %v2981_v58  ;;  %v2987_v55 = vadd.s32 %v2981_v58, %v2977_v18  ;;  %v3001_v30 = vmul.u32 %v2997_v13, %v2974_v14 }
 0x4df   : > { %v2878_v53 = vsel %vm5798_vm7, 0, %v5797_v47  ;;  %v2986_v31 = vsel %vm2985_vm2, 1, %v10109_v32  ;;  %v3003_v25 = vshll.u32 %v3000_v41, 16  ;;  %v2982_v19 = vshrl.u32 %v2978_v36, 16 }
 0x4e0   : > { %v2879_v45 = vsub.s32 32, %v2878_v53  ;;  %v2883_v59 = vsub.s32 4294967266, %v2878_v53  ;;  %v2988_v15 = vadd.s32 %v2986_v31, %v2980_v61  ;;  %v2880_v63 = vshll.u32 %v2871_v5, %v2878_v53 }
 0x4e1   : > { %vm2989_vm6 = vc.u32 %v2987_v55, %v2983_v23  ;;  %v3002_v33 = vmul.u32 %v2998_v26, %v2974_v14  ;;  %vm3007_vm12 = vc.u32 %v2999_v50, %v3003_v25  ;;  %v3005_v44 = vshll.u32 %v3001_v30, 16 }
 0x4e2   : > { %v2881_v60 = vshrl.u32 %v2863_v34, %v2879_v45  ;;  %v2884_v3 = vadd.s32 127, %v2883_v59  ;;  %v2990_v62 = vsel %vm2989_vm6, 1, %v10109_v32  ;;  %v3008_v39 = vsel %vm3007_vm12, 1, %v10109_v32 }
 0x4e3   : > { %v2992_v8 = vadd.s32 %v2990_v62, %v2988_v15  ;;  %v3009_v16 = vadd.s32 %v3003_v25, %v2999_v50  ;;  %v3010_v12 = vadd.s32 %v3008_v39, %v3002_v33  ;;  %vm2771_vm3 = vcmp.lt.s32.totalorder %v9074_v52, 0 }
 0x4e4   : > { %v2882_v43 = vor.u32 %v2881_v60, %v2880_v63  ;;  %v2885_v42 = vshll.u32 %v2884_v3, 23  ;;  %v9278_v56 = vadd.f32 %v3111_v6, %v9068_v35  ;;  %v2960_v5 = vsel %vm2956_vm8, %v2940_v37, %v9214_v17 }
 0x4e5   : > { %v2962_v14 = vsel %vm2958_vm4, %v9217_v24, %v2961_v0  ;;  %v2993_v38 = vadd.s32 %v2992_v8, %v2982_v19  ;;  %vm3011_vm9 = vc.u32 %v3009_v16, %v3005_v44  ;;  %v2984_v21 = vshrl.u32 %v2979_v27, 16 }
 0x4e6   : > { %v2886_v26 = vor.u32 4788187, %v2885_v42  ;;  %v3012_v36 = vsel %vm3011_vm9, 1, %v10109_v32  ;;  %v5299_v13 = vand.u32 2147483647, %v9278_v56  ;;  %v2894_v6 = vsel %vm2771_vm3, %v2893_v57, %v9228_v20 }
 0x4e7   : > { %v3004_v34 = vshrl.u32 %v3000_v41, 16  ;;  %v3014_v47 = vadd.s32 %v3012_v36, %v3010_v12  ;;  %v5302_v17 = vand.u32 2139095040, %v9278_v56  ;;  %v2889_v18 = vcvt.s32.f32 %v2882_v43 }
 0x4e8   : > { %v2887_v37 = vand.u32 2147483647, %v2886_v26  ;;  %v2994_v58 = vadd.s32 %v2993_v38, %v2984_v21  ;;  %v3006_v24 = vshrl.u32 %v3001_v30, 16  ;;  %v9293_v61 = vadd.f32 %v3112_v54, %v9068_v35 }
 0x4e9   : > { %v3015_v0 = vadd.s32 %v3014_v47, %v3004_v34  ;;  %v5303_v27 = vshrl.u32 %v5302_v17, 23  ;;  %v5306_v23 = vand.u32 8388607, %v5299_v13  ;;  %v3013_v50 = vadd.s32 %v3009_v16, %v3005_v44 }
 0x4ea   : > { %v2890_v55 = vmul.f32 %v2889_v18, %v2887_v37  ;;  %vm9299_vm10 = vcmp.le.f32.partialorder %v2769_v48, 0.7853982  ;;  %v2963_v57 = vsel %vm2957_vm14, %v2960_v5, %v2962_v14  ;;  %v5457_v45 = vand.u32 2139095040, %v9293_v61 }
 0x4eb   : > { %v3016_v41 = vadd.s32 %v3015_v0, %v3006_v24  ;;  %v5844_v53 = vadd.s32 4294967169, %v5303_v27  ;;  %v2896_v35 = vsel %vm9299_vm10, 0, %v2894_v6  ;;  %vm3019_vm8 = vc.u32 %v2994_v58, %v3013_v50 }
 0x4ec   : > { %v2891_v31 = vxor.u32 2147483648, %v2890_v55  ;;  %v5307_v30 = vor.u32 8388608, %v5306_v23  ;;  %v3017_v59 = vmul.u32 %v9226_v1, %v2963_v57  ;;  %v2913_v63 = vadd.s32 3, %v2896_v35 }
 0x4ed   : > { %v3020_v54 = vadd.s32 1, %v3016_v41  ;;  %v5309_v25 = vadd.s32 1, %v5844_v53  ;;  %v5458_v39 = vshrl.u32 %v5457_v45, 23  ;;  %v9320_v14 = vadd.s32 %v3013_v50, %v2994_v58 }
 0x4ee   : > { %v2892_v48 = vsel %vm2771_vm3, %v2891_v31, %v2890_v55  ;;  %v9314_v62 = vshll.u32 %v5307_v30, 8  ;;  %v9318_v42 = vand.u32 3, %v2913_v63  ;;  %v5454_v26 = vand.u32 2147483647, %v9293_v61 }
 0x4ef   : > { %v2895_v9 = vsel %vm9299_vm10, %v9074_v52, %v2892_v48  ;;  %v3021_v19 = vsel %vm3019_vm8, %v3020_v54, %v3016_v41  ;;  %vm5310_vm15 = vcmp.gt.s32.totalorder %v5309_v25, 0  ;;  %v5847_v21 = vadd.s32 4294967169, %v5458_v39 }
 0x4f0   : > { %v2897_v15 = vmul.f32 %v2895_v9, %v2895_v9  ;;  %v3022_v33 = vadd.s32 %v3021_v19, %v3017_v59  ;;  %v5311_v60 = vsel %vm5310_vm15, %v5309_v25, 0  ;;  %v9323_v38 = vand.u32 65535, %v9314_v62 }
 0x4f1   : > { %v5313_v3 = vand.u32 31, %v5311_v60  ;;  %vm2926_vm4 = vcmp.lt.s32.totalorder %v9080_v2, 0  ;;  %v9327_v47 = vshrl.u32 %v5311_v60, 5  ;;  %vm2919_vm11 = vcmp.eq.s32.totalorder %v9318_v42, 2 }
 0x4f2   : > { %v2898_v8 = vmul.f32 -0.001358992, %v2897_v15  ;;  %v2905_v44 = vmul.f32 -0.00019511016, %v2897_v15  ;;  %v3023_v16 = vadd.s32 536870912, %v3022_v33  ;;  %vm2916_vm5 = vcmp.eq.s32.totalorder %v9318_v42, 0 }
 0x4f3   : > { %v9316_v12 = vsub.s32 32, %v5313_v3  ;;  %v5316_v17 = vshll.u32 %v10078_v40, %v5313_v3  ;;  %v5319_v23 = vshll.u32 %v10082_v46, %v5313_v3  ;;  %v5322_v55 = vshll.u32 %v10083_v4, %v5313_v3 }
 0x4f4   : > { %v2899_v1 = vadd.f32 0.041655596, %v2898_v8  ;;  %v2906_v43 = vadd.f32 0.008332121, %v2905_v44  ;;  %v3024_v5 = vshrl.u32 %v3023_v16, 30  ;;  %v5325_v20 = vshll.u32 %v10087_v11, %v5313_v3 }
 0x4f5   : > { %v5317_v37 = vshrl.u32 %v10082_v46, %v9316_v12  ;;  %v5320_v18 = vshrl.u32 %v10083_v4, %v9316_v12  ;;  %v5326_v58 = vshrl.u32 %v10088_v28, %v9316_v12  ;;  %v5323_v50 = vshrl.u32 %v10087_v11, %v9316_v12 }
 0x4f6   : > { %v2900_v36 = vmul.f32 %v2899_v1, %v2897_v15  ;;  %v2907_v6 = vmul.f32 %v2906_v43, %v2897_v15  ;;  %v3025_v34 = vshll.u32 %v3024_v5, 30  ;;  %v5329_v57 = vshrl.u32 %v10092_v10, %v9316_v12 }
 0x4f7   : > { %vm2915_vm0 = vcmp.lt.s32.totalorder %v9318_v42, 2  ;;  %vm2912_vm1 = vweird.f32 %v9074_v52  ;;  %v3048_v35 = vsub.s32 4, %v3024_v5  ;;  %v5318_v54 = vor.u32 %v5317_v37, %v5316_v17 }
 0x4f8   : > { %v2901_v24 = vadd.f32 -0.4999988, %v2900_v36  ;;  %v2908_v0 = vadd.f32 -0.16666654, %v2907_v6  ;;  %v9337_v27 = vsub.s32 %v3022_v33, %v3025_v34  ;;  %v5321_v30 = vor.u32 %v5320_v18, %v5319_v23 }
 0x4f9   : > { %v5327_v25 = vor.u32 %v5326_v58, %v5325_v20  ;;  %v5328_v19 = vshll.u32 %v10088_v28, %v5313_v3  ;;  %v5349_v33 = vshrl.u32 %v9314_v62, 16  ;;  %v9354_v60 = vadd.s32 1, %v5847_v21 }
 0x4fa   : > { %v2902_v41 = vmul.f32 %v2901_v24, %v2897_v15  ;;  %v2909_v53 = vmul.f32 %v2908_v0, %v2897_v15  ;;  %vm3027_vm14 = vcmp.lt.s32.totalorder %v9337_v27, 0  ;;  %v3028_v31 = vsub.s32 0, %v9337_v27 }
 0x4fb   : > { %v5324_v15 = vor.u32 %v5323_v50, %v5322_v55  ;;  %vm9358_vm13 = vcmp.le.f32.partialorder %v2924_v7, 0.7853982  ;;  %v5330_v16 = vor.u32 %v5329_v57, %v5328_v19  ;;  %vm5331_vm7 = vcmp.lt.s32.totalorder %v9327_v47, 1 }
 0x4fc   : > { %v2903_v45 = vadd.f32 1.0, %v2902_v41  ;;  %v2910_v48 = vadd.f32 1.0, %v2909_v53  ;;  %v3029_v59 = vsel %vm3027_vm14, %v3028_v31, %v9337_v27  ;;  %v9365_v3 = vsel %vm2926_vm4, %v3048_v35, %v3024_v5 }
 0x4fd   : > { %v3030_v63 = vclz %v3029_v59  ;;  %vm5334_vm2 = vcmp.lt.s32.totalorder %v9327_v47, 4  ;;  %vm5332_vm6 = vcmp.lt.s32.totalorder %v9327_v47, 2  ;;  %vm5333_vm12 = vcmp.lt.s32.totalorder %v9327_v47, 3 }
 0x4fe   : > { %v2911_v39 = vmul.f32 %v2910_v48, %v2895_v9  ;;  %v2920_v8 = vxor.u32 2147483648, %v2903_v45  ;;  %v5339_v9 = vsel %vm5331_vm7, %v5318_v54, %v5321_v30  ;;  %v5340_v7 = vsel %vm5334_vm2, %v5327_v25, 920167782 }
 0x4ff   : > { %v5800_v1 = vadd.s32 4294967294, %v3030_v63  ;;  %v5341_v5 = vsel %vm5333_vm12, %v5324_v15, %v5340_v7  ;;  %v5343_v36 = vsel %vm5331_vm7, %v5321_v30, %v5324_v15  ;;  %v5344_v37 = vsel %vm5334_vm2, %v5330_v16, 1326507024 }
 0x500   : > { %v2917_v43 = vxor.u32 2147483648, %v2911_v39  ;;  %v2921_v21 = vsel %vm2919_vm11, %v2920_v8, %v2911_v39  ;;  %v5342_v17 = vsel %vm5332_vm6, %v5339_v9, %v5341_v5  ;;  %v5336_v0 = vsel %vm5334_vm2, %v5324_v15, 2102212464 }
 0x501   : > { %vm5801_vm3 = vcmp.lt.s32.totalorder %v5800_v1, 0  ;;  %v5345_v55 = vsel %vm5333_vm12, %v5327_v25, %v5344_v37  ;;  %v5372_v50 = vand.u32 65535, %v5342_v17  ;;  %v5373_v20 = vshrl.u32 %v5342_v17, 16 }
 0x502   : > { %v2918_v6 = vsel %vm2916_vm5, %v2903_v45, %v2917_v43  ;;  %v3033_v34 = vsel %vm5801_vm3, 0, %v5800_v1  ;;  %v5346_v42 = vsel %vm5332_vm6, %v5343_v36, %v5345_v55  ;;  %v5315_v31 = vshrl.u32 %v10078_v40, %v9316_v12 }
 0x503   : > { %v2922_v18 = vsel %vm2915_vm0, %v2918_v6, %v2921_v21  ;;  %v3034_v58 = vsub.s32 32, %v3033_v34  ;;  %v3038_v24 = vsub.s32 4294967266, %v3033_v34  ;;  %v3035_v57 = vshll.u32 %v9337_v27, %v3033_v34 }
 0x504   : > { %v2923_v23 = vsel %vm2912_vm1, nan, %v2922_v18  ;;  %v5350_v35 = vand.u32 65535, %v5346_v42  ;;  %v5351_v52 = vshrl.u32 %v5346_v42, 16  ;;  %v5375_v45 = vmul.u32 %v5373_v20, %v9323_v38 }
 0x505   : > { %v3036_v41 = vshrl.u32 %v9320_v14, %v3034_v58  ;;  %v3039_v53 = vadd.s32 127, %v3038_v24  ;;  %3093 = vst [vmem:[%s6642_s12 + $0x70] sm:$0xff] %v2923_v23  ;;  %v3051_v27 = vsel %vm9358_vm13, 0, %v9365_v3  ;;  %v5376_v59 = vmul.u32 %v5372_v50, %v5349_v33 }
 0x506   : > { %v5335_v14 = vsel %vm5331_vm7, %v5315_v31, %v5318_v54  ;;  %v5337_v19 = vsel %vm5333_vm12, %v5321_v30, %v5336_v0  ;;  %v5353_v63 = vmul.u32 %v5351_v52, %v9323_v38  ;;  %v5354_v12 = vmul.u32 %v5350_v35, %v5349_v33 }
 0x507   : > { %v3037_v48 = vor.u32 %v3036_v41, %v3035_v57  ;;  %v3040_v25 = vshll.u32 %v3039_v53, 23  ;;  %v5374_v39 = vmul.u32 %v5372_v50, %v9323_v38  ;;  %v5377_v8 = vmul.u32 %v5373_v20, %v5349_v33 }
 0x508   : > { %v5378_v16 = vshll.u32 %v5375_v45, 16  ;;  %v5352_v9 = vmul.u32 %v5350_v35, %v9323_v38  ;;  %v5355_v43 = vmul.u32 %v5351_v52, %v5349_v33  ;;  %v5356_v3 = vshll.u32 %v5353_v63, 16 }
 0x509   : > { %v3041_v15 = vor.u32 4788187, %v3040_v25  ;;  %v3044_v1 = vcvt.s32.f32 %v3037_v48  ;;  %v5358_v21 = vshll.u32 %v5354_v12, 16  ;;  %v5380_v5 = vshll.u32 %v5376_v59, 16 }
 0x50a   : > { %vm5382_vm9 = vc.u32 %v5374_v39, %v5378_v16  ;;  %vm5360_vm10 = vc.u32 %v5352_v9, %v5356_v3  ;;  %v5362_v54 = vadd.s32 %v5356_v3, %v5352_v9  ;;  %v5384_v36 = vadd.s32 %v5378_v16, %v5374_v39 }
 0x50b   : > { %v3042_v7 = vand.u32 2147483647, %v3041_v15  ;;  %v5383_v30 = vsel %vm5382_vm9, 1, %v10109_v32  ;;  %v5361_v34 = vsel %vm5360_vm10, 1, %v10109_v32  ;;  %vm5465_vm8 = vcmp.gt.s32.totalorder %v9354_v60, 0 }
 0x50c   : > { %v5385_v17 = vadd.s32 %v5383_v30, %v5377_v8  ;;  %v5363_v37 = vadd.s32 %v5361_v34, %v5355_v43  ;;  %vm5364_vm15 = vc.u32 %v5362_v54, %v5358_v21  ;;  %v5379_v38 = vshrl.u32 %v5375_v45, 16 }
 0x50d   : > { %v3045_v6 = vmul.f32 %v3044_v1, %v3042_v7  ;;  %vm5386_vm11 = vc.u32 %v5384_v36, %v5380_v5  ;;  %v5365_v18 = vsel %vm5364_vm15, 1, %v10109_v32  ;;  %v5466_v24 = vsel %vm5465_vm8, %v9354_v60, 0 }
 0x50e   : > { %v5387_v58 = vsel %vm5386_vm11, 1, %v10109_v32  ;;  %v5357_v0 = vshrl.u32 %v5353_v63, 16  ;;  %v5367_v23 = vadd.s32 %v5365_v18, %v5363_v37  ;;  %v5468_v50 = vand.u32 31, %v5466_v24 }
 0x50f   : > { %v3046_v33 = vxor.u32 2147483648, %v3045_v6  ;;  %v5389_v55 = vadd.s32 %v5387_v58, %v5385_v17  ;;  %v5338_v57 = vsel %vm5332_vm6, %v5335_v14, %v5337_v19  ;;  %v5359_v41 = vshrl.u32 %v5354_v12, 16 }
 0x510   : > { %v5381_v53 = vshrl.u32 %v5376_v59, 16  ;;  %v5368_v31 = vadd.s32 %v5367_v23, %v5357_v0  ;;  %v9425_v52 = vsub.s32 32, %v5468_v50  ;;  %v3068_v45 = vadd.s32 3, %v3051_v27 }
 0x511   : > { %v3047_v20 = vsel %vm2926_vm4, %v3046_v33, %v3045_v6  ;;  %v5390_v35 = vadd.s32 %v5389_v55, %v5379_v38  ;;  %v5461_v48 = vand.u32 8388607, %v5454_v26  ;;  %v9431_v63 = vadd.s32 %v5384_v36, %v5380_v5 }
 0x512   : > { %v3050_v42 = vsel %vm9358_vm13, %v9080_v2, %v3047_v20  ;;  %v9429_v25 = vadd.s32 %v5368_v31, %v5359_v41  ;;  %v5392_v59 = vmul.u32 %v9314_v62, %v5338_v57  ;;  %v9434_v44 = vshrl.u32 %v5466_v24, 5 }
 0x513   : > { %v3052_v60 = vmul.f32 %v3050_v42, %v3050_v42  ;;  %v5391_v47 = vadd.s32 %v5390_v35, %v5381_v53  ;;  %v5474_v12 = vshll.u32 %v10082_v46, %v5468_v50  ;;  %v5475_v15 = vshrl.u32 %v10083_v4, %v9425_v52 }
 0x514   : > { %vm5394_vm4 = vc.u32 %v9429_v25, %v9431_v63  ;;  %v5478_v39 = vshrl.u32 %v10087_v11, %v9425_v52  ;;  %v5472_v62 = vshrl.u32 %v10082_v46, %v9425_v52  ;;  %v5477_v1 = vshll.u32 %v10083_v4, %v5468_v50 }
 0x515   : > { %v3053_v14 = vmul.f32 -0.001358992, %v3052_v60  ;;  %v3060_v19 = vmul.f32 -0.00019511016, %v3052_v60  ;;  %v5395_v27 = vadd.s32 1, %v5391_v47  ;;  %v5480_v43 = vshll.u32 %v10087_v11, %v5468_v50 }
 0x516   : > { %v5481_v3 = vshrl.u32 %v10088_v28, %v9425_v52  ;;  %v5483_v7 = vshll.u32 %v10088_v28, %v5468_v50  ;;  %v5484_v30 = vshrl.u32 %v10092_v10, %v9425_v52  ;;  %v5471_v36 = vshll.u32 %v10078_v40, %v5468_v50 }
 0x517   : > { %v3054_v8 = vadd.f32 0.041655596, %v3053_v14  ;;  %v3061_v16 = vadd.f32 0.008332121, %v3060_v19  ;;  %v5396_v9 = vsel %vm5394_vm4, %v5395_v27, %v5391_v47  ;;  %v9453_v6 = vor.u32 %v5475_v15, %v5474_v12  ;;  %v10156_v27 = vld [vmem:[#allocation7_spill] sm:$0xff] }
 0x518   : > { %v5397_v54 = vadd.s32 %v5396_v9, %v5392_v59  ;;  %v5479_v34 = vor.u32 %v5478_v39, %v5477_v1  ;;  %v5482_v17 = vor.u32 %v5481_v3, %v5480_v43  ;;  %v5485_v18 = vor.u32 %v5484_v30, %v5483_v7 }
 0x519   : > { %v3055_v21 = vmul.f32 %v3054_v8, %v3052_v60  ;;  %v3062_v5 = vmul.f32 %v3061_v16, %v3052_v60  ;;  %v3069_v58 = vand.u32 3, %v3068_v45  ;;  %v5462_v24 = vor.u32 8388608, %v5461_v48 }
 0x51a   : > { %v5398_v33 = vadd.s32 536870912, %v5397_v54  ;;  %v5473_v0 = vor.u32 %v5472_v62, %v5471_v36  ;;  %vm5489_vm5 = vcmp.lt.s32.totalorder %v9434_v44, 4  ;;  %vm3067_vm0 = vweird.f32 %v9080_v2 }
 0x51b   : > { %v3056_v37 = vadd.f32 -0.4999988, %v3055_v21  ;;  %v3063_v38 = vadd.f32 -0.16666654, %v3062_v5  ;;  %vm5486_vm14 = vcmp.lt.s32.totalorder %v9434_v44, 1  ;;  %vm5488_vm1 = vcmp.lt.s32.totalorder %v9434_v44, 3 }
 0x51c   : > { %v9455_v20 = vshrl.u32 %v5398_v33, 30  ;;  %v5495_v50 = vsel %vm5489_vm5, %v5482_v17, 920167782  ;;  %v5499_v57 = vsel %vm5489_vm5, %v5485_v18, 1326507024  ;;  %v5498_v35 = vsel %vm5486_vm14, %v9453_v6, %v5479_v34 }
 0x51d   : > { %v3057_v23 = vmul.f32 %v3056_v37, %v3052_v60  ;;  %v3064_v55 = vmul.f32 %v3063_v38, %v3052_v60  ;;  %v5494_v60 = vsel %vm5486_vm14, %v5473_v0, %v9453_v6  ;;  %v5496_v45 = vsel %vm5488_vm1, %v5479_v34, %v5495_v50 }
 0x51e   : > { %v5400_v31 = vshll.u32 %v9455_v20, 30  ;;  %v5500_v48 = vsel %vm5488_vm1, %v5482_v17, %v5499_v57  ;;  %v9476_v47 = vshll.u32 %v5462_v24, 8  ;;  %vm5487_vm13 = vcmp.lt.s32.totalorder %v9434_v44, 2 }
 0x51f   : > { %v3058_v41 = vadd.f32 1.0, %v3057_v23  ;;  %v3065_v53 = vadd.f32 1.0, %v3064_v55  ;;  %vm3070_vm7 = vcmp.lt.s32.totalorder %v3069_v58, 2  ;;  %vm3071_vm2 = vcmp.eq.s32.totalorder %v3069_v58, 0 }
 0x520   : > { %v5401_v19 = vsub.s32 %v5397_v54, %v5400_v31  ;;  %v5501_v12 = vsel %vm5487_vm13, %v5498_v35, %v5500_v48  ;;  %v579_v15 = vmul.f32 %v10148_v29, %v10156_v27  ;;  %v5497_v16 = vsel %vm5487_vm13, %v5494_v60, %v5496_v45  ;;  %v9502_v48 = vpop.permute.xlu0 %353 }
 0x521   : > { %v3066_v59 = vmul.f32 %v3065_v53, %v3050_v42  ;;  %v3075_v14 = vxor.u32 2147483648, %v3058_v41  ;;  %vm3074_vm12 = vcmp.eq.s32.totalorder %v3069_v58, 2  ;;  %v5503_v42 = vand.u32 65535, %v9476_v47 }
 0x522   : > { %vm5402_vm6 = vcmp.lt.s32.totalorder %v5401_v19, 0  ;;  %v5403_v8 = vsub.s32 0, %v5401_v19  ;;  %v5505_v62 = vand.u32 65535, %v5501_v12  ;;  %v5506_v1 = vshrl.u32 %v5501_v12, 16 }
 0x523   : > { %v3072_v39 = vxor.u32 2147483648, %v3066_v59  ;;  %v3076_v43 = vsel %vm3074_vm12, %v3075_v14, %v3066_v59  ;;  %v5504_v7 = vshrl.u32 %v9476_v47, 16  ;;  %v5470_v5 = vshrl.u32 %v10078_v40, %v9425_v52 }
 0x524   : > { %v5404_v3 = vsel %vm5402_vm6, %v5403_v8, %v5401_v19  ;;  %v5528_v54 = vshrl.u32 %v5497_v16, 16  ;;  %v5508_v36 = vmul.u32 %v5506_v1, %v5503_v42  ;;  %v5527_v37 = vand.u32 65535, %v5497_v16 }
 0x525   : > { %v3073_v9 = vsel %vm3071_vm2, %v3058_v41, %v3072_v39  ;;  %v5405_v29 = vclz %v5404_v3  ;;  %v5509_v17 = vmul.u32 %v5505_v62, %v5504_v7  ;;  %v5393_v38 = vadd.s32 %v9431_v63, %v9429_v25 }
 0x526   : > { %v3077_v21 = vsel %vm3070_vm7, %v3073_v9, %v3076_v43  ;;  %v5490_v18 = vsel %vm5486_vm14, %v5470_v5, %v5473_v0  ;;  %v5491_v58 = vsel %vm5489_vm5, %v5479_v34, 2102212464  ;;  %v5423_v52 = vsub.s32 4, %v9455_v20 }
 0x527   : > { %v3078_v30 = vsel %vm3067_vm0, nan, %v3077_v21  ;;  %v5845_v33 = vadd.s32 4294967294, %v5405_v29  ;;  %v5507_v24 = vmul.u32 %v5505_v62, %v5503_v42  ;;  %v5510_v23 = vmul.u32 %v5506_v1, %v5504_v7 }
 0x528   : > { %3094 = vst [vmem:[%s6642_s12 + $0x78] sm:$0xff] %v3078_v30  ;;  %v5511_v2 = vshll.u32 %v5508_v36, 16  ;;  %v5512_v55 = vshrl.u32 %v5508_v36, 16  ;;  %v5513_v50 = vshll.u32 %v5509_v17, 16  ;;  %v5530_v57 = vmul.u32 %v5528_v54, %v5503_v42 }
 0x529   : > { %vm5846_vm3 = vcmp.lt.s32.totalorder %v5845_v33, 0  ;;  %v5531_v25 = vmul.u32 %v5527_v37, %v5504_v7  ;;  %vm5301_vm10 = vcmp.lt.s32.totalorder %v9278_v56, 0  ;;  %v5529_v34 = vmul.u32 %v5527_v37, %v5503_v42 }
 0x52a   : > { %v5408_v41 = vsel %vm5846_vm3, 0, %v5845_v33  ;;  %vm5515_vm9 = vc.u32 %v5507_v24, %v5511_v2  ;;  %v5517_v53 = vadd.s32 %v5511_v2, %v5507_v24  ;;  %v5532_v60 = vmul.u32 %v5528_v54, %v5504_v7 }
 0x52b   : > { %v5409_v63 = vsub.s32 32, %v5408_v41  ;;  %v5413_v0 = vsub.s32 4294967266, %v5408_v41  ;;  %v5516_v31 = vsel %vm5515_vm9, 1, %v10109_v32  ;;  %v5533_v45 = vshll.u32 %v5530_v57, 16 }
 0x52c   : > { %v5518_v35 = vadd.s32 %v5516_v31, %v5510_v23  ;;  %vm5519_vm8 = vc.u32 %v5517_v53, %v5513_v50  ;;  %v5410_v59 = vshll.u32 %v5401_v19, %v5408_v41  ;;  %v5535_v16 = vshll.u32 %v5531_v25, 16 }
 0x52d   : > { %v5411_v14 = vshrl.u32 %v5393_v38, %v5409_v63  ;;  %v5414_v12 = vadd.s32 127, %v5413_v0  ;;  %v5520_v39 = vsel %vm5519_vm8, 1, %v10109_v32  ;;  %vm5537_vm15 = vc.u32 %v5529_v34, %v5533_v45 }
 0x52e   : > { %v5522_v8 = vadd.s32 %v5520_v39, %v5518_v35  ;;  %v5539_v62 = vadd.s32 %v5533_v45, %v5529_v34  ;;  %v5538_v43 = vsel %vm5537_vm15, 1, %v10109_v32  ;;  %v9507_v42 = vadd.f32 %v579_v15, %v9502_v48 }
 0x52f   : > { %v5412_v1 = vor.u32 %v5411_v14, %v5410_v59  ;;  %v5415_v9 = vshll.u32 %v5414_v12, 23  ;;  %v5540_v7 = vadd.s32 %v5538_v43, %v5532_v60  ;;  %v580_v19 = vmul.f32 %v8377_v22, %v10156_v27 }
 0x530   : > { %v5523_v3 = vadd.s32 %v5522_v8, %v5512_v55  ;;  %vm5541_vm11 = vc.u32 %v5539_v62, %v5535_v16  ;;  %v5492_v29 = vsel %vm5488_vm1, %v9453_v6, %v5491_v58  ;;  %v5514_v5 = vshrl.u32 %v5509_v17, 16 }
 0x531   : > { %v5416_v21 = vor.u32 4788187, %v5415_v9  ;;  %v5542_v54 = vsel %vm5541_vm11, 1, %v10109_v32  ;;  %v5534_v30 = vshrl.u32 %v5530_v57, 16  ;;  %v9516_v37 = vadd.f32 %v580_v19, %v9502_v48 }
 0x532   : > { %v5544_v36 = vadd.s32 %v5542_v54, %v5540_v7  ;;  %v2459_v15 = vand.u32 2147483647, %v9507_v42  ;;  %v5419_v33 = vcvt.s32.f32 %v5412_v1  ;;  %v5524_v24 = vadd.s32 %v5523_v3, %v5514_v5 }
 0x533   : > { %v5417_v38 = vand.u32 2147483647, %v5416_v21  ;;  %v2462_v22 = vand.u32 2139095040, %v9507_v42  ;;  %v5424_v23 = vsel %vm5301_vm10, %v5423_v52, %v9455_v20  ;;  %v5536_v6 = vshrl.u32 %v5531_v25, 16 }
 0x534   : > { %v5545_v17 = vadd.s32 %v5544_v36, %v5534_v30  ;;  %v5543_v2 = vadd.s32 %v5539_v62, %v5535_v16  ;;  %v2466_v50 = vand.u32 8388607, %v2459_v15  ;;  %vm5300_vm4 = vcmp.le.f32.partialorder %v5299_v13, 0.7853982 }
 0x535   : > { %v5420_v58 = vmul.f32 %v5419_v33, %v5417_v38  ;;  %v2463_v55 = vshrl.u32 %v2462_v22, 23  ;;  %v5493_v57 = vsel %vm5487_vm13, %v5490_v18, %v5492_v29  ;;  %v2617_v53 = vand.u32 2139095040, %v9516_v37 }
 0x536   : > { %v5546_v41 = vadd.s32 %v5545_v17, %v5536_v6  ;;  %v5426_v0 = vsel %vm5300_vm4, 0, %v5424_v23  ;;  %vm5549_vm5 = vc.u32 %v5524_v24, %v5543_v2  ;;  %v2467_v25 = vor.u32 8388608, %v2466_v50 }
 0x537   : > { %v5421_v63 = vxor.u32 2147483648, %v5420_v58  ;;  %v5790_v20 = vadd.s32 4294967169, %v2463_v55  ;;  %v5547_v34 = vmul.u32 %v9476_v47, %v5493_v57  ;;  %v5443_v60 = vadd.s32 3, %v5426_v0 }
 0x538   : > { %v5550_v52 = vadd.s32 1, %v5546_v41  ;;  %v2618_v18 = vshrl.u32 %v2617_v53, 23  ;;  %v9534_v12 = vshll.u32 %v2467_v25, 8  ;;  %v9538_v7 = vadd.s32 %v5543_v2, %v5524_v24 }
 0x539   : > { %v5422_v31 = vsel %vm5301_vm10, %v5421_v63, %v5420_v58  ;;  %v2469_v35 = vadd.s32 1, %v5790_v20  ;;  %v9536_v62 = vand.u32 3, %v5443_v60  ;;  %v2614_v29 = vand.u32 2147483647, %v9516_v37 }
 0x53a   : > { %v5425_v13 = vsel %vm5300_vm4, %v9278_v56, %v5422_v31  ;;  %v5551_v44 = vsel %vm5549_vm5, %v5550_v52, %v5546_v41  ;;  %v5793_v9 = vadd.s32 4294967169, %v2618_v18  ;;  %v9541_v21 = vand.u32 65535, %v9534_v12 }
 0x53b   : > { %v5427_v45 = vmul.f32 %v5425_v13, %v5425_v13  ;;  %v5552_v59 = vadd.s32 %v5551_v44, %v5547_v34  ;;  %vm2470_vm0 = vcmp.gt.s32.totalorder %v2469_v35, 0  ;;  %vm5456_vm14 = vcmp.lt.s32.totalorder %v9293_v61, 0 }
 0x53c   : > { %v2471_v14 = vsel %vm2470_vm0, %v2469_v35, 0  ;;  %v9546_v36 = vshrl.u32 %v9534_v12, 16  ;;  %vm5449_vm1 = vcmp.eq.s32.totalorder %v9536_v62, 2  ;;  %v9553_v22 = vadd.s32 1, %v5793_v9 }
 0x53d   : > { %v5428_v39 = vmul.f32 -0.001358992, %v5427_v45  ;;  %v5435_v8 = vmul.f32 -0.00019511016, %v5427_v45  ;;  %v5553_v16 = vadd.s32 536870912, %v5552_v59  ;;  %v2473_v1 = vand.u32 31, %v2471_v14 }
 0x53e   : > { %v9549_v38 = vshrl.u32 %v2471_v14, 5  ;;  %vm5446_vm13 = vcmp.eq.s32.totalorder %v9536_v62, 0  ;;  %vm5445_vm7 = vcmp.lt.s32.totalorder %v9536_v62, 2  ;;  %vm5442_vm6 = vweird.f32 %v9278_v56 }
 0x53f   : > { %v5429_v47 = vadd.f32 0.041655596, %v5428_v39  ;;  %v5436_v43 = vadd.f32 0.008332121, %v5435_v8  ;;  %v5554_v3 = vshrl.u32 %v5553_v16, 30  ;;  %v2474_v19 = vsub.s32 32, %v2473_v1 }
 0x540   : > { %v2476_v58 = vshll.u32 %v10078_v40, %v2473_v1  ;;  %v2479_v55 = vshll.u32 %v10082_v46, %v2473_v1  ;;  %v2482_v50 = vshll.u32 %v10083_v4, %v2473_v1  ;;  %v2485_v52 = vshll.u32 %v10087_v11, %v2473_v1 }
 0x541   : > { %v5430_v5 = vmul.f32 %v5429_v47, %v5427_v45  ;;  %v5437_v54 = vmul.f32 %v5436_v43, %v5427_v45  ;;  %v5555_v30 = vshll.u32 %v5554_v3, 30  ;;  %v2477_v33 = vshrl.u32 %v10082_v46, %v2474_v19 }
 0x542   : > { %v2480_v24 = vshrl.u32 %v10083_v4, %v2474_v19  ;;  %v5578_v2 = vsub.s32 4, %v5554_v3  ;;  %v2483_v57 = vshrl.u32 %v10087_v11, %v2474_v19  ;;  %v2486_v25 = vshrl.u32 %v10088_v28, %v2474_v19 }
 0x543   : > { %v5431_v23 = vadd.f32 -0.4999988, %v5430_v5  ;;  %v5438_v6 = vadd.f32 -0.16666654, %v5437_v54  ;;  %v9555_v17 = vsub.s32 %v5552_v59, %v5555_v30  ;;  %v2478_v0 = vor.u32 %v2477_v33, %v2476_v58 }
 0x544   : > { %v2481_v20 = vor.u32 %v2480_v24, %v2479_v55  ;;  %v2489_v60 = vshrl.u32 %v10092_v10, %v2474_v19  ;;  %vm9572_vm12 = vcmp.le.f32.partialorder %v5454_v26, 0.7853982  ;;  %v2487_v59 = vor.u32 %v2486_v25, %v2485_v52 }
 0x545   : > { %v5432_v41 = vmul.f32 %v5431_v23, %v5427_v45  ;;  %v5439_v53 = vmul.f32 %v5438_v6, %v5427_v45  ;;  %vm5557_vm2 = vcmp.lt.s32.totalorder %v9555_v17, 0  ;;  %v5558_v63 = vsub.s32 0, %v9555_v17 }
 0x546   : > { %v2484_v45 = vor.u32 %v2483_v57, %v2482_v50  ;;  %v2488_v14 = vshll.u32 %v10088_v28, %v2473_v1  ;;  %v2475_v16 = vshrl.u32 %v10078_v40, %v2474_v19  ;;  %vm2491_vm3 = vcmp.lt.s32.totalorder %v9549_v38, 1 }
 0x547   : > { %v5433_v31 = vadd.f32 1.0, %v5432_v41  ;;  %v5440_v34 = vadd.f32 1.0, %v5439_v53  ;;  %v5559_v35 = vsel %vm5557_vm2, %v5558_v63, %v9555_v17  ;;  %v5579_v47 = vsel %vm5456_vm14, %v5578_v2, %v5554_v3 }
 0x548   : > { %v5560_v18 = vclz %v5559_v35  ;;  %v2490_v43 = vor.u32 %v2489_v60, %v2488_v14  ;;  %vm2492_vm9 = vcmp.lt.s32.totalorder %v9549_v38, 2  ;;  %vm2493_vm10 = vcmp.lt.s32.totalorder %v9549_v38, 3 }
 0x549   : > { %v5441_v39 = vmul.f32 %v5440_v34, %v5425_v13  ;;  %v5450_v8 = vxor.u32 2147483648, %v5433_v31  ;;  %vm2494_vm8 = vcmp.lt.s32.totalorder %v9549_v38, 4  ;;  %v2499_v1 = vsel %vm2491_vm3, %v2478_v0, %v2481_v20 }
 0x54a   : > { %v5848_v9 = vadd.s32 4294967294, %v5560_v18  ;;  %v2496_v13 = vsel %vm2494_vm8, %v2484_v45, 2102212464  ;;  %v2500_v3 = vsel %vm2494_vm8, %v2487_v59, 920167782  ;;  %v2495_v30 = vsel %vm2491_vm3, %v2475_v16, %v2478_v0 }
 0x54b   : > { %v5447_v26 = vxor.u32 2147483648, %v5441_v39  ;;  %v5451_v5 = vsel %vm5449_vm1, %v5450_v8, %v5441_v39  ;;  %v2501_v33 = vsel %vm2493_vm10, %v2484_v45, %v2500_v3  ;;  %v2497_v58 = vsel %vm2493_vm10, %v2481_v20, %v2496_v13 }
 0x54c   : > { %vm5849_vm15 = vcmp.lt.s32.totalorder %v5848_v9, 0  ;;  %v2502_v50 = vsel %vm2492_vm9, %v2499_v1, %v2501_v33  ;;  %v2503_v57 = vsel %vm2491_vm3, %v2481_v20, %v2484_v45  ;;  %v2504_v53 = vsel %vm2494_vm8, %v2490_v43, 1326507024 }
 0x54d   : > { %v5448_v19 = vsel %vm5446_vm13, %v5433_v31, %v5447_v26  ;;  %v5563_v54 = vsel %vm5849_vm15, 0, %v5848_v9  ;;  %v2532_v63 = vand.u32 65535, %v2502_v50  ;;  %v5581_v56 = vsel %vm9572_vm12, 0, %v5579_v47 }
 0x54e   : > { %v5452_v24 = vsel %vm5445_vm7, %v5448_v19, %v5451_v5  ;;  %v5564_v23 = vsub.s32 32, %v5563_v54  ;;  %v5568_v6 = vsub.s32 4294967266, %v5563_v54  ;;  %v5565_v55 = vshll.u32 %v9555_v17, %v5563_v54 }
 0x54f   : > { %v5453_v2 = vsel %vm5442_vm6, nan, %v5452_v24  ;;  %v9617_v17 = vsel %vm2492_vm9, %v2495_v30, %v2497_v58  ;;  %v2505_v0 = vsel %vm2493_vm10, %v2487_v59, %v2504_v53  ;;  %v2533_v52 = vshrl.u32 %v2502_v50, 16 }
 0x550   : > { %v5566_v41 = vshrl.u32 %v9538_v7, %v5564_v23  ;;  %v5569_v62 = vadd.s32 127, %v5568_v6  ;;  %5623 = vst [vmem:[%s6642_s12 + $0xf0] sm:$0xff] %v5453_v2  ;;  %v2506_v7 = vsel %vm2492_vm9, %v2503_v57, %v2505_v0  ;;  %vm2625_vm11 = vcmp.gt.s32.totalorder %v9553_v22, 0 }
 0x551   : > { %v2510_v31 = vand.u32 65535, %v2506_v7  ;;  %v2511_v34 = vshrl.u32 %v2506_v7, 16  ;;  %v2535_v35 = vmul.u32 %v2533_v52, %v9541_v21  ;;  %v2536_v60 = vmul.u32 %v2532_v63, %v9546_v36 }
 0x552   : > { %v5567_v20 = vor.u32 %v5566_v41, %v5565_v55  ;;  %v5570_v25 = vshll.u32 %v5569_v62, 23  ;;  %v9626_v45 = vadd.s32 3, %v5581_v56  ;;  %v2552_v59 = vmul.u32 %v9534_v12, %v9617_v17 }
 0x553   : > { %v9632_v14 = vand.u32 8388607, %v2614_v29  ;;  %v2513_v38 = vmul.u32 %v2511_v34, %v9541_v21  ;;  %v2514_v39 = vmul.u32 %v2510_v31, %v9546_v36  ;;  %v2534_v8 = vmul.u32 %v2532_v63, %v9541_v21 }
 0x554   : > { %v5571_v18 = vor.u32 4788187, %v5570_v25  ;;  %v2626_v16 = vsel %vm2625_vm11, %v9553_v22, 0  ;;  %v5574_v47 = vcvt.s32.f32 %v5567_v20  ;;  %v2537_v43 = vmul.u32 %v2533_v52, %v9546_v36 }
 0x555   : > { %v2538_v26 = vshll.u32 %v2535_v35, 16  ;;  %v2512_v5 = vmul.u32 %v2510_v31, %v9541_v21  ;;  %v2515_v13 = vmul.u32 %v2511_v34, %v9546_v36  ;;  %v2516_v1 = vshll.u32 %v2513_v38, 16 }
 0x556   : > { %v5572_v9 = vand.u32 2147483647, %v5571_v18  ;;  %v2540_v3 = vshll.u32 %v2536_v60, 16  ;;  %v2518_v54 = vshll.u32 %v2514_v39, 16  ;;  %v2628_v22 = vand.u32 31, %v2626_v16 }
 0x557   : > { %vm2542_vm4 = vc.u32 %v2534_v8, %v2538_v26  ;;  %v2544_v30 = vadd.s32 %v2538_v26, %v2534_v8  ;;  %vm2520_vm5 = vc.u32 %v2512_v5, %v2516_v1  ;;  %v2522_v33 = vadd.s32 %v2516_v1, %v2512_v5 }
 0x558   : > { %v5575_v19 = vmul.f32 %v5574_v47, %v5572_v9  ;;  %v2543_v24 = vsel %vm2542_vm4, 1, %v10109_v32  ;;  %v2521_v6 = vsel %vm2520_vm5, 1, %v10109_v32  ;;  %v2539_v21 = vshrl.u32 %v2535_v35, 16 }
 0x559   : > { %v2545_v58 = vadd.s32 %v2543_v24, %v2537_v43  ;;  %vm2546_vm0 = vc.u32 %v2544_v30, %v2540_v3  ;;  %v2523_v2 = vadd.s32 %v2521_v6, %v2515_v13  ;;  %vm2524_vm1 = vc.u32 %v2522_v33, %v2518_v54 }
 0x55a   : > { %v5576_v23 = vxor.u32 2147483648, %v5575_v19  ;;  %v2547_v36 = vsel %vm2546_vm0, 1, %v10109_v32  ;;  %v2525_v50 = vsel %vm2524_vm1, 1, %v10109_v32  ;;  %v9647_v41 = vsub.s32 32, %v2628_v22 }
 0x55b   : > { %v2549_v57 = vadd.s32 %v2547_v36, %v2545_v58  ;;  %v2517_v53 = vshrl.u32 %v2513_v38, 16  ;;  %v2527_v63 = vadd.s32 %v2525_v50, %v2523_v2  ;;  %v9652_v56 = vshrl.u32 %v2626_v16, 5 }
 0x55c   : > { %v5577_v55 = vsel %vm5456_vm14, %v5576_v23, %v5575_v19  ;;  %v2519_v52 = vshrl.u32 %v2514_v39, 16  ;;  %v2541_v20 = vshrl.u32 %v2536_v60, 16  ;;  %v9654_v31 = vadd.s32 %v2544_v30, %v2540_v3 }
 0x55d   : > { %v5580_v62 = vsel %vm9572_vm12, %v9293_v61, %v5577_v55  ;;  %v2550_v25 = vadd.s32 %v2549_v57, %v2539_v21  ;;  %v2528_v7 = vadd.s32 %v2527_v63, %v2517_v53  ;;  %v2631_v34 = vshll.u32 %v10078_v40, %v2628_v22 }
 0x55e   : > { %v5582_v0 = vmul.f32 %v5580_v62, %v5580_v62  ;;  %v2634_v35 = vshll.u32 %v10082_v46, %v2628_v22  ;;  %v2632_v44 = vshrl.u32 %v10082_v46, %v9647_v41  ;;  %v2635_v39 = vshrl.u32 %v10083_v4, %v9647_v41 }
 0x55f   : > { %v2551_v9 = vadd.s32 %v2550_v25, %v2541_v20  ;;  %v9660_v38 = vadd.s32 %v2528_v7, %v2519_v52  ;;  %v2638_v60 = vshrl.u32 %v10087_v11, %v9647_v41  ;;  %v2640_v16 = vshll.u32 %v10087_v11, %v2628_v22 }
 0x560   : > { %v5583_v18 = vmul.f32 -0.001358992, %v5582_v0  ;;  %v5590_v8 = vmul.f32 -0.00019511016, %v5582_v0  ;;  %v2641_v5 = vshrl.u32 %v10088_v28, %v9647_v41  ;;  %v2637_v13 = vshll.u32 %v10083_v4, %v2628_v22 }
 0x561   : > { %v2555_v26 = vadd.s32 1, %v2551_v9  ;;  %vm2554_vm14 = vc.u32 %v9660_v38, %v9654_v31  ;;  %v2643_v1 = vshll.u32 %v10088_v28, %v2628_v22  ;;  %v2644_v3 = vshrl.u32 %v10092_v10, %v9647_v41 }
 0x562   : > { %v5584_v47 = vadd.f32 0.041655596, %v5583_v18  ;;  %v5591_v43 = vadd.f32 0.008332121, %v5590_v8  ;;  %v2642_v33 = vor.u32 %v2641_v5, %v2640_v16  ;;  %v9678_v23 = vor.u32 %v2632_v44, %v2631_v34 }
 0x563   : > { %v2556_v30 = vsel %vm2554_vm14, %v2555_v26, %v2551_v9  ;;  %v9680_v6 = vor.u32 %v2635_v39, %v2634_v35  ;;  %v9682_v58 = vor.u32 %v2638_v60, %v2637_v13  ;;  %v2645_v22 = vor.u32 %v2644_v3, %v2643_v1 }
 0x564   : > { %v5585_v19 = vmul.f32 %v5584_v47, %v5582_v0  ;;  %v5592_v54 = vmul.f32 %v5591_v43, %v5582_v0  ;;  %v2557_v24 = vadd.s32 %v2556_v30, %v2552_v59  ;;  %v5599_v36 = vand.u32 3, %v9626_v45 }
 0x565   : > { %v2622_v50 = vor.u32 8388608, %v9632_v14  ;;  %vm2649_vm13 = vcmp.lt.s32.totalorder %v9652_v56, 4  ;;  %vm2646_vm7 = vcmp.lt.s32.totalorder %v9652_v56, 1  ;;  %vm2648_vm2 = vcmp.lt.s32.totalorder %v9652_v56, 3 }
 0x566   : > { %v5586_v2 = vadd.f32 -0.4999988, %v5585_v19  ;;  %v5593_v21 = vadd.f32 -0.16666654, %v5592_v54  ;;  %v2558_v55 = vadd.s32 536870912, %v2557_v24  ;;  %v2654_v45 = vsel %vm2646_vm7, %v9678_v23, %v9680_v6 }
 0x567   : > { %v2655_v12 = vsel %vm2649_vm13, %v2642_v33, 920167782  ;;  %v2658_v59 = vsel %vm2646_vm7, %v9680_v6, %v9682_v58  ;;  %v2659_v52 = vsel %vm2649_vm13, %v2645_v22, 1326507024  ;;  %vm2647_vm6 = vcmp.lt.s32.totalorder %v9652_v56, 2 }
 0x568   : > { %v5587_v57 = vmul.f32 %v5586_v2, %v5582_v0  ;;  %v5594_v53 = vmul.f32 %v5593_v21, %v5582_v0  ;;  %v9690_v17 = vshrl.u32 %v2558_v55, 30  ;;  %v2656_v0 = vsel %vm2648_vm2, %v9682_v58, %v2655_v12 }
 0x569   : > { %v2660_v25 = vsel %vm2648_vm2, %v2642_v33, %v2659_v52  ;;  %v9710_v7 = vshll.u32 %v2622_v50, 8  ;;  %vm5597_vm12 = vweird.f32 %v9293_v61  ;;  %vm5600_vm3 = vcmp.lt.s32.totalorder %v5599_v36, 2 }
 0x56a   : > { %v5588_v14 = vadd.f32 1.0, %v5587_v57  ;;  %v5595_v63 = vadd.f32 1.0, %v5594_v53  ;;  %v2560_v20 = vshll.u32 %v9690_v17, 30  ;;  %v2661_v18 = vsel %vm2647_vm6, %v2658_v59, %v2660_v25 }
 0x56b   : > { %vm5601_vm9 = vcmp.eq.s32.totalorder %v5599_v36, 0  ;;  %v2657_v9 = vsel %vm2647_vm6, %v2654_v45, %v2656_v0  ;;  %vm5604_vm10 = vcmp.eq.s32.totalorder %v5599_v36, 2  ;;  %v2664_v39 = vshrl.u32 %v9710_v7, 16 }
 0x56c   : > { %v5596_v34 = vmul.f32 %v5595_v63, %v5580_v62  ;;  %v5605_v35 = vxor.u32 2147483648, %v5588_v14  ;;  %v2561_v8 = vsub.s32 %v2557_v24, %v2560_v20  ;;  %v2665_v60 = vand.u32 65535, %v2661_v18 }
 0x56d   : > { %v2663_v16 = vand.u32 65535, %v9710_v7  ;;  %v2666_v47 = vshrl.u32 %v2661_v18, 16  ;;  %v2687_v13 = vand.u32 65535, %v2657_v9  ;;  %v2688_v54 = vshrl.u32 %v2657_v9, 16 }
 0x56e   : > { %v5602_v44 = vxor.u32 2147483648, %v5596_v34  ;;  %vm2562_vm8 = vcmp.lt.s32.totalorder %v2561_v8, 0  ;;  %v2563_v62 = vsub.s32 0, %v2561_v8  ;;  %v5606_v26 = vsel %vm5604_vm10, %v5605_v35, %v5596_v34 }
 0x56f   : > { %v2669_v5 = vmul.u32 %v2665_v60, %v2664_v39  ;;  %v2668_v19 = vmul.u32 %v2666_v47, %v2663_v16  ;;  %v3109_v24 = vmul.f32 %v10151_v49, %v10156_v27  ;;  %v2667_v2 = vmul.u32 %v2665_v60, %v2663_v16 }
 0x570   : > { %v5603_v43 = vsel %vm5601_vm9, %v5588_v14, %v5602_v44  ;;  %v2564_v3 = vsel %vm2562_vm8, %v2563_v62, %v2561_v8  ;;  %v9727_v22 = vmul.f32 %v7597_v51, %v10156_v27  ;;  %v2670_v36 = vmul.u32 %v2666_v47, %v2664_v39 }
 0x571   : > { %v5607_v1 = vsel %vm5600_vm3, %v5603_v43, %v5606_v26  ;;  %v2565_v33 = vclz %v2564_v3  ;;  %v2671_v21 = vshll.u32 %v2668_v19, 16  ;;  %v2673_v50 = vshll.u32 %v2669_v5, 16 }
 0x572   : > { %v5608_v30 = vsel %vm5597_vm12, nan, %v5607_v1  ;;  %v2690_v53 = vmul.u32 %v2688_v54, %v2663_v16  ;;  %v2691_v12 = vmul.u32 %v2687_v13, %v2664_v39  ;;  %v2553_v61 = vadd.s32 %v9654_v31, %v9660_v38 }
 0x573   : > { %5624 = vst [vmem:[%s6642_s12 + $0xf8] sm:$0xff] %v5608_v30  ;;  %v5791_v55 = vadd.s32 4294967294, %v2565_v33  ;;  %vm2675_vm15 = vc.u32 %v2667_v2, %v2671_v21  ;;  %v2677_v57 = vadd.s32 %v2671_v21, %v2667_v2  ;;  %v2672_v45 = vshrl.u32 %v2668_v19, 16 }
 0x574   : > { %v2676_v49 = vsel %vm2675_vm15, 1, %v10109_v32  ;;  %v2693_v63 = vshll.u32 %v2690_v53, 16  ;;  %v2689_v52 = vmul.u32 %v2687_v13, %v2663_v16  ;;  %v2692_v34 = vmul.u32 %v2688_v54, %v2664_v39 }
 0x575   : > { %vm5792_vm11 = vcmp.lt.s32.totalorder %v5791_v55, 0  ;;  %v2678_v14 = vadd.s32 %v2676_v49, %v2670_v36  ;;  %vm2679_vm4 = vc.u32 %v2677_v57, %v2673_v50  ;;  %v2695_v35 = vshll.u32 %v2691_v12, 16 }
 0x576   : > { %v2568_v59 = vsel %vm5792_vm11, 0, %v5791_v55  ;;  %v2680_v0 = vsel %vm2679_vm4, 1, %v10109_v32  ;;  %vm2697_vm5 = vc.u32 %v2689_v52, %v2693_v63  ;;  %v2699_v31 = vadd.s32 %v2693_v63, %v2689_v52 }
 0x577   : > { %v2569_v51 = vsub.s32 32, %v2568_v59  ;;  %v2573_v27 = vsub.s32 4294967266, %v2568_v59  ;;  %v2570_v20 = vshll.u32 %v2561_v8, %v2568_v59  ;;  %v2682_v25 = vadd.s32 %v2680_v0, %v2678_v14 }
 0x578   : > { %v2651_v38 = vsel %vm2649_vm13, %v9682_v58, 2102212464  ;;  %v2698_v60 = vsel %vm2697_vm5, 1, %v10109_v32  ;;  %v9738_v62 = vadd.f32 %v3109_v24, %v9502_v48  ;;  %vm2701_vm0 = vc.u32 %v2699_v31, %v2695_v35 }
 0x579   : > { %v2571_v18 = vshrl.u32 %v2553_v61, %v2569_v51  ;;  %v2574_v9 = vadd.s32 127, %v2573_v27  ;;  %v2683_v44 = vadd.s32 %v2682_v25, %v2672_v45  ;;  %v2700_v8 = vadd.s32 %v2698_v60, %v2692_v34 }
 0x57a   : > { %v2583_v39 = vsub.s32 4, %v9690_v17  ;;  %v2630_v43 = vshrl.u32 %v10078_v40, %v9647_v41  ;;  %v2674_v26 = vshrl.u32 %v2669_v5, 16  ;;  %v2702_v13 = vsel %vm2701_vm0, 1, %v10109_v32 }
 0x57b   : > { %v2572_v47 = vor.u32 %v2571_v18, %v2570_v20  ;;  %v2575_v16 = vshll.u32 %v2574_v9, 23  ;;  %v2694_v58 = vshrl.u32 %v2690_v53, 16  ;;  %v2704_v3 = vadd.s32 %v2702_v13, %v2700_v8 }
 0x57c   : > { %v4989_v19 = vand.u32 2147483647, %v9738_v62  ;;  %v2650_v54 = vsel %vm2646_vm7, %v2630_v43, %v9678_v23  ;;  %v2652_v30 = vsel %vm2648_vm2, %v9680_v6, %v2651_v38  ;;  %v2684_v33 = vadd.s32 %v2683_v44, %v2674_v26 }
 0x57d   : > { %v2576_v1 = vor.u32 4788187, %v2575_v16  ;;  %v4992_v24 = vand.u32 2139095040, %v9738_v62  ;;  %v2579_v5 = vcvt.s32.f32 %v2572_v47  ;;  %v2696_v2 = vshrl.u32 %v2691_v12, 16 }
 0x57e   : > { %v2705_v21 = vadd.s32 %v2704_v3, %v2694_v58  ;;  %vm2461_vm1 = vcmp.lt.s32.totalorder %v9507_v42, 0  ;;  %v2703_v55 = vadd.s32 %v2699_v31, %v2695_v35  ;;  %v4996_v50 = vand.u32 8388607, %v4989_v19 }
 0x57f   : > { %v2577_v41 = vand.u32 2147483647, %v2576_v1  ;;  %v4993_v36 = vshrl.u32 %v4992_v24, 23  ;;  %v2584_v23 = vsel %vm2461_vm1, %v2583_v39, %v9690_v17  ;;  %v2653_v6 = vsel %vm2647_vm6, %v2650_v54, %v2652_v30 }
 0x580   : > { %v2706_v53 = vadd.s32 %v2705_v21, %v2696_v2  ;;  %vm2709_vm14 = vc.u32 %v2684_v33, %v2703_v55  ;;  %vm2460_vm13 = vcmp.le.f32.partialorder %v2459_v15, 0.7853982  ;;  %v9764_v49 = vadd.f32 %v9727_v22, %v9502_v48 }
 0x581   : > { %v2580_v57 = vmul.f32 %v2579_v5, %v2577_v41  ;;  %v5838_v61 = vadd.s32 4294967169, %v4993_v36  ;;  %v2586_v59 = vsel %vm2460_vm13, 0, %v2584_v23  ;;  %v2707_v14 = vmul.u32 %v9710_v7, %v2653_v6 }
 0x582   : > { %v2710_v45 = vadd.s32 1, %v2706_v53  ;;  %v4997_v63 = vor.u32 8388608, %v4996_v50  ;;  %v2603_v52 = vadd.s32 3, %v2586_v59  ;;  %v5144_v25 = vand.u32 2147483647, %v9764_v49 }
 0x583   : > { %v2581_v12 = vxor.u32 2147483648, %v2580_v57  ;;  %v4999_v17 = vadd.s32 1, %v5838_v61  ;;  %v5147_v7 = vand.u32 2139095040, %v9764_v49  ;;  %v9776_v47 = vadd.s32 %v2703_v55, %v2684_v33 }
 0x584   : > { %v2711_v51 = vsel %vm2709_vm14, %v2710_v45, %v2706_v53  ;;  %v9771_v34 = vshll.u32 %v4997_v63, 8  ;;  %v9774_v60 = vand.u32 3, %v2603_v52  ;;  %v9783_v43 = vand.u32 8388607, %v5144_v25 }
 0x585   : > { %v2582_v56 = vsel %vm2461_vm1, %v2581_v12, %v2580_v57  ;;  %v2712_v0 = vadd.s32 %v2711_v51, %v2707_v14  ;;  %vm5000_vm7 = vcmp.gt.s32.totalorder %v4999_v17, 0  ;;  %v5148_v39 = vshrl.u32 %v5147_v7, 23 }
 0x586   : > { %v2585_v27 = vsel %vm2460_vm13, %v9507_v42, %v2582_v56  ;;  %v5001_v20 = vsel %vm5000_vm7, %v4999_v17, 0  ;;  %v9779_v8 = vand.u32 65535, %v9771_v34  ;;  %vm2616_vm2 = vcmp.lt.s32.totalorder %v9516_v37, 0 }
 0x587   : > { %v2587_v15 = vmul.f32 %v2585_v27, %v2585_v27  ;;  %v2713_v48 = vadd.s32 536870912, %v2712_v0  ;;  %v5003_v22 = vand.u32 31, %v5001_v20  ;;  %v9786_v1 = vshrl.u32 %v5001_v20, 5 }
 0x588   : > { %v9789_v58 = vshrl.u32 %v9771_v34, 16  ;;  %vm2606_vm6 = vcmp.eq.s32.totalorder %v9774_v60, 0  ;;  %vm2609_vm12 = vcmp.eq.s32.totalorder %v9774_v60, 2  ;;  %vm2605_vm9 = vcmp.lt.s32.totalorder %v9774_v60, 2 }
 0x589   : > { %v2588_v35 = vmul.f32 -0.001358992, %v2587_v15  ;;  %v2595_v18 = vmul.f32 -0.00019511016, %v2587_v15  ;;  %v2714_v9 = vshrl.u32 %v2713_v48, 30  ;;  %v5004_v31 = vsub.s32 32, %v5003_v22 }
 0x58a   : > { %v5006_v54 = vshll.u32 %v10078_v40, %v5003_v22  ;;  %v5009_v33 = vshll.u32 %v10082_v46, %v5003_v22  ;;  %v5012_v2 = vshll.u32 %v10083_v4, %v5003_v22  ;;  %v5015_v6 = vshll.u32 %v10087_v11, %v5003_v22 }
 0x58b   : > { %v2589_v38 = vadd.f32 0.041655596, %v2588_v35  ;;  %v2596_v44 = vadd.f32 0.008332121, %v2595_v18  ;;  %v2715_v16 = vshll.u32 %v2714_v9, 30  ;;  %v5007_v30 = vshrl.u32 %v10082_v46, %v5004_v31 }
 0x58c   : > { %v5010_v5 = vshrl.u32 %v10083_v4, %v5004_v31  ;;  %v5013_v55 = vshrl.u32 %v10087_v11, %v5004_v31  ;;  %v5016_v36 = vshrl.u32 %v10088_v28, %v5004_v31  ;;  %v2738_v23 = vsub.s32 4, %v2714_v9 }
 0x58d   : > { %v2590_v26 = vmul.f32 %v2589_v38, %v2587_v15  ;;  %v2597_v13 = vmul.f32 %v2596_v44, %v2587_v15  ;;  %v9791_v3 = vsub.s32 %v2712_v0, %v2715_v16  ;;  %vm2602_vm10 = vweird.f32 %v9507_v42 }
 0x58e   : > { %v5008_v61 = vor.u32 %v5007_v30, %v5006_v54  ;;  %v5018_v12 = vshll.u32 %v10088_v28, %v5003_v22  ;;  %v5019_v45 = vshrl.u32 %v10092_v10, %v5004_v31  ;;  %v5011_v17 = vor.u32 %v5010_v5, %v5009_v33 }
 0x58f   : > { %v2591_v24 = vadd.f32 -0.4999988, %v2590_v26  ;;  %v2598_v41 = vadd.f32 -0.16666654, %v2597_v13  ;;  %vm2717_vm3 = vcmp.lt.s32.totalorder %v9791_v3, 0  ;;  %v2718_v21 = vsub.s32 0, %v9791_v3 }
 0x590   : > { %v5014_v56 = vor.u32 %v5013_v55, %v5012_v2  ;;  %v5017_v51 = vor.u32 %v5016_v36, %v5015_v6  ;;  %v5020_v0 = vor.u32 %v5019_v45, %v5018_v12  ;;  %vm9812_vm8 = vcmp.le.f32.partialorder %v2614_v29, 0.7853982 }
 0x591   : > { %v2592_v50 = vmul.f32 %v2591_v24, %v2587_v15  ;;  %v2599_v57 = vmul.f32 %v2598_v41, %v2587_v15  ;;  %v2719_v53 = vsel %vm2717_vm3, %v2718_v21, %v9791_v3  ;;  %v5841_v15 = vadd.s32 4294967169, %v5148_v39 }
 0x592   : > { %v2720_v63 = vclz %v2719_v53  ;;  %v5005_v22 = vshrl.u32 %v10078_v40, %v5004_v31  ;;  %v9819_v35 = vsel %vm2616_vm2, %v2738_v23, %v2714_v9  ;;  %vm5021_vm15 = vcmp.lt.s32.totalorder %v9786_v1, 1 }
 0x593   : > { %v2593_v59 = vadd.f32 1.0, %v2592_v50  ;;  %v2600_v14 = vadd.f32 1.0, %v2599_v57  ;;  %vm5022_vm11 = vcmp.lt.s32.totalorder %v9786_v1, 2  ;;  %vm5023_vm4 = vcmp.lt.s32.totalorder %v9786_v1, 3 }
 0x594   : > { %v5794_v7 = vadd.s32 4294967294, %v2720_v63  ;;  %vm5024_vm0 = vcmp.lt.s32.totalorder %v9786_v1, 4  ;;  %v5029_v29 = vsel %vm5021_vm15, %v5008_v61, %v5011_v17  ;;  %v5033_v9 = vsel %vm5021_vm15, %v5011_v17, %v5014_v56 }
 0x595   : > { %v2601_v52 = vmul.f32 %v2600_v14, %v2585_v27  ;;  %v2610_v20 = vxor.u32 2147483648, %v2593_v59  ;;  %v5030_v31 = vsel %vm5024_vm0, %v5017_v51, 920167782  ;;  %v5034_v38 = vsel %vm5024_vm0, %v5020_v0, 1326507024 }
 0x596   : > { %vm5795_vm5 = vcmp.lt.s32.totalorder %v5794_v7, 0  ;;  %v5031_v30 = vsel %vm5023_vm4, %v5014_v56, %v5030_v31  ;;  %v5035_v33 = vsel %vm5023_vm4, %v5017_v51, %v5034_v38  ;;  %v5026_v60 = vsel %vm5024_vm0, %v5014_v56, 2102212464 }
 0x597   : > { %v2607_v27 = vxor.u32 2147483648, %v2601_v52  ;;  %v2723_v18 = vsel %vm5795_vm5, 0, %v5794_v7  ;;  %v2611_v16 = vsel %vm2609_vm12, %v2610_v20, %v2601_v52  ;;  %v5032_v2 = vsel %vm5022_vm11, %v5029_v29, %v5031_v30 }
 0x598   : > { %v2724_v39 = vsub.s32 32, %v2723_v18  ;;  %v2728_v26 = vsub.s32 4294967266, %v2723_v18  ;;  %v2725_v54 = vshll.u32 %v9791_v3, %v2723_v18  ;;  %v5036_v3 = vsel %vm5022_vm11, %v5033_v9, %v5035_v33 }
 0x599   : > { %v2608_v44 = vsel %vm2606_vm6, %v2593_v59, %v2607_v27  ;;  %v5062_v21 = vand.u32 65535, %v5032_v2  ;;  %v5063_v55 = vshrl.u32 %v5032_v2, 16  ;;  %v5040_v57 = vand.u32 65535, %v5036_v3 }
 0x59a   : > { %v2612_v13 = vsel %vm2605_vm9, %v2608_v44, %v2611_v16  ;;  %v2726_v41 = vshrl.u32 %v9776_v47, %v2724_v39  ;;  %v2729_v5 = vadd.s32 127, %v2728_v26  ;;  %v5041_v42 = vshrl.u32 %v5036_v3, 16 }
 0x59b   : > { %v2613_v24 = vsel %vm2602_vm10, nan, %v2612_v13  ;;  %v2741_v47 = vsel %vm9812_vm8, 0, %v9819_v35  ;;  %v5065_v23 = vmul.u32 %v5063_v55, %v9779_v8  ;;  %v5066_v6 = vmul.u32 %v5062_v21, %v9789_v58 }
 0x59c   : > { %3091 = vst [vmem:[%s6642_s12 + $0x60] sm:$0xff] %v2613_v24  ;;  %v2727_v36 = vor.u32 %v2726_v41, %v2725_v54  ;;  %v2730_v50 = vshll.u32 %v2729_v5, 23  ;;  %v5154_v53 = vadd.s32 1, %v5841_v15  ;;  %v5025_v45 = vsel %vm5021_vm15, %v5005_v22, %v5008_v61 }
 0x59d   : > { %v5027_v59 = vsel %vm5023_vm4, %v5011_v17, %v5026_v60  ;;  %v5043_v14 = vmul.u32 %v5041_v42, %v9779_v8  ;;  %v5044_v63 = vmul.u32 %v5040_v57, %v9789_v58  ;;  %v5064_v56 = vmul.u32 %v5062_v21, %v9779_v8 }
 0x59e   : > { %v2731_v12 = vor.u32 4788187, %v2730_v50  ;;  %v5067_v51 = vmul.u32 %v5063_v55, %v9789_v58  ;;  %v5068_v0 = vshll.u32 %v5065_v23, 16  ;;  %v2734_v20 = vcvt.s32.f32 %v2727_v36 }
 0x59f   : > { %v5042_v15 = vmul.u32 %v5040_v57, %v9779_v8  ;;  %v5046_v7 = vshll.u32 %v5043_v14, 16  ;;  %v5045_v35 = vmul.u32 %v5041_v42, %v9789_v58  ;;  %v5048_v61 = vshll.u32 %v5044_v63, 16 }
 0x5a0   : > { %v2732_v52 = vand.u32 2147483647, %v2731_v12  ;;  %v5070_v22 = vshll.u32 %v5066_v6, 16  ;;  %vm5072_vm1 = vc.u32 %v5064_v56, %v5068_v0  ;;  %v5074_v31 = vadd.s32 %v5068_v0, %v5064_v56 }
 0x5a1   : > { %vm5050_vm14 = vc.u32 %v5042_v15, %v5046_v7  ;;  %v5052_v27 = vadd.s32 %v5046_v7, %v5042_v15  ;;  %v5073_v29 = vsel %vm5072_vm1, 1, %v10109_v32  ;;  %vm5155_vm13 = vcmp.gt.s32.totalorder %v5154_v53, 0 }
 0x5a2   : > { %v2735_v17 = vmul.f32 %v2734_v20, %v2732_v52  ;;  %v5051_v18 = vsel %vm5050_vm14, 1, %v10109_v32  ;;  %v5075_v9 = vadd.s32 %v5073_v29, %v5067_v51  ;;  %v5156_v8 = vsel %vm5155_vm13, %v5154_v53, 0 }
 0x5a3   : > { %v5053_v44 = vadd.s32 %v5051_v18, %v5045_v35  ;;  %vm5054_vm7 = vc.u32 %v5052_v27, %v5048_v61  ;;  %v5028_v58 = vsel %vm5022_vm11, %v5025_v45, %v5027_v59  ;;  %v5047_v16 = vshrl.u32 %v5043_v14, 16 }
 0x5a4   : > { %v2736_v38 = vxor.u32 2147483648, %v2735_v17  ;;  %v5055_v39 = vsel %vm5054_vm7, 1, %v10109_v32  ;;  %vm5076_vm6 = vc.u32 %v5074_v31, %v5070_v22  ;;  %v5158_v30 = vand.u32 31, %v5156_v8 }
 0x5a5   : > { %v5057_v13 = vadd.s32 %v5055_v39, %v5053_v44  ;;  %v5077_v54 = vsel %vm5076_vm6, 1, %v10109_v32  ;;  %v2758_v24 = vadd.s32 3, %v2741_v47  ;;  %v5069_v41 = vshrl.u32 %v5065_v23, 16 }
 0x5a6   : > { %v2737_v26 = vsel %vm2616_vm2, %v2736_v38, %v2735_v17  ;;  %v5079_v5 = vadd.s32 %v5077_v54, %v5075_v9  ;;  %v5049_v2 = vshrl.u32 %v5044_v63, 16  ;;  %v9880_v3 = vsub.s32 32, %v5158_v30 }
 0x5a7   : > { %v2740_v33 = vsel %vm9812_vm8, %v9516_v37, %v2737_v26  ;;  %v5058_v60 = vadd.s32 %v5057_v13, %v5047_v16  ;;  %v5071_v21 = vshrl.u32 %v5066_v6, 16  ;;  %v9882_v55 = vadd.s32 %v5074_v31, %v5070_v22 }
 0x5a8   : > { %v2742_v1 = vmul.f32 %v2740_v33, %v2740_v33  ;;  %v5080_v36 = vadd.s32 %v5079_v5, %v5069_v41  ;;  %v5082_v50 = vmul.u32 %v9771_v34, %v5028_v58  ;;  %v9887_v48 = vshrl.u32 %v5156_v8, 5 }
 0x5a9   : > { %v9885_v53 = vadd.s32 %v5058_v60, %v5049_v2  ;;  %v5161_v23 = vshll.u32 %v10078_v40, %v5158_v30  ;;  %v5165_v12 = vshrl.u32 %v10083_v4, %v9880_v3  ;;  %v5168_v6 = vshrl.u32 %v10087_v11, %v9880_v3 }
 0x5aa   : > { %v2743_v57 = vmul.f32 -0.001358992, %v2742_v1  ;;  %v2750_v42 = vmul.f32 -0.00019511016, %v2742_v1  ;;  %v5081_v47 = vadd.s32 %v5080_v36, %v5071_v21  ;;  %v5164_v34 = vshll.u32 %v10082_v46, %v5158_v30 }
 0x5ab   : > { %vm5084_vm2 = vc.u32 %v9885_v53, %v9882_v55  ;;  %v5162_v63 = vshrl.u32 %v10082_v46, %v9880_v3  ;;  %v5167_v56 = vshll.u32 %v10083_v4, %v5158_v30  ;;  %v5170_v51 = vshll.u32 %v10087_v11, %v5158_v30 }
 0x5ac   : > { %v2744_v45 = vadd.f32 0.041655596, %v2743_v57  ;;  %v2751_v59 = vadd.f32 0.008332121, %v2750_v42  ;;  %v5085_v14 = vadd.s32 1, %v5081_v47  ;;  %v9901_v20 = vor.u32 %v5165_v12, %v5164_v34 }
 0x5ad   : > { %v5171_v15 = vshrl.u32 %v10088_v28, %v9880_v3  ;;  %v9905_v35 = vor.u32 %v5168_v6, %v5167_v56  ;;  %v5173_v61 = vshll.u32 %v10088_v28, %v5158_v30  ;;  %v5174_v22 = vshrl.u32 %v10092_v10, %v9880_v3 }
 0x5ae   : > { %v2745_v0 = vmul.f32 %v2744_v45, %v2742_v1  ;;  %v2752_v52 = vmul.f32 %v2751_v59, %v2742_v1  ;;  %v5086_v7 = vsel %vm5084_vm2, %v5085_v14, %v5081_v47  ;;  %v2759_v11 = vand.u32 3, %v2758_v24 }
 0x5af   : > { %v5087_v4 = vadd.s32 %v5086_v7, %v5082_v50  ;;  %v5172_v27 = vor.u32 %v5171_v15, %v5170_v51  ;;  %v5152_v29 = vor.u32 8388608, %v9783_v43  ;;  %v9911_v18 = vor.u32 %v5162_v63, %v5161_v23 }
 0x5b0   : > { %v2746_v46 = vadd.f32 -0.4999988, %v2745_v0  ;;  %v2753_v17 = vadd.f32 -0.16666654, %v2752_v52  ;;  %v5175_v31 = vor.u32 %v5174_v22, %v5173_v61  ;;  %vm5179_vm12 = vcmp.lt.s32.totalorder %v9887_v48, 4 }
 0x5b1   : > { %v5088_v44 = vadd.s32 536870912, %v5087_v4  ;;  %vm5176_vm3 = vcmp.lt.s32.totalorder %v9887_v48, 1  ;;  %vm5178_vm9 = vcmp.lt.s32.totalorder %v9887_v48, 3  ;;  %v5185_v28 = vsel %vm5179_vm12, %v5172_v27, 920167782 }
 0x5b2   : > { %v2747_v9 = vmul.f32 %v2746_v46, %v2742_v1  ;;  %v2754_v38 = vmul.f32 %v2753_v17, %v2742_v1  ;;  %v5189_v10 = vsel %vm5179_vm12, %v5175_v31, 1326507024  ;;  %v5188_v16 = vsel %vm5176_vm3, %v9901_v20, %v9905_v35 }
 0x5b3   : > { %v9920_v58 = vshrl.u32 %v5088_v44, 30  ;;  %v5184_v39 = vsel %vm5176_vm3, %v9911_v18, %v9901_v20  ;;  %v5186_v26 = vsel %vm5178_vm9, %v9905_v35, %v5185_v28  ;;  %v5190_v13 = vsel %vm5178_vm9, %v5172_v27, %v5189_v10 }
 0x5b4   : > { %v2748_v8 = vadd.f32 1.0, %v2747_v9  ;;  %v2755_v43 = vadd.f32 1.0, %v2754_v38  ;;  %v9935_v54 = vshll.u32 %v5152_v29, 8  ;;  %vm5177_vm10 = vcmp.lt.s32.totalorder %v9887_v48, 2 }
 0x5b5   : > { %v5090_v41 = vshll.u32 %v9920_v58, 30  ;;  %vm2760_vm8 = vcmp.lt.s32.totalorder %v2759_v11, 2  ;;  %vm2761_vm15 = vcmp.eq.s32.totalorder %v2759_v11, 0  ;;  %v5191_v5 = vsel %vm5177_vm10, %v5188_v16, %v5190_v13 }
 0x5b6   : > { %v2756_v30 = vmul.f32 %v2755_v43, %v2740_v33  ;;  %v2765_v24 = vxor.u32 2147483648, %v2748_v8  ;;  %vm2764_vm11 = vcmp.eq.s32.totalorder %v2759_v11, 2  ;;  %v5187_v60 = vsel %vm5177_vm10, %v5184_v39, %v5186_v26 }
 0x5b7   : > { %v5091_v2 = vsub.s32 %v5087_v4, %v5090_v41  ;;  %v5193_v21 = vand.u32 65535, %v9935_v54  ;;  %v5194_v33 = vshrl.u32 %v9935_v54, 16  ;;  %v5195_v36 = vand.u32 65535, %v5191_v5 }
 0x5b8   : > { %v2762_v1 = vxor.u32 2147483648, %v2756_v30  ;;  %v5196_v50 = vshrl.u32 %v5191_v5, 16  ;;  %v2766_v42 = vsel %vm2764_vm11, %v2765_v24, %v2756_v30  ;;  %vm2757_vm5 = vweird.f32 %v9516_v37 }
 0x5b9   : > { %vm5092_vm4 = vcmp.lt.s32.totalorder %v5091_v2, 0  ;;  %v5093_v47 = vsub.s32 0, %v5091_v2  ;;  %v5199_v6 = vmul.u32 %v5195_v36, %v5194_v33  ;;  %v5217_v34 = vand.u32 65535, %v5187_v60 }
 0x5ba   : > { %v2763_v57 = vsel %vm2761_vm15, %v2748_v8, %v2762_v1  ;;  %v5198_v12 = vmul.u32 %v5196_v50, %v5193_v21  ;;  %v5218_v14 = vshrl.u32 %v5187_v60, 16  ;;  %v5197_v56 = vmul.u32 %v5195_v36, %v5193_v21 }
 0x5bb   : > { %v2767_v23 = vsel %vm2760_vm8, %v2763_v57, %v2766_v42  ;;  %v5094_v59 = vsel %vm5092_vm4, %v5093_v47, %v5091_v2  ;;  %v5200_v0 = vmul.u32 %v5196_v50, %v5194_v33  ;;  %v5203_v15 = vshll.u32 %v5199_v6, 16 }
 0x5bc   : > { %v2768_v45 = vsel %vm2757_vm5, nan, %v2767_v23  ;;  %v5095_v63 = vclz %v5094_v59  ;;  %v5201_v51 = vshll.u32 %v5198_v12, 16  ;;  %v5083_v37 = vadd.s32 %v9882_v55, %v9885_v53 }
 0x5bd   : > { %3092 = vst [vmem:[%s6642_s12 + $0x68] sm:$0xff] %v2768_v45  ;;  %v5220_v22 = vmul.u32 %v5218_v14, %v5193_v21  ;;  %v5221_v46 = vmul.u32 %v5217_v34, %v5194_v33  ;;  %v5202_v17 = vshrl.u32 %v5198_v12, 16  ;;  %v5219_v29 = vmul.u32 %v5217_v34, %v5193_v21 }
 0x5be   : > { %v5839_v52 = vadd.s32 4294967294, %v5095_v63  ;;  %vm5205_vm0 = vc.u32 %v5197_v56, %v5201_v51  ;;  %v5207_v7 = vadd.s32 %v5201_v51, %v5197_v56  ;;  %v5222_v28 = vmul.u32 %v5218_v14, %v5194_v33 }
 0x5bf   : > { %v5206_v61 = vsel %vm5205_vm0, 1, %v10109_v32  ;;  %v5223_v31 = vshll.u32 %v5220_v22, 16  ;;  %v5225_v8 = vshll.u32 %v5221_v46, 16  ;;  %v5160_v26 = vshrl.u32 %v10078_v40, %v9880_v3 }
 0x5c0   : > { %vm5840_vm1 = vcmp.lt.s32.totalorder %v5839_v52, 0  ;;  %v5208_v4 = vadd.s32 %v5206_v61, %v5200_v0  ;;  %vm5209_vm14 = vc.u32 %v5207_v7, %v5203_v15  ;;  %v5181_v13 = vsel %vm5179_vm12, %v9905_v35, 2102212464 }
 0x5c1   : > { %v5098_v27 = vsel %vm5840_vm1, 0, %v5839_v52  ;;  %v5210_v11 = vsel %vm5209_vm14, 1, %v10109_v32  ;;  %vm5227_vm13 = vc.u32 %v5219_v29, %v5223_v31  ;;  %v5229_v55 = vadd.s32 %v5223_v31, %v5219_v29 }
 0x5c2   : > { %v5099_v9 = vsub.s32 32, %v5098_v27  ;;  %v5103_v38 = vsub.s32 4294967266, %v5098_v27  ;;  %v5212_v44 = vadd.s32 %v5210_v11, %v5208_v4  ;;  %v5100_v10 = vshll.u32 %v5091_v2, %v5098_v27 }
 0x5c3   : > { %v5228_v39 = vsel %vm5227_vm13, 1, %v10109_v32  ;;  %vm5231_vm7 = vc.u32 %v5229_v55, %v5225_v8  ;;  %v5204_v5 = vshrl.u32 %v5199_v6, 16  ;;  %v5224_v2 = vshrl.u32 %v5220_v22, 16 }
 0x5c4   : > { %v5101_v53 = vshrl.u32 %v5083_v37, %v5099_v9  ;;  %v5104_v43 = vadd.s32 127, %v5103_v38  ;;  %v5213_v16 = vadd.s32 %v5212_v44, %v5202_v17  ;;  %v5230_v30 = vadd.s32 %v5228_v39, %v5222_v28 }
 0x5c5   : > { %v5232_v1 = vsel %vm5231_vm7, 1, %v10109_v32  ;;  %v5180_v33 = vsel %vm5176_vm3, %v5160_v26, %v9911_v18  ;;  %v5182_v40 = vsel %vm5178_vm9, %v9901_v20, %v5181_v13  ;;  %v5226_v35 = vshrl.u32 %v5221_v46, 16 }
 0x5c6   : > { %v5102_v24 = vor.u32 %v5101_v53, %v5100_v10  ;;  %v5105_v41 = vshll.u32 %v5104_v43, 23  ;;  %v5234_v60 = vadd.s32 %v5232_v1, %v5230_v30  ;;  %v5214_v3 = vadd.s32 %v5213_v16, %v5204_v5 }
 0x5c7   : > { %v5233_v42 = vadd.s32 %v5229_v55, %v5225_v8  ;;  %v5183_v32 = vsel %vm5177_vm10, %v5180_v33, %v5182_v40  ;;  %vm4991_vm2 = vcmp.lt.s32.totalorder %v9738_v62, 0  ;;  %v5113_v20 = vsub.s32 4, %v9920_v58 }
 0x5c8   : > { %v5106_v21 = vor.u32 4788187, %v5105_v41  ;;  %v5235_v36 = vadd.s32 %v5234_v60, %v5224_v2  ;;  %v5109_v57 = vcvt.s32.f32 %v5102_v24  ;;  %v5237_v18 = vmul.u32 %v9935_v54, %v5183_v32 }
 0x5c9   : > { %vm5239_vm6 = vc.u32 %v5214_v3, %v5233_v42  ;;  %vm9972_vm12 = vcmp.le.f32.partialorder %v4989_v19, 0.7853982  ;;  %v5114_v54 = vsel %vm4991_vm2, %v5113_v20, %v9920_v58  ;;  %v5238_v16 = vadd.s32 %v5233_v42, %v5214_v3 }
 0x5ca   : > { %v5107_v50 = vand.u32 2147483647, %v5106_v21  ;;  %v5236_v47 = vadd.s32 %v5235_v36, %v5226_v35  ;;  %v5116_v15 = vsel %vm9972_vm12, 0, %v5114_v54  ;;  %vm5132_vm15 = vweird.f32 %v9738_v62 }
 0x5cb   : > { %v5133_v17 = vadd.s32 3, %v5116_v15  ;;  %vm5146_vm4 = vcmp.lt.s32.totalorder %v9764_v49, 0  ;;  %vm5145_vm5 = vcmp.le.f32.partialorder %v5144_v25, 0.7853982  ;;  %vm5287_vm13 = vweird.f32 %v9764_v49 }
 0x5cc   : > { %v5110_v23 = vmul.f32 %v5109_v57, %v5107_v50  ;;  %v5240_v12 = vadd.s32 1, %v5236_v47 }
 0x5cd   : > { %v5134_v28 = vand.u32 3, %v5133_v17 }
 0x5ce   : > { %v5111_v6 = vxor.u32 2147483648, %v5110_v23  ;;  %v5241_v45 = vsel %vm5239_vm6, %v5240_v12, %v5236_v47 }
 0x5cf   : > { %v5242_v34 = vadd.s32 %v5241_v45, %v5237_v18  ;;  %vm5136_vm10 = vcmp.eq.s32.totalorder %v5134_v28, 0  ;;  %vm5139_vm8 = vcmp.eq.s32.totalorder %v5134_v28, 2  ;;  %vm5135_vm11 = vcmp.lt.s32.totalorder %v5134_v28, 2 }
 0x5d0   : > { %v5112_v48 = vsel %vm4991_vm2, %v5111_v6, %v5110_v23 }
 0x5d1   : > { %v5115_v14 = vsel %vm9972_vm12, %v9738_v62, %v5112_v48  ;;  %v5243_v56 = vadd.s32 536870912, %v5242_v34 }
 0x5d2   : > { %v5117_v63 = vmul.f32 %v5115_v14, %v5115_v14 }
 0x5d3   : > { %v5244_v52 = vshrl.u32 %v5243_v56, 30 }
 0x5d4   : > { %v5118_v51 = vmul.f32 -0.001358992, %v5117_v63  ;;  %v5125_v0 = vmul.f32 -0.00019511016, %v5117_v63 }
 0x5d5   : > { %v5245_v37 = vshll.u32 %v5244_v52, 30  ;;  %v5268_v50 = vsub.s32 4, %v5244_v52 }
 0x5d6   : > { %v5119_v19 = vadd.f32 0.041655596, %v5118_v51  ;;  %v5126_v7 = vadd.f32 0.008332121, %v5125_v0 }
 0x5d7   : > { %v5246_v46 = vsub.s32 %v5242_v34, %v5245_v37  ;;  %v5269_v23 = vsel %vm5146_vm4, %v5268_v50, %v5244_v52 }
 0x5d8   : > { %v5120_v61 = vmul.f32 %v5119_v19, %v5117_v63  ;;  %v5127_v22 = vmul.f32 %v5126_v7, %v5117_v63  ;;  %v5271_v18 = vsel %vm5145_vm5, 0, %v5269_v23 }
 0x5d9   : > { %vm5247_vm3 = vcmp.lt.s32.totalorder %v5246_v46, 0  ;;  %v5248_v11 = vsub.s32 0, %v5246_v46  ;;  %v5288_v34 = vadd.s32 3, %v5271_v18 }
 0x5da   : > { %v5121_v4 = vadd.f32 -0.4999988, %v5120_v61  ;;  %v5128_v27 = vadd.f32 -0.16666654, %v5127_v22 }
 0x5db   : > { %v5249_v58 = vsel %vm5247_vm3, %v5248_v11, %v5246_v46  ;;  %v5289_v54 = vand.u32 3, %v5288_v34 }
 0x5dc   : > { %v5122_v29 = vmul.f32 %v5121_v4, %v5117_v63  ;;  %v5129_v31 = vmul.f32 %v5128_v27, %v5117_v63  ;;  %v5250_v9 = vclz %v5249_v58 }
 0x5dd   : > { %vm5291_vm0 = vcmp.eq.s32.totalorder %v5289_v54, 0  ;;  %vm5294_vm1 = vcmp.eq.s32.totalorder %v5289_v54, 2  ;;  %vm5290_vm14 = vcmp.lt.s32.totalorder %v5289_v54, 2 }
 0x5de   : > { %v5123_v38 = vadd.f32 1.0, %v5122_v29  ;;  %v5130_v44 = vadd.f32 1.0, %v5129_v31  ;;  %v5842_v10 = vadd.s32 4294967294, %v5250_v9 }
 0x5e0   : > { %v5131_v8 = vmul.f32 %v5130_v44, %v5115_v14  ;;  %v5140_v55 = vxor.u32 2147483648, %v5123_v38  ;;  %vm5843_vm9 = vcmp.lt.s32.totalorder %v5842_v10, 0 }
 0x5e1   : > { %v5253_v43 = vsel %vm5843_vm9, 0, %v5842_v10 }
 0x5e2   : > { %v5137_v53 = vxor.u32 2147483648, %v5131_v8  ;;  %v5254_v39 = vsub.s32 32, %v5253_v43  ;;  %v5258_v26 = vsub.s32 4294967266, %v5253_v43  ;;  %v5141_v30 = vsel %vm5139_vm8, %v5140_v55, %v5131_v8 }
 0x5e3   : > { %v5255_v41 = vshll.u32 %v5246_v46, %v5253_v43 }
 0x5e4   : > { %v5138_v13 = vsel %vm5136_vm10, %v5123_v38, %v5137_v53  ;;  %v5256_v5 = vshrl.u32 %v5238_v16, %v5254_v39  ;;  %v5259_v1 = vadd.s32 127, %v5258_v26 }
 0x5e5   : > { %v5142_v24 = vsel %vm5135_vm11, %v5138_v13, %v5141_v30 }
 0x5e6   : > { %v5143_v2 = vsel %vm5132_vm15, nan, %v5142_v24  ;;  %v5257_v60 = vor.u32 %v5256_v5, %v5255_v41  ;;  %v5260_v21 = vshll.u32 %v5259_v1, 23 }
 0x5e7   : > { %5621 = vst [vmem:[%s6642_s12 + $0xe0] sm:$0xff] %v5143_v2 }
 0x5e8   : > { %v5261_v33 = vor.u32 4788187, %v5260_v21  ;;  %v5264_v35 = vcvt.s32.f32 %v5257_v60 }
 0x5ea   : > { %v5262_v40 = vand.u32 2147483647, %v5261_v33 }
 0x5ec   : > { %v5265_v36 = vmul.f32 %v5264_v35, %v5262_v40 }
 0x5ee   : > { %v5266_v3 = vxor.u32 2147483648, %v5265_v36 }
 0x5f0   : > { %v5267_v62 = vsel %vm5146_vm4, %v5266_v3, %v5265_v36 }
 0x5f1   : > { %v5270_v57 = vsel %vm5145_vm5, %v9764_v49, %v5267_v62 }
 0x5f2   : > { %v5272_v42 = vmul.f32 %v5270_v57, %v5270_v57 }
 0x5f4   : > { %v5273_v32 = vmul.f32 -0.001358992, %v5272_v42  ;;  %v5280_v47 = vmul.f32 -0.00019511016, %v5272_v42 }
 0x5f6   : > { %v5274_v12 = vadd.f32 0.041655596, %v5273_v32  ;;  %v5281_v6 = vadd.f32 0.008332121, %v5280_v47 }
 0x5f8   : > { %v5275_v20 = vmul.f32 %v5274_v12, %v5272_v42  ;;  %v5282_v45 = vmul.f32 %v5281_v6, %v5272_v42 }
 0x5fa   : > { %v5276_v59 = vadd.f32 -0.4999988, %v5275_v20  ;;  %v5283_v48 = vadd.f32 -0.16666654, %v5282_v45 }
 0x5fc   : > { %v5277_v14 = vmul.f32 %v5276_v59, %v5272_v42  ;;  %v5284_v25 = vmul.f32 %v5283_v48, %v5272_v42 }
 0x5fe   : > { %v5278_v63 = vadd.f32 1.0, %v5277_v14  ;;  %v5285_v56 = vadd.f32 1.0, %v5284_v25 }
 0x600   : > { %v5286_v51 = vmul.f32 %v5285_v56, %v5270_v57  ;;  %v5295_v0 = vxor.u32 2147483648, %v5278_v63 }
 0x602   : > { %v5292_v52 = vxor.u32 2147483648, %v5286_v51  ;;  %v5296_v19 = vsel %vm5294_vm1, %v5295_v0, %v5286_v51 }
 0x604   : > { %v5293_v15 = vsel %vm5291_vm0, %v5278_v63, %v5292_v52 }
 0x605   : > { %v5297_v7 = vsel %vm5290_vm14, %v5293_v15, %v5296_v19 }
 0x606   : > { %v5298_v37 = vsel %vm5287_vm13, nan, %v5297_v7 }
 0x607   : > { %5622 = vst [vmem:[%s6642_s12 + $0xe8] sm:$0xff] %v5298_v37 }
 0x608   : > { %5960 = shalt.err (!%p5957_p5)
}
 0x609   : > { %s6027_s10 = smov 256  }
 0x60a   : > { %5860 = dma.vmem_to_hbm [thread:$0]  (%p6098_p4), %s5641_s24, 4096, %s5643_s25, %s5626_s21, %s6027_s10, %s6027_s10, %s6016_s14  }
 0x60b PF: > { %p5866_p6 = scmp.ge.s32.totalorder %s6011_s23, 2  ;;  %s5657_s12 = sand.u32 1, %s5991_s18  }
 0x60c   : > { %s5658_s15 = scalar_lea.sflag [#allocation3], %s5657_s12 }
 0x60d   : > { %p5863_p7 = pnand %p5866_p6, %p6105_p8 }
 0x60f   : > { %p5864_p9 = pneg %p5863_p7 }
 0x611   : > { %5986 = dma.done.wait (%p5864_p9), %s5658_s15, 4096  }
 0x612   : > { %5988 = vsyncadd (%p5864_p9), %s5658_s15, 4294963200  ;;  %s18_s23 = sadd.s32 1, %s6011_s23   ;;  %s10163_s18 = smov %s5995_s19 }
 0x613   : > { %p15_p10 = scmp.ge.s32.totalorder %s18_s23, 4   ;;  %s10164_s19 = smov %s5999_s20 }
 0x614   : > { %s10165_s20 = smov %s6111_s6  ;;  %s10166_s21 = smov %s6007_s22 }
 0x615   : > { %s10167_s22 = smov %s10169_s26  ;;  %17 = sbr.rel (!%p15_p10) target bundleno = 4 (0x4), region = 78 }
 0x61a   :  { %5664 = vsyncpa [#allocation3], 1 }
 0x61b   :  { %5666 = vsyncpa [#allocation3 + $0x1], 1 }

</bundles_post_ra>
